<compile_context>
chip_gen: v6e
topology: v6e:2x2x1
jax: 0.10.0
libtpu: 0.0.40
codegen_flags: <defaults>
</compile_context>

<pallas_src>
import functools

import jax
import jax.numpy as jnp
from jax.experimental import pallas as pl
from jax.experimental.pallas import tpu as pltpu

_VMEM = pl.BlockSpec(memory_space=pltpu.MemorySpace.VMEM)


# ----------------------- in-kernel compute helpers --------------------------
# These operate on VMEM *values* inside the single fused kernel body.

def _snake(x, alpha, inv_alpha):
    # Snake1d: x + sin(alpha*x)^2 / (alpha + 1e-9); 1/(alpha+1e-9) precomputed.
    s = jnp.sin(alpha * x)
    return x + s * s * inv_alpha


def _conv1d(x, w_flat, bias, *, B, T, K, dil, pad):
    # x: (C_in, B*T) batch folded into lane axis.
    # w_flat: (C_out, K*C_in), column index = k*C_in + ci.  bias: (C_out, 1).
    # 'same' conv: T_out == T for all convs in this decoder.
    C_in = x.shape[0]
    T_out = T + 2 * pad - dil * (K - 1)
    if K == 1 and pad == 0:
        cols = x                                    # im2col is the identity
    else:
        parts = []
        for b in range(B):                          # static tiny batch
            xb = x[:, b * T:(b + 1) * T]
            if pad > 0:
                z = jnp.zeros((C_in, pad), x.dtype)
                xb = jnp.concatenate([z, xb, z], axis=1)
            win = [xb[:, k * dil:k * dil + T_out] for k in range(K)]
            parts.append(jnp.concatenate(win, axis=0))      # (K*C_in, T_out)
        cols = parts[0] if B == 1 else jnp.concatenate(parts, axis=1)
    y = jnp.dot(w_flat, cols, preferred_element_type=jnp.float32)
    return y + bias                                  # (C_out, B*T_out)


def _conv_transpose1d(x, w_ph, bias, *, B, T, stride):
    # Polyphase ConvTranspose1d(C_in, C_out, K=2*stride, stride,
    # padding=stride//2)  (even stride => L_out = stride*T).
    # x: (C_in, B*T);  w_ph: (stride, C_out, 2*C_in) per-phase weights
    # (columns: [tap k_a @ offset d ; tap k_b @ offset d-1]);  bias: (C_out,1).
    C_in = x.shape[0]
    C_out = w_ph.shape[1]
    T_out = stride * T
    BT, BT_out = B * T, B * T_out
    p = stride // 2

    # per-batch pad of one zero column each side covers tap offsets {-1,0,1}
    padded = []
    for b in range(B):
        xb = x[:, b * T:(b + 1) * T]
        z = jnp.zeros((C_in, 1), x.dtype)
        padded.append(jnp.concatenate([z, xb, z], axis=1))    # (C_in, T+2)

    rows = jax.lax.broadcasted_iota(jnp.int32, (BT, BT_out), 0)
    cidx = jax.lax.broadcasted_iota(jnp.int32, (BT, BT_out), 1)

    y = jnp.zeros((C_out, BT_out), jnp.float32)
    for r in range(stride):
        k_a = (r + p) % stride
        d = (r + p) // stride
        parts = []
        for b in range(B):
            xp = padded[b]
            win_a = xp[:, d + 1:d + 1 + T]          # x[:, q + d]
            win_b = xp[:, d:d + T]                  # x[:, q + d - 1]
            parts.append(jnp.concatenate([win_a, win_b], axis=0))
        cols = parts[0] if B == 1 else jnp.concatenate(parts, axis=1)
        y_r = jnp.dot(w_ph[r], cols, preferred_element_type=jnp.float32)
        # scatter phase r: output column = stride*input_column + r
        s_r = (cidx == stride * rows + r).astype(jnp.float32)
        y = y + jnp.dot(y_r, s_r, preferred_element_type=jnp.float32)
    return y + bias                                  # (C_out, B*T_out)


# ------------------------------ fused kernel --------------------------------

def _make_decoder_kernel(treedef, *, B, T_in, rates, dilations):
    def kernel(*refs):
        z_ref, skip_ref = refs[0], refs[1]
        o_ref = refs[-1]
        prm = jax.tree_util.tree_unflatten(treedef, refs[2:-1])

        # z + skip, with batch folded into the lane axis -> (C, B*T)
        x = jnp.concatenate([z_ref[b] + skip_ref[b] for b in range(B)], axis=1)
        T = T_in

        c0 = prm["conv0"]
        x = _conv1d(x, c0["w"][...], c0["b"][...], B=B, T=T, K=7, dil=1, pad=3)

        for blk, stride in zip(prm["blocks"], rates):
            x = _snake(x, blk["snake"]["alpha"][...],
                       blk["snake"]["inv_alpha"][...])
            x = _conv_transpose1d(x, blk["tconv"]["w_ph"][...],
                                  blk["tconv"]["b"][...],
                                  B=B, T=T, stride=stride)
            T *= stride
            for ru, dil in zip(blk["res"], dilations):
                y = _snake(x, ru["snake1"]["alpha"][...],
                           ru["snake1"]["inv_alpha"][...])
                y = _conv1d(y, ru["conv1"]["w"][...], ru["conv1"]["b"][...],
                            B=B, T=T, K=7, dil=dil, pad=3 * dil)
                y = _snake(y, ru["snake2"]["alpha"][...],
                           ru["snake2"]["inv_alpha"][...])
                y = _conv1d(y, ru["conv2"]["w"][...], ru["conv2"]["b"][...],
                            B=B, T=T, K=1, dil=1, pad=0)
                x = x + y                 # residual add fused in the epilogue

        x = _snake(x, prm["final_snake"]["alpha"][...],
                   prm["final_snake"]["inv_alpha"][...])
        fc = prm["final_conv"]
        x = _conv1d(x, fc["w"][...], fc["b"][...], B=B, T=T, K=7, dil=1, pad=3)
        o_ref[...] = jnp.tanh(x).astype(o_ref.dtype)   # lane-dense (d_out, B*T)
    return kernel


# ------------------------- parameter construction ---------------------------

def _wn_weight(v, g):
    # weight_norm with dim=0 (PyTorch default): w = g * v / ||v||_{dims != 0}
    norm = jnp.sqrt(jnp.sum(v * v, axis=(1, 2), keepdims=True))
    return g * v / norm


def _conv_params(key, c_out, c_in, k, scale=0.1):
    kv, kg, kb = jax.random.split(key, 3)
    v = scale * jax.random.normal(kv, (c_out, c_in, k), jnp.float32)
    g = jax.random.uniform(kg, (c_out, 1, 1), jnp.float32, minval=0.5, maxval=1.5)
    b = 0.01 * jax.random.normal(kb, (c_out,), jnp.float32)
    w = _wn_weight(v, g)                                      # (c_out, c_in, k)
    # im2col layout: column index = k*C_in + ci
    w_flat = jnp.transpose(w, (0, 2, 1)).reshape(c_out, k * c_in)
    return {"w": w_flat, "b": b.reshape(c_out, 1)}


def _tconv_params(key, c_in, c_out, stride, scale=0.1):
    # TODO(synk): polyphase path assumes even stride (true for DAC rates).
    assert stride % 2 == 0, "polyphase ConvTranspose1d implemented for even stride"
    k = 2 * stride
    p = stride // 2
    kv, kg, kb = jax.random.split(key, 3)
    v = scale * jax.random.normal(kv, (c_in, c_out, k), jnp.float32)
    g = jax.random.uniform(kg, (c_in, 1, 1), jnp.float32, minval=0.5, maxval=1.5)
    b = 0.01 * jax.random.normal(kb, (c_out,), jnp.float32)
    w_t = _wn_weight(v, g)                                    # (c_in, c_out, k)
    phases = []
    for r in range(stride):
        k_a = (r + p) % stride
        k_b = k_a + stride
        phases.append(jnp.concatenate([w_t[:, :, k_a].T, w_t[:, :, k_b].T],
                                      axis=1))                # (c_out, 2*c_in)
    return {"w_ph": jnp.stack(phases, axis=0), "b": b.reshape(c_out, 1)}


def _snake_params(key, dim):
    alpha = jax.random.uniform(key, (dim, 1), jnp.float32, minval=0.5, maxval=1.5)
    return {"alpha": alpha, "inv_alpha": 1.0 / (alpha + 1e-9)}


def init_dac_decoder(key, input_channel=8, channels=32, rates=(2, 2), d_out=1):
    ki = iter(jax.random.split(key, 128))
    params = {"conv0": _conv_params(next(ki), channels, input_channel, 7)}
    blocks = []
    for i, stride in enumerate(rates):
        in_dim = channels // (2 ** i)
        out_dim = channels // (2 ** (i + 1))
        blk = {
            "snake": _snake_params(next(ki), in_dim),
            "tconv": _tconv_params(next(ki), in_dim, out_dim, stride),
            "res": [],
        }
        for _dil in (1, 3, 9):
            blk["res"].append({
                "snake1": _snake_params(next(ki), out_dim),
                "conv1": _conv_params(next(ki), out_dim, out_dim, 7),
                "snake2": _snake_params(next(ki), out_dim),
                "conv2": _conv_params(next(ki), out_dim, out_dim, 1),
            })
        blocks.append(blk)
    params["blocks"] = blocks
    last_dim = channels // (2 ** len(rates))
    params["final_snake"] = _snake_params(next(ki), last_dim)
    params["final_conv"] = _conv_params(next(ki), d_out, last_dim, 7)
    return params


# ------------------------------ forward pass --------------------------------

@functools.partial(jax.jit, static_argnames=("rates", "dilations"))
def discoder_decoder_forward(params, z, skip, rates=(2, 2), dilations=(1, 3, 9)):
    """DisCoderDecoder.forward: dac_decoder(z + skip) (or dac_decoder(z))."""
    if skip is None:
        skip = jnp.zeros_like(z)        # semantically identical to "no skip"
    B, _, T = z.shape
    T_out = T
    for s in rates:
        T_out *= s
    d_out = params["final_conv"]["w"].shape[0]

    flat, treedef = jax.tree_util.tree_flatten(params)
    kernel = _make_decoder_kernel(treedef, B=B, T_in=T, rates=rates,
                                  dilations=dilations)
    out2 = pl.pallas_call(
        kernel,
        in_specs=[_VMEM] * (2 + len(flat)),
        out_specs=_VMEM,
        out_shape=jax.ShapeDtypeStruct((d_out, B * T_out), jnp.float32),
    )(z, skip, *flat)
    # lane-dense (d_out, B*T_out) -> PyTorch NCW (B, d_out, T_out)
    return out2.reshape(d_out, B, T_out).transpose(1, 0, 2)


# --------------------------------- main --------------------------------------

if __name__ == "__main__":
    key = jax.random.PRNGKey(0)
    kp, kz, ks = jax.random.split(key, 3)

    B, C_LAT, T = 2, 8, 16
    RATES = (2, 2)                      # total upsampling factor = 4
    DILS = (1, 3, 9)

    params = init_dac_decoder(kp, input_channel=C_LAT, channels=32,
                              rates=RATES, d_out=1)
    z = jax.random.normal(kz, (B, C_LAT, T), jnp.float32)
    skip = jax.random.normal(ks, (B, C_LAT, T), jnp.float32)

    out = discoder_decoder_forward(params, z, skip, rates=RATES, dilations=DILS)
    out = jax.block_until_ready(out)
    assert out.shape == (B, 1, T * 4), out.shape
    assert bool(jnp.all(jnp.isfinite(out)))
    print("KERNEL_OK")
</pallas_src>

<mosaic_0001>
module attributes {stable_mosaic.version = 11 : i64} {
  func.func @kernel(%arg0: memref<2x8x16xf32, #tpu.memory_space<vmem>>, %arg1: memref<2x8x16xf32, #tpu.memory_space<vmem>>, %arg2: memref<16x1xf32, #tpu.memory_space<vmem>>, %arg3: memref<16x112xf32, #tpu.memory_space<vmem>>, %arg4: memref<16x1xf32, #tpu.memory_space<vmem>>, %arg5: memref<16x16xf32, #tpu.memory_space<vmem>>, %arg6: memref<16x1xf32, #tpu.memory_space<vmem>>, %arg7: memref<16x1xf32, #tpu.memory_space<vmem>>, %arg8: memref<16x1xf32, #tpu.memory_space<vmem>>, %arg9: memref<16x1xf32, #tpu.memory_space<vmem>>, %arg10: memref<16x1xf32, #tpu.memory_space<vmem>>, %arg11: memref<16x112xf32, #tpu.memory_space<vmem>>, %arg12: memref<16x1xf32, #tpu.memory_space<vmem>>, %arg13: memref<16x16xf32, #tpu.memory_space<vmem>>, %arg14: memref<16x1xf32, #tpu.memory_space<vmem>>, %arg15: memref<16x1xf32, #tpu.memory_space<vmem>>, %arg16: memref<16x1xf32, #tpu.memory_space<vmem>>, %arg17: memref<16x1xf32, #tpu.memory_space<vmem>>, %arg18: memref<16x1xf32, #tpu.memory_space<vmem>>, %arg19: memref<16x112xf32, #tpu.memory_space<vmem>>, %arg20: memref<16x1xf32, #tpu.memory_space<vmem>>, %arg21: memref<16x16xf32, #tpu.memory_space<vmem>>, %arg22: memref<16x1xf32, #tpu.memory_space<vmem>>, %arg23: memref<16x1xf32, #tpu.memory_space<vmem>>, %arg24: memref<16x1xf32, #tpu.memory_space<vmem>>, %arg25: memref<16x1xf32, #tpu.memory_space<vmem>>, %arg26: memref<32x1xf32, #tpu.memory_space<vmem>>, %arg27: memref<32x1xf32, #tpu.memory_space<vmem>>, %arg28: memref<16x1xf32, #tpu.memory_space<vmem>>, %arg29: memref<2x16x64xf32, #tpu.memory_space<vmem>>, %arg30: memref<8x1xf32, #tpu.memory_space<vmem>>, %arg31: memref<8x56xf32, #tpu.memory_space<vmem>>, %arg32: memref<8x1xf32, #tpu.memory_space<vmem>>, %arg33: memref<8x8xf32, #tpu.memory_space<vmem>>, %arg34: memref<8x1xf32, #tpu.memory_space<vmem>>, %arg35: memref<8x1xf32, #tpu.memory_space<vmem>>, %arg36: memref<8x1xf32, #tpu.memory_space<vmem>>, %arg37: memref<8x1xf32, #tpu.memory_space<vmem>>, %arg38: memref<8x1xf32, #tpu.memory_space<vmem>>, %arg39: memref<8x56xf32, #tpu.memory_space<vmem>>, %arg40: memref<8x1xf32, #tpu.memory_space<vmem>>, %arg41: memref<8x8xf32, #tpu.memory_space<vmem>>, %arg42: memref<8x1xf32, #tpu.memory_space<vmem>>, %arg43: memref<8x1xf32, #tpu.memory_space<vmem>>, %arg44: memref<8x1xf32, #tpu.memory_space<vmem>>, %arg45: memref<8x1xf32, #tpu.memory_space<vmem>>, %arg46: memref<8x1xf32, #tpu.memory_space<vmem>>, %arg47: memref<8x56xf32, #tpu.memory_space<vmem>>, %arg48: memref<8x1xf32, #tpu.memory_space<vmem>>, %arg49: memref<8x8xf32, #tpu.memory_space<vmem>>, %arg50: memref<8x1xf32, #tpu.memory_space<vmem>>, %arg51: memref<8x1xf32, #tpu.memory_space<vmem>>, %arg52: memref<8x1xf32, #tpu.memory_space<vmem>>, %arg53: memref<8x1xf32, #tpu.memory_space<vmem>>, %arg54: memref<16x1xf32, #tpu.memory_space<vmem>>, %arg55: memref<16x1xf32, #tpu.memory_space<vmem>>, %arg56: memref<8x1xf32, #tpu.memory_space<vmem>>, %arg57: memref<2x8x32xf32, #tpu.memory_space<vmem>>, %arg58: memref<32x1xf32, #tpu.memory_space<vmem>>, %arg59: memref<32x56xf32, #tpu.memory_space<vmem>>, %arg60: memref<1x1xf32, #tpu.memory_space<vmem>>, %arg61: memref<1x56xf32, #tpu.memory_space<vmem>>, %arg62: memref<8x1xf32, #tpu.memory_space<vmem>>, %arg63: memref<8x1xf32, #tpu.memory_space<vmem>>, %arg64: memref<1x128xf32, #tpu.memory_space<vmem>>) attributes {dimension_semantics = [], scalar_prefetch = 0 : i64, scratch_operands = 0 : i64, tpu.core_type = #tpu.core_type<tc>} {
    %c0 = arith.constant 0 : index
    %c0_0 = arith.constant 0 : index
    %c0_1 = arith.constant 0 : index
    %0 = vector.load %arg0[%c0, %c0_0, %c0_1] : memref<2x8x16xf32, #tpu.memory_space<vmem>>, vector<1x8x16xf32>
    %1 = vector.shape_cast %0 : vector<1x8x16xf32> to vector<8x16xf32>
    %c0_2 = arith.constant 0 : index
    %c0_3 = arith.constant 0 : index
    %c0_4 = arith.constant 0 : index
    %2 = vector.load %arg1[%c0_2, %c0_3, %c0_4] : memref<2x8x16xf32, #tpu.memory_space<vmem>>, vector<1x8x16xf32>
    %3 = vector.shape_cast %2 : vector<1x8x16xf32> to vector<8x16xf32>
    %4 = arith.addf %1, %3 : vector<8x16xf32>
    %c1 = arith.constant 1 : index
    %c0_5 = arith.constant 0 : index
    %c0_6 = arith.constant 0 : index
    %5 = vector.load %arg0[%c1, %c0_5, %c0_6] : memref<2x8x16xf32, #tpu.memory_space<vmem>>, vector<1x8x16xf32>
    %6 = vector.shape_cast %5 : vector<1x8x16xf32> to vector<8x16xf32>
    %c1_7 = arith.constant 1 : index
    %c0_8 = arith.constant 0 : index
    %c0_9 = arith.constant 0 : index
    %7 = vector.load %arg1[%c1_7, %c0_8, %c0_9] : memref<2x8x16xf32, #tpu.memory_space<vmem>>, vector<1x8x16xf32>
    %8 = vector.shape_cast %7 : vector<1x8x16xf32> to vector<8x16xf32>
    %9 = arith.addf %6, %8 : vector<8x16xf32>
    %10 = tpu.concatenate %4, %9 in 1 : vector<8x16xf32>, vector<8x16xf32> -> vector<8x32xf32>
    %c0_10 = arith.constant 0 : index
    %c0_11 = arith.constant 0 : index
    %11 = vector.load %arg59[%c0_10, %c0_11] : memref<32x56xf32, #tpu.memory_space<vmem>>, vector<32x56xf32>
    %c0_12 = arith.constant 0 : index
    %c0_13 = arith.constant 0 : index
    %12 = vector.load %arg58[%c0_12, %c0_13] : memref<32x1xf32, #tpu.memory_space<vmem>>, vector<32x1xf32>
    %13 = vector.extract_strided_slice %10 {offsets = [0, 0], sizes = [8, 16], strides = [1, 1]} : vector<8x32xf32> to vector<8x16xf32>
    %cst = arith.constant 0.000000e+00 : f32
    %14 = vector.broadcast %cst : f32 to vector<8x3xf32>
    %15 = tpu.concatenate %14, %13, %14 in 1 : vector<8x3xf32>, vector<8x16xf32>, vector<8x3xf32> -> vector<8x22xf32>
    %16 = vector.extract_strided_slice %15 {offsets = [0, 0], sizes = [8, 16], strides = [1, 1]} : vector<8x22xf32> to vector<8x16xf32>
    %17 = vector.extract_strided_slice %15 {offsets = [0, 1], sizes = [8, 16], strides = [1, 1]} : vector<8x22xf32> to vector<8x16xf32>
    %18 = vector.extract_strided_slice %15 {offsets = [0, 2], sizes = [8, 16], strides = [1, 1]} : vector<8x22xf32> to vector<8x16xf32>
    %19 = vector.extract_strided_slice %15 {offsets = [0, 3], sizes = [8, 16], strides = [1, 1]} : vector<8x22xf32> to vector<8x16xf32>
    %20 = vector.extract_strided_slice %15 {offsets = [0, 4], sizes = [8, 16], strides = [1, 1]} : vector<8x22xf32> to vector<8x16xf32>
    %21 = vector.extract_strided_slice %15 {offsets = [0, 5], sizes = [8, 16], strides = [1, 1]} : vector<8x22xf32> to vector<8x16xf32>
    %22 = vector.extract_strided_slice %15 {offsets = [0, 6], sizes = [8, 16], strides = [1, 1]} : vector<8x22xf32> to vector<8x16xf32>
    %23 = tpu.concatenate %16, %17, %18, %19, %20, %21, %22 in 0 : vector<8x16xf32>, vector<8x16xf32>, vector<8x16xf32>, vector<8x16xf32>, vector<8x16xf32>, vector<8x16xf32>, vector<8x16xf32> -> vector<56x16xf32>
    %24 = vector.extract_strided_slice %10 {offsets = [0, 16], sizes = [8, 16], strides = [1, 1]} : vector<8x32xf32> to vector<8x16xf32>
    %cst_14 = arith.constant 0.000000e+00 : f32
    %25 = vector.broadcast %cst_14 : f32 to vector<8x3xf32>
    %26 = tpu.concatenate %25, %24, %25 in 1 : vector<8x3xf32>, vector<8x16xf32>, vector<8x3xf32> -> vector<8x22xf32>
    %27 = vector.extract_strided_slice %26 {offsets = [0, 0], sizes = [8, 16], strides = [1, 1]} : vector<8x22xf32> to vector<8x16xf32>
    %28 = vector.extract_strided_slice %26 {offsets = [0, 1], sizes = [8, 16], strides = [1, 1]} : vector<8x22xf32> to vector<8x16xf32>
    %29 = vector.extract_strided_slice %26 {offsets = [0, 2], sizes = [8, 16], strides = [1, 1]} : vector<8x22xf32> to vector<8x16xf32>
    %30 = vector.extract_strided_slice %26 {offsets = [0, 3], sizes = [8, 16], strides = [1, 1]} : vector<8x22xf32> to vector<8x16xf32>
    %31 = vector.extract_strided_slice %26 {offsets = [0, 4], sizes = [8, 16], strides = [1, 1]} : vector<8x22xf32> to vector<8x16xf32>
    %32 = vector.extract_strided_slice %26 {offsets = [0, 5], sizes = [8, 16], strides = [1, 1]} : vector<8x22xf32> to vector<8x16xf32>
    %33 = vector.extract_strided_slice %26 {offsets = [0, 6], sizes = [8, 16], strides = [1, 1]} : vector<8x22xf32> to vector<8x16xf32>
    %34 = tpu.concatenate %27, %28, %29, %30, %31, %32, %33 in 0 : vector<8x16xf32>, vector<8x16xf32>, vector<8x16xf32>, vector<8x16xf32>, vector<8x16xf32>, vector<8x16xf32>, vector<8x16xf32> -> vector<56x16xf32>
    %35 = tpu.concatenate %23, %34 in 1 : vector<56x16xf32>, vector<56x16xf32> -> vector<56x32xf32>
    %cst_15 = arith.constant dense<0.000000e+00> : vector<32x32xf32>
    %36 = tpu.matmul %11, %35, %cst_15 {dimension_numbers = #tpu.dot_dimension_numbers<[1], [0], [0], [1], [0, 0, 1, 1], [], []>} : vector<32x56xf32>, vector<56x32xf32>, vector<32x32xf32> -> vector<32x32xf32>
    %37 = vector.broadcast %12 : vector<32x1xf32> to vector<32x32xf32>
    %38 = arith.addf %36, %37 : vector<32x32xf32>
    %c0_16 = arith.constant 0 : index
    %c0_17 = arith.constant 0 : index
    %39 = vector.load %arg26[%c0_16, %c0_17] : memref<32x1xf32, #tpu.memory_space<vmem>>, vector<32x1xf32>
    %c0_18 = arith.constant 0 : index
    %c0_19 = arith.constant 0 : index
    %40 = vector.load %arg27[%c0_18, %c0_19] : memref<32x1xf32, #tpu.memory_space<vmem>>, vector<32x1xf32>
    %41 = vector.broadcast %39 : vector<32x1xf32> to vector<32x32xf32>
    %42 = arith.mulf %41, %38 : vector<32x32xf32>
    %43 = math.sin %42 : vector<32x32xf32>
    %44 = arith.mulf %43, %43 : vector<32x32xf32>
    %45 = vector.broadcast %40 : vector<32x1xf32> to vector<32x32xf32>
    %46 = arith.mulf %44, %45 : vector<32x32xf32>
    %47 = arith.addf %38, %46 : vector<32x32xf32>
    %c0_20 = arith.constant 0 : index
    %c0_21 = arith.constant 0 : index
    %c0_22 = arith.constant 0 : index
    %48 = vector.load %arg29[%c0_20, %c0_21, %c0_22] : memref<2x16x64xf32, #tpu.memory_space<vmem>>, vector<2x16x64xf32>
    %c0_23 = arith.constant 0 : index
    %c0_24 = arith.constant 0 : index
    %49 = vector.load %arg28[%c0_23, %c0_24] : memref<16x1xf32, #tpu.memory_space<vmem>>, vector<16x1xf32>
    %50 = vector.extract_strided_slice %47 {offsets = [0, 0], sizes = [32, 16], strides = [1, 1]} : vector<32x32xf32> to vector<32x16xf32>
    %cst_25 = arith.constant 0.000000e+00 : f32
    %51 = vector.broadcast %cst_25 : f32 to vector<32x1xf32>
    %52 = tpu.concatenate %51, %50, %51 in 1 : vector<32x1xf32>, vector<32x16xf32>, vector<32x1xf32> -> vector<32x18xf32>
    %53 = vector.extract_strided_slice %47 {offsets = [0, 16], sizes = [32, 16], strides = [1, 1]} : vector<32x32xf32> to vector<32x16xf32>
    %cst_26 = arith.constant 0.000000e+00 : f32
    %54 = vector.broadcast %cst_26 : f32 to vector<32x1xf32>
    %55 = tpu.concatenate %54, %53, %54 in 1 : vector<32x1xf32>, vector<32x16xf32>, vector<32x1xf32> -> vector<32x18xf32>
    %56 = tpu.iota {dimensions = array<i32: 0>} : vector<32x64xi32>
    %57 = tpu.iota {dimensions = array<i32: 1>} : vector<32x64xi32>
    %cst_27 = arith.constant 0.000000e+00 : f32
    %58 = vector.broadcast %cst_27 : f32 to vector<16x64xf32>
    %59 = vector.extract_strided_slice %52 {offsets = [0, 1], sizes = [32, 16], strides = [1, 1]} : vector<32x18xf32> to vector<32x16xf32>
    %60 = vector.extract_strided_slice %52 {offsets = [0, 0], sizes = [32, 16], strides = [1, 1]} : vector<32x18xf32> to vector<32x16xf32>
    %61 = tpu.concatenate %59, %60 in 0 : vector<32x16xf32>, vector<32x16xf32> -> vector<64x16xf32>
    %62 = vector.extract_strided_slice %55 {offsets = [0, 1], sizes = [32, 16], strides = [1, 1]} : vector<32x18xf32> to vector<32x16xf32>
    %63 = vector.extract_strided_slice %55 {offsets = [0, 0], sizes = [32, 16], strides = [1, 1]} : vector<32x18xf32> to vector<32x16xf32>
    %64 = tpu.concatenate %62, %63 in 0 : vector<32x16xf32>, vector<32x16xf32> -> vector<64x16xf32>
    %65 = tpu.concatenate %61, %64 in 1 : vector<64x16xf32>, vector<64x16xf32> -> vector<64x32xf32>
    %66 = vector.extract_strided_slice %48 {offsets = [0, 0, 0], sizes = [1, 16, 64], strides = [1, 1, 1]} : vector<2x16x64xf32> to vector<1x16x64xf32>
    %67 = vector.shape_cast %66 : vector<1x16x64xf32> to vector<16x64xf32>
    %cst_28 = arith.constant dense<0.000000e+00> : vector<16x32xf32>
    %68 = tpu.matmul %67, %65, %cst_28 {dimension_numbers = #tpu.dot_dimension_numbers<[1], [0], [0], [1], [0, 0, 1, 1], [], []>} : vector<16x64xf32>, vector<64x32xf32>, vector<16x32xf32> -> vector<16x32xf32>
    %c2_i32 = arith.constant 2 : i32
    %69 = vector.broadcast %c2_i32 : i32 to vector<32x64xi32>
    %70 = arith.muli %69, %56 : vector<32x64xi32>
    %c0_i32 = arith.constant 0 : i32
    %71 = vector.broadcast %c0_i32 : i32 to vector<32x64xi32>
    %72 = arith.addi %70, %71 : vector<32x64xi32>
    %73 = arith.cmpi eq, %57, %72 : vector<32x64xi32>
    %74 = arith.extui %73 : vector<32x64xi1> to vector<32x64xi32>
    %75 = arith.sitofp %74 : vector<32x64xi32> to vector<32x64xf32>
    %cst_29 = arith.constant dense<0.000000e+00> : vector<16x64xf32>
    %76 = tpu.matmul %68, %75, %cst_29 {dimension_numbers = #tpu.dot_dimension_numbers<[1], [0], [0], [1], [0, 0, 1, 1], [], []>} : vector<16x32xf32>, vector<32x64xf32>, vector<16x64xf32> -> vector<16x64xf32>
    %77 = arith.addf %58, %76 : vector<16x64xf32>
    %78 = vector.extract_strided_slice %52 {offsets = [0, 2], sizes = [32, 16], strides = [1, 1]} : vector<32x18xf32> to vector<32x16xf32>
    %79 = vector.extract_strided_slice %52 {offsets = [0, 1], sizes = [32, 16], strides = [1, 1]} : vector<32x18xf32> to vector<32x16xf32>
    %80 = tpu.concatenate %78, %79 in 0 : vector<32x16xf32>, vector<32x16xf32> -> vector<64x16xf32>
    %81 = vector.extract_strided_slice %55 {offsets = [0, 2], sizes = [32, 16], strides = [1, 1]} : vector<32x18xf32> to vector<32x16xf32>
    %82 = vector.extract_strided_slice %55 {offsets = [0, 1], sizes = [32, 16], strides = [1, 1]} : vector<32x18xf32> to vector<32x16xf32>
    %83 = tpu.concatenate %81, %82 in 0 : vector<32x16xf32>, vector<32x16xf32> -> vector<64x16xf32>
    %84 = tpu.concatenate %80, %83 in 1 : vector<64x16xf32>, vector<64x16xf32> -> vector<64x32xf32>
    %85 = vector.extract_strided_slice %48 {offsets = [1, 0, 0], sizes = [1, 16, 64], strides = [1, 1, 1]} : vector<2x16x64xf32> to vector<1x16x64xf32>
    %86 = vector.shape_cast %85 : vector<1x16x64xf32> to vector<16x64xf32>
    %cst_30 = arith.constant dense<0.000000e+00> : vector<16x32xf32>
    %87 = tpu.matmul %86, %84, %cst_30 {dimension_numbers = #tpu.dot_dimension_numbers<[1], [0], [0], [1], [0, 0, 1, 1], [], []>} : vector<16x64xf32>, vector<64x32xf32>, vector<16x32xf32> -> vector<16x32xf32>
    %c2_i32_31 = arith.constant 2 : i32
    %88 = vector.broadcast %c2_i32_31 : i32 to vector<32x64xi32>
    %89 = arith.muli %88, %56 : vector<32x64xi32>
    %c1_i32 = arith.constant 1 : i32
    %90 = vector.broadcast %c1_i32 : i32 to vector<32x64xi32>
    %91 = arith.addi %89, %90 : vector<32x64xi32>
    %92 = arith.cmpi eq, %57, %91 : vector<32x64xi32>
    %93 = arith.extui %92 : vector<32x64xi1> to vector<32x64xi32>
    %94 = arith.sitofp %93 : vector<32x64xi32> to vector<32x64xf32>
    %cst_32 = arith.constant dense<0.000000e+00> : vector<16x64xf32>
    %95 = tpu.matmul %87, %94, %cst_32 {dimension_numbers = #tpu.dot_dimension_numbers<[1], [0], [0], [1], [0, 0, 1, 1], [], []>} : vector<16x32xf32>, vector<32x64xf32>, vector<16x64xf32> -> vector<16x64xf32>
    %96 = arith.addf %77, %95 : vector<16x64xf32>
    %97 = vector.broadcast %49 : vector<16x1xf32> to vector<16x64xf32>
    %98 = arith.addf %96, %97 : vector<16x64xf32>
    %c0_33 = arith.constant 0 : index
    %c0_34 = arith.constant 0 : index
    %99 = vector.load %arg6[%c0_33, %c0_34] : memref<16x1xf32, #tpu.memory_space<vmem>>, vector<16x1xf32>
    %c0_35 = arith.constant 0 : index
    %c0_36 = arith.constant 0 : index
    %100 = vector.load %arg7[%c0_35, %c0_36] : memref<16x1xf32, #tpu.memory_space<vmem>>, vector<16x1xf32>
    %101 = vector.broadcast %99 : vector<16x1xf32> to vector<16x64xf32>
    %102 = arith.mulf %101, %98 : vector<16x64xf32>
    %103 = math.sin %102 : vector<16x64xf32>
    %104 = arith.mulf %103, %103 : vector<16x64xf32>
    %105 = vector.broadcast %100 : vector<16x1xf32> to vector<16x64xf32>
    %106 = arith.mulf %104, %105 : vector<16x64xf32>
    %107 = arith.addf %98, %106 : vector<16x64xf32>
    %c0_37 = arith.constant 0 : index
    %c0_38 = arith.constant 0 : index
    %108 = vector.load %arg3[%c0_37, %c0_38] : memref<16x112xf32, #tpu.memory_space<vmem>>, vector<16x112xf32>
    %c0_39 = arith.constant 0 : index
    %c0_40 = arith.constant 0 : index
    %109 = vector.load %arg2[%c0_39, %c0_40] : memref<16x1xf32, #tpu.memory_space<vmem>>, vector<16x1xf32>
    %110 = vector.extract_strided_slice %107 {offsets = [0, 0], sizes = [16, 32], strides = [1, 1]} : vector<16x64xf32> to vector<16x32xf32>
    %cst_41 = arith.constant 0.000000e+00 : f32
    %111 = vector.broadcast %cst_41 : f32 to vector<16x3xf32>
    %112 = tpu.concatenate %111, %110, %111 in 1 : vector<16x3xf32>, vector<16x32xf32>, vector<16x3xf32> -> vector<16x38xf32>
    %113 = vector.extract_strided_slice %112 {offsets = [0, 0], sizes = [16, 32], strides = [1, 1]} : vector<16x38xf32> to vector<16x32xf32>
    %114 = vector.extract_strided_slice %112 {offsets = [0, 1], sizes = [16, 32], strides = [1, 1]} : vector<16x38xf32> to vector<16x32xf32>
    %115 = vector.extract_strided_slice %112 {offsets = [0, 2], sizes = [16, 32], strides = [1, 1]} : vector<16x38xf32> to vector<16x32xf32>
    %116 = vector.extract_strided_slice %112 {offsets = [0, 3], sizes = [16, 32], strides = [1, 1]} : vector<16x38xf32> to vector<16x32xf32>
    %117 = vector.extract_strided_slice %112 {offsets = [0, 4], sizes = [16, 32], strides = [1, 1]} : vector<16x38xf32> to vector<16x32xf32>
    %118 = vector.extract_strided_slice %112 {offsets = [0, 5], sizes = [16, 32], strides = [1, 1]} : vector<16x38xf32> to vector<16x32xf32>
    %119 = vector.extract_strided_slice %112 {offsets = [0, 6], sizes = [16, 32], strides = [1, 1]} : vector<16x38xf32> to vector<16x32xf32>
    %120 = tpu.concatenate %113, %114, %115, %116, %117, %118, %119 in 0 : vector<16x32xf32>, vector<16x32xf32>, vector<16x32xf32>, vector<16x32xf32>, vector<16x32xf32>, vector<16x32xf32>, vector<16x32xf32> -> vector<112x32xf32>
    %121 = vector.extract_strided_slice %107 {offsets = [0, 32], sizes = [16, 32], strides = [1, 1]} : vector<16x64xf32> to vector<16x32xf32>
    %cst_42 = arith.constant 0.000000e+00 : f32
    %122 = vector.broadcast %cst_42 : f32 to vector<16x3xf32>
    %123 = tpu.concatenate %122, %121, %122 in 1 : vector<16x3xf32>, vector<16x32xf32>, vector<16x3xf32> -> vector<16x38xf32>
    %124 = vector.extract_strided_slice %123 {offsets = [0, 0], sizes = [16, 32], strides = [1, 1]} : vector<16x38xf32> to vector<16x32xf32>
    %125 = vector.extract_strided_slice %123 {offsets = [0, 1], sizes = [16, 32], strides = [1, 1]} : vector<16x38xf32> to vector<16x32xf32>
    %126 = vector.extract_strided_slice %123 {offsets = [0, 2], sizes = [16, 32], strides = [1, 1]} : vector<16x38xf32> to vector<16x32xf32>
    %127 = vector.extract_strided_slice %123 {offsets = [0, 3], sizes = [16, 32], strides = [1, 1]} : vector<16x38xf32> to vector<16x32xf32>
    %128 = vector.extract_strided_slice %123 {offsets = [0, 4], sizes = [16, 32], strides = [1, 1]} : vector<16x38xf32> to vector<16x32xf32>
    %129 = vector.extract_strided_slice %123 {offsets = [0, 5], sizes = [16, 32], strides = [1, 1]} : vector<16x38xf32> to vector<16x32xf32>
    %130 = vector.extract_strided_slice %123 {offsets = [0, 6], sizes = [16, 32], strides = [1, 1]} : vector<16x38xf32> to vector<16x32xf32>
    %131 = tpu.concatenate %124, %125, %126, %127, %128, %129, %130 in 0 : vector<16x32xf32>, vector<16x32xf32>, vector<16x32xf32>, vector<16x32xf32>, vector<16x32xf32>, vector<16x32xf32>, vector<16x32xf32> -> vector<112x32xf32>
    %132 = tpu.concatenate %120, %131 in 1 : vector<112x32xf32>, vector<112x32xf32> -> vector<112x64xf32>
    %cst_43 = arith.constant dense<0.000000e+00> : vector<16x64xf32>
    %133 = tpu.matmul %108, %132, %cst_43 {dimension_numbers = #tpu.dot_dimension_numbers<[1], [0], [0], [1], [0, 0, 1, 1], [], []>} : vector<16x112xf32>, vector<112x64xf32>, vector<16x64xf32> -> vector<16x64xf32>
    %134 = vector.broadcast %109 : vector<16x1xf32> to vector<16x64xf32>
    %135 = arith.addf %133, %134 : vector<16x64xf32>
    %c0_44 = arith.constant 0 : index
    %c0_45 = arith.constant 0 : index
    %136 = vector.load %arg8[%c0_44, %c0_45] : memref<16x1xf32, #tpu.memory_space<vmem>>, vector<16x1xf32>
    %c0_46 = arith.constant 0 : index
    %c0_47 = arith.constant 0 : index
    %137 = vector.load %arg9[%c0_46, %c0_47] : memref<16x1xf32, #tpu.memory_space<vmem>>, vector<16x1xf32>
    %138 = vector.broadcast %136 : vector<16x1xf32> to vector<16x64xf32>
    %139 = arith.mulf %138, %135 : vector<16x64xf32>
    %140 = math.sin %139 : vector<16x64xf32>
    %141 = arith.mulf %140, %140 : vector<16x64xf32>
    %142 = vector.broadcast %137 : vector<16x1xf32> to vector<16x64xf32>
    %143 = arith.mulf %141, %142 : vector<16x64xf32>
    %144 = arith.addf %135, %143 : vector<16x64xf32>
    %c0_48 = arith.constant 0 : index
    %c0_49 = arith.constant 0 : index
    %145 = vector.load %arg5[%c0_48, %c0_49] : memref<16x16xf32, #tpu.memory_space<vmem>>, vector<16x16xf32>
    %c0_50 = arith.constant 0 : index
    %c0_51 = arith.constant 0 : index
    %146 = vector.load %arg4[%c0_50, %c0_51] : memref<16x1xf32, #tpu.memory_space<vmem>>, vector<16x1xf32>
    %cst_52 = arith.constant dense<0.000000e+00> : vector<16x64xf32>
    %147 = tpu.matmul %145, %144, %cst_52 {dimension_numbers = #tpu.dot_dimension_numbers<[1], [0], [0], [1], [0, 0, 1, 1], [], []>} : vector<16x16xf32>, vector<16x64xf32>, vector<16x64xf32> -> vector<16x64xf32>
    %148 = vector.broadcast %146 : vector<16x1xf32> to vector<16x64xf32>
    %149 = arith.addf %147, %148 : vector<16x64xf32>
    %150 = arith.addf %98, %149 : vector<16x64xf32>
    %c0_53 = arith.constant 0 : index
    %c0_54 = arith.constant 0 : index
    %151 = vector.load %arg14[%c0_53, %c0_54] : memref<16x1xf32, #tpu.memory_space<vmem>>, vector<16x1xf32>
    %c0_55 = arith.constant 0 : index
    %c0_56 = arith.constant 0 : index
    %152 = vector.load %arg15[%c0_55, %c0_56] : memref<16x1xf32, #tpu.memory_space<vmem>>, vector<16x1xf32>
    %153 = vector.broadcast %151 : vector<16x1xf32> to vector<16x64xf32>
    %154 = arith.mulf %153, %150 : vector<16x64xf32>
    %155 = math.sin %154 : vector<16x64xf32>
    %156 = arith.mulf %155, %155 : vector<16x64xf32>
    %157 = vector.broadcast %152 : vector<16x1xf32> to vector<16x64xf32>
    %158 = arith.mulf %156, %157 : vector<16x64xf32>
    %159 = arith.addf %150, %158 : vector<16x64xf32>
    %c0_57 = arith.constant 0 : index
    %c0_58 = arith.constant 0 : index
    %160 = vector.load %arg11[%c0_57, %c0_58] : memref<16x112xf32, #tpu.memory_space<vmem>>, vector<16x112xf32>
    %c0_59 = arith.constant 0 : index
    %c0_60 = arith.constant 0 : index
    %161 = vector.load %arg10[%c0_59, %c0_60] : memref<16x1xf32, #tpu.memory_space<vmem>>, vector<16x1xf32>
    %162 = vector.extract_strided_slice %159 {offsets = [0, 0], sizes = [16, 32], strides = [1, 1]} : vector<16x64xf32> to vector<16x32xf32>
    %cst_61 = arith.constant 0.000000e+00 : f32
    %163 = vector.broadcast %cst_61 : f32 to vector<16x9xf32>
    %164 = tpu.concatenate %163, %162, %163 in 1 : vector<16x9xf32>, vector<16x32xf32>, vector<16x9xf32> -> vector<16x50xf32>
    %165 = vector.extract_strided_slice %164 {offsets = [0, 0], sizes = [16, 32], strides = [1, 1]} : vector<16x50xf32> to vector<16x32xf32>
    %166 = vector.extract_strided_slice %164 {offsets = [0, 3], sizes = [16, 32], strides = [1, 1]} : vector<16x50xf32> to vector<16x32xf32>
    %167 = vector.extract_strided_slice %164 {offsets = [0, 6], sizes = [16, 32], strides = [1, 1]} : vector<16x50xf32> to vector<16x32xf32>
    %168 = vector.extract_strided_slice %164 {offsets = [0, 9], sizes = [16, 32], strides = [1, 1]} : vector<16x50xf32> to vector<16x32xf32>
    %169 = vector.extract_strided_slice %164 {offsets = [0, 12], sizes = [16, 32], strides = [1, 1]} : vector<16x50xf32> to vector<16x32xf32>
    %170 = vector.extract_strided_slice %164 {offsets = [0, 15], sizes = [16, 32], strides = [1, 1]} : vector<16x50xf32> to vector<16x32xf32>
    %171 = vector.extract_strided_slice %164 {offsets = [0, 18], sizes = [16, 32], strides = [1, 1]} : vector<16x50xf32> to vector<16x32xf32>
    %172 = tpu.concatenate %165, %166, %167, %168, %169, %170, %171 in 0 : vector<16x32xf32>, vector<16x32xf32>, vector<16x32xf32>, vector<16x32xf32>, vector<16x32xf32>, vector<16x32xf32>, vector<16x32xf32> -> vector<112x32xf32>
    %173 = vector.extract_strided_slice %159 {offsets = [0, 32], sizes = [16, 32], strides = [1, 1]} : vector<16x64xf32> to vector<16x32xf32>
    %cst_62 = arith.constant 0.000000e+00 : f32
    %174 = vector.broadcast %cst_62 : f32 to vector<16x9xf32>
    %175 = tpu.concatenate %174, %173, %174 in 1 : vector<16x9xf32>, vector<16x32xf32>, vector<16x9xf32> -> vector<16x50xf32>
    %176 = vector.extract_strided_slice %175 {offsets = [0, 0], sizes = [16, 32], strides = [1, 1]} : vector<16x50xf32> to vector<16x32xf32>
    %177 = vector.extract_strided_slice %175 {offsets = [0, 3], sizes = [16, 32], strides = [1, 1]} : vector<16x50xf32> to vector<16x32xf32>
    %178 = vector.extract_strided_slice %175 {offsets = [0, 6], sizes = [16, 32], strides = [1, 1]} : vector<16x50xf32> to vector<16x32xf32>
    %179 = vector.extract_strided_slice %175 {offsets = [0, 9], sizes = [16, 32], strides = [1, 1]} : vector<16x50xf32> to vector<16x32xf32>
    %180 = vector.extract_strided_slice %175 {offsets = [0, 12], sizes = [16, 32], strides = [1, 1]} : vector<16x50xf32> to vector<16x32xf32>
    %181 = vector.extract_strided_slice %175 {offsets = [0, 15], sizes = [16, 32], strides = [1, 1]} : vector<16x50xf32> to vector<16x32xf32>
    %182 = vector.extract_strided_slice %175 {offsets = [0, 18], sizes = [16, 32], strides = [1, 1]} : vector<16x50xf32> to vector<16x32xf32>
    %183 = tpu.concatenate %176, %177, %178, %179, %180, %181, %182 in 0 : vector<16x32xf32>, vector<16x32xf32>, vector<16x32xf32>, vector<16x32xf32>, vector<16x32xf32>, vector<16x32xf32>, vector<16x32xf32> -> vector<112x32xf32>
    %184 = tpu.concatenate %172, %183 in 1 : vector<112x32xf32>, vector<112x32xf32> -> vector<112x64xf32>
    %cst_63 = arith.constant dense<0.000000e+00> : vector<16x64xf32>
    %185 = tpu.matmul %160, %184, %cst_63 {dimension_numbers = #tpu.dot_dimension_numbers<[1], [0], [0], [1], [0, 0, 1, 1], [], []>} : vector<16x112xf32>, vector<112x64xf32>, vector<16x64xf32> -> vector<16x64xf32>
    %186 = vector.broadcast %161 : vector<16x1xf32> to vector<16x64xf32>
    %187 = arith.addf %185, %186 : vector<16x64xf32>
    %c0_64 = arith.constant 0 : index
    %c0_65 = arith.constant 0 : index
    %188 = vector.load %arg16[%c0_64, %c0_65] : memref<16x1xf32, #tpu.memory_space<vmem>>, vector<16x1xf32>
    %c0_66 = arith.constant 0 : index
    %c0_67 = arith.constant 0 : index
    %189 = vector.load %arg17[%c0_66, %c0_67] : memref<16x1xf32, #tpu.memory_space<vmem>>, vector<16x1xf32>
    %190 = vector.broadcast %188 : vector<16x1xf32> to vector<16x64xf32>
    %191 = arith.mulf %190, %187 : vector<16x64xf32>
    %192 = math.sin %191 : vector<16x64xf32>
    %193 = arith.mulf %192, %192 : vector<16x64xf32>
    %194 = vector.broadcast %189 : vector<16x1xf32> to vector<16x64xf32>
    %195 = arith.mulf %193, %194 : vector<16x64xf32>
    %196 = arith.addf %187, %195 : vector<16x64xf32>
    %c0_68 = arith.constant 0 : index
    %c0_69 = arith.constant 0 : index
    %197 = vector.load %arg13[%c0_68, %c0_69] : memref<16x16xf32, #tpu.memory_space<vmem>>, vector<16x16xf32>
    %c0_70 = arith.constant 0 : index
    %c0_71 = arith.constant 0 : index
    %198 = vector.load %arg12[%c0_70, %c0_71] : memref<16x1xf32, #tpu.memory_space<vmem>>, vector<16x1xf32>
    %cst_72 = arith.constant dense<0.000000e+00> : vector<16x64xf32>
    %199 = tpu.matmul %197, %196, %cst_72 {dimension_numbers = #tpu.dot_dimension_numbers<[1], [0], [0], [1], [0, 0, 1, 1], [], []>} : vector<16x16xf32>, vector<16x64xf32>, vector<16x64xf32> -> vector<16x64xf32>
    %200 = vector.broadcast %198 : vector<16x1xf32> to vector<16x64xf32>
    %201 = arith.addf %199, %200 : vector<16x64xf32>
    %202 = arith.addf %150, %201 : vector<16x64xf32>
    %c0_73 = arith.constant 0 : index
    %c0_74 = arith.constant 0 : index
    %203 = vector.load %arg22[%c0_73, %c0_74] : memref<16x1xf32, #tpu.memory_space<vmem>>, vector<16x1xf32>
    %c0_75 = arith.constant 0 : index
    %c0_76 = arith.constant 0 : index
    %204 = vector.load %arg23[%c0_75, %c0_76] : memref<16x1xf32, #tpu.memory_space<vmem>>, vector<16x1xf32>
    %205 = vector.broadcast %203 : vector<16x1xf32> to vector<16x64xf32>
    %206 = arith.mulf %205, %202 : vector<16x64xf32>
    %207 = math.sin %206 : vector<16x64xf32>
    %208 = arith.mulf %207, %207 : vector<16x64xf32>
    %209 = vector.broadcast %204 : vector<16x1xf32> to vector<16x64xf32>
    %210 = arith.mulf %208, %209 : vector<16x64xf32>
    %211 = arith.addf %202, %210 : vector<16x64xf32>
    %c0_77 = arith.constant 0 : index
    %c0_78 = arith.constant 0 : index
    %212 = vector.load %arg19[%c0_77, %c0_78] : memref<16x112xf32, #tpu.memory_space<vmem>>, vector<16x112xf32>
    %c0_79 = arith.constant 0 : index
    %c0_80 = arith.constant 0 : index
    %213 = vector.load %arg18[%c0_79, %c0_80] : memref<16x1xf32, #tpu.memory_space<vmem>>, vector<16x1xf32>
    %214 = vector.extract_strided_slice %211 {offsets = [0, 0], sizes = [16, 32], strides = [1, 1]} : vector<16x64xf32> to vector<16x32xf32>
    %cst_81 = arith.constant 0.000000e+00 : f32
    %215 = vector.broadcast %cst_81 : f32 to vector<16x27xf32>
    %216 = tpu.concatenate %215, %214, %215 in 1 : vector<16x27xf32>, vector<16x32xf32>, vector<16x27xf32> -> vector<16x86xf32>
    %217 = vector.extract_strided_slice %216 {offsets = [0, 0], sizes = [16, 32], strides = [1, 1]} : vector<16x86xf32> to vector<16x32xf32>
    %218 = vector.extract_strided_slice %216 {offsets = [0, 9], sizes = [16, 32], strides = [1, 1]} : vector<16x86xf32> to vector<16x32xf32>
    %219 = vector.extract_strided_slice %216 {offsets = [0, 18], sizes = [16, 32], strides = [1, 1]} : vector<16x86xf32> to vector<16x32xf32>
    %220 = vector.extract_strided_slice %216 {offsets = [0, 27], sizes = [16, 32], strides = [1, 1]} : vector<16x86xf32> to vector<16x32xf32>
    %221 = vector.extract_strided_slice %216 {offsets = [0, 36], sizes = [16, 32], strides = [1, 1]} : vector<16x86xf32> to vector<16x32xf32>
    %222 = vector.extract_strided_slice %216 {offsets = [0, 45], sizes = [16, 32], strides = [1, 1]} : vector<16x86xf32> to vector<16x32xf32>
    %223 = vector.extract_strided_slice %216 {offsets = [0, 54], sizes = [16, 32], strides = [1, 1]} : vector<16x86xf32> to vector<16x32xf32>
    %224 = tpu.concatenate %217, %218, %219, %220, %221, %222, %223 in 0 : vector<16x32xf32>, vector<16x32xf32>, vector<16x32xf32>, vector<16x32xf32>, vector<16x32xf32>, vector<16x32xf32>, vector<16x32xf32> -> vector<112x32xf32>
    %225 = vector.extract_strided_slice %211 {offsets = [0, 32], sizes = [16, 32], strides = [1, 1]} : vector<16x64xf32> to vector<16x32xf32>
    %cst_82 = arith.constant 0.000000e+00 : f32
    %226 = vector.broadcast %cst_82 : f32 to vector<16x27xf32>
    %227 = tpu.concatenate %226, %225, %226 in 1 : vector<16x27xf32>, vector<16x32xf32>, vector<16x27xf32> -> vector<16x86xf32>
    %228 = vector.extract_strided_slice %227 {offsets = [0, 0], sizes = [16, 32], strides = [1, 1]} : vector<16x86xf32> to vector<16x32xf32>
    %229 = vector.extract_strided_slice %227 {offsets = [0, 9], sizes = [16, 32], strides = [1, 1]} : vector<16x86xf32> to vector<16x32xf32>
    %230 = vector.extract_strided_slice %227 {offsets = [0, 18], sizes = [16, 32], strides = [1, 1]} : vector<16x86xf32> to vector<16x32xf32>
    %231 = vector.extract_strided_slice %227 {offsets = [0, 27], sizes = [16, 32], strides = [1, 1]} : vector<16x86xf32> to vector<16x32xf32>
    %232 = vector.extract_strided_slice %227 {offsets = [0, 36], sizes = [16, 32], strides = [1, 1]} : vector<16x86xf32> to vector<16x32xf32>
    %233 = vector.extract_strided_slice %227 {offsets = [0, 45], sizes = [16, 32], strides = [1, 1]} : vector<16x86xf32> to vector<16x32xf32>
    %234 = vector.extract_strided_slice %227 {offsets = [0, 54], sizes = [16, 32], strides = [1, 1]} : vector<16x86xf32> to vector<16x32xf32>
    %235 = tpu.concatenate %228, %229, %230, %231, %232, %233, %234 in 0 : vector<16x32xf32>, vector<16x32xf32>, vector<16x32xf32>, vector<16x32xf32>, vector<16x32xf32>, vector<16x32xf32>, vector<16x32xf32> -> vector<112x32xf32>
    %236 = tpu.concatenate %224, %235 in 1 : vector<112x32xf32>, vector<112x32xf32> -> vector<112x64xf32>
    %cst_83 = arith.constant dense<0.000000e+00> : vector<16x64xf32>
    %237 = tpu.matmul %212, %236, %cst_83 {dimension_numbers = #tpu.dot_dimension_numbers<[1], [0], [0], [1], [0, 0, 1, 1], [], []>} : vector<16x112xf32>, vector<112x64xf32>, vector<16x64xf32> -> vector<16x64xf32>
    %238 = vector.broadcast %213 : vector<16x1xf32> to vector<16x64xf32>
    %239 = arith.addf %237, %238 : vector<16x64xf32>
    %c0_84 = arith.constant 0 : index
    %c0_85 = arith.constant 0 : index
    %240 = vector.load %arg24[%c0_84, %c0_85] : memref<16x1xf32, #tpu.memory_space<vmem>>, vector<16x1xf32>
    %c0_86 = arith.constant 0 : index
    %c0_87 = arith.constant 0 : index
    %241 = vector.load %arg25[%c0_86, %c0_87] : memref<16x1xf32, #tpu.memory_space<vmem>>, vector<16x1xf32>
    %242 = vector.broadcast %240 : vector<16x1xf32> to vector<16x64xf32>
    %243 = arith.mulf %242, %239 : vector<16x64xf32>
    %244 = math.sin %243 : vector<16x64xf32>
    %245 = arith.mulf %244, %244 : vector<16x64xf32>
    %246 = vector.broadcast %241 : vector<16x1xf32> to vector<16x64xf32>
    %247 = arith.mulf %245, %246 : vector<16x64xf32>
    %248 = arith.addf %239, %247 : vector<16x64xf32>
    %c0_88 = arith.constant 0 : index
    %c0_89 = arith.constant 0 : index
    %249 = vector.load %arg21[%c0_88, %c0_89] : memref<16x16xf32, #tpu.memory_space<vmem>>, vector<16x16xf32>
    %c0_90 = arith.constant 0 : index
    %c0_91 = arith.constant 0 : index
    %250 = vector.load %arg20[%c0_90, %c0_91] : memref<16x1xf32, #tpu.memory_space<vmem>>, vector<16x1xf32>
    %cst_92 = arith.constant dense<0.000000e+00> : vector<16x64xf32>
    %251 = tpu.matmul %249, %248, %cst_92 {dimension_numbers = #tpu.dot_dimension_numbers<[1], [0], [0], [1], [0, 0, 1, 1], [], []>} : vector<16x16xf32>, vector<16x64xf32>, vector<16x64xf32> -> vector<16x64xf32>
    %252 = vector.broadcast %250 : vector<16x1xf32> to vector<16x64xf32>
    %253 = arith.addf %251, %252 : vector<16x64xf32>
    %254 = arith.addf %202, %253 : vector<16x64xf32>
    %c0_93 = arith.constant 0 : index
    %c0_94 = arith.constant 0 : index
    %255 = vector.load %arg54[%c0_93, %c0_94] : memref<16x1xf32, #tpu.memory_space<vmem>>, vector<16x1xf32>
    %c0_95 = arith.constant 0 : index
    %c0_96 = arith.constant 0 : index
    %256 = vector.load %arg55[%c0_95, %c0_96] : memref<16x1xf32, #tpu.memory_space<vmem>>, vector<16x1xf32>
    %257 = vector.broadcast %255 : vector<16x1xf32> to vector<16x64xf32>
    %258 = arith.mulf %257, %254 : vector<16x64xf32>
    %259 = math.sin %258 : vector<16x64xf32>
    %260 = arith.mulf %259, %259 : vector<16x64xf32>
    %261 = vector.broadcast %256 : vector<16x1xf32> to vector<16x64xf32>
    %262 = arith.mulf %260, %261 : vector<16x64xf32>
    %263 = arith.addf %254, %262 : vector<16x64xf32>
    %c0_97 = arith.constant 0 : index
    %c0_98 = arith.constant 0 : index
    %c0_99 = arith.constant 0 : index
    %264 = vector.load %arg57[%c0_97, %c0_98, %c0_99] : memref<2x8x32xf32, #tpu.memory_space<vmem>>, vector<2x8x32xf32>
    %c0_100 = arith.constant 0 : index
    %c0_101 = arith.constant 0 : index
    %265 = vector.load %arg56[%c0_100, %c0_101] : memref<8x1xf32, #tpu.memory_space<vmem>>, vector<8x1xf32>
    %266 = vector.extract_strided_slice %263 {offsets = [0, 0], sizes = [16, 32], strides = [1, 1]} : vector<16x64xf32> to vector<16x32xf32>
    %cst_102 = arith.constant 0.000000e+00 : f32
    %267 = vector.broadcast %cst_102 : f32 to vector<16x1xf32>
    %268 = tpu.concatenate %267, %266, %267 in 1 : vector<16x1xf32>, vector<16x32xf32>, vector<16x1xf32> -> vector<16x34xf32>
    %269 = vector.extract_strided_slice %263 {offsets = [0, 32], sizes = [16, 32], strides = [1, 1]} : vector<16x64xf32> to vector<16x32xf32>
    %cst_103 = arith.constant 0.000000e+00 : f32
    %270 = vector.broadcast %cst_103 : f32 to vector<16x1xf32>
    %271 = tpu.concatenate %270, %269, %270 in 1 : vector<16x1xf32>, vector<16x32xf32>, vector<16x1xf32> -> vector<16x34xf32>
    %272 = tpu.iota {dimensions = array<i32: 0>} : vector<64x128xi32>
    %273 = tpu.iota {dimensions = array<i32: 1>} : vector<64x128xi32>
    %cst_104 = arith.constant 0.000000e+00 : f32
    %274 = vector.broadcast %cst_104 : f32 to vector<8x128xf32>
    %275 = vector.extract_strided_slice %268 {offsets = [0, 1], sizes = [16, 32], strides = [1, 1]} : vector<16x34xf32> to vector<16x32xf32>
    %276 = vector.extract_strided_slice %268 {offsets = [0, 0], sizes = [16, 32], strides = [1, 1]} : vector<16x34xf32> to vector<16x32xf32>
    %277 = tpu.concatenate %275, %276 in 0 : vector<16x32xf32>, vector<16x32xf32> -> vector<32x32xf32>
    %278 = vector.extract_strided_slice %271 {offsets = [0, 1], sizes = [16, 32], strides = [1, 1]} : vector<16x34xf32> to vector<16x32xf32>
    %279 = vector.extract_strided_slice %271 {offsets = [0, 0], sizes = [16, 32], strides = [1, 1]} : vector<16x34xf32> to vector<16x32xf32>
    %280 = tpu.concatenate %278, %279 in 0 : vector<16x32xf32>, vector<16x32xf32> -> vector<32x32xf32>
    %281 = tpu.concatenate %277, %280 in 1 : vector<32x32xf32>, vector<32x32xf32> -> vector<32x64xf32>
    %282 = vector.extract_strided_slice %264 {offsets = [0, 0, 0], sizes = [1, 8, 32], strides = [1, 1, 1]} : vector<2x8x32xf32> to vector<1x8x32xf32>
    %283 = vector.shape_cast %282 : vector<1x8x32xf32> to vector<8x32xf32>
    %cst_105 = arith.constant dense<0.000000e+00> : vector<8x64xf32>
    %284 = tpu.matmul %283, %281, %cst_105 {dimension_numbers = #tpu.dot_dimension_numbers<[1], [0], [0], [1], [0, 0, 1, 1], [], []>} : vector<8x32xf32>, vector<32x64xf32>, vector<8x64xf32> -> vector<8x64xf32>
    %c2_i32_106 = arith.constant 2 : i32
    %285 = vector.broadcast %c2_i32_106 : i32 to vector<64x128xi32>
    %286 = arith.muli %285, %272 : vector<64x128xi32>
    %c0_i32_107 = arith.constant 0 : i32
    %287 = vector.broadcast %c0_i32_107 : i32 to vector<64x128xi32>
    %288 = arith.addi %286, %287 : vector<64x128xi32>
    %289 = arith.cmpi eq, %273, %288 : vector<64x128xi32>
    %290 = arith.extui %289 : vector<64x128xi1> to vector<64x128xi32>
    %291 = arith.sitofp %290 : vector<64x128xi32> to vector<64x128xf32>
    %cst_108 = arith.constant dense<0.000000e+00> : vector<8x128xf32>
    %292 = tpu.matmul %284, %291, %cst_108 {dimension_numbers = #tpu.dot_dimension_numbers<[1], [0], [0], [1], [0, 0, 1, 1], [], []>} : vector<8x64xf32>, vector<64x128xf32>, vector<8x128xf32> -> vector<8x128xf32>
    %293 = arith.addf %274, %292 : vector<8x128xf32>
    %294 = vector.extract_strided_slice %268 {offsets = [0, 2], sizes = [16, 32], strides = [1, 1]} : vector<16x34xf32> to vector<16x32xf32>
    %295 = vector.extract_strided_slice %268 {offsets = [0, 1], sizes = [16, 32], strides = [1, 1]} : vector<16x34xf32> to vector<16x32xf32>
    %296 = tpu.concatenate %294, %295 in 0 : vector<16x32xf32>, vector<16x32xf32> -> vector<32x32xf32>
    %297 = vector.extract_strided_slice %271 {offsets = [0, 2], sizes = [16, 32], strides = [1, 1]} : vector<16x34xf32> to vector<16x32xf32>
    %298 = vector.extract_strided_slice %271 {offsets = [0, 1], sizes = [16, 32], strides = [1, 1]} : vector<16x34xf32> to vector<16x32xf32>
    %299 = tpu.concatenate %297, %298 in 0 : vector<16x32xf32>, vector<16x32xf32> -> vector<32x32xf32>
    %300 = tpu.concatenate %296, %299 in 1 : vector<32x32xf32>, vector<32x32xf32> -> vector<32x64xf32>
    %301 = vector.extract_strided_slice %264 {offsets = [1, 0, 0], sizes = [1, 8, 32], strides = [1, 1, 1]} : vector<2x8x32xf32> to vector<1x8x32xf32>
    %302 = vector.shape_cast %301 : vector<1x8x32xf32> to vector<8x32xf32>
    %cst_109 = arith.constant dense<0.000000e+00> : vector<8x64xf32>
    %303 = tpu.matmul %302, %300, %cst_109 {dimension_numbers = #tpu.dot_dimension_numbers<[1], [0], [0], [1], [0, 0, 1, 1], [], []>} : vector<8x32xf32>, vector<32x64xf32>, vector<8x64xf32> -> vector<8x64xf32>
    %c2_i32_110 = arith.constant 2 : i32
    %304 = vector.broadcast %c2_i32_110 : i32 to vector<64x128xi32>
    %305 = arith.muli %304, %272 : vector<64x128xi32>
    %c1_i32_111 = arith.constant 1 : i32
    %306 = vector.broadcast %c1_i32_111 : i32 to vector<64x128xi32>
    %307 = arith.addi %305, %306 : vector<64x128xi32>
    %308 = arith.cmpi eq, %273, %307 : vector<64x128xi32>
    %309 = arith.extui %308 : vector<64x128xi1> to vector<64x128xi32>
    %310 = arith.sitofp %309 : vector<64x128xi32> to vector<64x128xf32>
    %cst_112 = arith.constant dense<0.000000e+00> : vector<8x128xf32>
    %311 = tpu.matmul %303, %310, %cst_112 {dimension_numbers = #tpu.dot_dimension_numbers<[1], [0], [0], [1], [0, 0, 1, 1], [], []>} : vector<8x64xf32>, vector<64x128xf32>, vector<8x128xf32> -> vector<8x128xf32>
    %312 = arith.addf %293, %311 : vector<8x128xf32>
    %313 = vector.broadcast %265 : vector<8x1xf32> to vector<8x128xf32>
    %314 = arith.addf %312, %313 : vector<8x128xf32>
    %c0_113 = arith.constant 0 : index
    %c0_114 = arith.constant 0 : index
    %315 = vector.load %arg34[%c0_113, %c0_114] : memref<8x1xf32, #tpu.memory_space<vmem>>, vector<8x1xf32>
    %c0_115 = arith.constant 0 : index
    %c0_116 = arith.constant 0 : index
    %316 = vector.load %arg35[%c0_115, %c0_116] : memref<8x1xf32, #tpu.memory_space<vmem>>, vector<8x1xf32>
    %317 = vector.broadcast %315 : vector<8x1xf32> to vector<8x128xf32>
    %318 = arith.mulf %317, %314 : vector<8x128xf32>
    %319 = math.sin %318 : vector<8x128xf32>
    %320 = arith.mulf %319, %319 : vector<8x128xf32>
    %321 = vector.broadcast %316 : vector<8x1xf32> to vector<8x128xf32>
    %322 = arith.mulf %320, %321 : vector<8x128xf32>
    %323 = arith.addf %314, %322 : vector<8x128xf32>
    %c0_117 = arith.constant 0 : index
    %c0_118 = arith.constant 0 : index
    %324 = vector.load %arg31[%c0_117, %c0_118] : memref<8x56xf32, #tpu.memory_space<vmem>>, vector<8x56xf32>
    %c0_119 = arith.constant 0 : index
    %c0_120 = arith.constant 0 : index
    %325 = vector.load %arg30[%c0_119, %c0_120] : memref<8x1xf32, #tpu.memory_space<vmem>>, vector<8x1xf32>
    %326 = vector.extract_strided_slice %323 {offsets = [0, 0], sizes = [8, 64], strides = [1, 1]} : vector<8x128xf32> to vector<8x64xf32>
    %cst_121 = arith.constant 0.000000e+00 : f32
    %327 = vector.broadcast %cst_121 : f32 to vector<8x3xf32>
    %328 = tpu.concatenate %327, %326, %327 in 1 : vector<8x3xf32>, vector<8x64xf32>, vector<8x3xf32> -> vector<8x70xf32>
    %329 = vector.extract_strided_slice %328 {offsets = [0, 0], sizes = [8, 64], strides = [1, 1]} : vector<8x70xf32> to vector<8x64xf32>
    %330 = vector.extract_strided_slice %328 {offsets = [0, 1], sizes = [8, 64], strides = [1, 1]} : vector<8x70xf32> to vector<8x64xf32>
    %331 = vector.extract_strided_slice %328 {offsets = [0, 2], sizes = [8, 64], strides = [1, 1]} : vector<8x70xf32> to vector<8x64xf32>
    %332 = vector.extract_strided_slice %328 {offsets = [0, 3], sizes = [8, 64], strides = [1, 1]} : vector<8x70xf32> to vector<8x64xf32>
    %333 = vector.extract_strided_slice %328 {offsets = [0, 4], sizes = [8, 64], strides = [1, 1]} : vector<8x70xf32> to vector<8x64xf32>
    %334 = vector.extract_strided_slice %328 {offsets = [0, 5], sizes = [8, 64], strides = [1, 1]} : vector<8x70xf32> to vector<8x64xf32>
    %335 = vector.extract_strided_slice %328 {offsets = [0, 6], sizes = [8, 64], strides = [1, 1]} : vector<8x70xf32> to vector<8x64xf32>
    %336 = tpu.concatenate %329, %330, %331, %332, %333, %334, %335 in 0 : vector<8x64xf32>, vector<8x64xf32>, vector<8x64xf32>, vector<8x64xf32>, vector<8x64xf32>, vector<8x64xf32>, vector<8x64xf32> -> vector<56x64xf32>
    %337 = vector.extract_strided_slice %323 {offsets = [0, 64], sizes = [8, 64], strides = [1, 1]} : vector<8x128xf32> to vector<8x64xf32>
    %cst_122 = arith.constant 0.000000e+00 : f32
    %338 = vector.broadcast %cst_122 : f32 to vector<8x3xf32>
    %339 = tpu.concatenate %338, %337, %338 in 1 : vector<8x3xf32>, vector<8x64xf32>, vector<8x3xf32> -> vector<8x70xf32>
    %340 = vector.extract_strided_slice %339 {offsets = [0, 0], sizes = [8, 64], strides = [1, 1]} : vector<8x70xf32> to vector<8x64xf32>
    %341 = vector.extract_strided_slice %339 {offsets = [0, 1], sizes = [8, 64], strides = [1, 1]} : vector<8x70xf32> to vector<8x64xf32>
    %342 = vector.extract_strided_slice %339 {offsets = [0, 2], sizes = [8, 64], strides = [1, 1]} : vector<8x70xf32> to vector<8x64xf32>
    %343 = vector.extract_strided_slice %339 {offsets = [0, 3], sizes = [8, 64], strides = [1, 1]} : vector<8x70xf32> to vector<8x64xf32>
    %344 = vector.extract_strided_slice %339 {offsets = [0, 4], sizes = [8, 64], strides = [1, 1]} : vector<8x70xf32> to vector<8x64xf32>
    %345 = vector.extract_strided_slice %339 {offsets = [0, 5], sizes = [8, 64], strides = [1, 1]} : vector<8x70xf32> to vector<8x64xf32>
    %346 = vector.extract_strided_slice %339 {offsets = [0, 6], sizes = [8, 64], strides = [1, 1]} : vector<8x70xf32> to vector<8x64xf32>
    %347 = tpu.concatenate %340, %341, %342, %343, %344, %345, %346 in 0 : vector<8x64xf32>, vector<8x64xf32>, vector<8x64xf32>, vector<8x64xf32>, vector<8x64xf32>, vector<8x64xf32>, vector<8x64xf32> -> vector<56x64xf32>
    %348 = tpu.concatenate %336, %347 in 1 : vector<56x64xf32>, vector<56x64xf32> -> vector<56x128xf32>
    %cst_123 = arith.constant dense<0.000000e+00> : vector<8x128xf32>
    %349 = tpu.matmul %324, %348, %cst_123 {dimension_numbers = #tpu.dot_dimension_numbers<[1], [0], [0], [1], [0, 0, 1, 1], [], []>} : vector<8x56xf32>, vector<56x128xf32>, vector<8x128xf32> -> vector<8x128xf32>
    %350 = vector.broadcast %325 : vector<8x1xf32> to vector<8x128xf32>
    %351 = arith.addf %349, %350 : vector<8x128xf32>
    %c0_124 = arith.constant 0 : index
    %c0_125 = arith.constant 0 : index
    %352 = vector.load %arg36[%c0_124, %c0_125] : memref<8x1xf32, #tpu.memory_space<vmem>>, vector<8x1xf32>
    %c0_126 = arith.constant 0 : index
    %c0_127 = arith.constant 0 : index
    %353 = vector.load %arg37[%c0_126, %c0_127] : memref<8x1xf32, #tpu.memory_space<vmem>>, vector<8x1xf32>
    %354 = vector.broadcast %352 : vector<8x1xf32> to vector<8x128xf32>
    %355 = arith.mulf %354, %351 : vector<8x128xf32>
    %356 = math.sin %355 : vector<8x128xf32>
    %357 = arith.mulf %356, %356 : vector<8x128xf32>
    %358 = vector.broadcast %353 : vector<8x1xf32> to vector<8x128xf32>
    %359 = arith.mulf %357, %358 : vector<8x128xf32>
    %360 = arith.addf %351, %359 : vector<8x128xf32>
    %c0_128 = arith.constant 0 : index
    %c0_129 = arith.constant 0 : index
    %361 = vector.load %arg33[%c0_128, %c0_129] : memref<8x8xf32, #tpu.memory_space<vmem>>, vector<8x8xf32>
    %c0_130 = arith.constant 0 : index
    %c0_131 = arith.constant 0 : index
    %362 = vector.load %arg32[%c0_130, %c0_131] : memref<8x1xf32, #tpu.memory_space<vmem>>, vector<8x1xf32>
    %cst_132 = arith.constant dense<0.000000e+00> : vector<8x128xf32>
    %363 = tpu.matmul %361, %360, %cst_132 {dimension_numbers = #tpu.dot_dimension_numbers<[1], [0], [0], [1], [0, 0, 1, 1], [], []>} : vector<8x8xf32>, vector<8x128xf32>, vector<8x128xf32> -> vector<8x128xf32>
    %364 = vector.broadcast %362 : vector<8x1xf32> to vector<8x128xf32>
    %365 = arith.addf %363, %364 : vector<8x128xf32>
    %366 = arith.addf %314, %365 : vector<8x128xf32>
    %c0_133 = arith.constant 0 : index
    %c0_134 = arith.constant 0 : index
    %367 = vector.load %arg42[%c0_133, %c0_134] : memref<8x1xf32, #tpu.memory_space<vmem>>, vector<8x1xf32>
    %c0_135 = arith.constant 0 : index
    %c0_136 = arith.constant 0 : index
    %368 = vector.load %arg43[%c0_135, %c0_136] : memref<8x1xf32, #tpu.memory_space<vmem>>, vector<8x1xf32>
    %369 = vector.broadcast %367 : vector<8x1xf32> to vector<8x128xf32>
    %370 = arith.mulf %369, %366 : vector<8x128xf32>
    %371 = math.sin %370 : vector<8x128xf32>
    %372 = arith.mulf %371, %371 : vector<8x128xf32>
    %373 = vector.broadcast %368 : vector<8x1xf32> to vector<8x128xf32>
    %374 = arith.mulf %372, %373 : vector<8x128xf32>
    %375 = arith.addf %366, %374 : vector<8x128xf32>
    %c0_137 = arith.constant 0 : index
    %c0_138 = arith.constant 0 : index
    %376 = vector.load %arg39[%c0_137, %c0_138] : memref<8x56xf32, #tpu.memory_space<vmem>>, vector<8x56xf32>
    %c0_139 = arith.constant 0 : index
    %c0_140 = arith.constant 0 : index
    %377 = vector.load %arg38[%c0_139, %c0_140] : memref<8x1xf32, #tpu.memory_space<vmem>>, vector<8x1xf32>
    %378 = vector.extract_strided_slice %375 {offsets = [0, 0], sizes = [8, 64], strides = [1, 1]} : vector<8x128xf32> to vector<8x64xf32>
    %cst_141 = arith.constant 0.000000e+00 : f32
    %379 = vector.broadcast %cst_141 : f32 to vector<8x9xf32>
    %380 = tpu.concatenate %379, %378, %379 in 1 : vector<8x9xf32>, vector<8x64xf32>, vector<8x9xf32> -> vector<8x82xf32>
    %381 = vector.extract_strided_slice %380 {offsets = [0, 0], sizes = [8, 64], strides = [1, 1]} : vector<8x82xf32> to vector<8x64xf32>
    %382 = vector.extract_strided_slice %380 {offsets = [0, 3], sizes = [8, 64], strides = [1, 1]} : vector<8x82xf32> to vector<8x64xf32>
    %383 = vector.extract_strided_slice %380 {offsets = [0, 6], sizes = [8, 64], strides = [1, 1]} : vector<8x82xf32> to vector<8x64xf32>
    %384 = vector.extract_strided_slice %380 {offsets = [0, 9], sizes = [8, 64], strides = [1, 1]} : vector<8x82xf32> to vector<8x64xf32>
    %385 = vector.extract_strided_slice %380 {offsets = [0, 12], sizes = [8, 64], strides = [1, 1]} : vector<8x82xf32> to vector<8x64xf32>
    %386 = vector.extract_strided_slice %380 {offsets = [0, 15], sizes = [8, 64], strides = [1, 1]} : vector<8x82xf32> to vector<8x64xf32>
    %387 = vector.extract_strided_slice %380 {offsets = [0, 18], sizes = [8, 64], strides = [1, 1]} : vector<8x82xf32> to vector<8x64xf32>
    %388 = tpu.concatenate %381, %382, %383, %384, %385, %386, %387 in 0 : vector<8x64xf32>, vector<8x64xf32>, vector<8x64xf32>, vector<8x64xf32>, vector<8x64xf32>, vector<8x64xf32>, vector<8x64xf32> -> vector<56x64xf32>
    %389 = vector.extract_strided_slice %375 {offsets = [0, 64], sizes = [8, 64], strides = [1, 1]} : vector<8x128xf32> to vector<8x64xf32>
    %cst_142 = arith.constant 0.000000e+00 : f32
    %390 = vector.broadcast %cst_142 : f32 to vector<8x9xf32>
    %391 = tpu.concatenate %390, %389, %390 in 1 : vector<8x9xf32>, vector<8x64xf32>, vector<8x9xf32> -> vector<8x82xf32>
    %392 = vector.extract_strided_slice %391 {offsets = [0, 0], sizes = [8, 64], strides = [1, 1]} : vector<8x82xf32> to vector<8x64xf32>
    %393 = vector.extract_strided_slice %391 {offsets = [0, 3], sizes = [8, 64], strides = [1, 1]} : vector<8x82xf32> to vector<8x64xf32>
    %394 = vector.extract_strided_slice %391 {offsets = [0, 6], sizes = [8, 64], strides = [1, 1]} : vector<8x82xf32> to vector<8x64xf32>
    %395 = vector.extract_strided_slice %391 {offsets = [0, 9], sizes = [8, 64], strides = [1, 1]} : vector<8x82xf32> to vector<8x64xf32>
    %396 = vector.extract_strided_slice %391 {offsets = [0, 12], sizes = [8, 64], strides = [1, 1]} : vector<8x82xf32> to vector<8x64xf32>
    %397 = vector.extract_strided_slice %391 {offsets = [0, 15], sizes = [8, 64], strides = [1, 1]} : vector<8x82xf32> to vector<8x64xf32>
    %398 = vector.extract_strided_slice %391 {offsets = [0, 18], sizes = [8, 64], strides = [1, 1]} : vector<8x82xf32> to vector<8x64xf32>
    %399 = tpu.concatenate %392, %393, %394, %395, %396, %397, %398 in 0 : vector<8x64xf32>, vector<8x64xf32>, vector<8x64xf32>, vector<8x64xf32>, vector<8x64xf32>, vector<8x64xf32>, vector<8x64xf32> -> vector<56x64xf32>
    %400 = tpu.concatenate %388, %399 in 1 : vector<56x64xf32>, vector<56x64xf32> -> vector<56x128xf32>
    %cst_143 = arith.constant dense<0.000000e+00> : vector<8x128xf32>
    %401 = tpu.matmul %376, %400, %cst_143 {dimension_numbers = #tpu.dot_dimension_numbers<[1], [0], [0], [1], [0, 0, 1, 1], [], []>} : vector<8x56xf32>, vector<56x128xf32>, vector<8x128xf32> -> vector<8x128xf32>
    %402 = vector.broadcast %377 : vector<8x1xf32> to vector<8x128xf32>
    %403 = arith.addf %401, %402 : vector<8x128xf32>
    %c0_144 = arith.constant 0 : index
    %c0_145 = arith.constant 0 : index
    %404 = vector.load %arg44[%c0_144, %c0_145] : memref<8x1xf32, #tpu.memory_space<vmem>>, vector<8x1xf32>
    %c0_146 = arith.constant 0 : index
    %c0_147 = arith.constant 0 : index
    %405 = vector.load %arg45[%c0_146, %c0_147] : memref<8x1xf32, #tpu.memory_space<vmem>>, vector<8x1xf32>
    %406 = vector.broadcast %404 : vector<8x1xf32> to vector<8x128xf32>
    %407 = arith.mulf %406, %403 : vector<8x128xf32>
    %408 = math.sin %407 : vector<8x128xf32>
    %409 = arith.mulf %408, %408 : vector<8x128xf32>
    %410 = vector.broadcast %405 : vector<8x1xf32> to vector<8x128xf32>
    %411 = arith.mulf %409, %410 : vector<8x128xf32>
    %412 = arith.addf %403, %411 : vector<8x128xf32>
    %c0_148 = arith.constant 0 : index
    %c0_149 = arith.constant 0 : index
    %413 = vector.load %arg41[%c0_148, %c0_149] : memref<8x8xf32, #tpu.memory_space<vmem>>, vector<8x8xf32>
    %c0_150 = arith.constant 0 : index
    %c0_151 = arith.constant 0 : index
    %414 = vector.load %arg40[%c0_150, %c0_151] : memref<8x1xf32, #tpu.memory_space<vmem>>, vector<8x1xf32>
    %cst_152 = arith.constant dense<0.000000e+00> : vector<8x128xf32>
    %415 = tpu.matmul %413, %412, %cst_152 {dimension_numbers = #tpu.dot_dimension_numbers<[1], [0], [0], [1], [0, 0, 1, 1], [], []>} : vector<8x8xf32>, vector<8x128xf32>, vector<8x128xf32> -> vector<8x128xf32>
    %416 = vector.broadcast %414 : vector<8x1xf32> to vector<8x128xf32>
    %417 = arith.addf %415, %416 : vector<8x128xf32>
    %418 = arith.addf %366, %417 : vector<8x128xf32>
    %c0_153 = arith.constant 0 : index
    %c0_154 = arith.constant 0 : index
    %419 = vector.load %arg50[%c0_153, %c0_154] : memref<8x1xf32, #tpu.memory_space<vmem>>, vector<8x1xf32>
    %c0_155 = arith.constant 0 : index
    %c0_156 = arith.constant 0 : index
    %420 = vector.load %arg51[%c0_155, %c0_156] : memref<8x1xf32, #tpu.memory_space<vmem>>, vector<8x1xf32>
    %421 = vector.broadcast %419 : vector<8x1xf32> to vector<8x128xf32>
    %422 = arith.mulf %421, %418 : vector<8x128xf32>
    %423 = math.sin %422 : vector<8x128xf32>
    %424 = arith.mulf %423, %423 : vector<8x128xf32>
    %425 = vector.broadcast %420 : vector<8x1xf32> to vector<8x128xf32>
    %426 = arith.mulf %424, %425 : vector<8x128xf32>
    %427 = arith.addf %418, %426 : vector<8x128xf32>
    %c0_157 = arith.constant 0 : index
    %c0_158 = arith.constant 0 : index
    %428 = vector.load %arg47[%c0_157, %c0_158] : memref<8x56xf32, #tpu.memory_space<vmem>>, vector<8x56xf32>
    %c0_159 = arith.constant 0 : index
    %c0_160 = arith.constant 0 : index
    %429 = vector.load %arg46[%c0_159, %c0_160] : memref<8x1xf32, #tpu.memory_space<vmem>>, vector<8x1xf32>
    %430 = vector.extract_strided_slice %427 {offsets = [0, 0], sizes = [8, 64], strides = [1, 1]} : vector<8x128xf32> to vector<8x64xf32>
    %cst_161 = arith.constant 0.000000e+00 : f32
    %431 = vector.broadcast %cst_161 : f32 to vector<8x27xf32>
    %432 = tpu.concatenate %431, %430, %431 in 1 : vector<8x27xf32>, vector<8x64xf32>, vector<8x27xf32> -> vector<8x118xf32>
    %433 = vector.extract_strided_slice %432 {offsets = [0, 0], sizes = [8, 64], strides = [1, 1]} : vector<8x118xf32> to vector<8x64xf32>
    %434 = vector.extract_strided_slice %432 {offsets = [0, 9], sizes = [8, 64], strides = [1, 1]} : vector<8x118xf32> to vector<8x64xf32>
    %435 = vector.extract_strided_slice %432 {offsets = [0, 18], sizes = [8, 64], strides = [1, 1]} : vector<8x118xf32> to vector<8x64xf32>
    %436 = vector.extract_strided_slice %432 {offsets = [0, 27], sizes = [8, 64], strides = [1, 1]} : vector<8x118xf32> to vector<8x64xf32>
    %437 = vector.extract_strided_slice %432 {offsets = [0, 36], sizes = [8, 64], strides = [1, 1]} : vector<8x118xf32> to vector<8x64xf32>
    %438 = vector.extract_strided_slice %432 {offsets = [0, 45], sizes = [8, 64], strides = [1, 1]} : vector<8x118xf32> to vector<8x64xf32>
    %439 = vector.extract_strided_slice %432 {offsets = [0, 54], sizes = [8, 64], strides = [1, 1]} : vector<8x118xf32> to vector<8x64xf32>
    %440 = tpu.concatenate %433, %434, %435, %436, %437, %438, %439 in 0 : vector<8x64xf32>, vector<8x64xf32>, vector<8x64xf32>, vector<8x64xf32>, vector<8x64xf32>, vector<8x64xf32>, vector<8x64xf32> -> vector<56x64xf32>
    %441 = vector.extract_strided_slice %427 {offsets = [0, 64], sizes = [8, 64], strides = [1, 1]} : vector<8x128xf32> to vector<8x64xf32>
    %cst_162 = arith.constant 0.000000e+00 : f32
    %442 = vector.broadcast %cst_162 : f32 to vector<8x27xf32>
    %443 = tpu.concatenate %442, %441, %442 in 1 : vector<8x27xf32>, vector<8x64xf32>, vector<8x27xf32> -> vector<8x118xf32>
    %444 = vector.extract_strided_slice %443 {offsets = [0, 0], sizes = [8, 64], strides = [1, 1]} : vector<8x118xf32> to vector<8x64xf32>
    %445 = vector.extract_strided_slice %443 {offsets = [0, 9], sizes = [8, 64], strides = [1, 1]} : vector<8x118xf32> to vector<8x64xf32>
    %446 = vector.extract_strided_slice %443 {offsets = [0, 18], sizes = [8, 64], strides = [1, 1]} : vector<8x118xf32> to vector<8x64xf32>
    %447 = vector.extract_strided_slice %443 {offsets = [0, 27], sizes = [8, 64], strides = [1, 1]} : vector<8x118xf32> to vector<8x64xf32>
    %448 = vector.extract_strided_slice %443 {offsets = [0, 36], sizes = [8, 64], strides = [1, 1]} : vector<8x118xf32> to vector<8x64xf32>
    %449 = vector.extract_strided_slice %443 {offsets = [0, 45], sizes = [8, 64], strides = [1, 1]} : vector<8x118xf32> to vector<8x64xf32>
    %450 = vector.extract_strided_slice %443 {offsets = [0, 54], sizes = [8, 64], strides = [1, 1]} : vector<8x118xf32> to vector<8x64xf32>
    %451 = tpu.concatenate %444, %445, %446, %447, %448, %449, %450 in 0 : vector<8x64xf32>, vector<8x64xf32>, vector<8x64xf32>, vector<8x64xf32>, vector<8x64xf32>, vector<8x64xf32>, vector<8x64xf32> -> vector<56x64xf32>
    %452 = tpu.concatenate %440, %451 in 1 : vector<56x64xf32>, vector<56x64xf32> -> vector<56x128xf32>
    %cst_163 = arith.constant dense<0.000000e+00> : vector<8x128xf32>
    %453 = tpu.matmul %428, %452, %cst_163 {dimension_numbers = #tpu.dot_dimension_numbers<[1], [0], [0], [1], [0, 0, 1, 1], [], []>} : vector<8x56xf32>, vector<56x128xf32>, vector<8x128xf32> -> vector<8x128xf32>
    %454 = vector.broadcast %429 : vector<8x1xf32> to vector<8x128xf32>
    %455 = arith.addf %453, %454 : vector<8x128xf32>
    %c0_164 = arith.constant 0 : index
    %c0_165 = arith.constant 0 : index
    %456 = vector.load %arg52[%c0_164, %c0_165] : memref<8x1xf32, #tpu.memory_space<vmem>>, vector<8x1xf32>
    %c0_166 = arith.constant 0 : index
    %c0_167 = arith.constant 0 : index
    %457 = vector.load %arg53[%c0_166, %c0_167] : memref<8x1xf32, #tpu.memory_space<vmem>>, vector<8x1xf32>
    %458 = vector.broadcast %456 : vector<8x1xf32> to vector<8x128xf32>
    %459 = arith.mulf %458, %455 : vector<8x128xf32>
    %460 = math.sin %459 : vector<8x128xf32>
    %461 = arith.mulf %460, %460 : vector<8x128xf32>
    %462 = vector.broadcast %457 : vector<8x1xf32> to vector<8x128xf32>
    %463 = arith.mulf %461, %462 : vector<8x128xf32>
    %464 = arith.addf %455, %463 : vector<8x128xf32>
    %c0_168 = arith.constant 0 : index
    %c0_169 = arith.constant 0 : index
    %465 = vector.load %arg49[%c0_168, %c0_169] : memref<8x8xf32, #tpu.memory_space<vmem>>, vector<8x8xf32>
    %c0_170 = arith.constant 0 : index
    %c0_171 = arith.constant 0 : index
    %466 = vector.load %arg48[%c0_170, %c0_171] : memref<8x1xf32, #tpu.memory_space<vmem>>, vector<8x1xf32>
    %cst_172 = arith.constant dense<0.000000e+00> : vector<8x128xf32>
    %467 = tpu.matmul %465, %464, %cst_172 {dimension_numbers = #tpu.dot_dimension_numbers<[1], [0], [0], [1], [0, 0, 1, 1], [], []>} : vector<8x8xf32>, vector<8x128xf32>, vector<8x128xf32> -> vector<8x128xf32>
    %468 = vector.broadcast %466 : vector<8x1xf32> to vector<8x128xf32>
    %469 = arith.addf %467, %468 : vector<8x128xf32>
    %470 = arith.addf %418, %469 : vector<8x128xf32>
    %c0_173 = arith.constant 0 : index
    %c0_174 = arith.constant 0 : index
    %471 = vector.load %arg62[%c0_173, %c0_174] : memref<8x1xf32, #tpu.memory_space<vmem>>, vector<8x1xf32>
    %c0_175 = arith.constant 0 : index
    %c0_176 = arith.constant 0 : index
    %472 = vector.load %arg63[%c0_175, %c0_176] : memref<8x1xf32, #tpu.memory_space<vmem>>, vector<8x1xf32>
    %473 = vector.broadcast %471 : vector<8x1xf32> to vector<8x128xf32>
    %474 = arith.mulf %473, %470 : vector<8x128xf32>
    %475 = math.sin %474 : vector<8x128xf32>
    %476 = arith.mulf %475, %475 : vector<8x128xf32>
    %477 = vector.broadcast %472 : vector<8x1xf32> to vector<8x128xf32>
    %478 = arith.mulf %476, %477 : vector<8x128xf32>
    %479 = arith.addf %470, %478 : vector<8x128xf32>
    %c0_177 = arith.constant 0 : index
    %c0_178 = arith.constant 0 : index
    %480 = vector.load %arg61[%c0_177, %c0_178] : memref<1x56xf32, #tpu.memory_space<vmem>>, vector<1x56xf32>
    %c0_179 = arith.constant 0 : index
    %c0_180 = arith.constant 0 : index
    %481 = vector.load %arg60[%c0_179, %c0_180] : memref<1x1xf32, #tpu.memory_space<vmem>>, vector<1x1xf32>
    %482 = vector.extract_strided_slice %479 {offsets = [0, 0], sizes = [8, 64], strides = [1, 1]} : vector<8x128xf32> to vector<8x64xf32>
    %cst_181 = arith.constant 0.000000e+00 : f32
    %483 = vector.broadcast %cst_181 : f32 to vector<8x3xf32>
    %484 = tpu.concatenate %483, %482, %483 in 1 : vector<8x3xf32>, vector<8x64xf32>, vector<8x3xf32> -> vector<8x70xf32>
    %485 = vector.extract_strided_slice %484 {offsets = [0, 0], sizes = [8, 64], strides = [1, 1]} : vector<8x70xf32> to vector<8x64xf32>
    %486 = vector.extract_strided_slice %484 {offsets = [0, 1], sizes = [8, 64], strides = [1, 1]} : vector<8x70xf32> to vector<8x64xf32>
    %487 = vector.extract_strided_slice %484 {offsets = [0, 2], sizes = [8, 64], strides = [1, 1]} : vector<8x70xf32> to vector<8x64xf32>
    %488 = vector.extract_strided_slice %484 {offsets = [0, 3], sizes = [8, 64], strides = [1, 1]} : vector<8x70xf32> to vector<8x64xf32>
    %489 = vector.extract_strided_slice %484 {offsets = [0, 4], sizes = [8, 64], strides = [1, 1]} : vector<8x70xf32> to vector<8x64xf32>
    %490 = vector.extract_strided_slice %484 {offsets = [0, 5], sizes = [8, 64], strides = [1, 1]} : vector<8x70xf32> to vector<8x64xf32>
    %491 = vector.extract_strided_slice %484 {offsets = [0, 6], sizes = [8, 64], strides = [1, 1]} : vector<8x70xf32> to vector<8x64xf32>
    %492 = tpu.concatenate %485, %486, %487, %488, %489, %490, %491 in 0 : vector<8x64xf32>, vector<8x64xf32>, vector<8x64xf32>, vector<8x64xf32>, vector<8x64xf32>, vector<8x64xf32>, vector<8x64xf32> -> vector<56x64xf32>
    %493 = vector.extract_strided_slice %479 {offsets = [0, 64], sizes = [8, 64], strides = [1, 1]} : vector<8x128xf32> to vector<8x64xf32>
    %cst_182 = arith.constant 0.000000e+00 : f32
    %494 = vector.broadcast %cst_182 : f32 to vector<8x3xf32>
    %495 = tpu.concatenate %494, %493, %494 in 1 : vector<8x3xf32>, vector<8x64xf32>, vector<8x3xf32> -> vector<8x70xf32>
    %496 = vector.extract_strided_slice %495 {offsets = [0, 0], sizes = [8, 64], strides = [1, 1]} : vector<8x70xf32> to vector<8x64xf32>
    %497 = vector.extract_strided_slice %495 {offsets = [0, 1], sizes = [8, 64], strides = [1, 1]} : vector<8x70xf32> to vector<8x64xf32>
    %498 = vector.extract_strided_slice %495 {offsets = [0, 2], sizes = [8, 64], strides = [1, 1]} : vector<8x70xf32> to vector<8x64xf32>
    %499 = vector.extract_strided_slice %495 {offsets = [0, 3], sizes = [8, 64], strides = [1, 1]} : vector<8x70xf32> to vector<8x64xf32>
    %500 = vector.extract_strided_slice %495 {offsets = [0, 4], sizes = [8, 64], strides = [1, 1]} : vector<8x70xf32> to vector<8x64xf32>
    %501 = vector.extract_strided_slice %495 {offsets = [0, 5], sizes = [8, 64], strides = [1, 1]} : vector<8x70xf32> to vector<8x64xf32>
    %502 = vector.extract_strided_slice %495 {offsets = [0, 6], sizes = [8, 64], strides = [1, 1]} : vector<8x70xf32> to vector<8x64xf32>
    %503 = tpu.concatenate %496, %497, %498, %499, %500, %501, %502 in 0 : vector<8x64xf32>, vector<8x64xf32>, vector<8x64xf32>, vector<8x64xf32>, vector<8x64xf32>, vector<8x64xf32>, vector<8x64xf32> -> vector<56x64xf32>
    %504 = tpu.concatenate %492, %503 in 1 : vector<56x64xf32>, vector<56x64xf32> -> vector<56x128xf32>
    %cst_183 = arith.constant dense<0.000000e+00> : vector<1x128xf32>
    %505 = tpu.matmul %480, %504, %cst_183 {dimension_numbers = #tpu.dot_dimension_numbers<[1], [0], [0], [1], [0, 0, 1, 1], [], []>} : vector<1x56xf32>, vector<56x128xf32>, vector<1x128xf32> -> vector<1x128xf32>
    %506 = vector.broadcast %481 : vector<1x1xf32> to vector<1x128xf32>
    %507 = arith.addf %505, %506 : vector<1x128xf32>
    %508 = math.tanh %507 : vector<1x128xf32>
    %c0_184 = arith.constant 0 : index
    %c0_185 = arith.constant 0 : index
    %509 = vector.load %arg64[%c0_184, %c0_185] : memref<1x128xf32, #tpu.memory_space<vmem>>, vector<1x128xf32>
    tpu.vector_store %arg64[%c0_184, %c0_185], %508 {strides = array<i32>} : memref<1x128xf32, #tpu.memory_space<vmem>>, vector<1x128xf32>,
    return
  }
}

</mosaic_0001>

<bundles_post_ra>
// kernel: discoder_decoder_forward.1
= control target key start
LH: loop header
LB: loop body
LE: loop exit
PB: predicated region body
PF: predicated region fallthrough
CT: control target
= control target key end

     0   :  { %s7432_s6 = smov 1   ;;  %s7433_s10 = smov 2   ;;  %s10038_s0 = inlined_call_operand.smem [shape: u32[65], index: -1, kind: input, shape index: {}] }
   0x1   :  { %s7547_s5 = sld [smem:[%s10038_s0]]   ;;  %s7434_s14 = smov 3  }
   0x2   :  { %s7552_s9 = sld [smem:[%s10038_s0 + %s7432_s6]]   ;;  %s7435_s18 = smov 4  }
   0x3   :  { %s7557_s13 = sld [smem:[%s10038_s0 + %s7433_s10]]   ;;  %s7436_s22 = smov 5  }
   0x4   :  { %s7562_s17 = sld [smem:[%s10038_s0 + %s7434_s14]]   ;;  %s7437_s26 = smov 6  }
   0x5   :  { %s7567_s21 = sld [smem:[%s10038_s0 + %s7435_s18]]   ;;  %s7438_s30 = smov 7  }
   0x6   :  { %s7572_s25 = sld [smem:[%s10038_s0 + %s7436_s22]]   ;;  %s7439_s4 = smov 8  }
   0x7   :  { %s7577_s29 = sld [smem:[%s10038_s0 + %s7437_s26]]   ;;  %s7440_s10 = smov 9  }
   0x8   :  { %s7582_s3 = sld [smem:[%s10038_s0 + %s7438_s30]]   ;;  %s7441_s15 = smov 10  }
   0x9   :  { %s7587_s8 = sld [smem:[%s10038_s0 + %s7439_s4]]   ;;  %s7442_s20 = smov 11  }
   0xa   :  { %10067 = sst [smem:[#allocation6_spill]] %s7562_s17  ;;  %s7443_s26 = smov 12  }
   0xb   :  { %10068 = sst [smem:[#allocation7_spill]] %s7567_s21  ;;  %s7444_s1 = smov 13  }
   0xc   :  { %10069 = sst [smem:[#allocation8_spill]] %s7572_s25  ;;  %s7445_s7 = smov 14  }
   0xd   :  { %s7592_s14 = sld [smem:[%s10038_s0 + %s7440_s10]]   ;;  %s7447_s22 = smov 16  }
   0xe   :  { %s7597_s19 = sld [smem:[%s10038_s0 + %s7441_s15]]   ;;  %s7446_s15 = smov 15  }
   0xf   :  { %s7602_s24 = sld [smem:[%s10038_s0 + %s7442_s20]]   ;;  %s7448_s28 = smov 17  }
  0x10   :  { %s7607_s30 = sld [smem:[%s10038_s0 + %s7443_s26]]   ;;  %s7495_s21 = smov 64  }
  0x11   :  { %s7612_s6 = sld [smem:[%s10038_s0 + %s7444_s1]]   ;;  %s7492_s1 = smov 61  }
  0x12   :  { %s7617_s12 = sld [smem:[%s10038_s0 + %s7445_s7]]   ;;  %s7449_s7 = smov 18  }
  0x13   :  { %s7622_s20 = sld [smem:[%s10038_s0 + %s7446_s15]]   ;;  %s7450_s15 = smov 19  }
  0x14   :  { %10070 = sst [smem:[#allocation9_spill]] %s7597_s19 }
  0x15   :  { %10071 = sst [smem:[#allocation10_spill]] %s7602_s24 }
  0x16   :  { %10072 = sst [smem:[#allocation11_spill]] %s7607_s30 }
  0x17   :  { %10073 = sst [smem:[#allocation12_spill]] %s7612_s6 }
  0x18   :  { %10074 = sst [smem:[#allocation13_spill]] %s7617_s12  ;;  %s7494_s12 = smov 63  }
  0x19   :  { %10075 = sst [smem:[#allocation14_spill]] %s7622_s20  ;;  %s7493_s20 = smov 62  }
  0x1a   :  { %s7627_s27 = sld [smem:[%s10038_s0 + %s7447_s22]]   ;;  %s7451_s22 = smov 20  }
  0x1b   :  { %s7632_s4 = sld [smem:[%s10038_s0 + %s7448_s28]]   ;;  %s7452_s28 = smov 21  }
  0x1c   :  { %s7637_s6 = sld [smem:[%s10038_s0 + %s7449_s7]]   ;;  %s7453_s7 = smov 22  }
  0x1d   :  { %s7642_s24 = sld [smem:[%s10038_s0 + %s7450_s15]]   ;;  %s7454_s15 = smov 23  }
  0x1e   :  { %s7647_s30 = sld [smem:[%s10038_s0 + %s7451_s22]]   ;;  %s7455_s22 = smov 24  }
  0x1f   :  { %s7853_s11 = sld [smem:[%s10038_s0 + %s7493_s20]]  }
  0x20   :  { %10076 = sst [smem:[#allocation15_spill]] %s7627_s27 }
  0x21   :  { %10077 = sst [smem:[#allocation16_spill]] %s7632_s4 }
  0x22   :  { %10078 = sst [smem:[#allocation17_spill]] %s7637_s6 }
  0x23   :  { %10079 = sst [smem:[#allocation18_spill]] %s7642_s24 }
  0x24   :  { %10080 = sst [smem:[#allocation19_spill]] %s7647_s30 }
  0x25   :  { %s7652_s4 = sld [smem:[%s10038_s0 + %s7452_s28]]   ;;  %s7456_s28 = smov 25  }
  0x26   :  { %s7657_s6 = sld [smem:[%s10038_s0 + %s7453_s7]]   ;;  %s7457_s7 = smov 26  }
  0x27   :  { %s7662_s24 = sld [smem:[%s10038_s0 + %s7454_s15]]   ;;  %s7458_s15 = smov 27  }
  0x28   :  { %s7667_s30 = sld [smem:[%s10038_s0 + %s7455_s22]]   ;;  %s7459_s22 = smov 28  }
  0x29   :  { %s7858_s18 = sld [smem:[%s10038_s0 + %s7494_s12]]  }
  0x2a   :  { %s7863_s26 = sld [smem:[%s10038_s0 + %s7495_s21]]  }
  0x2b   :  { %10081 = sst [smem:[#allocation20_spill]] %s7652_s4 }
  0x2c   :  { %10082 = sst [smem:[#allocation21_spill]] %s7657_s6 }
  0x2d   :  { %10083 = sst [smem:[#allocation22_spill]] %s7662_s24 }
  0x2e   :  { %10084 = sst [smem:[#allocation23_spill]] %s7667_s30 }
  0x2f   :  { %s7672_s4 = sld [smem:[%s10038_s0 + %s7456_s28]]   ;;  %s7460_s28 = smov 29  }
  0x30   :  { %s7677_s6 = sld [smem:[%s10038_s0 + %s7457_s7]]   ;;  %s7461_s7 = smov 30  }
  0x31   :  { %s7682_s24 = sld [smem:[%s10038_s0 + %s7458_s15]]   ;;  %s7462_s15 = smov 31  }
  0x32   :  { %s7687_s30 = sld [smem:[%s10038_s0 + %s7459_s22]]   ;;  %s7463_s22 = smov 32  }
  0x33   :  { %s7697_s27 = sld [smem:[%s10038_s0 + %s7461_s7]]   ;;  %s7465_s7 = smov 34  }
  0x34   :  { %s7702_s19 = sld [smem:[%s10038_s0 + %s7462_s15]]   ;;  %s7466_s15 = smov 35  }
  0x35   :  { %10085 = sst [smem:[#allocation24_spill]] %s7672_s4 }
  0x36   :  { %s7692_s4 = sld [smem:[%s10038_s0 + %s7460_s28]]   ;;  %s7464_s28 = smov 33  }
  0x37   :  { %s7707_s25 = sld [smem:[%s10038_s0 + %s7463_s22]]   ;;  %s7467_s22 = smov 36  }
  0x38   :  { %s7712_s17 = sld [smem:[%s10038_s0 + %s7464_s28]]   ;;  %s7468_s28 = smov 37  }
  0x39   :  { %10086 = sst [smem:[#allocation25_spill]] %s7697_s27 }
  0x3a   :  { %10087 = sst [smem:[#allocation26_spill]] %s7702_s19 }
  0x3b   :  { %s7717_s27 = sld [smem:[%s10038_s0 + %s7465_s7]]   ;;  %s7469_s7 = smov 38  }
  0x3c   :  { %s7722_s19 = sld [smem:[%s10038_s0 + %s7466_s15]]   ;;  %s7470_s15 = smov 39  }
  0x3d   :  { %10088 = sst [smem:[#allocation27_spill]] %s7707_s25 }
  0x3e   :  { %10089 = sst [smem:[#allocation28_spill]] %s7712_s17 }
  0x3f   :  { %s7727_s25 = sld [smem:[%s10038_s0 + %s7467_s22]]   ;;  %s7471_s22 = smov 40  }
  0x40   :  { %s7732_s17 = sld [smem:[%s10038_s0 + %s7468_s28]]   ;;  %s7472_s28 = smov 41  }
  0x41   :  { %10090 = sst [smem:[#allocation29_spill]] %s7717_s27 }
  0x42   :  { %10091 = sst [smem:[#allocation30_spill]] %s7722_s19 }
  0x43   :  { %s7737_s27 = sld [smem:[%s10038_s0 + %s7469_s7]]   ;;  %s7473_s7 = smov 42  }
  0x44   :  { %s7742_s19 = sld [smem:[%s10038_s0 + %s7470_s15]]   ;;  %s7474_s15 = smov 43  }
  0x45   :  { %10092 = sst [smem:[#allocation31_spill]] %s7727_s25 }
  0x46   :  { %10093 = sst [smem:[#allocation32_spill]] %s7732_s17 }
  0x47   :  { %s7747_s25 = sld [smem:[%s10038_s0 + %s7471_s22]]   ;;  %s7475_s22 = smov 44  }
  0x48   :  { %s7752_s17 = sld [smem:[%s10038_s0 + %s7472_s28]]   ;;  %s7476_s28 = smov 45  }
  0x49   :  { %10094 = sst [smem:[#allocation33_spill]] %s7737_s27 }
  0x4a   :  { %10095 = sst [smem:[#allocation34_spill]] %s7742_s19 }
  0x4b   :  { %s7757_s27 = sld [smem:[%s10038_s0 + %s7473_s7]]   ;;  %s7477_s7 = smov 46  }
  0x4c   :  { %s7762_s19 = sld [smem:[%s10038_s0 + %s7474_s15]]   ;;  %s7478_s15 = smov 47  }
  0x4d   :  { %10096 = sst [smem:[#allocation35_spill]] %s7747_s25 }
  0x4e   :  { %10097 = sst [smem:[#allocation36_spill]] %s7752_s17 }
  0x4f   :  { %s7767_s25 = sld [smem:[%s10038_s0 + %s7475_s22]]   ;;  %s7479_s22 = smov 48  }
  0x50   :  { %s7772_s17 = sld [smem:[%s10038_s0 + %s7476_s28]]   ;;  %s7480_s28 = smov 49  }
  0x51   :  { %10098 = sst [smem:[#allocation37_spill]] %s7757_s27 }
  0x52   :  { %10099 = sst [smem:[#allocation38_spill]] %s7762_s19 }
  0x53   :  { %s7777_s27 = sld [smem:[%s10038_s0 + %s7477_s7]]   ;;  %s7481_s7 = smov 50  }
  0x54   :  { %s7782_s19 = sld [smem:[%s10038_s0 + %s7478_s15]]   ;;  %s7482_s15 = smov 51  }
  0x55   :  { %10100 = sst [smem:[#allocation39_spill]] %s7767_s25 }
  0x56   :  { %10101 = sst [smem:[#allocation40_spill]] %s7772_s17 }
  0x57   :  { %s7787_s25 = sld [smem:[%s10038_s0 + %s7479_s22]]   ;;  %s7483_s22 = smov 52  }
  0x58   :  { %s7792_s17 = sld [smem:[%s10038_s0 + %s7480_s28]]   ;;  %s7484_s28 = smov 53  }
  0x59   :  { %10102 = sst [smem:[#allocation41_spill]] %s7777_s27 }
  0x5a   :  { %10103 = sst [smem:[#allocation42_spill]] %s7782_s19 }
  0x5b   :  { %s7797_s27 = sld [smem:[%s10038_s0 + %s7481_s7]]   ;;  %s7485_s7 = smov 54  }
  0x5c   :  { %s7802_s19 = sld [smem:[%s10038_s0 + %s7482_s15]]   ;;  %s7486_s15 = smov 55  }
  0x5d   :  { %10104 = sst [smem:[#allocation43_spill]] %s7787_s25 }
  0x5e   :  { %10105 = sst [smem:[#allocation44_spill]] %s7792_s17 }
  0x5f   :  { %s7807_s25 = sld [smem:[%s10038_s0 + %s7483_s22]]   ;;  %s7487_s22 = smov 56  }
  0x60   :  { %s7812_s17 = sld [smem:[%s10038_s0 + %s7484_s28]]   ;;  %s7488_s28 = smov 57  }
  0x61   :  { %10106 = sst [smem:[#allocation45_spill]] %s7797_s27 }
  0x62   :  { %10107 = sst [smem:[#allocation46_spill]] %s7802_s19 }
  0x63   :  { %s7817_s27 = sld [smem:[%s10038_s0 + %s7485_s7]]   ;;  %s7489_s7 = smov 58  }
  0x64   :  { %s7822_s19 = sld [smem:[%s10038_s0 + %s7486_s15]]   ;;  %s7490_s15 = smov 59  }
  0x65   :  { %10108 = sst [smem:[#allocation47_spill]] %s7807_s25 }
  0x66   :  { %10109 = sst [smem:[#allocation48_spill]] %s7812_s17 }
  0x67   :  { %s7827_s25 = sld [smem:[%s10038_s0 + %s7487_s22]]   ;;  %s7491_s22 = smov 60  }
  0x68   :  { %s7832_s17 = sld [smem:[%s10038_s0 + %s7488_s28]]  }
  0x69   :  { %10110 = sst [smem:[#allocation49_spill]] %s7817_s27 }
  0x6a   :  { %10111 = sst [smem:[#allocation50_spill]] %s7822_s19 }
  0x6b   :  { %s7837_s27 = sld [smem:[%s10038_s0 + %s7489_s7]]  }
  0x6c   :  { %s7842_s19 = sld [smem:[%s10038_s0 + %s7490_s15]]  }
  0x6d   :  { %10112 = sst [smem:[#allocation51_spill]] %s7827_s25 }
  0x6e   :  { %10113 = sst [smem:[#allocation52_spill]] %s7832_s17 }
  0x6f   :  { %s6411_s25 = sld [smem:[%s10038_s0 + %s7491_s22]]  }
  0x70   :  { %s6412_s17 = sld [smem:[%s10038_s0 + %s7492_s1]]  }
  0x75   :  { %v134_v0 = vstv %s6411_s25 }
  0x76   :  { %135 = vst [vmem:[#allocation2] sm:$0x1] %v134_v0 }
  0x77   :  { %136 = vsyncpa [#allocation4], 0  ;;  %s7496_s1 = smov [#allocation3]  }
  0x78   :  { %s265_s28 = sshll.u32 %s7496_s1, 4  ;;  %s266_s28 = int_to_ptr.vmem [resolvable:$true] %s265_s28 }
  0x79   :  { %s7418_s20 = scalar_lea.vmem %s266_s28, 16  ;;  %s7422_s2 = scalar_lea.vmem %s266_s28, 32 }
  0x7a   :  { %p7419_p0 = scmp.ne.s32.totalorder %s266_s28, %s7418_s20  ;;  %p7423_p1 = scmp.lt.s32.totalorder %s266_s28, %s266_s28 }
  0x7b   :  { %p7424_p2 = scmp.lt.s32.totalorder %s7422_s2, %s7418_s20 }
  0x7d   :  { %p7425_p3 = por %p7424_p2, %p7423_p1 }
  0x7f   :  { %p7426_p4 = pnand %p7425_p3, %p7419_p0 }
  0x81   :  { %7429 = shalt.err (!%p7426_p4)
}
  0x82   :  { %268 = dma.hbm_to_vmem [thread:$0]  %s6412_s17, 16, %s266_s28, [#allocation4]  }
  0x83   :  { %7430 = dma.done.wait [#allocation4], 16  }
  0x84   :  { %7431 = vsyncadd [#allocation4], 4294967280  ;;  %v6416_v1 = vld [vmem:[%s7547_s5 + $0x8] sm:$0xff]  ;;  %s7497_s0 = smov 16   ;;  %v276_v4 = vld [vmem:[%s7547_s5] sm:$0xff]  ;;  %vm288_vm0 = vcmask 130048  }
  0x85   :  { %v6417_v2 = vld [vmem:[%s7552_s9 + $0x8] sm:$0xff]  ;;  %v277_v5 = vld [vmem:[%s7552_s9] sm:$0xff]  ;;  %s7498_s17 = smov 3   ;;  %s7499_s21 = smov 115   ;;  %vm10065_vm1 = vcmask 23552   ;;  %vm304_vm2 = vcmask 154624  }
  0x86   :  { %v283_v3 = vadd.f32 %v6417_v2, %v6416_v1  ;;  %v278_v6 = vadd.f32 %v277_v5, %v276_v4  ;;  %s7500_s25 = smov 123   ;;  %s7501_s5 = smov 122   ;;  %v290_v18 = vld [vmem:[%s7842_s19] sm:$0xff]  ;;  %vm10061_vm3 = vcmask 457728   ;;  %v296_v21 = vld [vmem:[%s7837_s27 + $0x10] sm:$0xff]  ;;  %v7506_v22 = vmov 0  }
  0x87   :  { %s7502_s9 = smov 125   ;;  %s7503_s12 = smov 124   ;;  %6776 = vmatprep.mubr.msk.f32.mxu0 %vm10061_vm3, %v290_v18  ;;  %7307 = vset.pattern.permute.xlu1 %v7506_v22  ;;  %v492_v24 = vld [vmem:[%s7677_s6 + $0x18] sm:$0xff]  ;;  %v491_v26 = vld [vmem:[%s7677_s6 + $0x10] sm:$0xff]  ;;  %v295_v27 = vld [vmem:[%s7837_s27 + $0x8] sm:$0xff] }
  0x88   :  { %285 = vrot.lane.b32.xlu0 %v283_v3, %s7497_s0  ;;  %s7504_s10 = smov 127   ;;  %s7505_s7 = smov 126   ;;  %v297_v25 = vld [vmem:[%s7837_s27 + $0x18] sm:$0xff]  ;;  %v490_v28 = vld [vmem:[%s7677_s6 + $0x8] sm:$0xff]  ;;  %v294_v29 = vld [vmem:[%s7837_s27] sm:$0xff] }
  0x89   :  { %7306 = vset.pattern.permute.xlu0 %v7506_v22  ;;  %v496_v30 = vld [vmem:[%s7682_s24 + $0x18] sm:$0xff]  ;;  %v489_v31 = vld [vmem:[%s7677_s6] sm:$0xff]  ;;  %v494_v32 = vld [vmem:[%s7682_s24 + $0x8] sm:$0xff]  ;;  %s7515_s6 = smov 14   ;;  %s7516_s27 = smov 15  }
  0x8a   :  { %v495_v33 = vld [vmem:[%s7682_s24 + $0x10] sm:$0xff]  ;;  %v493_v34 = vld [vmem:[%s7682_s24] sm:$0xff]  ;;  %v291_v55 = vld [vmem:[%s7842_s19 + $0x8] sm:$0xff]  ;;  %s7514_s24 = smov 1   ;;  %s7519_s16 = smov 32  }
  0x8b   :  { %v292_v56 = vld [vmem:[%s7842_s19 + $0x10] sm:$0xff]  ;;  %v293_v57 = vld [vmem:[%s7842_s19 + $0x18] sm:$0xff]  ;;  %s7513_s19 = smov 113   ;;  %s10133_s15 = sld [smem:[#allocation6_spill]] }
  0x8c   :  { %s7522_s23 = smov 110   ;;  %s7523_s22 = smov 116  }
  0x8d   :  { %s7524_s1 = smov 119   ;;  %s10139_s28 = sld [smem:[#allocation9_spill]] }
  0x8e   :  { %s10140_s20 = sld [smem:[#allocation15_spill]] }
  0x8f   :  { %s10141_s2 = sld [smem:[#allocation16_spill]] }
  0xfa   :  { %v286_v7 = vpop.permute.xlu0 %285 }
  0xfb   :  { %v289_v8 = vsel %vm288_vm0, %v278_v6, %v286_v7 }
  0xfc   :  { %299 = vrot.lane.b32.xlu1 %v289_v8, %s7498_s17  ;;  %325 = vrot.lane.b32.xlu0 %v289_v8, %s7499_s21  ;;  %s10143_s21 = sld [smem:[#allocation21_spill]] }
 0x16e   :  { %v326_v9 = vpop.permute.xlu0 %325  ;;  %v300_v12 = vpop.permute.xlu1 %299 }
 0x16f   :  { %v328_v10 = vsel %vm10065_vm1, 0.0, %v326_v9  ;;  %v303_v13 = vsel %vm10065_vm1, 0.0, %v300_v12 }
 0x170   :  { %v329_v11 = vsel %vm304_vm2, %v328_v10, 0.0  ;;  %v7882_v14 = vsel %vm304_vm2, %v303_v13, 0.0 }
 0x171   :  { %339 = vrot.lane.b32.xlu0 %v329_v11, %s7500_s25  ;;  %341 = vrot.lane.b32.xlu1 %v329_v11, %s7501_s5 }
 0x175   :  { %335 = vrot.lane.b32.xlu0 %v329_v11, %s7502_s9  ;;  %337 = vrot.lane.b32.xlu1 %v329_v11, %s7503_s12 }
 0x179   :  { %331 = vrot.lane.b32.xlu0 %v329_v11, %s7504_s10  ;;  %333 = vrot.lane.b32.xlu1 %v329_v11, %s7505_s7 }
 0x17d   :  { %322 = vrot.lane.b32.xlu1 %v7882_v14, %s7501_s5 }
 0x181   :  { %319 = vrot.lane.b32.xlu1 %v7882_v14, %s7500_s25 }
 0x185   :  { %316 = vrot.lane.b32.xlu1 %v7882_v14, %s7503_s12 }
 0x189   :  { %313 = vrot.lane.b32.xlu1 %v7882_v14, %s7502_s9 }
 0x18d   :  { %310 = vrot.lane.b32.xlu1 %v7882_v14, %s7505_s7 }
 0x191   :  { %307 = vrot.lane.b32.xlu1 %v7882_v14, %s7504_s10 }
 0x195   :  { %343 = vrot.lane.b32.xlu1 %v329_v11, %s7497_s0 }
 0x199   :  { %383 = vperm.xlu1 %7307, %v296_v21  }
 0x19d   :  { %514 = vperm.xlu1 %7307, %v492_v24  }
 0x1a1   :  { %509 = vperm.xlu1 %7307, %v491_v26  }
 0x1a5   :  { %504 = vperm.xlu1 %7307, %v490_v28  }
 0x1a9   :  { %958 = vperm.xlu1 %7307, %v496_v30  }
 0x1ad   :  { %948 = vperm.xlu1 %7307, %v494_v32  }
 0x1e3   :  { %v342_v15 = vpop.permute.xlu1 %341  ;;  %v340_v16 = vpop.permute.xlu0 %339 }
 0x1e4   :  { %355 = vrot.lane.b32.xlu0 %v342_v15, %s7497_s0 }
 0x1e7   :  { %v338_v17 = vpop.permute.xlu1 %337  ;;  %v336_v19 = vpop.permute.xlu0 %335 }
 0x1e8   :  { %353 = vrot.lane.b32.xlu0 %v340_v16, %s7497_s0 }
 0x1eb   :  { %v334_v20 = vpop.permute.xlu1 %333  ;;  %v332_v23 = vpop.permute.xlu0 %331 }
 0x1ec   :  { %351 = vrot.lane.b32.xlu0 %v338_v17, %s7497_s0 }
 0x1ef   :  { %v323_v35 = vpop.permute.xlu1 %322 }
 0x1f0   :  { %349 = vrot.lane.b32.xlu0 %v336_v19, %s7497_s0 }
 0x1f3   :  { %v320_v36 = vpop.permute.xlu1 %319 }
 0x1f4   :  { %347 = vrot.lane.b32.xlu0 %v334_v20, %s7497_s0 }
 0x1f7   :  { %v317_v37 = vpop.permute.xlu1 %316 }
 0x1f8   :  { %345 = vrot.lane.b32.xlu0 %v332_v23, %s7497_s0  ;;  %s10142_s0 = sld [smem:[#allocation11_spill]] }
 0x1fb   :  { %v314_v40 = vpop.permute.xlu1 %313 }
 0x1fc   :  { %388 = vperm.xlu0 %7306, %v297_v25  }
 0x1ff   :  { %v311_v43 = vpop.permute.xlu1 %310 }
 0x200   :  { %378 = vperm.xlu0 %7306, %v295_v27  }
 0x203   :  { %v308_v48 = vpop.permute.xlu1 %307 }
 0x204   :  { %373 = vperm.xlu0 %7306, %v294_v29  }
 0x207   :  { %v344_v51 = vpop.permute.xlu1 %343 }
 0x208   :  { %499 = vperm.xlu0 %7306, %v489_v31   ;;  %v364_v54 = vsel %vm288_vm0, %v7882_v14, %v344_v51 }
 0x20c   :  { %953 = vperm.xlu0 %7306, %v495_v33  }
 0x210   :  { %943 = vperm.xlu0 %7306, %v493_v34  }
 0x214   :  { %v384_v58 = vpop.permute.xlu1 %383 }
 0x218   :  { %v515_v60 = vpop.permute.xlu1 %514 }
 0x21c   :  { %v7931_v62 = vpop.permute.xlu1 %509 }
 0x220   :  { %v505_v2 = vpop.permute.xlu1 %504 }
 0x256   :  { %v356_v38 = vpop.permute.xlu0 %355 }
 0x257   :  { %v370_v39 = vsel %vm288_vm0, %v323_v35, %v356_v38  ;;  %v7507_v35 = vmov 683565275  }
 0x258   :  { %6762 = vmatprep.subr.mxu0 %v370_v39 }
 0x259   :  { %6763 = vmatpush3.msra.mxu0 %v370_v39  ;;  %v7509_v39 = vmov 2131351028  }
 0x25a   :  { %v354_v41 = vpop.permute.xlu0 %353 }
 0x25b   :  { %v369_v42 = vsel %vm288_vm0, %v320_v36, %v354_v41  ;;  %v7510_v41 = vmov 2102212464  }
 0x25c   :  { %6764 = vmatprep.subr.mxu0 %v369_v42 }
 0x25d   :  { %6765 = vmatpush3.msra.mxu0 %v369_v42 }
 0x25e   :  { %v352_v44 = vpop.permute.xlu0 %351 }
 0x25f   :  { %v368_v45 = vsel %vm288_vm0, %v317_v37, %v352_v44  ;;  %v7508_v37 = vmov 2475754826  }
 0x260   :  { %6766 = vmatprep.subr.mxu0 %v368_v45 }
 0x261   :  { %6767 = vmatpush3.msra.mxu0 %v368_v45 }
 0x262   :  { %v350_v46 = vpop.permute.xlu0 %349 }
 0x263   :  { %v367_v47 = vsel %vm288_vm0, %v314_v40, %v350_v46 }
 0x264   :  { %6768 = vmatprep.subr.mxu0 %v367_v47 }
 0x265   :  { %6769 = vmatpush3.msra.mxu0 %v367_v47 }
 0x266   :  { %v348_v49 = vpop.permute.xlu0 %347 }
 0x267   :  { %v366_v50 = vsel %vm288_vm0, %v311_v43, %v348_v49  ;;  %v7511_v43 = vmov 920167782  }
 0x268   :  { %6770 = vmatprep.subr.mxu0 %v366_v50 }
 0x269   :  { %6771 = vmatpush3.msra.mxu0 %v366_v50  ;;  %v7512_v50 = vmov 1326507024  }
 0x26a   :  { %v346_v52 = vpop.permute.xlu0 %345 }
 0x26b   :  { %v365_v53 = vsel %vm288_vm0, %v308_v48, %v346_v52 }
 0x26c   :  { %6772 = vmatprep.subr.mxu0 %v365_v53 }
 0x26d   :  { %6773 = vmatpush3.msra.mxu0 %v365_v53 }
 0x26e   :  { %6774 = vmatprep.subr.mxu0 %v364_v54 }
 0x26f   :  { %6775 = vmatpush3.msra.mxu0 %v364_v54 }
 0x270   :  { %6777 = vmatmul.mubr.msk.f32.vlgmr.msra.gmra.mxu0 %vm10061_vm3, %v291_v55 }
 0x271   :  { %6779 = vmatprep.mubr.msk.f32.mxu0 %vm10061_vm3, %v292_v56 }
 0x274   :  { %6780 = vmatmul.mubr.msk.f32.gmra.mxu0 %vm10061_vm3, %v293_v57 }
 0x277   :  { %v389_v59 = vpop.permute.xlu0 %388 }
 0x27b   :  { %v379_v61 = vpop.permute.xlu0 %378 }
 0x27f   :  { %v374_v63 = vpop.permute.xlu0 %373 }
 0x283   :  { %v500_v7 = vpop.permute.xlu0 %499 }
 0x330   :  { %v6778_v0 = vpop.f32.mrf.mxu0 }
 0x331   :  { %v7933_v1 = vadd.f32 %v6778_v0, %v379_v61 }
 0x332   :  { %v470_v3 = vpop.f32.mrf.mxu0 }
 0x333   :  { %v7936_v4 = vmul.f32 %v505_v2, %v7933_v1  ;;  %v7938_v5 = vadd.f32 %v470_v3, %v374_v63 }
 0x334   :  { %v6781_v6 = vpop.f32.mrf.mxu0 }
 0x335   :  { %v625_v8 = vand.u32 2147483647, %v7936_v4  ;;  %v628_v9 = vand.u32 2139095040, %v7936_v4  ;;  %v7943_v10 = vmul.f32 %v500_v7, %v7938_v5  ;;  %v7945_v11 = vadd.f32 %v6781_v6, %v389_v59 }
 0x336   :  { %v480_v25 = vpop.f32.mrf.mxu0 }
 0x337   :  { %v629_v12 = vshrl.u32 %v628_v9, 23  ;;  %v632_v13 = vand.u32 8388607, %v625_v8  ;;  %v521_v14 = vand.u32 2147483647, %v7943_v10  ;;  %v524_v15 = vand.u32 2139095040, %v7943_v10 }
 0x338   :  { %v7952_v17 = vmul.f32 %v515_v60, %v7945_v11  ;;  %v7961_v33 = vadd.f32 %v480_v25, %v384_v58 }
 0x339   :  { %v6426_v16 = vadd.s32 4294967169, %v629_v12  ;;  %v525_v18 = vshrl.u32 %v524_v15, 23  ;;  %v528_v19 = vand.u32 8388607, %v521_v14  ;;  %v633_v21 = vor.u32 8388608, %v632_v13 }
 0x33a   :  { %v836_v24 = vand.u32 2139095040, %v7952_v17 }
 0x33b   :  { %v635_v20 = vadd.s32 1, %v6426_v16  ;;  %v6422_v22 = vadd.s32 4294967169, %v525_v18  ;;  %v529_v23 = vor.u32 8388608, %v528_v19  ;;  %v7957_v30 = vshll.u32 %v633_v21, 8 }
 0x33c   :  { %v837_v32 = vshrl.u32 %v836_v24, 23 }
 0x33d   :  { %vm636_vm4 = vcmp.gt.s32.totalorder %v635_v20, 0  ;;  %v531_v27 = vadd.s32 1, %v6422_v22  ;;  %v7959_v31 = vshll.u32 %v529_v23, 8 }
 0x33e   :  { %v637_v26 = vsel %vm636_vm4, %v635_v20, 0  ;;  %v6434_v13 = vadd.s32 4294967169, %v837_v32  ;;  %vm627_vm4 = vcmp.lt.s32.totalorder %v7936_v4, 0 }
 0x33f   :  { %v638_v28 = vshrl.u32 %v637_v26, 5  ;;  %v639_v29 = vand.u32 31, %v637_v26  ;;  %vm532_vm5 = vcmp.gt.s32.totalorder %v531_v27, 0 }
 0x340   :  { %v533_v55 = vsel %vm532_vm5, %v531_v27, 0 }
 0x341   :  { %v640_v34 = vsub.s32 32, %v639_v29  ;;  %v642_v36 = vshll.u32 %v7507_v35, %v639_v29  ;;  %v645_v38 = vshll.u32 %v7508_v37, %v639_v29  ;;  %v648_v40 = vshll.u32 %v7509_v39, %v639_v29 }
 0x342   :  { %v651_v42 = vshll.u32 %v7510_v41, %v639_v29  ;;  %v654_v44 = vshll.u32 %v7511_v43, %v639_v29  ;;  %vm657_vm6 = vcmp.lt.s32.totalorder %v638_v28, 1  ;;  %vm658_vm7 = vcmp.lt.s32.totalorder %v638_v28, 2 }
 0x343   :  { %v643_v45 = vshrl.u32 %v7508_v37, %v640_v34  ;;  %v646_v46 = vshrl.u32 %v7509_v39, %v640_v34  ;;  %v649_v47 = vshrl.u32 %v7510_v41, %v640_v34  ;;  %v641_v48 = vshrl.u32 %v7507_v35, %v640_v34 }
 0x344   :  { %v652_v49 = vshrl.u32 %v7511_v43, %v640_v34  ;;  %v655_v51 = vshrl.u32 %v7512_v50, %v640_v34  ;;  %vm659_vm8 = vcmp.lt.s32.totalorder %v638_v28, 3  ;;  %vm660_vm9 = vcmp.lt.s32.totalorder %v638_v28, 4 }
 0x345   :  { %v644_v52 = vor.u32 %v643_v45, %v642_v36  ;;  %v647_v53 = vor.u32 %v646_v46, %v645_v38  ;;  %v650_v54 = vor.u32 %v649_v47, %v648_v40  ;;  %v535_v58 = vand.u32 31, %v533_v55 }
 0x346   :  { %v653_v56 = vor.u32 %v652_v49, %v651_v42  ;;  %v656_v57 = vor.u32 %v655_v51, %v654_v44  ;;  %v534_v18 = vshrl.u32 %v533_v55, 5 }
 0x347   :  { %v661_v59 = vsel %vm657_vm6, %v641_v48, %v644_v52  ;;  %v662_v60 = vsel %vm660_vm9, %v650_v54, 2102212464  ;;  %v665_v61 = vsel %vm657_vm6, %v644_v52, %v647_v53  ;;  %v669_v63 = vsel %vm657_vm6, %v647_v53, %v650_v54 }
 0x348   :  { %v663_v0 = vsel %vm659_vm8, %v647_v53, %v662_v60  ;;  %v666_v2 = vsel %vm660_vm9, %v653_v56, 920167782  ;;  %v670_v3 = vsel %vm660_vm9, %v656_v57, 1326507024  ;;  %v536_v6 = vsub.s32 32, %v535_v58 }
 0x349   :  { %v664_v7 = vsel %vm658_vm7, %v661_v59, %v663_v0  ;;  %v667_v9 = vsel %vm659_vm8, %v650_v54, %v666_v2  ;;  %v671_v12 = vsel %vm659_vm8, %v653_v56, %v670_v3  ;;  %v538_v19 = vshll.u32 %v7507_v35, %v535_v58 }
 0x34a   :  { %v668_v15 = vsel %vm658_vm7, %v665_v61, %v667_v9  ;;  %v672_v16 = vsel %vm658_vm7, %v669_v63, %v671_v12  ;;  %v680_v24 = vmul.u32 %v7957_v30, %v664_v7  ;;  %v539_v25 = vshrl.u32 %v7508_v37, %v536_v6 }
 0x34b   :  { %v7986_v20 = vmul.u32.u64.low %v7957_v30, %v672_v16  ;;  %v7987_v21 = vmul.u32.u64.high %v7957_v30, %v672_v16, %v7986_v20  ;;  %v7990_v22 = vmul.u32.u64.low %v7957_v30, %v668_v15  ;;  %v7991_v23 = vmul.u32.u64.high %v7957_v30, %v668_v15, %v7990_v22 }
 0x34c   :  { %v541_v26 = vshll.u32 %v7508_v37, %v535_v58  ;;  %v542_v27 = vshrl.u32 %v7509_v39, %v536_v6  ;;  %v544_v28 = vshll.u32 %v7509_v39, %v535_v58  ;;  %v545_v29 = vshrl.u32 %v7510_v41, %v536_v6 }
 0x34d   :  { %v547_v32 = vshll.u32 %v7510_v41, %v535_v58  ;;  %v548_v34 = vshrl.u32 %v7511_v43, %v536_v6  ;;  %v540_v36 = vor.u32 %v539_v25, %v538_v19  ;;  %v550_v40 = vshll.u32 %v7511_v43, %v535_v58 }
 0x34e   :  { %v543_v38 = vor.u32 %v542_v27, %v541_v26  ;;  %v551_v30 = vshrl.u32 %v7512_v50, %v536_v6  ;;  %vm682_vm10 = vc.u32 %v7987_v21, %v7990_v22  ;;  %v683_v42 = vadd.s32 1, %v7991_v23 }
 0x34f   :  { %v537_v44 = vshrl.u32 %v7507_v35, %v536_v6  ;;  %v546_v45 = vor.u32 %v545_v29, %v544_v28  ;;  %v549_v46 = vor.u32 %v548_v34, %v547_v32  ;;  %vm553_vm11 = vcmp.lt.s32.totalorder %v534_v18, 1 }
 0x350   :  { %v552_v47 = vor.u32 %v551_v30, %v550_v40  ;;  %vm554_vm12 = vcmp.lt.s32.totalorder %v534_v18, 2  ;;  %v684_v48 = vsel %vm682_vm10, %v683_v42, %v7991_v23  ;;  %vm555_vm13 = vcmp.lt.s32.totalorder %v534_v18, 3 }
 0x351   :  { %vm556_vm14 = vcmp.lt.s32.totalorder %v534_v18, 4  ;;  %v561_v49 = vsel %vm553_vm11, %v540_v36, %v543_v38  ;;  %v685_v51 = vadd.s32 %v684_v48, %v680_v24  ;;  %v565_v54 = vsel %vm553_vm11, %v543_v38, %v546_v45 }
 0x352   :  { %v558_v52 = vsel %vm556_vm14, %v546_v45, 2102212464  ;;  %v562_v53 = vsel %vm556_vm14, %v549_v46, 920167782  ;;  %v557_v55 = vsel %vm553_vm11, %v537_v44, %v540_v36  ;;  %v566_v57 = vsel %vm556_vm14, %v552_v47, 1326507024 }
 0x353   :  { %v563_v56 = vsel %vm555_vm13, %v546_v45, %v562_v53  ;;  %v843_v58 = vadd.s32 1, %v6434_v13  ;;  %v686_v59 = vadd.s32 536870912, %v685_v51  ;;  %v559_v60 = vsel %vm555_vm13, %v543_v38, %v558_v52 }
 0x354   :  { %v564_v61 = vsel %vm554_vm12, %v561_v49, %v563_v56  ;;  %v567_v63 = vsel %vm555_vm13, %v549_v46, %v566_v57  ;;  %v560_v12 = vsel %vm554_vm12, %v557_v55, %v559_v60  ;;  %v833_v13 = vand.u32 2147483647, %v7952_v17 }
 0x355   :  { %v568_v0 = vsel %vm554_vm12, %v565_v54, %v567_v63  ;;  %v8012_v2 = vmul.u32.u64.low %v7959_v31, %v564_v61  ;;  %v8013_v3 = vmul.u32.u64.high %v7959_v31, %v564_v61, %v8012_v2  ;;  %v8016_v6 = vshrl.u32 %v686_v59, 30 }
 0x356   :  { %v8019_v7 = vmul.u32.u64.low %v7959_v31, %v568_v0  ;;  %v8020_v9 = vmul.u32.u64.high %v7959_v31, %v568_v0, %v8019_v7  ;;  %vm844_vm15 = vcmp.gt.s32.totalorder %v843_v58, 0  ;;  %v8026_v16 = vmul.f32 %v7931_v62, %v7961_v33 }
 0x357   :  { %v845_v15 = vsel %vm844_vm15, %v843_v58, 0  ;;  %v688_v19 = vshll.u32 %v8016_v6, 30  ;;  %v579_v23 = vadd.s32 1, %v8013_v3  ;;  %v576_v25 = vmul.u32 %v7959_v31, %v560_v12 }
 0x358   :  { %v847_v20 = vand.u32 31, %v845_v15  ;;  %vm578_vm2 = vc.u32 %v8020_v9, %v8012_v2  ;;  %v840_v26 = vand.u32 8388607, %v833_v13  ;;  %v732_v62 = vand.u32 2139095040, %v8026_v16 }
 0x359   :  { %v689_v24 = vsub.s32 %v685_v51, %v688_v19  ;;  %v580_v18 = vsel %vm578_vm2, %v579_v23, %v8013_v3  ;;  %v846_v46 = vshrl.u32 %v845_v15, 5  ;;  %v681_v54 = vadd.s32 %v7990_v22, %v7987_v21 }
 0x35a   :  { %v848_v27 = vsub.s32 32, %v847_v20  ;;  %v581_v29 = vadd.s32 %v580_v18, %v576_v25  ;;  %v841_v36 = vor.u32 8388608, %v840_v26  ;;  %v733_v40 = vshrl.u32 %v732_v62, 23 }
 0x35b   :  { %v691_v28 = vsub.s32 0, %v689_v24  ;;  %v850_v47 = vshll.u32 %v7507_v35, %v847_v20  ;;  %v856_v48 = vshll.u32 %v7509_v39, %v847_v20  ;;  %v853_v51 = vshll.u32 %v7508_v37, %v847_v20 }
 0x35c   :  { %v582_v34 = vadd.s32 536870912, %v581_v29  ;;  %v857_v38 = vshrl.u32 %v7510_v41, %v848_v27  ;;  %v851_v30 = vshrl.u32 %v7508_v37, %v848_v27  ;;  %v854_v42 = vshrl.u32 %v7509_v39, %v848_v27 }
 0x35d   :  { %v6427_v32 = vmin.u32 %v691_v28, %v689_v24  ;;  %v860_v44 = vshrl.u32 %v7511_v43, %v848_v27  ;;  %v859_v52 = vshll.u32 %v7510_v41, %v847_v20  ;;  %v863_v53 = vshrl.u32 %v7512_v50, %v848_v27 }
 0x35e   :  { %v8041_v45 = vshrl.u32 %v582_v34, 30  ;;  %v711_v55 = vsub.s32 4, %v8016_v6  ;;  %v858_v56 = vor.u32 %v857_v38, %v856_v48  ;;  %v862_v57 = vshll.u32 %v7511_v43, %v847_v20 }
 0x35f   :  { %v693_v31 = vclz %v6427_v32  ;;  %v852_v58 = vor.u32 %v851_v30, %v850_v47  ;;  %v855_v59 = vor.u32 %v854_v42, %v853_v51  ;;  %v861_v60 = vor.u32 %v860_v44, %v859_v52 }
 0x360   :  { %v584_v63 = vshll.u32 %v8041_v45, 30  ;;  %v864_v0 = vor.u32 %v863_v53, %v862_v57  ;;  %v6430_v3 = vadd.s32 4294967169, %v733_v40  ;;  %v849_v15 = vshrl.u32 %v7507_v35, %v848_v27 }
 0x361   :  { %v6428_v49 = vadd.s32 4294967294, %v693_v31  ;;  %vm868_vm6 = vcmp.lt.s32.totalorder %v846_v46, 4  ;;  %vm865_vm7 = vcmp.lt.s32.totalorder %v846_v46, 1  ;;  %vm867_vm8 = vcmp.lt.s32.totalorder %v846_v46, 3 }
 0x362   :  { %v870_v22 = vsel %vm868_vm6, %v858_v56, 2102212464  ;;  %v873_v23 = vsel %vm865_vm7, %v852_v58, %v855_v59  ;;  %v874_v25 = vsel %vm868_vm6, %v861_v60, 920167782  ;;  %v8056_v18 = vsub.s32 %v581_v29, %v584_v63 }
 0x363   :  { %vm6429_vm5 = vcmp.lt.s32.totalorder %v6428_v49, 0  ;;  %v875_v26 = vsel %vm867_vm8, %v858_v56, %v874_v25  ;;  %v877_v62 = vsel %vm865_vm7, %v855_v59, %v858_v56  ;;  %v878_v28 = vsel %vm868_vm6, %v864_v0, 1326507024 }
 0x364   :  { %v696_v61 = vsel %vm6429_vm5, 0, %v6428_v49  ;;  %vm866_vm9 = vcmp.lt.s32.totalorder %v846_v46, 2  ;;  %v712_v27 = vsel %vm627_vm4, %v711_v55, %v8016_v6  ;;  %v881_v40 = vshll.u32 %v841_v36, 8 }
 0x365   :  { %v697_v7 = vsub.s32 32, %v696_v61  ;;  %v701_v12 = vsub.s32 4294967266, %v696_v61  ;;  %v698_v21 = vshll.u32 %v689_v24, %v696_v61  ;;  %v879_v24 = vsel %vm867_vm8, %v861_v60, %v878_v28 }
 0x366   :  { %v876_v38 = vsel %vm866_vm9, %v873_v23, %v875_v26  ;;  %v869_v29 = vsel %vm865_vm7, %v849_v15, %v852_v58  ;;  %v871_v30 = vsel %vm867_vm8, %v855_v59, %v870_v22  ;;  %v880_v42 = vsel %vm866_vm9, %v877_v62, %v879_v24 }
 0x367   :  { %v699_v19 = vshrl.u32 %v681_v54, %v697_v7  ;;  %v702_v20 = vadd.s32 127, %v701_v12  ;;  %v587_v47 = vsub.s32 0, %v8056_v18  ;;  %v739_v6 = vadd.s32 1, %v6430_v3 }
 0x368   :  { %v8069_v48 = vmul.u32.u64.low %v881_v40, %v880_v42  ;;  %v8070_v49 = vmul.u32.u64.high %v881_v40, %v880_v42, %v8069_v48  ;;  %v8072_v52 = vmul.u32.u64.low %v881_v40, %v876_v38  ;;  %v8073_v53 = vmul.u32.u64.high %v881_v40, %v876_v38, %v8072_v52 }
 0x369   :  { %v700_v32 = vor.u32 %v699_v19, %v698_v21  ;;  %v703_v34 = vshll.u32 %v702_v20, 23  ;;  %vm8078_vm10 = vcmp.le.f32.partialorder %v625_v8, 0.7853982  ;;  %v872_v55 = vsel %vm866_vm9, %v869_v29, %v871_v30 }
 0x36a   :  { %vm740_vm11 = vcmp.gt.s32.totalorder %v739_v6, 0  ;;  %v714_v56 = vsel %vm8078_vm10, 0, %v712_v27  ;;  %v6423_v57 = vmin.u32 %v587_v47, %v8056_v18  ;;  %vm890_vm12 = vc.u32 %v8070_v49, %v8072_v52 }
 0x36b   :  { %v704_v31 = vor.u32 4788187, %v703_v34  ;;  %v707_v44 = vcvt.s32.f32 %v700_v32  ;;  %v891_v59 = vadd.s32 1, %v8073_v53  ;;  %v741_v60 = vsel %vm740_vm11, %v739_v6, 0 }
 0x36c   :  { %v888_v8 = vmul.u32 %v881_v40, %v872_v55  ;;  %v743_v61 = vand.u32 31, %v741_v60  ;;  %v729_v0 = vand.u32 2147483647, %v8026_v16  ;;  %v718_v7 = vadd.s32 3, %v714_v56 }
 0x36d   :  { %v705_v51 = vand.u32 2147483647, %v704_v31  ;;  %v892_v46 = vsel %vm890_vm12, %v891_v59, %v8073_v53  ;;  %v589_v15 = vclz %v6423_v57  ;;  %v742_v27 = vshrl.u32 %v741_v60, 5 }
 0x36e   :  { %v893_v12 = vadd.s32 %v892_v46, %v888_v8  ;;  %v744_v21 = vsub.s32 32, %v743_v61  ;;  %v736_v19 = vand.u32 8388607, %v729_v0  ;;  %v719_v20 = vand.u32 3, %v718_v7 }
 0x36f   :  { %v708_v54 = vmul.f32 %v707_v44, %v705_v51  ;;  %v6424_v62 = vadd.s32 4294967294, %v589_v15  ;;  %v755_v32 = vshll.u32 %v7510_v41, %v743_v61  ;;  %v746_v38 = vshll.u32 %v7507_v35, %v743_v61 }
 0x370   :  { %v894_v22 = vadd.s32 536870912, %v893_v12  ;;  %v747_v25 = vshrl.u32 %v7508_v37, %v744_v21  ;;  %v750_v26 = vshrl.u32 %v7509_v39, %v744_v21  ;;  %v753_v28 = vshrl.u32 %v7510_v41, %v744_v21 }
 0x371   :  { %v709_v58 = vxor.u32 2147483648, %v708_v54  ;;  %v756_v34 = vshrl.u32 %v7511_v43, %v744_v21  ;;  %v749_v40 = vshll.u32 %v7508_v37, %v743_v61  ;;  %v752_v31 = vshll.u32 %v7509_v39, %v743_v61 }
 0x372   :  { %v8098_v23 = vshrl.u32 %v894_v22, 30  ;;  %v758_v30 = vshll.u32 %v7511_v43, %v743_v61  ;;  %v759_v42 = vshrl.u32 %v7512_v50, %v744_v21  ;;  %v748_v47 = vor.u32 %v747_v25, %v746_v38  ;;  %v8127_v25 = vpop.permute.xlu1 %958 }
 0x373   :  { %v710_v63 = vsel %vm627_vm4, %v709_v58, %v708_v54  ;;  %v757_v29 = vor.u32 %v756_v34, %v755_v32  ;;  %v751_v48 = vor.u32 %v750_v26, %v749_v40  ;;  %vm6425_vm13 = vcmp.lt.s32.totalorder %v6424_v62, 0 }
 0x374   :  { %v713_v3 = vsel %vm8078_vm10, %v7936_v4, %v710_v63  ;;  %v896_v24 = vshll.u32 %v8098_v23, 30  ;;  %v737_v51 = vor.u32 8388608, %v736_v19  ;;  %v754_v53 = vor.u32 %v753_v28, %v752_v31 }
 0x375   :  { %7308 = vcosq.f32 %v713_v3  ;;  %v760_v6 = vor.u32 %v759_v42, %v758_v30  ;;  %vm720_vm14 = vcmp.lt.s32.totalorder %v719_v20, 2  ;;  %vm764_vm15 = vcmp.lt.s32.totalorder %v742_v27, 4 }
 0x376   :  { %7310 = vsinq.f32 %v713_v3  ;;  %v8111_v44 = vsub.s32 %v893_v12, %v896_v24  ;;  %vm721_vm2 = vcmp.eq.s32.totalorder %v719_v20, 0  ;;  %vm724_vm4 = vcmp.eq.s32.totalorder %v719_v20, 2 }
 0x377   :  { %vm761_vm5 = vcmp.lt.s32.totalorder %v742_v27, 1  ;;  %v770_v54 = vsel %vm764_vm15, %v757_v29, 920167782  ;;  %v8115_v55 = vsel %vm6425_vm13, 0, %v6424_v62  ;;  %vm763_vm6 = vcmp.lt.s32.totalorder %v742_v27, 3 }
 0x378   :  { %v899_v36 = vsub.s32 0, %v8111_v44  ;;  %v769_v57 = vsel %vm761_vm5, %v748_v47, %v751_v48  ;;  %v771_v58 = vsel %vm763_vm6, %v754_v53, %v770_v54  ;;  %v773_v59 = vsel %vm761_vm5, %v751_v48, %v754_v53 }
 0x379   :  { %v774_v60 = vsel %vm764_vm15, %v760_v6, 1326507024  ;;  %v777_v8 = vshll.u32 %v737_v51, 8  ;;  %v745_v46 = vshrl.u32 %v7507_v35, %v744_v21  ;;  %vm762_vm7 = vcmp.lt.s32.totalorder %v742_v27, 2 }
 0x37a   :  { %v6435_v56 = vmin.u32 %v899_v36, %v8111_v44  ;;  %v766_v3 = vsel %vm764_vm15, %v754_v53, 2102212464  ;;  %v597_v15 = vsub.s32 4294967266, %v8115_v55  ;;  %v772_v22 = vsel %vm762_vm7, %v769_v57, %v771_v58 }
 0x37b   :  { %v775_v19 = vsel %vm763_vm6, %v757_v29, %v774_v60  ;;  %v765_v28 = vsel %vm761_vm5, %v745_v46, %v748_v47  ;;  %v767_v34 = vsel %vm763_vm6, %v751_v48, %v766_v3  ;;  %vm717_vm9 = vweird.f32 %v7936_v4 }
 0x37c   :  { %v901_v63 = vclz %v6435_v56  ;;  %v776_v32 = vsel %vm762_vm7, %v773_v59, %v775_v19  ;;  %v8137_v31 = vmul.u32.u64.low %v777_v8, %v772_v22  ;;  %v8138_v29 = vmul.u32.u64.high %v777_v8, %v772_v22, %v8137_v31  ;;  %v949_v56 = vpop.permute.xlu1 %948 }
 0x37d   :  { %v8133_v24 = vmul.u32.u64.low %v777_v8, %v776_v32  ;;  %v8134_v38 = vmul.u32.u64.high %v777_v8, %v776_v32, %v8133_v24  ;;  %v889_v42 = vadd.s32 %v8072_v52, %v8070_v49  ;;  %v768_v6 = vsel %vm762_vm7, %v765_v28, %v767_v34 }
 0x37e   :  { %v6436_v62 = vadd.s32 4294967294, %v901_v63  ;;  %v598_v54 = vadd.s32 127, %v597_v15  ;;  %v787_v58 = vadd.s32 1, %v8138_v29  ;;  %v593_v49 = vsub.s32 32, %v8115_v55 }
 0x37f   :  { %vm786_vm10 = vc.u32 %v8134_v38, %v8137_v31  ;;  %v784_v52 = vmul.u32 %v777_v8, %v768_v6  ;;  %v577_v46 = vadd.s32 %v8012_v2, %v8020_v9  ;;  %v594_v19 = vshll.u32 %v8056_v18, %v8115_v55 }
 0x380   :  { %vm6437_vm8 = vcmp.lt.s32.totalorder %v6436_v62, 0  ;;  %v788_v27 = vsel %vm786_vm10, %v787_v58, %v8138_v29  ;;  %v599_v3 = vshll.u32 %v598_v54, 23  ;;  %vm835_vm11 = vcmp.lt.s32.totalorder %v7952_v17, 0 }
 0x381   :  { %v904_v47 = vsel %vm6437_vm8, 0, %v6436_v62  ;;  %vm834_vm12 = vcmp.le.f32.partialorder %v833_v13, 0.7853982  ;;  %v785_v54 = vadd.s32 %v8137_v31, %v8134_v38  ;;  %vm8175_vm15 = vcmp.le.f32.partialorder %v521_v14, 0.7853982 }
 0x382   :  { %v7309_v61 = vpop.eup %7308  ;;  %v905_v48 = vsub.s32 32, %v904_v47  ;;  %v909_v53 = vsub.s32 4294967266, %v904_v47  ;;  %v906_v57 = vshll.u32 %v8111_v44, %v904_v47  ;;  %vm925_vm6 = vweird.f32 %v7952_v17 }
 0x383   :  { %v7311_v7 = vpop.eup %7310  ;;  %v725_v12 = vxor.u32 2147483648, %v7309_v61  ;;  %vm731_vm7 = vcmp.lt.s32.totalorder %v8026_v16, 0  ;;  %vm8192_vm8 = vcmp.le.f32.partialorder %v729_v0, 0.7853982 }
 0x384   :  { %v722_v26 = vxor.u32 2147483648, %v7311_v7  ;;  %v907_v4 = vshrl.u32 %v889_v42, %v905_v48  ;;  %v910_v20 = vadd.s32 127, %v909_v53 }
 0x385   :  { %v726_v21 = vsel %vm724_vm4, %v725_v12, %v7311_v7  ;;  %v789_v7 = vadd.s32 %v788_v27, %v784_v52  ;;  %v595_v12 = vshrl.u32 %v577_v46, %v593_v49 }
 0x386   :  { %v723_v40 = vsel %vm721_vm2, %v7309_v61, %v722_v26  ;;  %v908_v60 = vor.u32 %v907_v4, %v906_v57  ;;  %v911_v61 = vshll.u32 %v910_v20, 23 }
 0x387   :  { %v727_v30 = vsel %vm720_vm14, %v723_v40, %v726_v21  ;;  %v790_v15 = vadd.s32 536870912, %v789_v7  ;;  %v596_v9 = vor.u32 %v595_v12, %v594_v19  ;;  %v919_v21 = vsub.s32 4, %v8098_v23 }
 0x388   :  { %v728_v51 = vsel %vm717_vm9, nan, %v727_v30  ;;  %v912_v44 = vor.u32 4788187, %v911_v61  ;;  %v915_v22 = vcvt.s32.f32 %v908_v60  ;;  %vm523_vm14 = vcmp.lt.s32.totalorder %v7943_v10, 0 }
 0x389   :  { %v938_v36 = vmul.f32 %v728_v51, %v728_v51  ;;  %v8159_v26 = vshrl.u32 %v790_v15, 30  ;;  %v603_v40 = vcvt.s32.f32 %v596_v9  ;;  %v920_v30 = vsel %vm835_vm11, %v919_v21, %v8098_v23 }
 0x38a   :  { %v913_v8 = vand.u32 2147483647, %v912_v44  ;;  %v922_v51 = vsel %vm834_vm12, 0, %v920_v30 }
 0x38b   :  { %v962_v59 = vmul.f32 %v949_v56, %v938_v36  ;;  %v792_v62 = vshll.u32 %v8159_v26, 30  ;;  %v926_v6 = vadd.s32 3, %v922_v51  ;;  %v815_v9 = vsub.s32 4, %v8159_v26 }
 0x38c   :  { %v916_v2 = vmul.f32 %v915_v22, %v913_v8 }
 0x38d   :  { %v966_v63 = vadd.f32 %v962_v59, %v7933_v1  ;;  %v600_v1 = vor.u32 4788187, %v599_v3  ;;  %v793_v34 = vsub.s32 %v789_v7, %v792_v62  ;;  %v927_v4 = vand.u32 3, %v926_v6 }
 0x38e   :  { %v917_v28 = vxor.u32 2147483648, %v916_v2 }
 0x38f   :  { %1003 = vrot.lane.b32.xlu0 %v966_v63, %s7513_s19  ;;  %981 = vrot.lane.b32.xlu1 %v966_v63, %s7514_s24  ;;  %v601_v32 = vand.u32 2147483647, %v600_v1  ;;  %v795_v55 = vsub.s32 0, %v793_v34  ;;  %vm932_vm2 = vcmp.eq.s32.totalorder %v927_v4, 2  ;;  %v607_v63 = vsub.s32 4, %v8041_v45 }
 0x390   :  { %v918_v24 = vsel %vm835_vm11, %v917_v28, %v916_v2  ;;  %vm929_vm4 = vcmp.eq.s32.totalorder %v927_v4, 0  ;;  %vm928_vm5 = vcmp.lt.s32.totalorder %v927_v4, 2 }
 0x391   :  { %v921_v18 = vsel %vm834_vm12, %v7952_v17, %v918_v24  ;;  %v604_v29 = vmul.f32 %v603_v40, %v601_v32  ;;  %v6431_v42 = vmin.u32 %v795_v55, %v793_v34  ;;  %v608_v19 = vsel %vm523_vm14, %v607_v63, %v8041_v45 }
 0x392   :  { %7312 = vcosq.f32 %v921_v18  ;;  %v610_v28 = vsel %vm8175_vm15, 0, %v608_v19 }
 0x393   :  { %7314 = vsinq.f32 %v921_v18  ;;  %v797_v47 = vclz %v6431_v42  ;;  %v605_v48 = vxor.u32 2147483648, %v604_v29  ;;  %v614_v0 = vadd.s32 3, %v610_v28 }
 0x395   :  { %v6432_v53 = vadd.s32 4294967294, %v797_v47  ;;  %v606_v36 = vsel %vm523_vm14, %v605_v48, %v604_v29  ;;  %v615_v40 = vand.u32 3, %v614_v0 }
 0x396   :  { %v609_v49 = vsel %vm8175_vm15, %v7943_v10, %v606_v36 }
 0x397   :  { %vm6433_vm13 = vcmp.lt.s32.totalorder %v6432_v53, 0  ;;  %7316 = vcosq.f32 %v609_v49  ;;  %vm617_vm9 = vcmp.eq.s32.totalorder %v615_v40, 0  ;;  %vm620_vm10 = vcmp.eq.s32.totalorder %v615_v40, 2 }
 0x398   :  { %v800_v13 = vsel %vm6433_vm13, 0, %v6432_v53  ;;  %7318 = vsinq.f32 %v609_v49  ;;  %vm616_vm11 = vcmp.lt.s32.totalorder %v615_v40, 2  ;;  %vm613_vm13 = vweird.f32 %v7943_v10  ;;  %v969_v40 = vld [vmem:[%s7692_s4] sm:$0xff] }
 0x399   :  { %v801_v56 = vsub.s32 32, %v800_v13  ;;  %v805_v57 = vsub.s32 4294967266, %v800_v13  ;;  %v802_v20 = vshll.u32 %v793_v34, %v800_v13  ;;  %v954_v13 = vpop.permute.xlu0 %953 }
 0x39b   :  { %v803_v58 = vshrl.u32 %v785_v54, %v801_v56  ;;  %v806_v59 = vadd.s32 127, %v805_v57 }
 0x39d   :  { %v804_v60 = vor.u32 %v803_v58, %v802_v20  ;;  %v807_v61 = vshll.u32 %v806_v59, 23  ;;  %v944_v58 = vpop.permute.xlu0 %943 }
 0x39f   :  { %v7313_v52 = vpop.eup %7312  ;;  %v808_v14 = vor.u32 4788187, %v807_v61  ;;  %v811_v44 = vcvt.s32.f32 %v804_v60 }
 0x3a0   :  { %v7315_v38 = vpop.eup %7314  ;;  %v933_v31 = vxor.u32 2147483648, %v7313_v52 }
 0x3a1   :  { %v930_v27 = vxor.u32 2147483648, %v7315_v38  ;;  %v809_v7 = vand.u32 2147483647, %v808_v14 }
 0x3a2   :  { %v934_v46 = vsel %vm932_vm2, %v933_v31, %v7315_v38  ;;  %vm821_vm2 = vweird.f32 %v8026_v16 }
 0x3a3   :  { %v931_v3 = vsel %vm929_vm4, %v7313_v52, %v930_v27  ;;  %v812_v8 = vmul.f32 %v811_v44, %v809_v7  ;;  %vm991_vm4 = vcmask 7168  }
 0x3a4   :  { %v935_v12 = vsel %vm928_vm5, %v931_v3, %v934_v46  ;;  %v7317_v21 = vpop.eup %7316  ;;  %vm996_vm5 = vcmask 138240  }
 0x3a5   :  { %v936_v15 = vsel %vm925_vm6, nan, %v935_v12  ;;  %v813_v1 = vxor.u32 2147483648, %v812_v8  ;;  %v7319_v34 = vpop.eup %7318  ;;  %v621_v18 = vxor.u32 2147483648, %v7317_v21  ;;  %vm10062_vm6 = vcmask 523264  }
 0x3a6   :  { %v940_v22 = vmul.f32 %v936_v15, %v936_v15  ;;  %6798 = vmatprep.mubr.msk.f32.mxu1 %vm10062_vm6, %v969_v40 }
 0x3a7   :  { %v814_v17 = vsel %vm731_vm7, %v813_v1, %v812_v8  ;;  %v622_v30 = vsel %vm620_vm10, %v621_v18, %v7319_v34  ;;  %v974_v18 = vld [vmem:[%s7687_s30 + $0x8] sm:$0xff] }
 0x3a8   :  { %v964_v2 = vmul.f32 %v8127_v25, %v940_v22  ;;  %v817_v45 = vsel %vm8192_vm8, %v8026_v16, %v814_v17  ;;  %v816_v25 = vsel %vm731_vm7, %v815_v9, %v8159_v26 }
 0x3a9   :  { %7320 = vcosq.f32 %v817_v45  ;;  %v818_v24 = vsel %vm8192_vm8, 0, %v816_v25 }
 0x3aa   :  { %v968_v32 = vadd.f32 %v964_v2, %v7945_v11  ;;  %7322 = vsinq.f32 %v817_v45  ;;  %v618_v11 = vxor.u32 2147483648, %v7319_v34  ;;  %v822_v55 = vadd.s32 3, %v818_v24  ;;  %v971_v24 = vld [vmem:[%s7692_s4 + $0x10] sm:$0xff] }
 0x3ab   :  { %6817 = vmatprep.mubr.msk.f32.mxu0 %vm10062_vm6, %v971_v24 }
 0x3ac   :  { %1007 = vrot.lane.b32.xlu0 %v968_v32, %s7513_s19  ;;  %985 = vrot.lane.b32.xlu1 %v968_v32, %s7514_s24  ;;  %v619_v29 = vsel %vm617_vm9, %v7317_v21, %v618_v11  ;;  %v823_v26 = vand.u32 3, %v822_v55  ;;  %v973_v11 = vld [vmem:[%s7687_s30] sm:$0xff]  ;;  %s10131_s30 = sld [smem:[#allocation13_spill]] }
 0x3ad   :  { %v623_v51 = vsel %vm616_vm11, %v619_v29, %v622_v30  ;;  %v1534_v55 = vld [vmem:[%s7577_s29] sm:$0xff]  ;;  %v1535_v29 = vld [vmem:[%s7577_s29 + $0x8] sm:$0xff]  ;;  %s7518_s29 = smov 99  }
 0x3ae   :  { %vm828_vm12 = vcmp.eq.s32.totalorder %v823_v26, 2  ;;  %vm825_vm14 = vcmp.eq.s32.totalorder %v823_v26, 0  ;;  %v624_v36 = vsel %vm613_vm13, nan, %v623_v51  ;;  %vm824_vm15 = vcmp.lt.s32.totalorder %v823_v26, 2  ;;  %v1536_v30 = vld [vmem:[%s7582_s3] sm:$0xff]  ;;  %v1537_v26 = vld [vmem:[%s7582_s3 + $0x8] sm:$0xff] }
 0x3af   :  { %v937_v23 = vmul.f32 %v624_v36, %v624_v36  ;;  %s10130_s3 = sld [smem:[#allocation7_spill]] }
 0x3b1   :  { %v961_v59 = vmul.f32 %v944_v58, %v937_v23 }
 0x3b3   :  { %v965_v10 = vadd.f32 %v961_v59, %v7938_v5 }
 0x3b6   :  { %v7321_v42 = vpop.eup %7320 }
 0x3b7   :  { %v7323_v47 = vpop.eup %7322  ;;  %v829_v48 = vxor.u32 2147483648, %v7321_v42 }
 0x3b8   :  { %v826_v53 = vxor.u32 2147483648, %v7323_v47 }
 0x3b9   :  { %v830_v6 = vsel %vm828_vm12, %v829_v48, %v7323_v47  ;;  %vm1359_vm12 = vcmask 261120  }
 0x3ba   :  { %v827_v54 = vsel %vm825_vm14, %v7321_v42, %v826_v53 }
 0x3bb   :  { %v831_v56 = vsel %vm824_vm15, %v827_v54, %v830_v6 }
 0x3bc   :  { %v832_v57 = vsel %vm821_vm2, nan, %v831_v56 }
 0x3bd   :  { %v939_v4 = vmul.f32 %v832_v57, %v832_v57 }
 0x3bf   :  { %v963_v20 = vmul.f32 %v954_v13, %v939_v4 }
 0x3c1   :  { %v967_v49 = vadd.f32 %v963_v20, %v7961_v33 }
 0x3c3   :  { %1005 = vrot.lane.b32.xlu0 %v967_v49, %s7513_s19  ;;  %983 = vrot.lane.b32.xlu1 %v967_v49, %s7514_s24 }
 0x3c7   :  { %1001 = vrot.lane.b32.xlu0 %v965_v10, %s7513_s19  ;;  %979 = vrot.lane.b32.xlu1 %v965_v10, %s7514_s24 }
 0x401   :  { %v1004_v16 = vpop.permute.xlu0 %1003  ;;  %v982_v52 = vpop.permute.xlu1 %981 }
 0x402   :  { %v1014_v60 = vsel %vm991_vm4, 0.0, %v1004_v16  ;;  %v993_v61 = vsel %vm991_vm4, 0.0, %v982_v52 }
 0x403   :  { %v8218_v33 = vsel %vm996_vm5, %v1014_v60, 0.0  ;;  %v8221_v38 = vsel %vm996_vm5, %v993_v61, 0.0 }
 0x404   :  { %1046 = vrot.lane.b32.xlu0 %v8218_v33, %s7514_s24  ;;  %1034 = vrot.lane.b32.xlu1 %v8221_v38, %s7514_s24 }
 0x41e   :  { %v1008_v5 = vpop.permute.xlu0 %1007  ;;  %v986_v31 = vpop.permute.xlu1 %985 }
 0x41f   :  { %v1016_v27 = vsel %vm991_vm4, 0.0, %v1008_v5  ;;  %v995_v14 = vsel %vm991_vm4, 0.0, %v986_v31  ;;  %v1021_v31 = vlaneseq }
 0x420   :  { %v1020_v63 = vsel %vm996_vm5, %v1016_v27, 0.0  ;;  %v1000_v46 = vsel %vm996_vm5, %v995_v14, 0.0 }
 0x421   :  { %1050 = vrot.lane.b32.xlu0 %v1020_v63, %s7514_s24  ;;  %1038 = vrot.lane.b32.xlu1 %v1000_v46, %s7514_s24  ;;  %v8317_v40 = vand.u32 127, %v1021_v31 }
 0x435   :  { %v1006_v3 = vpop.permute.xlu0 %1005  ;;  %v984_v7 = vpop.permute.xlu1 %983 }
 0x436   :  { %v1015_v44 = vsel %vm991_vm4, 0.0, %v1006_v3  ;;  %v994_v12 = vsel %vm991_vm4, 0.0, %v984_v7  ;;  %v8296_v3 = vshrl.u32 %v1021_v31, 7 }
 0x437   :  { %v1019_v15 = vsel %vm996_vm5, %v1015_v44, 0.0  ;;  %v999_v8 = vsel %vm996_vm5, %v994_v12, 0.0 }
 0x438   :  { %1048 = vrot.lane.b32.xlu0 %v1019_v15, %s7514_s24  ;;  %1036 = vrot.lane.b32.xlu1 %v999_v8, %s7514_s24 }
 0x439   :  { %v1002_v22 = vpop.permute.xlu0 %1001  ;;  %v980_v19 = vpop.permute.xlu1 %979 }
 0x43a   :  { %v1013_v1 = vsel %vm991_vm4, 0.0, %v1002_v22  ;;  %v992_v2 = vsel %vm991_vm4, 0.0, %v980_v19  ;;  %v8302_v22 = vadd.s32 24, %v8296_v3 }
 0x43b   :  { %v1017_v9 = vsel %vm996_vm5, %v1013_v1, 0.0  ;;  %v997_v62 = vsel %vm996_vm5, %v992_v2, 0.0  ;;  %v8307_v2 = vadd.s32 16, %v8296_v3 }
 0x43c   :  { %1044 = vrot.lane.b32.xlu0 %v1017_v9, %s7514_s24  ;;  %1032 = vrot.lane.b32.xlu1 %v997_v62, %s7514_s24 }
 0x440   :  { %1236 = vrot.lane.b32.xlu0 %v1020_v63, %s7515_s6  ;;  %1212 = vrot.lane.b32.xlu1 %v1000_v46, %s7505_s7 }
 0x444   :  { %1232 = vrot.lane.b32.xlu0 %v8218_v33, %s7515_s6  ;;  %1208 = vrot.lane.b32.xlu1 %v8221_v38, %s7505_s7 }
 0x448   :  { %1230 = vrot.lane.b32.xlu0 %v1017_v9, %s7515_s6  ;;  %1206 = vrot.lane.b32.xlu1 %v997_v62, %s7505_s7 }
 0x44c   :  { %1234 = vrot.lane.b32.xlu0 %v1019_v15, %s7515_s6  ;;  %1210 = vrot.lane.b32.xlu1 %v999_v8, %s7505_s7 }
 0x476   :  { %v1047_v17 = vpop.permute.xlu0 %1046  ;;  %v1035_v28 = vpop.permute.xlu1 %1034 }
 0x477   :  { %1240 = vrot.lane.b32.xlu0 %v1047_v17, %s7515_s6  ;;  %1216 = vrot.lane.b32.xlu1 %v1035_v28, %s7505_s7 }
 0x47b   :  { %1086 = vrot.lane.b32.xlu0 %v1047_v17, %s7516_s27  ;;  %1062 = vrot.lane.b32.xlu1 %v1035_v28, %s7504_s10 }
 0x493   :  { %v1051_v32 = vpop.permute.xlu0 %1050  ;;  %v1039_v45 = vpop.permute.xlu1 %1038 }
 0x4aa   :  { %v1049_v25 = vpop.permute.xlu0 %1048  ;;  %v1037_v0 = vpop.permute.xlu1 %1036 }
 0x4ae   :  { %v1045_v21 = vpop.permute.xlu0 %1044  ;;  %v1033_v34 = vpop.permute.xlu1 %1032 }
 0x4af   :  { %1238 = vrot.lane.b32.xlu0 %v1045_v21, %s7515_s6  ;;  %1214 = vrot.lane.b32.xlu1 %v1033_v34, %s7505_s7 }
 0x4b2   :  { %v1237_v42 = vpop.permute.xlu0 %1236  ;;  %v1213_v47 = vpop.permute.xlu1 %1212 }
 0x4b3   :  { %1084 = vrot.lane.b32.xlu0 %v1045_v21, %s7516_s27  ;;  %1060 = vrot.lane.b32.xlu1 %v1033_v34, %s7504_s10  ;;  %v1257_v7 = vsel %vm288_vm0, %v1213_v47, %v1237_v42  ;;  %v970_v42 = vld [vmem:[%s7692_s4 + $0x8] sm:$0xff]  ;;  %v7517_v47 = vmov 1.0  }
 0x4b6   :  { %v1233_v51 = vpop.permute.xlu0 %1232  ;;  %v1209_v48 = vpop.permute.xlu1 %1208 }
 0x4b7   :  { %1244 = vrot.lane.b32.xlu0 %v1051_v32, %s7515_s6  ;;  %1220 = vrot.lane.b32.xlu1 %v1039_v45, %s7505_s7  ;;  %v1255_v1 = vsel %vm288_vm0, %v1209_v48, %v1233_v51  ;;  %v1023_v51 = vadd.s32 8, %v8296_v3 }
 0x4b9   :  { %v1191_v48 = vmul.u32 2, %v1023_v51 }
 0x4ba   :  { %v1231_v53 = vpop.permute.xlu0 %1230  ;;  %v1207_v6 = vpop.permute.xlu1 %1206 }
 0x4bb   :  { %1090 = vrot.lane.b32.xlu0 %v1051_v32, %s7516_s27  ;;  %1066 = vrot.lane.b32.xlu1 %v1039_v45, %s7504_s10  ;;  %v1254_v28 = vsel %vm288_vm0, %v1207_v6, %v1231_v53  ;;  %v972_v32 = vld [vmem:[%s7692_s4 + $0x18] sm:$0xff]  ;;  %v1193_v45 = vmul.u32 2, %v8302_v22  ;;  %v8348_v53 = vadd.s32 1, %v1191_v48  ;;  %v1190_v6 = vmul.u32 2, %v8296_v3  ;;  %s10132_s4 = sld [smem:[#allocation14_spill]] }
 0x4bc   :  { %vm8392_vm14 = vcmp.eq.s32.totalorder %v8317_v40, %v1191_v48 }
 0x4bd   :  { %vm10064_vm9 = vcmp.eq.s32.totalorder %v8317_v40, %v8348_v53  ;;  %vm8370_vm11 = vcmp.eq.s32.totalorder %v8317_v40, %v1193_v45  ;;  %vm8403_vm15 = vcmp.eq.s32.totalorder %v8317_v40, %v1190_v6 }
 0x4be   :  { %v1235_v13 = vpop.permute.xlu0 %1234  ;;  %v1211_v36 = vpop.permute.xlu1 %1210 }
 0x4bf   :  { %1242 = vrot.lane.b32.xlu0 %v1049_v25, %s7515_s6  ;;  %1218 = vrot.lane.b32.xlu1 %v1037_v0, %s7505_s7  ;;  %s10144_s6 = sld [smem:[#allocation22_spill]] }
 0x4c3   :  { %1082 = vrot.lane.b32.xlu0 %v1020_v63, %s7516_s27  ;;  %1058 = vrot.lane.b32.xlu1 %v1000_v46, %s7504_s10 }
 0x4c7   :  { %1088 = vrot.lane.b32.xlu0 %v1049_v25, %s7516_s27  ;;  %1064 = vrot.lane.b32.xlu1 %v1037_v0, %s7504_s10  ;;  %v1192_v0 = vmul.u32 2, %v8307_v2 }
 0x4c9   :  { %vm8383_vm13 = vcmp.eq.s32.totalorder %v8317_v40, %v1192_v0 }
 0x4cb   :  { %1080 = vrot.lane.b32.xlu0 %v1019_v15, %s7516_s27  ;;  %1056 = vrot.lane.b32.xlu1 %v999_v8, %s7504_s10  ;;  %v1256_v8 = vsel %vm288_vm0, %v1211_v36, %v1235_v13  ;;  %v8353_v13 = vadd.s32 1, %v1190_v6 }
 0x4cd   :  { %vm10063_vm10 = vcmp.eq.s32.totalorder %v8317_v40, %v8353_v13 }
 0x4cf   :  { %1078 = vrot.lane.b32.xlu0 %v8218_v33, %s7516_s27  ;;  %1054 = vrot.lane.b32.xlu1 %v8221_v38, %s7504_s10 }
 0x4d3   :  { %1076 = vrot.lane.b32.xlu0 %v1017_v9, %s7516_s27  ;;  %1052 = vrot.lane.b32.xlu1 %v997_v62, %s7504_s10  ;;  %s10145_s27 = sld [smem:[#allocation10_spill]] }
 0x4d7   :  { %1524 = vperm.xlu0 %7306, %v973_v11   ;;  %1529 = vperm.xlu1 %7307, %v974_v18   ;;  %v8319_v11 = vadd.s32 1, %v1193_v45 }
 0x4d9   :  { %vm1350_vm7 = vcmp.eq.s32.totalorder %v8317_v40, %v8319_v11 }
 0x4db   :  { %1540 = vperm.xlu0 %7306, %v1534_v55   ;;  %1545 = vperm.xlu1 %7307, %v1535_v29   ;;  %v8322_v55 = vadd.s32 1, %v1192_v0 }
 0x4dd   :  { %vm1349_vm8 = vcmp.eq.s32.totalorder %v8317_v40, %v8322_v55 }
 0x4df   :  { %1762 = vperm.xlu0 %7306, %v1536_v30   ;;  %1767 = vperm.xlu1 %7307, %v1537_v26  }
 0x4e9   :  { %v1241_v54 = vpop.permute.xlu0 %1240  ;;  %v1217_v56 = vpop.permute.xlu1 %1216 }
 0x4ea   :  { %v1259_v27 = vsel %vm288_vm0, %v1217_v56, %v1241_v54 }
 0x4ed   :  { %v1087_v57 = vpop.permute.xlu0 %1086  ;;  %v1063_v23 = vpop.permute.xlu1 %1062 }
 0x4ee   :  { %v1105_v19 = vsel %vm288_vm0, %v1063_v23, %v1087_v57 }
 0x521   :  { %v1239_v4 = vpop.permute.xlu0 %1238  ;;  %v1215_v20 = vpop.permute.xlu1 %1214 }
 0x522   :  { %v1258_v46 = vsel %vm288_vm0, %v1215_v20, %v1239_v4 }
 0x525   :  { %v1085_v58 = vpop.permute.xlu0 %1084  ;;  %v1061_v59 = vpop.permute.xlu1 %1060 }
 0x526   :  { %v1104_v17 = vsel %vm288_vm0, %v1061_v59, %v1085_v58 }
 0x529   :  { %v1245_v49 = vpop.permute.xlu0 %1244  ;;  %v1221_v10 = vpop.permute.xlu1 %1220 }
 0x52a   :  { %v1261_v16 = vsel %vm288_vm0, %v1221_v10, %v1245_v49 }
 0x52b   :  { %6801 = vmatprep.subr.mxu0 %v1261_v16 }
 0x52c   :  { %6802 = vmatpush3.msra.mxu0 %v1261_v16 }
 0x52d   :  { %v1091_v52 = vpop.permute.xlu0 %1090  ;;  %v1067_v60 = vpop.permute.xlu1 %1066 }
 0x52e   :  { %v1107_v61 = vsel %vm288_vm0, %v1067_v60, %v1091_v52 }
 0x52f   :  { %6782 = vmatprep.subr.mxu1 %v1107_v61 }
 0x530   :  { %6783 = vmatpush3.msra.mxu1 %v1107_v61 }
 0x531   :  { %v1243_v33 = vpop.permute.xlu0 %1242  ;;  %v1219_v38 = vpop.permute.xlu1 %1218 }
 0x532   :  { %v1260_v5 = vsel %vm288_vm0, %v1219_v38, %v1243_v33 }
 0x533   :  { %6803 = vmatprep.subr.mxu0 %v1260_v5 }
 0x534   :  { %6804 = vmatpush3.msra.mxu0 %v1260_v5 }
 0x535   :  { %v1083_v14 = vpop.permute.xlu0 %1082  ;;  %6805 = vmatprep.subr.mxu0 %v1259_v27  ;;  %v1059_v63 = vpop.permute.xlu1 %1058 }
 0x536   :  { %6806 = vmatpush3.msra.mxu0 %v1259_v27  ;;  %v1103_v25 = vsel %vm288_vm0, %v1059_v63, %v1083_v14 }
 0x537   :  { %6807 = vmatprep.subr.mxu0 %v1258_v46 }
 0x538   :  { %6808 = vmatpush3.msra.mxu0 %v1258_v46 }
 0x539   :  { %v1089_v44 = vpop.permute.xlu0 %1088  ;;  %6809 = vmatprep.subr.mxu0 %v1257_v7  ;;  %v1065_v12 = vpop.permute.xlu1 %1064 }
 0x53a   :  { %6810 = vmatpush3.msra.mxu0 %v1257_v7  ;;  %v1106_v15 = vsel %vm288_vm0, %v1065_v12, %v1089_v44 }
 0x53b   :  { %6784 = vmatprep.subr.mxu1 %v1106_v15  ;;  %6811 = vmatprep.subr.mxu0 %v1256_v8 }
 0x53c   :  { %6785 = vmatpush3.msra.mxu1 %v1106_v15  ;;  %6812 = vmatpush3.msra.mxu0 %v1256_v8 }
 0x53d   :  { %v1081_v9 = vpop.permute.xlu0 %1080  ;;  %6786 = vmatprep.subr.mxu1 %v1105_v19  ;;  %6813 = vmatprep.subr.mxu0 %v1255_v1  ;;  %v1057_v62 = vpop.permute.xlu1 %1056 }
 0x53e   :  { %6787 = vmatpush3.msra.mxu1 %v1105_v19  ;;  %6814 = vmatpush3.msra.mxu0 %v1255_v1  ;;  %v1102_v24 = vsel %vm288_vm0, %v1057_v62, %v1081_v9 }
 0x53f   :  { %6788 = vmatprep.subr.mxu1 %v1104_v17  ;;  %6815 = vmatprep.subr.mxu0 %v1254_v28 }
 0x540   :  { %6789 = vmatpush3.msra.mxu1 %v1104_v17  ;;  %6816 = vmatpush3.msra.mxu0 %v1254_v28 }
 0x541   :  { %v1079_v21 = vpop.permute.xlu0 %1078  ;;  %6790 = vmatprep.subr.mxu1 %v1103_v25  ;;  %6818 = vmatmul.mubr.msk.f32.vlgmr.msra.gmra.mxu0 %vm10062_vm6, %v972_v32  ;;  %v1055_v34 = vpop.permute.xlu1 %1054 }
 0x542   :  { %6791 = vmatpush3.msra.mxu1 %v1103_v25  ;;  %v1101_v18 = vsel %vm288_vm0, %v1055_v34, %v1079_v21 }
 0x543   :  { %6792 = vmatprep.subr.mxu1 %v1102_v24 }
 0x544   :  { %6793 = vmatpush3.msra.mxu1 %v1102_v24 }
 0x545   :  { %v1077_v29 = vpop.permute.xlu0 %1076  ;;  %6794 = vmatprep.subr.mxu1 %v1101_v18  ;;  %v1053_v30 = vpop.permute.xlu1 %1052 }
 0x546   :  { %6795 = vmatpush3.msra.mxu1 %v1101_v18  ;;  %v1100_v26 = vsel %vm288_vm0, %v1053_v30, %v1077_v29 }
 0x547   :  { %6796 = vmatprep.subr.mxu1 %v1100_v26 }
 0x548   :  { %6797 = vmatpush3.msra.mxu1 %v1100_v26 }
 0x549   :  { %6799 = vmatmul.mubr.msk.f32.vlgmr.msra.gmra.mxu1 %vm10062_vm6, %v970_v42  ;;  %6820 = vmatprep.subr.msk.mxu1 %vm1350_vm7, %v7517_v47 }
 0x54a   :  { %6821 = vmatpush3.msk.msra.mxu1 %vm1350_vm7, %v7517_v47 }
 0x54b   :  { %6822 = vmatprep.subr.msk.mxu1 %vm1349_vm8, %v7517_v47 }
 0x54c   :  { %6823 = vmatpush3.msk.msra.mxu1 %vm1349_vm8, %v7517_v47 }
 0x54d   :  { %6824 = vmatprep.subr.msk.mxu1 %vm10064_vm9, %v7517_v47 }
 0x54e   :  { %6825 = vmatpush3.msk.msra.mxu1 %vm10064_vm9, %v7517_v47 }
 0x54f   :  { %6826 = vmatprep.subr.msk.mxu1 %vm10063_vm10, %v7517_v47 }
 0x550   :  { %6827 = vmatpush3.msk.msra.mxu1 %vm10063_vm10, %v7517_v47 }
 0x551   :  { %6831 = vmatprep.subr.msk.mxu1 %vm8370_vm11, %v7517_v47 }
 0x552   :  { %v1530_v49 = vpop.permute.xlu1 %1529  ;;  %v1525_v16 = vpop.permute.xlu0 %1524 }
 0x556   :  { %v1546_v5 = vpop.permute.xlu1 %1545  ;;  %v1541_v14 = vpop.permute.xlu0 %1540 }
 0x601   :  { %v6819_v54 = vpop.f32.mrf.mxu0 }
 0x603   :  { %v1334_v56 = vpop.f32.mrf.mxu0 }
 0x604   :  { %6828 = vmatprep.mubr.msk.f32.mxu1 %vm1359_vm12, %v1334_v56 }
 0x605   :  { %6829 = vmatmul.mubr.msk.f32.vlgmr.msra.gmra.mxu1 %vm1359_vm12, %v6819_v54 }
 0x606   :  { %6832 = vmatpush3.msk.msra.mxu1 %vm8370_vm11, %v7517_v47 }
 0x607   :  { %6833 = vmatprep.subr.msk.mxu1 %vm8383_vm13, %v7517_v47 }
 0x608   :  { %6834 = vmatpush3.msk.msra.mxu1 %vm8383_vm13, %v7517_v47 }
 0x609   :  { %v6800_v20 = vpop.f32.mrf.mxu1  ;;  %6835 = vmatprep.subr.msk.mxu1 %vm8392_vm14, %v7517_v47 }
 0x60a   :  { %6836 = vmatpush3.msk.msra.mxu1 %vm8392_vm14, %v7517_v47 }
 0x60b   :  { %v1181_v58 = vpop.f32.mrf.mxu1  ;;  %6837 = vmatprep.subr.msk.mxu1 %vm8403_vm15, %v7517_v47 }
 0x60c   :  { %6838 = vmatpush3.msk.msra.mxu1 %vm8403_vm15, %v7517_v47  ;;  %6839 = vmatprep.mubr.msk.f32.mxu1 %vm1359_vm12, %v1181_v58 }
 0x60d   :  { %6840 = vmatmul.mubr.msk.f32.vlgmr.msra.gmra.mxu1 %vm1359_vm12, %v6800_v20 }
 0x6c5   :  { %v6830_v59 = vpop.f32.mrf.mxu1 }
 0x6c7   :  { %v1432_v10 = vpop.f32.mrf.mxu1 }
 0x6cd   :  { %v6841_v52 = vpop.f32.mrf.mxu1 }
 0x6ce   :  { %v1519_v60 = vadd.f32 %v6841_v52, %v6830_v59 }
 0x6cf   :  { %v1513_v61 = vpop.f32.mrf.mxu1 }
 0x6d0   :  { %v8421_v33 = vadd.f32 %v1530_v49, %v1519_v60  ;;  %v1514_v38 = vadd.f32 %v1513_v61, %v1432_v10 }
 0x6d2   :  { %v8424_v31 = vmul.f32 %v1546_v5, %v8421_v33  ;;  %v8426_v27 = vadd.f32 %v1525_v16, %v1514_v38 }
 0x6d4   :  { %v1654_v63 = vand.u32 2147483647, %v8424_v31  ;;  %v1657_v46 = vand.u32 2139095040, %v8424_v31  ;;  %v8431_v7 = vmul.f32 %v1541_v14, %v8426_v27  ;;  %vm1746_vm9 = vweird.f32 %v8424_v31 }
 0x6d6   :  { %v1658_v44 = vshrl.u32 %v1657_v46, 23  ;;  %v1661_v12 = vand.u32 8388607, %v1654_v63  ;;  %v1553_v15 = vand.u32 2139095040, %v8431_v7  ;;  %v1550_v22 = vand.u32 2147483647, %v8431_v7 }
 0x6d8   :  { %v6466_v8 = vadd.s32 4294967169, %v1658_v44  ;;  %v1554_v19 = vshrl.u32 %v1553_v15, 23  ;;  %v1662_v2 = vor.u32 8388608, %v1661_v12  ;;  %v1557_v62 = vand.u32 8388607, %v1550_v22 }
 0x6da   :  { %v1664_v1 = vadd.s32 1, %v6466_v8  ;;  %v6462_v9 = vadd.s32 4294967169, %v1554_v19  ;;  %v8439_v25 = vshll.u32 %v1662_v2, 8  ;;  %v1558_v34 = vor.u32 8388608, %v1557_v62 }
 0x6dc   :  { %vm1665_vm2 = vcmp.gt.s32.totalorder %v1664_v1, 0  ;;  %v1560_v28 = vadd.s32 1, %v6462_v9  ;;  %v1598_v8 = vshll.u32 %v1558_v34, 8 }
 0x6dd   :  { %v1666_v17 = vsel %vm1665_vm2, %v1664_v1, 0 }
 0x6de   :  { %v1667_v32 = vshrl.u32 %v1666_v17, 5  ;;  %v1668_v45 = vand.u32 31, %v1666_v17  ;;  %vm1561_vm5 = vcmp.gt.s32.totalorder %v1560_v28, 0 }
 0x6df   :  { %v1562_v59 = vsel %vm1561_vm5, %v1560_v28, 0 }
 0x6e0   :  { %v1669_v0 = vsub.s32 32, %v1668_v45  ;;  %v1671_v21 = vshll.u32 %v7507_v35, %v1668_v45  ;;  %v1674_v24 = vshll.u32 %v7508_v37, %v1668_v45  ;;  %v1677_v18 = vshll.u32 %v7509_v39, %v1668_v45 }
 0x6e1   :  { %v1680_v29 = vshll.u32 %v7510_v41, %v1668_v45  ;;  %v1683_v30 = vshll.u32 %v7511_v43, %v1668_v45  ;;  %vm1686_vm2 = vcmp.lt.s32.totalorder %v1667_v32, 1  ;;  %vm1688_vm3 = vcmp.lt.s32.totalorder %v1667_v32, 3 }
 0x6e2   :  { %v1672_v26 = vshrl.u32 %v7508_v37, %v1669_v0  ;;  %v1675_v42 = vshrl.u32 %v7509_v39, %v1669_v0  ;;  %v1678_v51 = vshrl.u32 %v7510_v41, %v1669_v0  ;;  %v1670_v48 = vshrl.u32 %v7507_v35, %v1669_v0 }
 0x6e3   :  { %v1681_v6 = vshrl.u32 %v7511_v43, %v1669_v0  ;;  %v1684_v54 = vshrl.u32 %v7512_v50, %v1669_v0  ;;  %vm1689_vm6 = vcmp.lt.s32.totalorder %v1667_v32, 4  ;;  %v1564_v16 = vand.u32 31, %v1562_v59 }
 0x6e4   :  { %v1673_v56 = vor.u32 %v1672_v26, %v1671_v21  ;;  %v1676_v20 = vor.u32 %v1675_v42, %v1674_v24  ;;  %v1679_v58 = vor.u32 %v1678_v51, %v1677_v18  ;;  %vm1687_vm10 = vcmp.lt.s32.totalorder %v1667_v32, 2 }
 0x6e5   :  { %v1682_v49 = vor.u32 %v1681_v6, %v1680_v29  ;;  %v1685_v10 = vor.u32 %v1684_v54, %v1683_v30  ;;  %v1565_v44 = vsub.s32 32, %v1564_v16  ;;  %v1563_v9 = vshrl.u32 %v1562_v59, 5 }
 0x6e6   :  { %v1690_v52 = vsel %vm1686_vm2, %v1670_v48, %v1673_v56  ;;  %v1691_v60 = vsel %vm1689_vm6, %v1679_v58, 2102212464  ;;  %v1694_v61 = vsel %vm1686_vm2, %v1673_v56, %v1676_v20  ;;  %v1698_v38 = vsel %vm1686_vm2, %v1676_v20, %v1679_v58 }
 0x6e7   :  { %v1692_v5 = vsel %vm1688_vm3, %v1676_v20, %v1691_v60  ;;  %v1695_v14 = vsel %vm1689_vm6, %v1682_v49, 920167782  ;;  %v1699_v46 = vsel %vm1689_vm6, %v1685_v10, 1326507024  ;;  %v1567_v0 = vshll.u32 %v7507_v35, %v1564_v16 }
 0x6e8   :  { %v1696_v12 = vsel %vm1688_vm3, %v1679_v58, %v1695_v14  ;;  %v1700_v15 = vsel %vm1688_vm3, %v1682_v49, %v1699_v46  ;;  %v1693_v19 = vsel %vm1687_vm10, %v1690_v52, %v1692_v5  ;;  %v1568_v21 = vshrl.u32 %v7508_v37, %v1565_v44 }
 0x6e9   :  { %v1697_v1 = vsel %vm1687_vm10, %v1694_v61, %v1696_v12  ;;  %v1701_v2 = vsel %vm1687_vm10, %v1698_v38, %v1700_v15  ;;  %v1570_v32 = vshll.u32 %v7508_v37, %v1564_v16  ;;  %v1571_v34 = vshrl.u32 %v7509_v39, %v1565_v44 }
 0x6ea   :  { %v8460_v62 = vmul.u32.u64.low %v8439_v25, %v1701_v2  ;;  %v8461_v17 = vmul.u32.u64.high %v8439_v25, %v1701_v2, %v8460_v62  ;;  %v8464_v28 = vmul.u32.u64.low %v8439_v25, %v1697_v1  ;;  %v8465_v45 = vmul.u32.u64.high %v8439_v25, %v1697_v1, %v8464_v28 }
 0x6eb   :  { %v1573_v24 = vshll.u32 %v7509_v39, %v1564_v16  ;;  %v1574_v18 = vshrl.u32 %v7510_v41, %v1565_v44  ;;  %v1576_v29 = vshll.u32 %v7510_v41, %v1564_v16  ;;  %v1577_v30 = vshrl.u32 %v7511_v43, %v1565_v44 }
 0x6ec   :  { %v1569_v26 = vor.u32 %v1568_v21, %v1567_v0  ;;  %v1572_v42 = vor.u32 %v1571_v34, %v1570_v32  ;;  %v1579_v51 = vshll.u32 %v7511_v43, %v1564_v16  ;;  %v1580_v48 = vshrl.u32 %v7512_v50, %v1565_v44 }
 0x6ed   :  { %v1709_v6 = vmul.u32 %v8439_v25, %v1693_v19  ;;  %vm1711_vm3 = vc.u32 %v8461_v17, %v8464_v28  ;;  %v1712_v54 = vadd.s32 1, %v8465_v45  ;;  %v1575_v56 = vor.u32 %v1574_v18, %v1573_v24 }
 0x6ee   :  { %v1566_v20 = vshrl.u32 %v7507_v35, %v1565_v44  ;;  %v1578_v58 = vor.u32 %v1577_v30, %v1576_v29  ;;  %v1581_v59 = vor.u32 %v1580_v48, %v1579_v51  ;;  %vm1582_vm6 = vcmp.lt.s32.totalorder %v1563_v9, 1 }
 0x6ef   :  { %v1713_v49 = vsel %vm1711_vm3, %v1712_v54, %v8465_v45  ;;  %vm1584_vm10 = vcmp.lt.s32.totalorder %v1563_v9, 3  ;;  %vm1585_vm5 = vcmp.lt.s32.totalorder %v1563_v9, 4  ;;  %v1590_v10 = vsel %vm1582_vm6, %v1569_v26, %v1572_v42 }
 0x6f0   :  { %v1714_v16 = vadd.s32 %v1713_v49, %v1709_v6  ;;  %v1587_v52 = vsel %vm1585_vm5, %v1575_v56, 2102212464  ;;  %v1591_v60 = vsel %vm1585_vm5, %v1578_v58, 920167782  ;;  %v1594_v25 = vsel %vm1582_vm6, %v1572_v42, %v1575_v56 }
 0x6f1   :  { %vm1583_vm2 = vcmp.lt.s32.totalorder %v1563_v9, 2  ;;  %v1586_v61 = vsel %vm1582_vm6, %v1566_v20, %v1569_v26  ;;  %v1592_v38 = vsel %vm1584_vm10, %v1575_v56, %v1591_v60  ;;  %v1595_v5 = vsel %vm1585_vm5, %v1581_v59, 1326507024 }
 0x6f2   :  { %v1715_v14 = vadd.s32 536870912, %v1714_v16  ;;  %v1588_v46 = vsel %vm1584_vm10, %v1572_v42, %v1587_v52  ;;  %v1593_v12 = vsel %vm1583_vm2, %v1590_v10, %v1592_v38  ;;  %v1596_v44 = vsel %vm1584_vm10, %v1578_v58, %v1595_v5 }
 0x6f3   :  { %v1597_v15 = vsel %vm1583_vm2, %v1594_v25, %v1596_v44  ;;  %v8484_v19 = vmul.u32.u64.low %v1598_v8, %v1593_v12  ;;  %v8485_v1 = vmul.u32.u64.high %v1598_v8, %v1593_v12, %v8484_v19  ;;  %v1589_v0 = vsel %vm1583_vm2, %v1586_v61, %v1588_v46 }
 0x6f4   :  { %v1716_v2 = vshrl.u32 %v1715_v14, 30  ;;  %v8487_v62 = vmul.u32.u64.low %v1598_v8, %v1597_v15  ;;  %v8488_v45 = vmul.u32.u64.high %v1598_v8, %v1597_v15, %v8487_v62  ;;  %v1605_v34 = vmul.u32 %v1598_v8, %v1589_v0 }
 0x6f5   :  { %v1608_v32 = vadd.s32 1, %v8485_v1  ;;  %v1710_v20 = vadd.s32 %v8464_v28, %v8461_v17  ;;  %vm1656_vm5 = vcmp.lt.s32.totalorder %v8424_v31, 0  ;;  %vm1655_vm2 = vcmp.le.f32.partialorder %v1654_v63, 0.7853982  ;;  %v2016_v63 = vld [vmem:[%s7592_s14 + $0x8] sm:$0xff] }
 0x6f6   :  { %v1717_v21 = vshll.u32 %v1716_v2, 30  ;;  %vm1607_vm3 = vc.u32 %v8488_v45, %v8484_v19  ;;  %v1606_v15 = vadd.s32 %v8484_v19, %v8488_v45 }
 0x6f7   :  { %v1609_v24 = vsel %vm1607_vm3, %v1608_v32, %v8485_v1  ;;  %v1740_v32 = vsub.s32 4, %v1716_v2  ;;  %vm1552_vm3 = vcmp.lt.s32.totalorder %v8431_v7, 0 }
 0x6f8   :  { %v1718_v9 = vsub.s32 %v1714_v16, %v1717_v21  ;;  %v1610_v29 = vadd.s32 %v1609_v24, %v1605_v34 }
 0x6f9   :  { %v1741_v19 = vsel %vm1656_vm5, %v1740_v32, %v1716_v2 }
 0x6fa   :  { %v1720_v18 = vsub.s32 0, %v1718_v9  ;;  %v1611_v26 = vadd.s32 536870912, %v1610_v29 }
 0x6fc   :  { %v6467_v30 = vmin.u32 %v1720_v18, %v1718_v9  ;;  %v1612_v51 = vshrl.u32 %v1611_v26, 30 }
 0x6fe   :  { %v1722_v42 = vclz %v6467_v30  ;;  %v1613_v6 = vshll.u32 %v1612_v51, 30 }
 0x700   :  { %v6468_v48 = vadd.s32 4294967294, %v1722_v42  ;;  %v1614_v54 = vsub.s32 %v1610_v29, %v1613_v6  ;;  %v1743_v42 = vsel %vm1655_vm2, 0, %v1741_v19 }
 0x701   :  { %v1747_v6 = vadd.s32 3, %v1743_v42 }
 0x702   :  { %vm6469_vm6 = vcmp.lt.s32.totalorder %v6468_v48, 0  ;;  %v1616_v59 = vsub.s32 0, %v1614_v54 }
 0x703   :  { %v1725_v56 = vsel %vm6469_vm6, 0, %v6468_v48  ;;  %vm8503_vm6 = vcmp.le.f32.partialorder %v1550_v22, 0.7853982 }
 0x704   :  { %v1726_v58 = vsub.s32 32, %v1725_v56  ;;  %v1730_v8 = vsub.s32 4294967266, %v1725_v56  ;;  %v1727_v49 = vshll.u32 %v1718_v9, %v1725_v56  ;;  %v6463_v52 = vmin.u32 %v1616_v59, %v1614_v54 }
 0x706   :  { %v1728_v10 = vshrl.u32 %v1710_v20, %v1726_v58  ;;  %v1731_v16 = vadd.s32 127, %v1730_v8  ;;  %v1618_v61 = vclz %v6463_v52  ;;  %v1748_v20 = vand.u32 3, %v1747_v6 }
 0x708   :  { %v1729_v60 = vor.u32 %v1728_v10, %v1727_v49  ;;  %v1732_v25 = vshll.u32 %v1731_v16, 23  ;;  %v6464_v5 = vadd.s32 4294967294, %v1618_v61 }
 0x70a   :  { %v1733_v38 = vor.u32 4788187, %v1732_v25  ;;  %v1736_v46 = vcvt.s32.f32 %v1729_v60  ;;  %vm6465_vm10 = vcmp.lt.s32.totalorder %v6464_v5, 0 }
 0x70b   :  { %v1621_v12 = vsel %vm6465_vm10, 0, %v6464_v5  ;;  %vm1753_vm10 = vcmp.eq.s32.totalorder %v1748_v20, 2 }
 0x70c   :  { %v1734_v14 = vand.u32 2147483647, %v1733_v38  ;;  %v1622_v17 = vsub.s32 32, %v1621_v12  ;;  %v1626_v28 = vsub.s32 4294967266, %v1621_v12  ;;  %v1623_v62 = vshll.u32 %v1614_v54, %v1621_v12 }
 0x70d   :  { %v1636_v54 = vsub.s32 4, %v1612_v51 }
 0x70e   :  { %v1737_v44 = vmul.f32 %v1736_v46, %v1734_v14  ;;  %v1624_v0 = vshrl.u32 %v1606_v15, %v1622_v17  ;;  %v1627_v21 = vadd.s32 127, %v1626_v28 }
 0x70f   :  { %v1637_v58 = vsel %vm1552_vm3, %v1636_v54, %v1612_v51  ;;  %v1768_v51 = vpop.permute.xlu1 %1767  ;;  %v1777_v54 = vld [vmem:[%s7557_s13 + $0x8] sm:$0xff] }
 0x710   :  { %v1738_v1 = vxor.u32 2147483648, %v1737_v44  ;;  %v1625_v34 = vor.u32 %v1624_v0, %v1623_v62  ;;  %v1628_v24 = vshll.u32 %v1627_v21, 23  ;;  %v1639_v10 = vsel %vm8503_vm6, 0, %v1637_v58  ;;  %v1763_v21 = vpop.permute.xlu0 %1762  ;;  %v2353_v58 = vld [vmem:[%s10132_s4 + $0x8] sm:$0xff] }
 0x711   :  { %v1643_v60 = vadd.s32 3, %v1639_v10 }
 0x712   :  { %v1739_v9 = vsel %vm1656_vm5, %v1738_v1, %v1737_v44  ;;  %v1629_v29 = vor.u32 4788187, %v1628_v24  ;;  %v1632_v30 = vcvt.s32.f32 %v1625_v34  ;;  %vm1750_vm5 = vcmp.eq.s32.totalorder %v1748_v20, 0 }
 0x713   :  { %v1742_v18 = vsel %vm1655_vm2, %v8424_v31, %v1739_v9  ;;  %vm1749_vm2 = vcmp.lt.s32.totalorder %v1748_v20, 2  ;;  %v1644_v5 = vand.u32 3, %v1643_v60  ;;  %v2351_v20 = vld [vmem:[%s10131_s30 + $0x8] sm:$0xff] }
 0x714   :  { %7324 = vcosq.f32 %v1742_v18  ;;  %v1630_v45 = vand.u32 2147483647, %v1629_v29 }
 0x715   :  { %7326 = vsinq.f32 %v1742_v18 }
 0x716   :  { %v1633_v26 = vmul.f32 %v1632_v30, %v1630_v45 }
 0x718   :  { %v1634_v48 = vxor.u32 2147483648, %v1633_v26 }
 0x71a   :  { %v1635_v56 = vsel %vm1552_vm3, %v1634_v48, %v1633_v26  ;;  %vm1649_vm3 = vcmp.eq.s32.totalorder %v1644_v5, 2 }
 0x71b   :  { %v1638_v2 = vsel %vm8503_vm6, %v8431_v7, %v1635_v56  ;;  %vm1646_vm6 = vcmp.eq.s32.totalorder %v1644_v5, 0  ;;  %v2014_v56 = vld [vmem:[%s7587_s8 + $0x8] sm:$0xff] }
 0x71c   :  { %7328 = vcosq.f32 %v1638_v2 }
 0x71d   :  { %7330 = vsinq.f32 %v1638_v2  ;;  %v2256_v2 = vld [vmem:[%s10130_s3 + $0x8] sm:$0xff] }
 0x721   :  { %v7325_v8 = vpop.eup %7324 }
 0x722   :  { %v7327_v59 = vpop.eup %7326  ;;  %v1754_v49 = vxor.u32 2147483648, %v7325_v8 }
 0x723   :  { %v1751_v16 = vxor.u32 2147483648, %v7327_v59 }
 0x724   :  { %v1755_v22 = vsel %vm1753_vm10, %v1754_v49, %v7327_v59  ;;  %vm1645_vm10 = vcmp.lt.s32.totalorder %v1644_v5, 2 }
 0x725   :  { %v1752_v52 = vsel %vm1750_vm5, %v7325_v8, %v1751_v16  ;;  %vm1642_vm5 = vweird.f32 %v8431_v7 }
 0x726   :  { %v1756_v25 = vsel %vm1749_vm2, %v1752_v52, %v1755_v22  ;;  %vm1931_vm2 = vcmask 916480  }
 0x727   :  { %v1757_v61 = vsel %vm1746_vm9, nan, %v1756_v25  ;;  %vm1788_vm9 = vcmask 285696  }
 0x728   :  { %v1759_v38 = vmul.f32 %v1757_v61, %v1757_v61 }
 0x729   :  { %v7329_v46 = vpop.eup %7328 }
 0x72a   :  { %v1771_v14 = vmul.f32 %v1768_v51, %v1759_v38  ;;  %v7331_v12 = vpop.eup %7330  ;;  %v1650_v15 = vxor.u32 2147483648, %v7329_v46  ;;  %v1774_v51 = vld [vmem:[%s10133_s15] sm:$0xff] }
 0x72b   :  { %v1647_v17 = vxor.u32 2147483648, %v7331_v12  ;;  %6870 = vmatprep.mubr.msk.f32.mxu0 %vm1931_vm2, %v1774_v51 }
 0x72c   :  { %v1773_v44 = vadd.f32 %v1771_v14, %v8421_v33  ;;  %v1651_v28 = vsel %vm1649_vm3, %v1650_v15, %v7331_v12  ;;  %v1776_v14 = vld [vmem:[%s7557_s13] sm:$0xff]  ;;  %s10134_s13 = sld [smem:[#allocation8_spill]] }
 0x72d   :  { %v1648_v1 = vsel %vm1646_vm6, %v7329_v46, %v1647_v17  ;;  %v2013_v46 = vld [vmem:[%s7587_s8] sm:$0xff]  ;;  %s7520_s8 = smov 105  }
 0x72e   :  { %1831 = vrot.lane.b32.xlu1 %v1773_v44, %s7518_s29  ;;  %v1652_v31 = vsel %vm1645_vm10, %v1648_v1, %v1651_v28  ;;  %v2015_v12 = vld [vmem:[%s7592_s14] sm:$0xff]  ;;  %s7521_s14 = smov 9  }
 0x72f   :  { %v1653_v62 = vsel %vm1642_vm5, nan, %v1652_v31  ;;  %v2350_v15 = vld [vmem:[%s10131_s30] sm:$0xff]  ;;  %s7526_s30 = smov 74  }
 0x730   :  { %v1758_v0 = vmul.f32 %v1653_v62, %v1653_v62  ;;  %v2352_v17 = vld [vmem:[%s10132_s4] sm:$0xff]  ;;  %s7527_s4 = smov 83  }
 0x732   :  { %1782 = vrot.lane.b32.xlu1 %v1773_v44, %s7498_s17  ;;  %v1770_v32 = vmul.f32 %v1763_v21, %v1758_v0  ;;  %v2255_v44 = vld [vmem:[%s10130_s3] sm:$0xff]  ;;  %s7525_s3 = smov 27  }
 0x734   :  { %v1772_v9 = vadd.f32 %v1770_v32, %v8426_v27 }
 0x736   :  { %1829 = vrot.lane.b32.xlu0 %v1772_v9, %s7518_s29  ;;  %s10146_s29 = sld [smem:[#allocation12_spill]] }
 0x73a   :  { %1780 = vrot.lane.b32.xlu0 %v1772_v9, %s7498_s17 }
 0x7a0   :  { %v1832_v34 = vpop.permute.xlu1 %1831 }
 0x7a1   :  { %v1836_v24 = vsel %vm10065_vm1, 0.0, %v1832_v34 }
 0x7a2   :  { %v1838_v18 = vsel %vm1788_vm9, %v1836_v24, 0.0 }
 0x7a3   :  { %1863 = vrot.lane.b32.xlu1 %v1838_v18, %s7501_s5 }
 0x7a4   :  { %v1783_v45 = vpop.permute.xlu1 %1782 }
 0x7a5   :  { %v1787_v30 = vsel %vm10065_vm1, 0.0, %v1783_v45 }
 0x7a6   :  { %v8540_v26 = vsel %vm1788_vm9, %v1787_v30, 0.0 }
 0x7a7   :  { %1859 = vrot.lane.b32.xlu1 %v1838_v18, %s7500_s25 }
 0x7a8   :  { %v1830_v7 = vpop.permute.xlu0 %1829 }
 0x7a9   :  { %v1835_v29 = vsel %vm10065_vm1, 0.0, %v1830_v7 }
 0x7aa   :  { %v8525_v19 = vsel %vm1788_vm9, %v1835_v29, 0.0 }
 0x7ab   :  { %1855 = vrot.lane.b32.xlu1 %v1838_v18, %s7503_s12  ;;  %1861 = vrot.lane.b32.xlu0 %v8525_v19, %s7501_s5 }
 0x7ac   :  { %v1781_v42 = vpop.permute.xlu0 %1780 }
 0x7ad   :  { %v1786_v48 = vsel %vm10065_vm1, 0.0, %v1781_v42 }
 0x7ae   :  { %v8560_v6 = vsel %vm1788_vm9, %v1786_v48, 0.0 }
 0x7af   :  { %1851 = vrot.lane.b32.xlu1 %v1838_v18, %s7502_s9  ;;  %1857 = vrot.lane.b32.xlu0 %v8525_v19, %s7500_s25 }
 0x7b3   :  { %1847 = vrot.lane.b32.xlu1 %v1838_v18, %s7505_s7  ;;  %1853 = vrot.lane.b32.xlu0 %v8525_v19, %s7503_s12 }
 0x7b7   :  { %1843 = vrot.lane.b32.xlu1 %v1838_v18, %s7504_s10  ;;  %1849 = vrot.lane.b32.xlu0 %v8525_v19, %s7502_s9 }
 0x7bb   :  { %1825 = vrot.lane.b32.xlu1 %v8540_v26, %s7501_s5  ;;  %1845 = vrot.lane.b32.xlu0 %v8525_v19, %s7505_s7 }
 0x7bf   :  { %1819 = vrot.lane.b32.xlu1 %v8540_v26, %s7500_s25  ;;  %1841 = vrot.lane.b32.xlu0 %v8525_v19, %s7504_s10 }
 0x7c3   :  { %1813 = vrot.lane.b32.xlu1 %v8540_v26, %s7503_s12 }
 0x7c7   :  { %1807 = vrot.lane.b32.xlu1 %v8540_v26, %s7502_s9 }
 0x7cb   :  { %1801 = vrot.lane.b32.xlu1 %v8540_v26, %s7505_s7 }
 0x7cf   :  { %1795 = vrot.lane.b32.xlu1 %v8540_v26, %s7504_s10 }
 0x7d3   :  { %1823 = vrot.lane.b32.xlu1 %v8560_v6, %s7501_s5 }
 0x7d7   :  { %1817 = vrot.lane.b32.xlu1 %v8560_v6, %s7500_s25 }
 0x7db   :  { %1811 = vrot.lane.b32.xlu1 %v8560_v6, %s7503_s12 }
 0x7df   :  { %1805 = vrot.lane.b32.xlu1 %v8560_v6, %s7502_s9 }
 0x7e3   :  { %1799 = vrot.lane.b32.xlu1 %v8560_v6, %s7505_s7 }
 0x7e7   :  { %1793 = vrot.lane.b32.xlu1 %v8560_v6, %s7504_s10 }
 0x7eb   :  { %1867 = vrot.lane.b32.xlu1 %v1838_v18, %s7519_s16 }
 0x7ef   :  { %1928 = vperm.xlu1 %7307, %v1777_v54  }
 0x7f3   :  { %2024 = vperm.xlu1 %7307, %v2014_v56  }
 0x7f7   :  { %2246 = vperm.xlu1 %7307, %v2016_v63  }
 0x7fb   :  { %2264 = vperm.xlu1 %7307, %v2256_v2  }
 0x7ff   :  { %2361 = vperm.xlu1 %7307, %v2351_v20  }
 0x803   :  { %2583 = vperm.xlu1 %7307, %v2353_v58  }
 0x815   :  { %v1864_v8 = vpop.permute.xlu1 %1863 }
 0x816   :  { %1891 = vrot.lane.b32.xlu0 %v1864_v8, %s7519_s16 }
 0x819   :  { %v1860_v59 = vpop.permute.xlu1 %1859 }
 0x81a   :  { %1887 = vrot.lane.b32.xlu0 %v1860_v59, %s7519_s16 }
 0x81d   :  { %v1856_v49 = vpop.permute.xlu1 %1855  ;;  %v1862_v16 = vpop.permute.xlu0 %1861 }
 0x81e   :  { %1883 = vrot.lane.b32.xlu0 %v1856_v49, %s7519_s16 }
 0x821   :  { %v1852_v10 = vpop.permute.xlu1 %1851  ;;  %v1858_v52 = vpop.permute.xlu0 %1857 }
 0x822   :  { %1879 = vrot.lane.b32.xlu0 %v1852_v10, %s7519_s16 }
 0x825   :  { %v1848_v22 = vpop.permute.xlu1 %1847  ;;  %v1854_v25 = vpop.permute.xlu0 %1853 }
 0x826   :  { %1875 = vrot.lane.b32.xlu0 %v1848_v22, %s7519_s16 }
 0x829   :  { %v1844_v60 = vpop.permute.xlu1 %1843  ;;  %v1850_v61 = vpop.permute.xlu0 %1849 }
 0x82a   :  { %1871 = vrot.lane.b32.xlu0 %v1844_v60, %s7519_s16 }
 0x82d   :  { %v1846_v38 = vpop.permute.xlu0 %1845  ;;  %v1826_v28 = vpop.permute.xlu1 %1825 }
 0x82e   :  { %1889 = vrot.lane.b32.xlu0 %v1862_v16, %s7519_s16 }
 0x831   :  { %v1842_v5 = vpop.permute.xlu0 %1841  ;;  %v1820_v1 = vpop.permute.xlu1 %1819 }
 0x832   :  { %1885 = vrot.lane.b32.xlu0 %v1858_v52, %s7519_s16 }
 0x835   :  { %v1814_v31 = vpop.permute.xlu1 %1813 }
 0x836   :  { %1881 = vrot.lane.b32.xlu0 %v1854_v25, %s7519_s16 }
 0x839   :  { %v1808_v62 = vpop.permute.xlu1 %1807 }
 0x83a   :  { %1877 = vrot.lane.b32.xlu0 %v1850_v61, %s7519_s16 }
 0x83d   :  { %v1802_v0 = vpop.permute.xlu1 %1801 }
 0x83e   :  { %1873 = vrot.lane.b32.xlu0 %v1846_v38, %s7519_s16 }
 0x841   :  { %v1796_v9 = vpop.permute.xlu1 %1795 }
 0x842   :  { %1869 = vrot.lane.b32.xlu0 %v1842_v5, %s7519_s16 }
 0x845   :  { %v1824_v24 = vpop.permute.xlu1 %1823 }
 0x846   :  { %1865 = vrot.lane.b32.xlu0 %v8525_v19, %s7519_s16 }
 0x849   :  { %v1818_v29 = vpop.permute.xlu1 %1817 }
 0x84a   :  { %1923 = vperm.xlu0 %7306, %v1776_v14  }
 0x84d   :  { %v1812_v45 = vpop.permute.xlu1 %1811 }
 0x84e   :  { %2019 = vperm.xlu0 %7306, %v2013_v46  }
 0x851   :  { %v1806_v54 = vpop.permute.xlu1 %1805 }
 0x852   :  { %2241 = vperm.xlu0 %7306, %v2015_v12  }
 0x855   :  { %v1800_v58 = vpop.permute.xlu1 %1799 }
 0x856   :  { %2259 = vperm.xlu0 %7306, %v2255_v44   ;;  %v1775_v44 = vld [vmem:[%s10133_s15 + $0x8] sm:$0xff]  ;;  %s7528_s15 = smov 92  }
 0x859   :  { %v1794_v22 = vpop.permute.xlu1 %1793 }
 0x85a   :  { %2356 = vperm.xlu0 %7306, %v2350_v15   ;;  %v2253_v15 = vld [vmem:[%s10134_s13] sm:$0xff] }
 0x85b   :  { %6877 = vmatprep.mubr.msk.f32.mxu1 %vm288_vm0, %v2253_v15 }
 0x85d   :  { %v1868_v38 = vpop.permute.xlu1 %1867 }
 0x85e   :  { %2578 = vperm.xlu0 %7306, %v2352_v17   ;;  %v1908_v14 = vsel %vm1359_vm12, %v8540_v26, %v1868_v38 }
 0x86a   :  { %v1929_v17 = vpop.permute.xlu1 %1928 }
 0x86e   :  { %v2025_v26 = vpop.permute.xlu1 %2024 }
 0x888   :  { %v1892_v21 = vpop.permute.xlu0 %1891 }
 0x889   :  { %v1920_v32 = vsel %vm1359_vm12, %v1826_v28, %v1892_v21 }
 0x88a   :  { %6842 = vmatprep.subr.mxu0 %v1920_v32 }
 0x88b   :  { %6843 = vmatpush3.msra.mxu0 %v1920_v32 }
 0x88c   :  { %v1888_v34 = vpop.permute.xlu0 %1887 }
 0x88d   :  { %v1918_v56 = vsel %vm1359_vm12, %v1820_v1, %v1888_v34 }
 0x890   :  { %v1884_v18 = vpop.permute.xlu0 %1883 }
 0x891   :  { %v1916_v20 = vsel %vm1359_vm12, %v1814_v31, %v1884_v18 }
 0x894   :  { %v1880_v7 = vpop.permute.xlu0 %1879 }
 0x895   :  { %v1914_v49 = vsel %vm1359_vm12, %v1808_v62, %v1880_v7 }
 0x898   :  { %v1876_v19 = vpop.permute.xlu0 %1875 }
 0x899   :  { %v1912_v52 = vsel %vm1359_vm12, %v1802_v0, %v1876_v19 }
 0x89c   :  { %v1872_v30 = vpop.permute.xlu0 %1871 }
 0x89d   :  { %v1910_v61 = vsel %vm1359_vm12, %v1796_v9, %v1872_v30 }
 0x8a0   :  { %v1890_v42 = vpop.permute.xlu0 %1889 }
 0x8a1   :  { %v1919_v48 = vsel %vm1359_vm12, %v1824_v24, %v1890_v42 }
 0x8a2   :  { %6844 = vmatprep.subr.mxu0 %v1919_v48 }
 0x8a3   :  { %6845 = vmatpush3.msra.mxu0 %v1919_v48 }
 0x8a4   :  { %v1886_v63 = vpop.permute.xlu0 %1885  ;;  %6846 = vmatprep.subr.mxu0 %v1918_v56 }
 0x8a5   :  { %6847 = vmatpush3.msra.mxu0 %v1918_v56  ;;  %v1917_v2 = vsel %vm1359_vm12, %v1818_v29, %v1886_v63 }
 0x8a6   :  { %6848 = vmatprep.subr.mxu0 %v1917_v2 }
 0x8a7   :  { %6849 = vmatpush3.msra.mxu0 %v1917_v2 }
 0x8a8   :  { %v1882_v8 = vpop.permute.xlu0 %1881  ;;  %6850 = vmatprep.subr.mxu0 %v1916_v20 }
 0x8a9   :  { %6851 = vmatpush3.msra.mxu0 %v1916_v20  ;;  %v1915_v59 = vsel %vm1359_vm12, %v1812_v45, %v1882_v8 }
 0x8aa   :  { %6852 = vmatprep.subr.mxu0 %v1915_v59 }
 0x8ab   :  { %6853 = vmatpush3.msra.mxu0 %v1915_v59 }
 0x8ac   :  { %v1878_v10 = vpop.permute.xlu0 %1877  ;;  %6854 = vmatprep.subr.mxu0 %v1914_v49 }
 0x8ad   :  { %6855 = vmatpush3.msra.mxu0 %v1914_v49  ;;  %v1913_v16 = vsel %vm1359_vm12, %v1806_v54, %v1878_v10 }
 0x8ae   :  { %6856 = vmatprep.subr.mxu0 %v1913_v16 }
 0x8af   :  { %6857 = vmatpush3.msra.mxu0 %v1913_v16 }
 0x8b0   :  { %v1874_v60 = vpop.permute.xlu0 %1873  ;;  %6858 = vmatprep.subr.mxu0 %v1912_v52 }
 0x8b1   :  { %6859 = vmatpush3.msra.mxu0 %v1912_v52  ;;  %v1911_v25 = vsel %vm1359_vm12, %v1800_v58, %v1874_v60 }
 0x8b2   :  { %6860 = vmatprep.subr.mxu0 %v1911_v25 }
 0x8b3   :  { %6861 = vmatpush3.msra.mxu0 %v1911_v25 }
 0x8b4   :  { %v1870_v51 = vpop.permute.xlu0 %1869  ;;  %6862 = vmatprep.subr.mxu0 %v1910_v61 }
 0x8b5   :  { %6863 = vmatpush3.msra.mxu0 %v1910_v61  ;;  %v1909_v5 = vsel %vm1359_vm12, %v1794_v22, %v1870_v51 }
 0x8b6   :  { %6864 = vmatprep.subr.mxu0 %v1909_v5 }
 0x8b7   :  { %6865 = vmatpush3.msra.mxu0 %v1909_v5 }
 0x8b8   :  { %v1866_v46 = vpop.permute.xlu0 %1865  ;;  %6866 = vmatprep.subr.mxu0 %v1908_v14 }
 0x8b9   :  { %6867 = vmatpush3.msra.mxu0 %v1908_v14  ;;  %v1907_v12 = vsel %vm1359_vm12, %v8560_v6, %v1866_v46 }
 0x8ba   :  { %6868 = vmatprep.subr.mxu0 %v1907_v12 }
 0x8bb   :  { %6869 = vmatpush3.msra.mxu0 %v1907_v12 }
 0x8bc   :  { %6871 = vmatmul.mubr.msk.f32.vlgmr.msra.gmra.mxu0 %vm1931_vm2, %v1775_v44 }
 0x8c5   :  { %v1924_v28 = vpop.permute.xlu0 %1923 }
 0x8c9   :  { %v2020_v6 = vpop.permute.xlu0 %2019 }
 0x97c   :  { %v6872_v1 = vpop.f32.mrf.mxu0 }
 0x97d   :  { %v8623_v31 = vadd.f32 %v6872_v1, %v1929_v17 }
 0x97e   :  { %v2004_v62 = vpop.f32.mrf.mxu0 }
 0x97f   :  { %v8626_v0 = vmul.f32 %v2025_v26, %v8623_v31  ;;  %v8628_v21 = vadd.f32 %v2004_v62, %v1924_v28 }
 0x981   :  { %v2133_v32 = vand.u32 2147483647, %v8626_v0  ;;  %v2136_v9 = vand.u32 2139095040, %v8626_v0  ;;  %v8633_v34 = vmul.f32 %v2020_v6, %v8628_v21  ;;  %vm2225_vm1 = vweird.f32 %v8626_v0 }
 0x983   :  { %v2137_v24 = vshrl.u32 %v2136_v9, 23  ;;  %v2140_v18 = vand.u32 8388607, %v2133_v32  ;;  %v2032_v7 = vand.u32 2139095040, %v8633_v34  ;;  %v2029_v19 = vand.u32 2147483647, %v8633_v34 }
 0x985   :  { %v6476_v29 = vadd.s32 4294967169, %v2137_v24  ;;  %v2033_v45 = vshrl.u32 %v2032_v7, 23  ;;  %v2141_v42 = vor.u32 8388608, %v2140_v18  ;;  %v2036_v54 = vand.u32 8388607, %v2029_v19 }
 0x987   :  { %v2143_v30 = vadd.s32 1, %v6476_v29  ;;  %v6472_v48 = vadd.s32 4294967169, %v2033_v45  ;;  %v8641_v58 = vshll.u32 %v2141_v42, 8  ;;  %v2037_v49 = vor.u32 8388608, %v2036_v54 }
 0x989   :  { %vm2144_vm3 = vcmp.gt.s32.totalorder %v2143_v30, 0  ;;  %v2039_v63 = vadd.s32 1, %v6472_v48 }
 0x98a   :  { %v2145_v56 = vsel %vm2144_vm3, %v2143_v30, 0  ;;  %v2077_v30 = vshll.u32 %v2037_v49, 8 }
 0x98b   :  { %v2146_v2 = vshrl.u32 %v2145_v56, 5  ;;  %v2147_v20 = vand.u32 31, %v2145_v56  ;;  %vm2040_vm6 = vcmp.gt.s32.totalorder %v2039_v63, 0 }
 0x98c   :  { %v2041_v44 = vsel %vm2040_vm6, %v2039_v63, 0 }
 0x98d   :  { %v2148_v8 = vsub.s32 32, %v2147_v20  ;;  %v2150_v59 = vshll.u32 %v7507_v35, %v2147_v20  ;;  %v2153_v10 = vshll.u32 %v7508_v37, %v2147_v20  ;;  %v2156_v16 = vshll.u32 %v7509_v39, %v2147_v20 }
 0x98e   :  { %v2159_v22 = vshll.u32 %v7510_v41, %v2147_v20  ;;  %v2162_v52 = vshll.u32 %v7511_v43, %v2147_v20  ;;  %vm2165_vm10 = vcmp.lt.s32.totalorder %v2146_v2, 1  ;;  %vm2167_vm5 = vcmp.lt.s32.totalorder %v2146_v2, 3 }
 0x98f   :  { %v2151_v60 = vshrl.u32 %v7508_v37, %v2148_v8  ;;  %v2154_v25 = vshrl.u32 %v7509_v39, %v2148_v8  ;;  %v2157_v61 = vshrl.u32 %v7510_v41, %v2148_v8  ;;  %v2149_v38 = vshrl.u32 %v7507_v35, %v2148_v8 }
 0x990   :  { %v2160_v51 = vshrl.u32 %v7511_v43, %v2148_v8  ;;  %v2163_v5 = vshrl.u32 %v7512_v50, %v2148_v8  ;;  %vm2168_vm9 = vcmp.lt.s32.totalorder %v2146_v2, 4  ;;  %v2043_v28 = vand.u32 31, %v2041_v44 }
 0x991   :  { %v2152_v14 = vor.u32 %v2151_v60, %v2150_v59  ;;  %v2155_v46 = vor.u32 %v2154_v25, %v2153_v10  ;;  %v2158_v12 = vor.u32 %v2157_v61, %v2156_v16  ;;  %vm2166_vm3 = vcmp.lt.s32.totalorder %v2146_v2, 2 }
 0x992   :  { %v2161_v15 = vor.u32 %v2160_v51, %v2159_v22  ;;  %v2164_v17 = vor.u32 %v2163_v5, %v2162_v52  ;;  %v2044_v7 = vsub.s32 32, %v2043_v28  ;;  %v2042_v56 = vshrl.u32 %v2041_v44, 5 }
 0x993   :  { %v2169_v1 = vsel %vm2165_vm10, %v2149_v38, %v2152_v14  ;;  %v2170_v26 = vsel %vm2168_vm9, %v2158_v12, 2102212464  ;;  %v2173_v62 = vsel %vm2165_vm10, %v2152_v14, %v2155_v46  ;;  %v2177_v6 = vsel %vm2165_vm10, %v2155_v46, %v2158_v12 }
 0x994   :  { %v2171_v9 = vsel %vm2167_vm5, %v2155_v46, %v2170_v26  ;;  %v2174_v24 = vsel %vm2168_vm9, %v2161_v15, 920167782  ;;  %v2178_v18 = vsel %vm2168_vm9, %v2164_v17, 1326507024  ;;  %v2046_v10 = vshll.u32 %v7507_v35, %v2043_v28 }
 0x995   :  { %v2175_v29 = vsel %vm2167_vm5, %v2158_v12, %v2174_v24  ;;  %v2179_v45 = vsel %vm2167_vm5, %v2161_v15, %v2178_v18  ;;  %v2172_v42 = vsel %vm2166_vm3, %v2169_v1, %v2171_v9  ;;  %v2047_v16 = vshrl.u32 %v7508_v37, %v2044_v7 }
 0x996   :  { %v2176_v48 = vsel %vm2166_vm3, %v2173_v62, %v2175_v29  ;;  %v2180_v54 = vsel %vm2166_vm3, %v2177_v6, %v2179_v45  ;;  %v2049_v2 = vshll.u32 %v7508_v37, %v2043_v28  ;;  %v2050_v49 = vshrl.u32 %v7509_v39, %v2044_v7 }
 0x997   :  { %v8662_v63 = vmul.u32.u64.low %v8641_v58, %v2180_v54  ;;  %v8663_v20 = vmul.u32.u64.high %v8641_v58, %v2180_v54, %v8662_v63  ;;  %v8666_v8 = vmul.u32.u64.low %v8641_v58, %v2176_v48  ;;  %v8667_v59 = vmul.u32.u64.high %v8641_v58, %v2176_v48, %v8666_v8 }
 0x998   :  { %v2052_v22 = vshll.u32 %v7509_v39, %v2043_v28  ;;  %v2053_v52 = vshrl.u32 %v7510_v41, %v2044_v7  ;;  %v2055_v60 = vshll.u32 %v7510_v41, %v2043_v28  ;;  %v2056_v25 = vshrl.u32 %v7511_v43, %v2044_v7 }
 0x999   :  { %v2048_v61 = vor.u32 %v2047_v16, %v2046_v10  ;;  %v2051_v38 = vor.u32 %v2050_v49, %v2049_v2  ;;  %v2058_v51 = vshll.u32 %v7511_v43, %v2043_v28  ;;  %v2059_v5 = vshrl.u32 %v7512_v50, %v2044_v7 }
 0x99a   :  { %v2188_v14 = vmul.u32 %v8641_v58, %v2172_v42  ;;  %vm2190_vm6 = vc.u32 %v8663_v20, %v8666_v8  ;;  %v2191_v46 = vadd.s32 1, %v8667_v59  ;;  %v2054_v12 = vor.u32 %v2053_v52, %v2052_v22 }
 0x99b   :  { %v2045_v44 = vshrl.u32 %v7507_v35, %v2044_v7  ;;  %v2057_v15 = vor.u32 %v2056_v25, %v2055_v60  ;;  %v2060_v17 = vor.u32 %v2059_v5, %v2058_v51  ;;  %vm2061_vm10 = vcmp.lt.s32.totalorder %v2042_v56, 1 }
 0x99c   :  { %v2192_v1 = vsel %vm2190_vm6, %v2191_v46, %v8667_v59  ;;  %vm2063_vm5 = vcmp.lt.s32.totalorder %v2042_v56, 3  ;;  %vm2064_vm9 = vcmp.lt.s32.totalorder %v2042_v56, 4  ;;  %v2069_v28 = vsel %vm2061_vm10, %v2048_v61, %v2051_v38 }
 0x99d   :  { %v2193_v26 = vadd.s32 %v2192_v1, %v2188_v14  ;;  %v2066_v62 = vsel %vm2064_vm9, %v2054_v12, 2102212464  ;;  %v2070_v6 = vsel %vm2064_vm9, %v2057_v15, 920167782  ;;  %v2073_v58 = vsel %vm2061_vm10, %v2051_v38, %v2054_v12 }
 0x99e   :  { %vm2062_vm3 = vcmp.lt.s32.totalorder %v2042_v56, 2  ;;  %v2065_v9 = vsel %vm2061_vm10, %v2045_v44, %v2048_v61  ;;  %v2071_v24 = vsel %vm2063_vm5, %v2054_v12, %v2070_v6  ;;  %v2074_v18 = vsel %vm2064_vm9, %v2060_v17, 1326507024 }
 0x99f   :  { %v2194_v29 = vadd.s32 536870912, %v2193_v26  ;;  %v2067_v45 = vsel %vm2063_vm5, %v2051_v38, %v2066_v62  ;;  %v2072_v42 = vsel %vm2062_vm3, %v2069_v28, %v2071_v24  ;;  %v2075_v7 = vsel %vm2063_vm5, %v2057_v15, %v2074_v18 }
 0x9a0   :  { %v2076_v48 = vsel %vm2062_vm3, %v2073_v58, %v2075_v7  ;;  %v8686_v54 = vmul.u32.u64.low %v2077_v30, %v2072_v42  ;;  %v8687_v63 = vmul.u32.u64.high %v2077_v30, %v2072_v42, %v8686_v54  ;;  %v2068_v2 = vsel %vm2062_vm3, %v2065_v9, %v2067_v45 }
 0x9a1   :  { %v2195_v59 = vshrl.u32 %v2194_v29, 30  ;;  %v8689_v10 = vmul.u32.u64.low %v2077_v30, %v2076_v48  ;;  %v8690_v16 = vmul.u32.u64.high %v2077_v30, %v2076_v48, %v8689_v10  ;;  %v2084_v52 = vmul.u32 %v2077_v30, %v2068_v2 }
 0x9a2   :  { %v2087_v22 = vadd.s32 1, %v8687_v63  ;;  %v2189_v17 = vadd.s32 %v8666_v8, %v8663_v20  ;;  %vm2135_vm9 = vcmp.lt.s32.totalorder %v8626_v0, 0  ;;  %vm2134_vm3 = vcmp.le.f32.partialorder %v2133_v32, 0.7853982 }
 0x9a3   :  { %v2196_v49 = vshll.u32 %v2195_v59, 30  ;;  %vm2086_vm6 = vc.u32 %v8690_v16, %v8686_v54  ;;  %v2085_v10 = vadd.s32 %v8686_v54, %v8690_v16 }
 0x9a4   :  { %v2088_v60 = vsel %vm2086_vm6, %v2087_v22, %v8687_v63  ;;  %vm2031_vm6 = vcmp.lt.s32.totalorder %v8633_v34, 0 }
 0x9a5   :  { %v2197_v56 = vsub.s32 %v2193_v26, %v2196_v49  ;;  %v2089_v61 = vadd.s32 %v2088_v60, %v2084_v52  ;;  %v2219_v49 = vsub.s32 4, %v2195_v59 }
 0x9a7   :  { %v2199_v25 = vsub.s32 0, %v2197_v56  ;;  %v2090_v51 = vadd.s32 536870912, %v2089_v61 }
 0x9a9   :  { %v6477_v38 = vmin.u32 %v2199_v25, %v2197_v56  ;;  %v2091_v14 = vshrl.u32 %v2090_v51, 30  ;;  %v2220_v51 = vsel %vm2135_vm9, %v2219_v49, %v2195_v59 }
 0x9ab   :  { %v2201_v5 = vclz %v6477_v38  ;;  %v2092_v12 = vshll.u32 %v2091_v14, 30 }
 0x9ad   :  { %v6478_v46 = vadd.s32 4294967294, %v2201_v5  ;;  %v2093_v15 = vsub.s32 %v2089_v61, %v2092_v12 }
 0x9af   :  { %vm6479_vm10 = vcmp.lt.s32.totalorder %v6478_v46, 0  ;;  %v2095_v28 = vsub.s32 0, %v2093_v15 }
 0x9b0   :  { %v2204_v44 = vsel %vm6479_vm10, 0, %v6478_v46  ;;  %v2222_v46 = vsel %vm2134_vm3, 0, %v2220_v51  ;;  %vm8705_vm10 = vcmp.le.f32.partialorder %v2029_v19, 0.7853982 }
 0x9b1   :  { %v2205_v1 = vsub.s32 32, %v2204_v44  ;;  %v2209_v30 = vsub.s32 4294967266, %v2204_v44  ;;  %v2206_v26 = vshll.u32 %v2197_v56, %v2204_v44  ;;  %v6473_v58 = vmin.u32 %v2095_v28, %v2093_v15 }
 0x9b2   :  { %v2226_v44 = vadd.s32 3, %v2222_v46 }
 0x9b3   :  { %v2207_v62 = vshrl.u32 %v2189_v17, %v2205_v1  ;;  %v2210_v6 = vadd.s32 127, %v2209_v30  ;;  %v2097_v18 = vclz %v6473_v58  ;;  %v2115_v17 = vsub.s32 4, %v2091_v14 }
 0x9b4   :  { %v2227_v30 = vand.u32 3, %v2226_v44 }
 0x9b5   :  { %v2208_v9 = vor.u32 %v2207_v62, %v2206_v26  ;;  %v2211_v24 = vshll.u32 %v2210_v6, 23  ;;  %v6474_v45 = vadd.s32 4294967294, %v2097_v18  ;;  %v2116_v28 = vsel %vm2031_vm6, %v2115_v17, %v2091_v14  ;;  %v2247_v14 = vpop.permute.xlu1 %2246 }
 0x9b6   :  { %v2118_v19 = vsel %vm8705_vm10, 0, %v2116_v28 }
 0x9b7   :  { %v2212_v29 = vor.u32 4788187, %v2211_v24  ;;  %v2215_v7 = vcvt.s32.f32 %v2208_v9  ;;  %vm6475_vm5 = vcmp.lt.s32.totalorder %v6474_v45, 0 }
 0x9b8   :  { %v2100_v63 = vsel %vm6475_vm5, 0, %v6474_v45  ;;  %vm2232_vm5 = vcmp.eq.s32.totalorder %v2227_v30, 2 }
 0x9b9   :  { %v2213_v42 = vand.u32 2147483647, %v2212_v29  ;;  %v2101_v20 = vsub.s32 32, %v2100_v63  ;;  %v2105_v8 = vsub.s32 4294967266, %v2100_v63  ;;  %v2102_v22 = vshll.u32 %v2093_v15, %v2100_v63 }
 0x9ba   :  { %v2122_v29 = vadd.s32 3, %v2118_v19 }
 0x9bb   :  { %v2216_v48 = vmul.f32 %v2215_v7, %v2213_v42  ;;  %v2103_v56 = vshrl.u32 %v2085_v10, %v2101_v20  ;;  %v2106_v52 = vadd.s32 127, %v2105_v8 }
 0x9bd   :  { %v2217_v2 = vxor.u32 2147483648, %v2216_v48  ;;  %v2104_v61 = vor.u32 %v2103_v56, %v2102_v22  ;;  %v2107_v38 = vshll.u32 %v2106_v52, 23 }
 0x9bf   :  { %v2218_v60 = vsel %vm2135_vm9, %v2217_v2, %v2216_v48  ;;  %v2108_v54 = vor.u32 4788187, %v2107_v38  ;;  %v2111_v5 = vcvt.s32.f32 %v2104_v61  ;;  %vm2229_vm9 = vcmp.eq.s32.totalorder %v2227_v30, 0  ;;  %v2254_v61 = vld [vmem:[%s10134_s13 + $0x8] sm:$0xff]  ;;  %v2265_v38 = vpop.permute.xlu1 %2264  ;;  %s7529_s13 = smov 101  }
 0x9c0   :  { %v2221_v25 = vsel %vm2134_vm3, %v8626_v0, %v2218_v60  ;;  %vm2228_vm3 = vcmp.lt.s32.totalorder %v2227_v30, 2  ;;  %v2123_v48 = vand.u32 3, %v2122_v29  ;;  %v2242_v60 = vpop.permute.xlu0 %2241 }
 0x9c1   :  { %7332 = vcosq.f32 %v2221_v25  ;;  %v2109_v16 = vand.u32 2147483647, %v2108_v54 }
 0x9c2   :  { %7334 = vsinq.f32 %v2221_v25 }
 0x9c3   :  { %v2112_v12 = vmul.f32 %v2111_v5, %v2109_v16 }
 0x9c4   :  { %v2260_v54 = vpop.permute.xlu0 %2259 }
 0x9c5   :  { %v2113_v15 = vxor.u32 2147483648, %v2112_v12 }
 0x9c7   :  { %v2114_v1 = vsel %vm2031_vm6, %v2113_v15, %v2112_v12  ;;  %vm2128_vm6 = vcmp.eq.s32.totalorder %v2123_v48, 2  ;;  %v2362_v12 = vpop.permute.xlu1 %2361 }
 0x9c8   :  { %v2117_v59 = vsel %vm8705_vm10, %v8633_v34, %v2114_v1  ;;  %vm2125_vm10 = vcmp.eq.s32.totalorder %v2123_v48, 0  ;;  %v2357_v15 = vpop.permute.xlu0 %2356 }
 0x9c9   :  { %7336 = vcosq.f32 %v2117_v59 }
 0x9ca   :  { %7338 = vsinq.f32 %v2117_v59 }
 0x9ce   :  { %v7333_v26 = vpop.eup %7332 }
 0x9cf   :  { %v7335_v62 = vpop.eup %7334  ;;  %v2233_v6 = vxor.u32 2147483648, %v7333_v26 }
 0x9d0   :  { %v2230_v58 = vxor.u32 2147483648, %v7335_v62 }
 0x9d1   :  { %v2234_v9 = vsel %vm2232_vm5, %v2233_v6, %v7335_v62  ;;  %vm2124_vm5 = vcmp.lt.s32.totalorder %v2123_v48, 2 }
 0x9d2   :  { %v2231_v24 = vsel %vm2229_vm9, %v7333_v26, %v2230_v58 }
 0x9d3   :  { %v2235_v18 = vsel %vm2228_vm3, %v2231_v24, %v2234_v9 }
 0x9d4   :  { %v2236_v45 = vsel %vm2225_vm1, nan, %v2235_v18  ;;  %vm2121_vm1 = vweird.f32 %v8633_v34 }
 0x9d5   :  { %v2238_v42 = vmul.f32 %v2236_v45, %v2236_v45 }
 0x9d6   :  { %v7337_v63 = vpop.eup %7336 }
 0x9d7   :  { %v2250_v7 = vmul.f32 %v2247_v14, %v2238_v42  ;;  %v7339_v20 = vpop.eup %7338  ;;  %v2129_v8 = vxor.u32 2147483648, %v7337_v63 }
 0x9d8   :  { %v2126_v2 = vxor.u32 2147483648, %v7339_v20 }
 0x9d9   :  { %v2252_v10 = vadd.f32 %v2250_v7, %v8623_v31  ;;  %v2130_v49 = vsel %vm2128_vm6, %v2129_v8, %v7339_v20 }
 0x9da   :  { %v2127_v0 = vsel %vm2125_vm10, %v7337_v63, %v2126_v2 }
 0x9db   :  { %6873 = vmatprep.subr.mxu1 %v2252_v10  ;;  %v2131_v22 = vsel %vm2124_vm5, %v2127_v0, %v2130_v49 }
 0x9dc   :  { %6874 = vmatpush3.msra.mxu1 %v2252_v10  ;;  %v2132_v56 = vsel %vm2121_vm1, nan, %v2131_v22 }
 0x9dd   :  { %v2237_v52 = vmul.f32 %v2132_v56, %v2132_v56 }
 0x9df   :  { %v2249_v25 = vmul.f32 %v2242_v60, %v2237_v52 }
 0x9e1   :  { %v2251_v31 = vadd.f32 %v2249_v25, %v8628_v21 }
 0x9e3   :  { %6875 = vmatprep.subr.mxu1 %v2251_v31 }
 0x9e4   :  { %6876 = vmatpush3.msra.mxu1 %v2251_v31 }
 0x9e5   :  { %6878 = vmatmul.mubr.msk.f32.vlgmr.msra.gmra.mxu1 %vm288_vm0, %v2254_v61 }
 0xaa5   :  { %v6879_v51 = vpop.f32.mrf.mxu1 }
 0xaa6   :  { %v2345_v16 = vadd.f32 %v6879_v51, %v2265_v38 }
 0xaa7   :  { %v2339_v5 = vpop.f32.mrf.mxu1 }
 0xaa8   :  { %v8721_v46 = vadd.f32 %v2345_v16, %v8421_v33  ;;  %v2340_v34 = vadd.f32 %v2339_v5, %v2260_v54 }
 0xaaa   :  { %v8724_v44 = vmul.f32 %v2362_v12, %v8721_v46  ;;  %v8727_v21 = vadd.f32 %v2340_v34, %v8426_v27 }
 0xaac   :  { %v2470_v17 = vand.u32 2147483647, %v8724_v44  ;;  %v2473_v32 = vand.u32 2139095040, %v8724_v44  ;;  %v8732_v1 = vmul.f32 %v2357_v15, %v8727_v21 }
 0xaae   :  { %v2474_v59 = vshrl.u32 %v2473_v32, 23  ;;  %v2477_v33 = vand.u32 8388607, %v2470_v17  ;;  %v2369_v30 = vand.u32 2139095040, %v8732_v1  ;;  %v2366_v26 = vand.u32 2147483647, %v8732_v1 }
 0xab0   :  { %v6486_v28 = vadd.s32 4294967169, %v2474_v59  ;;  %v2370_v62 = vshrl.u32 %v2369_v30, 23  ;;  %v2478_v6 = vor.u32 8388608, %v2477_v33  ;;  %v2373_v19 = vand.u32 8388607, %v2366_v26 }
 0xab2   :  { %v2480_v27 = vadd.s32 1, %v6486_v28  ;;  %v6482_v58 = vadd.s32 4294967169, %v2370_v62  ;;  %v8740_v45 = vshll.u32 %v2478_v6, 8  ;;  %v2374_v7 = vor.u32 8388608, %v2373_v19 }
 0xab4   :  { %vm2481_vm9 = vcmp.gt.s32.totalorder %v2480_v27, 0  ;;  %v2376_v24 = vadd.s32 1, %v6482_v58  ;;  %v2414_v28 = vshll.u32 %v2374_v7, 8 }
 0xab5   :  { %v2482_v9 = vsel %vm2481_vm9, %v2480_v27, 0 }
 0xab6   :  { %v2483_v18 = vshrl.u32 %v2482_v9, 5  ;;  %v2484_v29 = vand.u32 31, %v2482_v9  ;;  %vm2377_vm3 = vcmp.gt.s32.totalorder %v2376_v24, 0 }
 0xab7   :  { %v2378_v31 = vsel %vm2377_vm3, %v2376_v24, 0 }
 0xab8   :  { %v2485_v42 = vsub.s32 32, %v2484_v29  ;;  %v2487_v14 = vshll.u32 %v7507_v35, %v2484_v29  ;;  %v2490_v48 = vshll.u32 %v7508_v37, %v2484_v29  ;;  %v2493_v63 = vshll.u32 %v7509_v39, %v2484_v29 }
 0xab9   :  { %v2496_v10 = vshll.u32 %v7510_v41, %v2484_v29  ;;  %v2499_v20 = vshll.u32 %v7511_v43, %v2484_v29  ;;  %vm2502_vm6 = vcmp.lt.s32.totalorder %v2483_v18, 1  ;;  %vm2504_vm10 = vcmp.lt.s32.totalorder %v2483_v18, 3 }
 0xaba   :  { %v2488_v8 = vshrl.u32 %v7508_v37, %v2485_v42  ;;  %v2491_v2 = vshrl.u32 %v7509_v39, %v2485_v42  ;;  %v2494_v49 = vshrl.u32 %v7510_v41, %v2485_v42  ;;  %v2486_v0 = vshrl.u32 %v7507_v35, %v2485_v42 }
 0xabb   :  { %v2497_v22 = vshrl.u32 %v7511_v43, %v2485_v42  ;;  %v2500_v56 = vshrl.u32 %v7512_v50, %v2485_v42  ;;  %vm2505_vm5 = vcmp.lt.s32.totalorder %v2483_v18, 4  ;;  %v2380_v51 = vand.u32 31, %v2378_v31 }
 0xabc   :  { %v2489_v52 = vor.u32 %v2488_v8, %v2487_v14  ;;  %v2492_v60 = vor.u32 %v2491_v2, %v2490_v48  ;;  %v2495_v25 = vor.u32 %v2494_v49, %v2493_v63  ;;  %vm2503_vm1 = vcmp.lt.s32.totalorder %v2483_v18, 2 }
 0xabd   :  { %v2498_v61 = vor.u32 %v2497_v22, %v2496_v10  ;;  %v2501_v38 = vor.u32 %v2500_v56, %v2499_v20  ;;  %v2381_v59 = vsub.s32 32, %v2380_v51  ;;  %v2379_v58 = vshrl.u32 %v2378_v31, 5 }
 0xabe   :  { %v2506_v54 = vsel %vm2502_vm6, %v2486_v0, %v2489_v52  ;;  %v2507_v16 = vsel %vm2505_vm5, %v2495_v25, 2102212464  ;;  %v2510_v5 = vsel %vm2502_vm6, %v2489_v52, %v2492_v60  ;;  %v2514_v34 = vsel %vm2502_vm6, %v2492_v60, %v2495_v25 }
 0xabf   :  { %v2508_v12 = vsel %vm2504_vm10, %v2492_v60, %v2507_v16  ;;  %v2511_v15 = vsel %vm2505_vm5, %v2498_v61, 920167782  ;;  %v2515_v32 = vsel %vm2505_vm5, %v2501_v38, 1326507024  ;;  %v2383_v42 = vshll.u32 %v7507_v35, %v2380_v51 }
 0xac0   :  { %v2512_v33 = vsel %vm2504_vm10, %v2495_v25, %v2511_v15  ;;  %v2516_v30 = vsel %vm2504_vm10, %v2498_v61, %v2515_v32  ;;  %v2509_v62 = vsel %vm2503_vm1, %v2506_v54, %v2508_v12  ;;  %v2384_v14 = vshrl.u32 %v7508_v37, %v2381_v59 }
 0xac1   :  { %v2513_v27 = vsel %vm2503_vm1, %v2510_v5, %v2512_v33  ;;  %v2517_v6 = vsel %vm2503_vm1, %v2514_v34, %v2516_v30  ;;  %v2386_v18 = vshll.u32 %v7508_v37, %v2380_v51  ;;  %v2387_v7 = vshrl.u32 %v7509_v39, %v2381_v59 }
 0xac2   :  { %v8761_v19 = vmul.u32.u64.low %v8740_v45, %v2517_v6  ;;  %v8762_v9 = vmul.u32.u64.high %v8740_v45, %v2517_v6, %v8761_v19  ;;  %v8765_v24 = vmul.u32.u64.low %v8740_v45, %v2513_v27  ;;  %v8766_v29 = vmul.u32.u64.high %v8740_v45, %v2513_v27, %v8765_v24 }
 0xac3   :  { %v2389_v48 = vshll.u32 %v7509_v39, %v2380_v51  ;;  %v2390_v63 = vshrl.u32 %v7510_v41, %v2381_v59  ;;  %v2392_v10 = vshll.u32 %v7510_v41, %v2380_v51  ;;  %v2393_v20 = vshrl.u32 %v7511_v43, %v2381_v59 }
 0xac4   :  { %v2385_v8 = vor.u32 %v2384_v14, %v2383_v42  ;;  %v2388_v2 = vor.u32 %v2387_v7, %v2386_v18  ;;  %v2395_v49 = vshll.u32 %v7511_v43, %v2380_v51  ;;  %v2396_v0 = vshrl.u32 %v7512_v50, %v2381_v59 }
 0xac5   :  { %v2525_v22 = vmul.u32 %v8740_v45, %v2509_v62  ;;  %vm2527_vm9 = vc.u32 %v8762_v9, %v8765_v24  ;;  %v2528_v56 = vadd.s32 1, %v8766_v29  ;;  %v2391_v52 = vor.u32 %v2390_v63, %v2389_v48 }
 0xac6   :  { %v2382_v60 = vshrl.u32 %v7507_v35, %v2381_v59  ;;  %v2394_v25 = vor.u32 %v2393_v20, %v2392_v10  ;;  %v2397_v31 = vor.u32 %v2396_v0, %v2395_v49  ;;  %vm2398_vm3 = vcmp.lt.s32.totalorder %v2379_v58, 1 }
 0xac7   :  { %v2529_v61 = vsel %vm2527_vm9, %v2528_v56, %v8766_v29  ;;  %vm2400_vm6 = vcmp.lt.s32.totalorder %v2379_v58, 3  ;;  %vm2401_vm10 = vcmp.lt.s32.totalorder %v2379_v58, 4  ;;  %v2406_v38 = vsel %vm2398_vm3, %v2385_v8, %v2388_v2 }
 0xac8   :  { %v2530_v51 = vadd.s32 %v2529_v61, %v2525_v22  ;;  %v2403_v54 = vsel %vm2401_vm10, %v2391_v52, 2102212464  ;;  %v2407_v16 = vsel %vm2401_vm10, %v2394_v25, 920167782  ;;  %v2410_v45 = vsel %vm2398_vm3, %v2388_v2, %v2391_v52 }
 0xac9   :  { %vm2399_vm5 = vcmp.lt.s32.totalorder %v2379_v58, 2  ;;  %v2402_v5 = vsel %vm2398_vm3, %v2382_v60, %v2385_v8  ;;  %v2408_v34 = vsel %vm2400_vm6, %v2391_v52, %v2407_v16  ;;  %v2411_v12 = vsel %vm2401_vm10, %v2397_v31, 1326507024 }
 0xaca   :  { %v2531_v15 = vadd.s32 536870912, %v2530_v51  ;;  %v2404_v32 = vsel %vm2400_vm6, %v2388_v2, %v2403_v54  ;;  %v2409_v33 = vsel %vm2399_vm5, %v2406_v38, %v2408_v34  ;;  %v2412_v59 = vsel %vm2400_vm6, %v2394_v25, %v2411_v12 }
 0xacb   :  { %v2413_v30 = vsel %vm2399_vm5, %v2410_v45, %v2412_v59  ;;  %v8785_v62 = vmul.u32.u64.low %v2414_v28, %v2409_v33  ;;  %v8786_v27 = vmul.u32.u64.high %v2414_v28, %v2409_v33, %v8785_v62  ;;  %v2405_v42 = vsel %vm2399_vm5, %v2402_v5, %v2404_v32 }
 0xacc   :  { %v2532_v6 = vshrl.u32 %v2531_v15, 30  ;;  %v8788_v19 = vmul.u32.u64.low %v2414_v28, %v2413_v30  ;;  %v8789_v29 = vmul.u32.u64.high %v2414_v28, %v2413_v30, %v8788_v19  ;;  %v2421_v7 = vmul.u32 %v2414_v28, %v2405_v42 }
 0xacd   :  { %v2424_v18 = vadd.s32 1, %v8786_v27  ;;  %v2526_v60 = vadd.s32 %v8765_v24, %v8762_v9  ;;  %vm2472_vm6 = vcmp.lt.s32.totalorder %v8724_v44, 0  ;;  %vm2471_vm10 = vcmp.le.f32.partialorder %v2470_v17, 0.7853982  ;;  %v2830_v17 = vld [vmem:[%s10140_s20 + $0x8] sm:$0xff] }
 0xace   :  { %v2533_v14 = vshll.u32 %v2532_v6, 30  ;;  %vm2423_vm1 = vc.u32 %v8789_v29, %v8785_v62  ;;  %v2422_v30 = vadd.s32 %v8785_v62, %v8789_v29  ;;  %v2556_v19 = vsub.s32 4, %v2532_v6 }
 0xacf   :  { %v2425_v48 = vsel %vm2423_vm1, %v2424_v18, %v8786_v27  ;;  %vm2368_vm5 = vcmp.lt.s32.totalorder %v8732_v1, 0  ;;  %vm8804_vm1 = vcmp.le.f32.partialorder %v2366_v26, 0.7853982 }
 0xad0   :  { %v2534_v58 = vsub.s32 %v2530_v51, %v2533_v14  ;;  %v2426_v10 = vadd.s32 %v2425_v48, %v2421_v7 }
 0xad2   :  { %v2536_v63 = vsub.s32 0, %v2534_v58  ;;  %v2427_v8 = vadd.s32 536870912, %v2426_v10 }
 0xad4   :  { %v6487_v20 = vmin.u32 %v2536_v63, %v2534_v58  ;;  %v2428_v49 = vshrl.u32 %v2427_v8, 30 }
 0xad6   :  { %v2538_v2 = vclz %v6487_v20  ;;  %v2429_v22 = vshll.u32 %v2428_v49, 30 }
 0xad8   :  { %v6488_v0 = vadd.s32 4294967294, %v2538_v2  ;;  %v2430_v52 = vsub.s32 %v2426_v10, %v2429_v22  ;;  %v2557_v10 = vsel %vm2472_vm6, %v2556_v19, %v2532_v6 }
 0xad9   :  { %v2559_v8 = vsel %vm2471_vm10, 0, %v2557_v10 }
 0xada   :  { %vm6489_vm9 = vcmp.lt.s32.totalorder %v6488_v0, 0  ;;  %v2432_v31 = vsub.s32 0, %v2430_v52 }
 0xadb   :  { %v2541_v56 = vsel %vm6489_vm9, 0, %v6488_v0  ;;  %v2563_v0 = vadd.s32 3, %v2559_v8 }
 0xadc   :  { %v2542_v25 = vsub.s32 32, %v2541_v56  ;;  %v2546_v28 = vsub.s32 4294967266, %v2541_v56  ;;  %v2543_v61 = vshll.u32 %v2534_v58, %v2541_v56  ;;  %v6483_v54 = vmin.u32 %v2432_v31, %v2430_v52 }
 0xadd   :  { %v2452_v56 = vsub.s32 4, %v2428_v49 }
 0xade   :  { %v2544_v38 = vshrl.u32 %v2526_v60, %v2542_v25  ;;  %v2547_v51 = vadd.s32 127, %v2546_v28  ;;  %v2434_v5 = vclz %v6483_v54  ;;  %v2564_v60 = vand.u32 3, %v2563_v0 }
 0xadf   :  { %v2453_v25 = vsel %vm2368_vm5, %v2452_v56, %v2428_v49  ;;  %v2584_v49 = vpop.permute.xlu1 %2583  ;;  %v2593_v56 = vld [vmem:[%s10139_s28 + $0x8] sm:$0xff] }
 0xae0   :  { %v2545_v16 = vor.u32 %v2544_v38, %v2543_v61  ;;  %v2548_v45 = vshll.u32 %v2547_v51, 23  ;;  %v6484_v12 = vadd.s32 4294967294, %v2434_v5  ;;  %vm2569_vm9 = vcmp.eq.s32.totalorder %v2564_v60, 2 }
 0xae1   :  { %v2455_v26 = vsel %vm8804_vm1, 0, %v2453_v25  ;;  %v3169_v25 = vld [vmem:[%s10144_s6 + $0x8] sm:$0xff] }
 0xae2   :  { %v2549_v34 = vor.u32 4788187, %v2548_v45  ;;  %v2552_v32 = vcvt.s32.f32 %v2545_v16  ;;  %vm6485_vm3 = vcmp.lt.s32.totalorder %v6484_v12, 0  ;;  %v2459_v45 = vadd.s32 3, %v2455_v26 }
 0xae3   :  { %v2437_v59 = vsel %vm6485_vm3, 0, %v6484_v12  ;;  %vm2566_vm3 = vcmp.eq.s32.totalorder %v2564_v60, 0 }
 0xae4   :  { %v2550_v15 = vand.u32 2147483647, %v2549_v34  ;;  %v2438_v9 = vsub.s32 32, %v2437_v59  ;;  %v2442_v24 = vsub.s32 4294967266, %v2437_v59  ;;  %v2439_v42 = vshll.u32 %v2430_v52, %v2437_v59 }
 0xae6   :  { %v2553_v33 = vmul.f32 %v2552_v32, %v2550_v15  ;;  %v2440_v14 = vshrl.u32 %v2422_v30, %v2438_v9  ;;  %v2443_v18 = vadd.s32 127, %v2442_v24  ;;  %v2460_v15 = vand.u32 3, %v2459_v45 }
 0xae8   :  { %v2554_v27 = vxor.u32 2147483648, %v2553_v33  ;;  %v2441_v48 = vor.u32 %v2440_v14, %v2439_v42  ;;  %v2444_v63 = vshll.u32 %v2443_v18, 23  ;;  %v2579_v14 = vpop.permute.xlu0 %2578 }
 0xaea   :  { %v2555_v58 = vsel %vm2472_vm6, %v2554_v27, %v2553_v33  ;;  %v2445_v62 = vor.u32 4788187, %v2444_v63  ;;  %v2448_v20 = vcvt.s32.f32 %v2441_v48  ;;  %vm2565_vm6 = vcmp.lt.s32.totalorder %v2564_v60, 2  ;;  %v3167_v60 = vld [vmem:[%s10143_s21 + $0x8] sm:$0xff] }
 0xaeb   :  { %v2558_v7 = vsel %vm2471_vm10, %v8724_v44, %v2555_v58  ;;  %vm2562_vm10 = vweird.f32 %v8724_v44 }
 0xaec   :  { %7340 = vcosq.f32 %v2558_v7  ;;  %v2446_v29 = vand.u32 2147483647, %v2445_v62 }
 0xaed   :  { %7342 = vsinq.f32 %v2558_v7 }
 0xaee   :  { %v2449_v2 = vmul.f32 %v2448_v20, %v2446_v29 }
 0xaf0   :  { %v2450_v22 = vxor.u32 2147483648, %v2449_v2 }
 0xaf2   :  { %v2451_v52 = vsel %vm2368_vm5, %v2450_v22, %v2449_v2  ;;  %vm2465_vm5 = vcmp.eq.s32.totalorder %v2460_v15, 2 }
 0xaf3   :  { %v2454_v6 = vsel %vm8804_vm1, %v8732_v1, %v2451_v52  ;;  %vm2462_vm1 = vcmp.eq.s32.totalorder %v2460_v15, 0  ;;  %v2832_v52 = vld [vmem:[%s10141_s2 + $0x8] sm:$0xff] }
 0xaf4   :  { %7344 = vcosq.f32 %v2454_v6 }
 0xaf5   :  { %7346 = vsinq.f32 %v2454_v6  ;;  %v3072_v6 = vld [vmem:[%s10142_s0 + $0x8] sm:$0xff] }
 0xaf9   :  { %v7341_v28 = vpop.eup %7340 }
 0xafa   :  { %v7343_v31 = vpop.eup %7342  ;;  %v2570_v61 = vxor.u32 2147483648, %v7341_v28 }
 0xafb   :  { %v2567_v38 = vxor.u32 2147483648, %v7343_v31 }
 0xafc   :  { %v2571_v51 = vsel %vm2569_vm9, %v2570_v61, %v7343_v31  ;;  %vm2461_vm9 = vcmp.lt.s32.totalorder %v2460_v15, 2  ;;  %v2592_v15 = vld [vmem:[%s10139_s28] sm:$0xff]  ;;  %s10152_s28 = sld [smem:[#allocation23_spill]] }
 0xafd   :  { %v2568_v54 = vsel %vm2566_vm3, %v7341_v28, %v2567_v38  ;;  %vm2458_vm3 = vweird.f32 %v8732_v1 }
 0xafe   :  { %v2572_v16 = vsel %vm2565_vm6, %v2568_v54, %v2571_v51  ;;  %vm10066_vm6 = vcmask 72704  }
 0xaff   :  { %v2573_v5 = vsel %vm2562_vm10, nan, %v2572_v16  ;;  %vm2605_vm10 = vcmask 334848  }
 0xb00   :  { %v2575_v34 = vmul.f32 %v2573_v5, %v2573_v5 }
 0xb01   :  { %v7345_v32 = vpop.eup %7344 }
 0xb02   :  { %v2587_v12 = vmul.f32 %v2584_v49, %v2575_v34  ;;  %v7347_v59 = vpop.eup %7346  ;;  %v2466_v30 = vxor.u32 2147483648, %v7345_v32  ;;  %v2590_v49 = vld [vmem:[%s10145_s27] sm:$0xff] }
 0xb03   :  { %v2463_v9 = vxor.u32 2147483648, %v7347_v59  ;;  %6908 = vmatprep.mubr.msk.f32.mxu1 %vm1931_vm2, %v2590_v49 }
 0xb04   :  { %v2589_v33 = vadd.f32 %v2587_v12, %v8721_v46  ;;  %v2467_v24 = vsel %vm2465_vm5, %v2466_v30, %v7347_v59  ;;  %v3071_v59 = vld [vmem:[%s10142_s0] sm:$0xff]  ;;  %s10155_s0 = sld [smem:[#allocation49_spill]] }
 0xb05   :  { %v2464_v44 = vsel %vm2462_vm1, %v7345_v32, %v2463_v9  ;;  %v2829_v32 = vld [vmem:[%s10140_s20] sm:$0xff]  ;;  %s10153_s20 = sld [smem:[#allocation24_spill]] }
 0xb06   :  { %2648 = vrot.lane.b32.xlu1 %v2589_v33, %s7520_s8  ;;  %v2468_v27 = vsel %vm2461_vm9, %v2464_v44, %v2467_v24  ;;  %v3166_v30 = vld [vmem:[%s10143_s21] sm:$0xff]  ;;  %s10156_s21 = sld [smem:[#allocation50_spill]] }
 0xb07   :  { %v2469_v19 = vsel %vm2458_vm3, nan, %v2468_v27  ;;  %v3168_v9 = vld [vmem:[%s10144_s6] sm:$0xff]  ;;  %s10157_s6 = sld [smem:[#allocation18_spill]] }
 0xb08   :  { %v2574_v42 = vmul.f32 %v2469_v19, %v2469_v19 }
 0xb0a   :  { %2598 = vrot.lane.b32.xlu1 %v2589_v33, %s7521_s14  ;;  %v2586_v18 = vmul.f32 %v2579_v14, %v2574_v42  ;;  %v2831_v33 = vld [vmem:[%s10141_s2] sm:$0xff]  ;;  %s10154_s2 = sld [smem:[#allocation19_spill]] }
 0xb0c   :  { %v2588_v58 = vadd.f32 %v2586_v18, %v8727_v21 }
 0xb0e   :  { %2646 = vrot.lane.b32.xlu0 %v2588_v58, %s7520_s8  ;;  %s10151_s8 = sld [smem:[#allocation17_spill]] }
 0xb12   :  { %2596 = vrot.lane.b32.xlu0 %v2588_v58, %s7521_s14 }
 0xb78   :  { %v2649_v7 = vpop.permute.xlu1 %2648 }
 0xb79   :  { %v2653_v48 = vsel %vm10066_vm6, 0.0, %v2649_v7 }
 0xb7a   :  { %v2655_v1 = vsel %vm2605_vm10, %v2653_v48, 0.0 }
 0xb7b   :  { %2680 = vrot.lane.b32.xlu1 %v2655_v1, %s7522_s23 }
 0xb7c   :  { %v2599_v29 = vpop.permute.xlu1 %2598 }
 0xb7d   :  { %v2604_v20 = vsel %vm10066_vm6, 0.0, %v2599_v29 }
 0xb7e   :  { %v8839_v8 = vsel %vm2605_vm10, %v2604_v20, 0.0 }
 0xb7f   :  { %2676 = vrot.lane.b32.xlu1 %v2655_v1, %s7513_s19 }
 0xb80   :  { %v2647_v63 = vpop.permute.xlu0 %2646 }
 0xb81   :  { %v2652_v10 = vsel %vm10066_vm6, 0.0, %v2647_v63 }
 0xb82   :  { %v8826_v62 = vsel %vm2605_vm10, %v2652_v10, 0.0 }
 0xb83   :  { %2672 = vrot.lane.b32.xlu1 %v2655_v1, %s7523_s22  ;;  %2678 = vrot.lane.b32.xlu0 %v8826_v62, %s7522_s23 }
 0xb84   :  { %v2597_v2 = vpop.permute.xlu0 %2596 }
 0xb85   :  { %v2603_v0 = vsel %vm10066_vm6, 0.0, %v2597_v2 }
 0xb86   :  { %v8861_v22 = vsel %vm2605_vm10, %v2603_v0, 0.0 }
 0xb87   :  { %2668 = vrot.lane.b32.xlu1 %v2655_v1, %s7524_s1  ;;  %2674 = vrot.lane.b32.xlu0 %v8826_v62, %s7513_s19 }
 0xb8b   :  { %2664 = vrot.lane.b32.xlu1 %v2655_v1, %s7501_s5  ;;  %2670 = vrot.lane.b32.xlu0 %v8826_v62, %s7523_s22 }
 0xb8f   :  { %2660 = vrot.lane.b32.xlu1 %v2655_v1, %s7502_s9  ;;  %2666 = vrot.lane.b32.xlu0 %v8826_v62, %s7524_s1 }
 0xb93   :  { %2642 = vrot.lane.b32.xlu1 %v8839_v8, %s7522_s23  ;;  %2662 = vrot.lane.b32.xlu0 %v8826_v62, %s7501_s5 }
 0xb97   :  { %2636 = vrot.lane.b32.xlu1 %v8839_v8, %s7513_s19  ;;  %2658 = vrot.lane.b32.xlu0 %v8826_v62, %s7502_s9 }
 0xb9b   :  { %2630 = vrot.lane.b32.xlu1 %v8839_v8, %s7523_s22 }
 0xb9f   :  { %2624 = vrot.lane.b32.xlu1 %v8839_v8, %s7524_s1 }
 0xba3   :  { %2618 = vrot.lane.b32.xlu1 %v8839_v8, %s7501_s5 }
 0xba7   :  { %2612 = vrot.lane.b32.xlu1 %v8839_v8, %s7502_s9 }
 0xbab   :  { %2640 = vrot.lane.b32.xlu1 %v8861_v22, %s7522_s23 }
 0xbaf   :  { %2634 = vrot.lane.b32.xlu1 %v8861_v22, %s7513_s19 }
 0xbb3   :  { %2628 = vrot.lane.b32.xlu1 %v8861_v22, %s7523_s22 }
 0xbb7   :  { %2622 = vrot.lane.b32.xlu1 %v8861_v22, %s7524_s1 }
 0xbbb   :  { %2616 = vrot.lane.b32.xlu1 %v8861_v22, %s7501_s5 }
 0xbbf   :  { %2610 = vrot.lane.b32.xlu1 %v8861_v22, %s7502_s9 }
 0xbc3   :  { %2684 = vrot.lane.b32.xlu1 %v2655_v1, %s7519_s16 }
 0xbc7   :  { %2745 = vperm.xlu1 %7307, %v2593_v56  }
 0xbcb   :  { %2840 = vperm.xlu1 %7307, %v2830_v17  }
 0xbcf   :  { %3062 = vperm.xlu1 %7307, %v2832_v52  }
 0xbd3   :  { %3080 = vperm.xlu1 %7307, %v3072_v6  }
 0xbd7   :  { %3177 = vperm.xlu1 %7307, %v3167_v60  }
 0xbdb   :  { %3399 = vperm.xlu1 %7307, %v3169_v25  }
 0xbed   :  { %v2681_v28 = vpop.permute.xlu1 %2680 }
 0xbee   :  { %2708 = vrot.lane.b32.xlu0 %v2681_v28, %s7519_s16 }
 0xbf1   :  { %v2677_v31 = vpop.permute.xlu1 %2676 }
 0xbf2   :  { %2704 = vrot.lane.b32.xlu0 %v2677_v31, %s7519_s16 }
 0xbf5   :  { %v2673_v61 = vpop.permute.xlu1 %2672  ;;  %v2679_v26 = vpop.permute.xlu0 %2678 }
 0xbf6   :  { %2700 = vrot.lane.b32.xlu0 %v2673_v61, %s7519_s16 }
 0xbf9   :  { %v2669_v38 = vpop.permute.xlu1 %2668  ;;  %v2675_v54 = vpop.permute.xlu0 %2674 }
 0xbfa   :  { %2696 = vrot.lane.b32.xlu0 %v2669_v38, %s7519_s16 }
 0xbfd   :  { %v2665_v51 = vpop.permute.xlu1 %2664  ;;  %v2671_v45 = vpop.permute.xlu0 %2670 }
 0xbfe   :  { %2692 = vrot.lane.b32.xlu0 %v2665_v51, %s7519_s16 }
 0xc01   :  { %v2661_v16 = vpop.permute.xlu1 %2660  ;;  %v2667_v5 = vpop.permute.xlu0 %2666 }
 0xc02   :  { %2688 = vrot.lane.b32.xlu0 %v2661_v16, %s7519_s16 }
 0xc05   :  { %v2663_v34 = vpop.permute.xlu0 %2662  ;;  %v2643_v24 = vpop.permute.xlu1 %2642 }
 0xc06   :  { %2706 = vrot.lane.b32.xlu0 %v2679_v26, %s7519_s16 }
 0xc09   :  { %v2659_v12 = vpop.permute.xlu0 %2658  ;;  %v2637_v44 = vpop.permute.xlu1 %2636 }
 0xc0a   :  { %2702 = vrot.lane.b32.xlu0 %v2675_v54, %s7519_s16 }
 0xc0d   :  { %v2631_v27 = vpop.permute.xlu1 %2630 }
 0xc0e   :  { %2698 = vrot.lane.b32.xlu0 %v2671_v45, %s7519_s16 }
 0xc11   :  { %v2625_v19 = vpop.permute.xlu1 %2624 }
 0xc12   :  { %2694 = vrot.lane.b32.xlu0 %v2667_v5, %s7519_s16 }
 0xc15   :  { %v2619_v42 = vpop.permute.xlu1 %2618 }
 0xc16   :  { %2690 = vrot.lane.b32.xlu0 %v2663_v34, %s7519_s16 }
 0xc19   :  { %v2613_v58 = vpop.permute.xlu1 %2612 }
 0xc1a   :  { %2686 = vrot.lane.b32.xlu0 %v2659_v12, %s7519_s16 }
 0xc1d   :  { %v2641_v48 = vpop.permute.xlu1 %2640 }
 0xc1e   :  { %2682 = vrot.lane.b32.xlu0 %v8826_v62, %s7519_s16 }
 0xc21   :  { %v2635_v10 = vpop.permute.xlu1 %2634 }
 0xc22   :  { %2740 = vperm.xlu0 %7306, %v2592_v15  }
 0xc25   :  { %v2629_v29 = vpop.permute.xlu1 %2628 }
 0xc26   :  { %2835 = vperm.xlu0 %7306, %v2829_v32  }
 0xc29   :  { %v2623_v56 = vpop.permute.xlu1 %2622 }
 0xc2a   :  { %3057 = vperm.xlu0 %7306, %v2831_v33  }
 0xc2d   :  { %v2617_v25 = vpop.permute.xlu1 %2616 }
 0xc2e   :  { %3075 = vperm.xlu0 %7306, %v3071_v59   ;;  %v2591_v59 = vld [vmem:[%s10145_s27 + $0x8] sm:$0xff]  ;;  %s7530_s27 = smov 97  }
 0xc31   :  { %v2611_v51 = vpop.permute.xlu1 %2610 }
 0xc32   :  { %3172 = vperm.xlu0 %7306, %v3166_v30   ;;  %v3069_v30 = vld [vmem:[%s10146_s29] sm:$0xff] }
 0xc35   :  { %v2685_v34 = vpop.permute.xlu1 %2684 }
 0xc36   :  { %3394 = vperm.xlu0 %7306, %v3168_v9   ;;  %v2725_v15 = vsel %vm1359_vm12, %v8839_v8, %v2685_v34 }
 0xc42   :  { %v2746_v9 = vpop.permute.xlu1 %2745 }
 0xc46   :  { %v2841_v8 = vpop.permute.xlu1 %2840 }
 0xc60   :  { %v2709_v14 = vpop.permute.xlu0 %2708 }
 0xc61   :  { %v2737_v18 = vsel %vm1359_vm12, %v2643_v24, %v2709_v14 }
 0xc62   :  { %6880 = vmatprep.subr.mxu1 %v2737_v18 }
 0xc63   :  { %6881 = vmatpush3.msra.mxu1 %v2737_v18 }
 0xc64   :  { %v2705_v7 = vpop.permute.xlu0 %2704 }
 0xc65   :  { %v2735_v17 = vsel %vm1359_vm12, %v2637_v44, %v2705_v7 }
 0xc68   :  { %v2701_v1 = vpop.permute.xlu0 %2700 }
 0xc69   :  { %v2733_v60 = vsel %vm1359_vm12, %v2631_v27, %v2701_v1 }
 0xc6c   :  { %v2697_v63 = vpop.permute.xlu0 %2696 }
 0xc6d   :  { %v2731_v61 = vsel %vm1359_vm12, %v2625_v19, %v2697_v63 }
 0xc70   :  { %v2693_v62 = vpop.permute.xlu0 %2692 }
 0xc71   :  { %v2729_v54 = vsel %vm1359_vm12, %v2619_v42, %v2693_v62 }
 0xc74   :  { %v2689_v20 = vpop.permute.xlu0 %2688 }
 0xc75   :  { %v2727_v5 = vsel %vm1359_vm12, %v2613_v58, %v2689_v20 }
 0xc78   :  { %v2707_v2 = vpop.permute.xlu0 %2706 }
 0xc79   :  { %v2736_v0 = vsel %vm1359_vm12, %v2641_v48, %v2707_v2 }
 0xc7a   :  { %6882 = vmatprep.subr.mxu1 %v2736_v0 }
 0xc7b   :  { %6883 = vmatpush3.msra.mxu1 %v2736_v0 }
 0xc7c   :  { %v2703_v52 = vpop.permute.xlu0 %2702  ;;  %6884 = vmatprep.subr.mxu1 %v2735_v17 }
 0xc7d   :  { %6885 = vmatpush3.msra.mxu1 %v2735_v17  ;;  %v2734_v6 = vsel %vm1359_vm12, %v2635_v10, %v2703_v52 }
 0xc7e   :  { %6886 = vmatprep.subr.mxu1 %v2734_v6 }
 0xc7f   :  { %6887 = vmatpush3.msra.mxu1 %v2734_v6 }
 0xc80   :  { %v2699_v28 = vpop.permute.xlu0 %2698  ;;  %6888 = vmatprep.subr.mxu1 %v2733_v60 }
 0xc81   :  { %6889 = vmatpush3.msra.mxu1 %v2733_v60  ;;  %v2732_v31 = vsel %vm1359_vm12, %v2629_v29, %v2699_v28 }
 0xc82   :  { %6890 = vmatprep.subr.mxu1 %v2732_v31 }
 0xc83   :  { %6891 = vmatpush3.msra.mxu1 %v2732_v31 }
 0xc84   :  { %v2695_v38 = vpop.permute.xlu0 %2694  ;;  %6892 = vmatprep.subr.mxu1 %v2731_v61 }
 0xc85   :  { %6893 = vmatpush3.msra.mxu1 %v2731_v61  ;;  %v2730_v26 = vsel %vm1359_vm12, %v2623_v56, %v2695_v38 }
 0xc86   :  { %6894 = vmatprep.subr.mxu1 %v2730_v26 }
 0xc87   :  { %6895 = vmatpush3.msra.mxu1 %v2730_v26 }
 0xc88   :  { %v2691_v16 = vpop.permute.xlu0 %2690  ;;  %6896 = vmatprep.subr.mxu1 %v2729_v54 }
 0xc89   :  { %6897 = vmatpush3.msra.mxu1 %v2729_v54  ;;  %v2728_v45 = vsel %vm1359_vm12, %v2617_v25, %v2691_v16 }
 0xc8a   :  { %6898 = vmatprep.subr.mxu1 %v2728_v45 }
 0xc8b   :  { %6899 = vmatpush3.msra.mxu1 %v2728_v45 }
 0xc8c   :  { %v2687_v49 = vpop.permute.xlu0 %2686  ;;  %6900 = vmatprep.subr.mxu1 %v2727_v5 }
 0xc8d   :  { %6901 = vmatpush3.msra.mxu1 %v2727_v5  ;;  %v2726_v12 = vsel %vm1359_vm12, %v2611_v51, %v2687_v49 }
 0xc8e   :  { %6902 = vmatprep.subr.mxu1 %v2726_v12 }
 0xc8f   :  { %6903 = vmatpush3.msra.mxu1 %v2726_v12 }
 0xc90   :  { %v2683_v32 = vpop.permute.xlu0 %2682  ;;  %6904 = vmatprep.subr.mxu1 %v2725_v15 }
 0xc91   :  { %6905 = vmatpush3.msra.mxu1 %v2725_v15  ;;  %v2724_v33 = vsel %vm1359_vm12, %v8861_v22, %v2683_v32 }
 0xc92   :  { %6906 = vmatprep.subr.mxu1 %v2724_v33 }
 0xc93   :  { %6907 = vmatpush3.msra.mxu1 %v2724_v33 }
 0xc94   :  { %6909 = vmatmul.mubr.msk.f32.vlgmr.msra.gmra.mxu1 %vm1931_vm2, %v2591_v59 }
 0xc95   :  { %6915 = vmatprep.mubr.msk.f32.mxu1 %vm288_vm0, %v3069_v30 }
 0xc9d   :  { %v2741_v24 = vpop.permute.xlu0 %2740 }
 0xca1   :  { %v2836_v22 = vpop.permute.xlu0 %2835 }
 0xd54   :  { %v6910_v44 = vpop.f32.mrf.mxu1 }
 0xd55   :  { %v8924_v27 = vadd.f32 %v6910_v44, %v2746_v9 }
 0xd56   :  { %v2820_v19 = vpop.f32.mrf.mxu1 }
 0xd57   :  { %v8927_v42 = vmul.f32 %v2841_v8, %v8924_v27  ;;  %v8929_v14 = vadd.f32 %v2820_v19, %v2741_v24 }
 0xd59   :  { %v2949_v18 = vand.u32 2147483647, %v8927_v42  ;;  %v2952_v58 = vand.u32 2139095040, %v8927_v42  ;;  %v8934_v7 = vmul.f32 %v2836_v22, %v8929_v14  ;;  %vm3041_vm6 = vweird.f32 %v8927_v42 }
 0xd5b   :  { %v2953_v48 = vshrl.u32 %v2952_v58, 23  ;;  %v2956_v1 = vand.u32 8388607, %v2949_v18  ;;  %v2848_v63 = vand.u32 2139095040, %v8934_v7  ;;  %v2845_v62 = vand.u32 2147483647, %v8934_v7 }
 0xd5d   :  { %v6496_v10 = vadd.s32 4294967169, %v2953_v48  ;;  %v2849_v29 = vshrl.u32 %v2848_v63, 23  ;;  %v2957_v2 = vor.u32 8388608, %v2956_v1  ;;  %v2852_v56 = vand.u32 8388607, %v2845_v62 }
 0xd5f   :  { %v2959_v20 = vadd.s32 1, %v6496_v10  ;;  %v6492_v0 = vadd.s32 4294967169, %v2849_v29  ;;  %v8942_v25 = vshll.u32 %v2957_v2, 8  ;;  %v2853_v61 = vor.u32 8388608, %v2852_v56 }
 0xd61   :  { %vm2960_vm5 = vcmp.gt.s32.totalorder %v2959_v20, 0  ;;  %v2855_v52 = vadd.s32 1, %v6492_v0 }
 0xd62   :  { %v2961_v17 = vsel %vm2960_vm5, %v2959_v20, 0  ;;  %v2893_v20 = vshll.u32 %v2853_v61, 8 }
 0xd63   :  { %v2962_v6 = vshrl.u32 %v2961_v17, 5  ;;  %v2963_v60 = vand.u32 31, %v2961_v17  ;;  %vm2856_vm1 = vcmp.gt.s32.totalorder %v2855_v52, 0 }
 0xd64   :  { %v2857_v59 = vsel %vm2856_vm1, %v2855_v52, 0 }
 0xd65   :  { %v2964_v28 = vsub.s32 32, %v2963_v60  ;;  %v2966_v31 = vshll.u32 %v7507_v35, %v2963_v60  ;;  %v2969_v38 = vshll.u32 %v7508_v37, %v2963_v60  ;;  %v2972_v26 = vshll.u32 %v7509_v39, %v2963_v60 }
 0xd66   :  { %v2975_v51 = vshll.u32 %v7510_v41, %v2963_v60  ;;  %v2978_v54 = vshll.u32 %v7511_v43, %v2963_v60  ;;  %vm2981_vm9 = vcmp.lt.s32.totalorder %v2962_v6, 1  ;;  %vm2983_vm3 = vcmp.lt.s32.totalorder %v2962_v6, 3 }
 0xd67   :  { %v2967_v16 = vshrl.u32 %v7508_v37, %v2964_v28  ;;  %v2970_v45 = vshrl.u32 %v7509_v39, %v2964_v28  ;;  %v2973_v5 = vshrl.u32 %v7510_v41, %v2964_v28  ;;  %v2965_v34 = vshrl.u32 %v7507_v35, %v2964_v28 }
 0xd68   :  { %v2976_v49 = vshrl.u32 %v7511_v43, %v2964_v28  ;;  %v2979_v12 = vshrl.u32 %v7512_v50, %v2964_v28  ;;  %vm2984_vm10 = vcmp.lt.s32.totalorder %v2962_v6, 4  ;;  %v2859_v24 = vand.u32 31, %v2857_v59 }
 0xd69   :  { %v2968_v15 = vor.u32 %v2967_v16, %v2966_v31  ;;  %v2971_v32 = vor.u32 %v2970_v45, %v2969_v38  ;;  %v2974_v33 = vor.u32 %v2973_v5, %v2972_v26  ;;  %vm2982_vm5 = vcmp.lt.s32.totalorder %v2962_v6, 2 }
 0xd6a   :  { %v2977_v30 = vor.u32 %v2976_v49, %v2975_v51  ;;  %v2980_v9 = vor.u32 %v2979_v12, %v2978_v54  ;;  %v2860_v63 = vsub.s32 32, %v2859_v24  ;;  %v2858_v17 = vshrl.u32 %v2857_v59, 5 }
 0xd6b   :  { %v2985_v44 = vsel %vm2981_vm9, %v2965_v34, %v2968_v15  ;;  %v2986_v8 = vsel %vm2984_vm10, %v2974_v33, 2102212464  ;;  %v2989_v19 = vsel %vm2981_vm9, %v2968_v15, %v2971_v32  ;;  %v2993_v22 = vsel %vm2981_vm9, %v2971_v32, %v2974_v33 }
 0xd6c   :  { %v2987_v58 = vsel %vm2983_vm3, %v2971_v32, %v2986_v8  ;;  %v2990_v48 = vsel %vm2984_vm10, %v2977_v30, 920167782  ;;  %v2994_v1 = vsel %vm2984_vm10, %v2980_v9, 1326507024  ;;  %v2862_v38 = vshll.u32 %v7507_v35, %v2859_v24 }
 0xd6d   :  { %v2991_v10 = vsel %vm2983_vm3, %v2974_v33, %v2990_v48  ;;  %v2995_v29 = vsel %vm2983_vm3, %v2977_v30, %v2994_v1  ;;  %v2988_v2 = vsel %vm2982_vm5, %v2985_v44, %v2987_v58  ;;  %v2863_v26 = vshrl.u32 %v7508_v37, %v2860_v63 }
 0xd6e   :  { %v2992_v0 = vsel %vm2982_vm5, %v2989_v19, %v2991_v10  ;;  %v2996_v56 = vsel %vm2982_vm5, %v2993_v22, %v2995_v29  ;;  %v2865_v6 = vshll.u32 %v7508_v37, %v2859_v24  ;;  %v2866_v61 = vshrl.u32 %v7509_v39, %v2860_v63 }
 0xd6f   :  { %v8963_v52 = vmul.u32.u64.low %v8942_v25, %v2996_v56  ;;  %v8964_v60 = vmul.u32.u64.high %v8942_v25, %v2996_v56, %v8963_v52  ;;  %v8967_v28 = vmul.u32.u64.low %v8942_v25, %v2992_v0  ;;  %v8968_v31 = vmul.u32.u64.high %v8942_v25, %v2992_v0, %v8967_v28 }
 0xd70   :  { %v2868_v51 = vshll.u32 %v7509_v39, %v2859_v24  ;;  %v2869_v54 = vshrl.u32 %v7510_v41, %v2860_v63  ;;  %v2871_v16 = vshll.u32 %v7510_v41, %v2859_v24  ;;  %v2872_v45 = vshrl.u32 %v7511_v43, %v2860_v63 }
 0xd71   :  { %v2864_v5 = vor.u32 %v2863_v26, %v2862_v38  ;;  %v2867_v34 = vor.u32 %v2866_v61, %v2865_v6  ;;  %v2874_v49 = vshll.u32 %v7511_v43, %v2859_v24  ;;  %v2875_v12 = vshrl.u32 %v7512_v50, %v2860_v63 }
 0xd72   :  { %v3004_v15 = vmul.u32 %v8942_v25, %v2988_v2  ;;  %vm3006_vm1 = vc.u32 %v8964_v60, %v8967_v28  ;;  %v3007_v32 = vadd.s32 1, %v8968_v31  ;;  %v2870_v33 = vor.u32 %v2869_v54, %v2868_v51 }
 0xd73   :  { %v2861_v59 = vshrl.u32 %v7507_v35, %v2860_v63  ;;  %v2873_v30 = vor.u32 %v2872_v45, %v2871_v16  ;;  %v2876_v9 = vor.u32 %v2875_v12, %v2874_v49  ;;  %vm2877_vm9 = vcmp.lt.s32.totalorder %v2858_v17, 1 }
 0xd74   :  { %v3008_v44 = vsel %vm3006_vm1, %v3007_v32, %v8968_v31  ;;  %vm2879_vm3 = vcmp.lt.s32.totalorder %v2858_v17, 3  ;;  %vm2880_vm10 = vcmp.lt.s32.totalorder %v2858_v17, 4  ;;  %v2885_v24 = vsel %vm2877_vm9, %v2864_v5, %v2867_v34 }
 0xd75   :  { %v3009_v8 = vadd.s32 %v3008_v44, %v3004_v15  ;;  %v2882_v19 = vsel %vm2880_vm10, %v2870_v33, 2102212464  ;;  %v2886_v22 = vsel %vm2880_vm10, %v2873_v30, 920167782  ;;  %v2889_v25 = vsel %vm2877_vm9, %v2867_v34, %v2870_v33 }
 0xd76   :  { %vm2878_vm5 = vcmp.lt.s32.totalorder %v2858_v17, 2  ;;  %v2881_v58 = vsel %vm2877_vm9, %v2861_v59, %v2864_v5  ;;  %v2887_v48 = vsel %vm2879_vm3, %v2870_v33, %v2886_v22  ;;  %v2890_v1 = vsel %vm2880_vm10, %v2876_v9, 1326507024 }
 0xd77   :  { %v3010_v10 = vadd.s32 536870912, %v3009_v8  ;;  %v2883_v29 = vsel %vm2879_vm3, %v2867_v34, %v2882_v19  ;;  %v2888_v2 = vsel %vm2878_vm5, %v2885_v24, %v2887_v48  ;;  %v2891_v63 = vsel %vm2879_vm3, %v2873_v30, %v2890_v1 }
 0xd78   :  { %v2892_v0 = vsel %vm2878_vm5, %v2889_v25, %v2891_v63  ;;  %v8987_v56 = vmul.u32.u64.low %v2893_v20, %v2888_v2  ;;  %v8988_v52 = vmul.u32.u64.high %v2893_v20, %v2888_v2, %v8987_v56  ;;  %v2884_v6 = vsel %vm2878_vm5, %v2881_v58, %v2883_v29 }
 0xd79   :  { %v3011_v31 = vshrl.u32 %v3010_v10, 30  ;;  %v8990_v38 = vmul.u32.u64.low %v2893_v20, %v2892_v0  ;;  %v8991_v26 = vmul.u32.u64.high %v2893_v20, %v2892_v0, %v8990_v38  ;;  %v2900_v54 = vmul.u32 %v2893_v20, %v2884_v6 }
 0xd7a   :  { %v2903_v51 = vadd.s32 1, %v8988_v52  ;;  %v3005_v9 = vadd.s32 %v8967_v28, %v8964_v60  ;;  %vm2951_vm10 = vcmp.lt.s32.totalorder %v8927_v42, 0  ;;  %vm2950_vm5 = vcmp.le.f32.partialorder %v2949_v18, 0.7853982 }
 0xd7b   :  { %v3012_v61 = vshll.u32 %v3011_v31, 30  ;;  %vm2902_vm1 = vc.u32 %v8991_v26, %v8987_v56  ;;  %v2901_v38 = vadd.s32 %v8987_v56, %v8991_v26 }
 0xd7c   :  { %v2904_v16 = vsel %vm2902_vm1, %v2903_v51, %v8988_v52  ;;  %vm2847_vm1 = vcmp.lt.s32.totalorder %v8934_v7, 0 }
 0xd7d   :  { %v3013_v17 = vsub.s32 %v3009_v8, %v3012_v61  ;;  %v2905_v5 = vadd.s32 %v2904_v16, %v2900_v54  ;;  %v3035_v61 = vsub.s32 4, %v3011_v31 }
 0xd7f   :  { %v3015_v45 = vsub.s32 0, %v3013_v17  ;;  %v2906_v49 = vadd.s32 536870912, %v2905_v5 }
 0xd81   :  { %v6497_v34 = vmin.u32 %v3015_v45, %v3013_v17  ;;  %v2907_v15 = vshrl.u32 %v2906_v49, 30  ;;  %v3036_v49 = vsel %vm2951_vm10, %v3035_v61, %v3011_v31 }
 0xd83   :  { %v3017_v12 = vclz %v6497_v34  ;;  %v2908_v33 = vshll.u32 %v2907_v15, 30 }
 0xd85   :  { %v6498_v32 = vadd.s32 4294967294, %v3017_v12  ;;  %v2909_v30 = vsub.s32 %v2905_v5, %v2908_v33 }
 0xd87   :  { %vm6499_vm9 = vcmp.lt.s32.totalorder %v6498_v32, 0  ;;  %v2911_v24 = vsub.s32 0, %v2909_v30 }
 0xd88   :  { %v3020_v59 = vsel %vm6499_vm9, 0, %v6498_v32  ;;  %v3038_v32 = vsel %vm2950_vm5, 0, %v3036_v49  ;;  %vm9006_vm9 = vcmp.le.f32.partialorder %v2845_v62, 0.7853982 }
 0xd89   :  { %v3021_v44 = vsub.s32 32, %v3020_v59  ;;  %v3025_v20 = vsub.s32 4294967266, %v3020_v59  ;;  %v3022_v8 = vshll.u32 %v3013_v17, %v3020_v59  ;;  %v6493_v25 = vmin.u32 %v2911_v24, %v2909_v30 }
 0xd8a   :  { %v3042_v59 = vadd.s32 3, %v3038_v32 }
 0xd8b   :  { %v3023_v19 = vshrl.u32 %v3005_v9, %v3021_v44  ;;  %v3026_v22 = vadd.s32 127, %v3025_v20  ;;  %v2913_v1 = vclz %v6493_v25  ;;  %v2931_v9 = vsub.s32 4, %v2907_v15 }
 0xd8c   :  { %v3043_v20 = vand.u32 3, %v3042_v59 }
 0xd8d   :  { %v3024_v58 = vor.u32 %v3023_v19, %v3022_v8  ;;  %v3027_v48 = vshll.u32 %v3026_v22, 23  ;;  %v6494_v29 = vadd.s32 4294967294, %v2913_v1  ;;  %v2932_v24 = vsel %vm2847_vm1, %v2931_v9, %v2907_v15  ;;  %v3063_v15 = vpop.permute.xlu1 %3062 }
 0xd8e   :  { %v2934_v62 = vsel %vm9006_vm9, 0, %v2932_v24 }
 0xd8f   :  { %v3028_v10 = vor.u32 4788187, %v3027_v48  ;;  %v3031_v63 = vcvt.s32.f32 %v3024_v58  ;;  %vm6495_vm3 = vcmp.lt.s32.totalorder %v6494_v29, 0 }
 0xd90   :  { %v2916_v52 = vsel %vm6495_vm3, 0, %v6494_v29  ;;  %vm3048_vm3 = vcmp.eq.s32.totalorder %v3043_v20, 2 }
 0xd91   :  { %v3029_v2 = vand.u32 2147483647, %v3028_v10  ;;  %v2917_v60 = vsub.s32 32, %v2916_v52  ;;  %v2921_v28 = vsub.s32 4294967266, %v2916_v52  ;;  %v2918_v51 = vshll.u32 %v2909_v30, %v2916_v52 }
 0xd92   :  { %v2938_v10 = vadd.s32 3, %v2934_v62 }
 0xd93   :  { %v3032_v0 = vmul.f32 %v3031_v63, %v3029_v2  ;;  %v2919_v17 = vshrl.u32 %v2901_v38, %v2917_v60  ;;  %v2922_v54 = vadd.s32 127, %v2921_v28 }
 0xd95   :  { %v3033_v6 = vxor.u32 2147483648, %v3032_v0  ;;  %v2920_v5 = vor.u32 %v2919_v17, %v2918_v51  ;;  %v2923_v34 = vshll.u32 %v2922_v54, 23 }
 0xd97   :  { %v3034_v16 = vsel %vm2951_vm10, %v3033_v6, %v3032_v0  ;;  %v2924_v56 = vor.u32 4788187, %v2923_v34  ;;  %v2927_v12 = vcvt.s32.f32 %v2920_v5  ;;  %vm3045_vm10 = vcmp.eq.s32.totalorder %v3043_v20, 0  ;;  %v3070_v5 = vld [vmem:[%s10146_s29 + $0x8] sm:$0xff]  ;;  %v3081_v34 = vpop.permute.xlu1 %3080  ;;  %s7531_s29 = smov 31  }
 0xd98   :  { %v3037_v45 = vsel %vm2950_vm5, %v8927_v42, %v3034_v16  ;;  %vm3044_vm5 = vcmp.lt.s32.totalorder %v3043_v20, 2  ;;  %v2939_v0 = vand.u32 3, %v2938_v10  ;;  %v3058_v16 = vpop.permute.xlu0 %3057 }
 0xd99   :  { %7348 = vcosq.f32 %v3037_v45  ;;  %v2925_v26 = vand.u32 2147483647, %v2924_v56 }
 0xd9a   :  { %7350 = vsinq.f32 %v3037_v45 }
 0xd9b   :  { %v2928_v33 = vmul.f32 %v2927_v12, %v2925_v26 }
 0xd9c   :  { %v3076_v56 = vpop.permute.xlu0 %3075 }
 0xd9d   :  { %v2929_v30 = vxor.u32 2147483648, %v2928_v33 }
 0xd9f   :  { %v2930_v44 = vsel %vm2847_vm1, %v2929_v30, %v2928_v33  ;;  %vm2944_vm1 = vcmp.eq.s32.totalorder %v2939_v0, 2  ;;  %v3178_v33 = vpop.permute.xlu1 %3177 }
 0xda0   :  { %v2933_v31 = vsel %vm9006_vm9, %v8934_v7, %v2930_v44  ;;  %vm2941_vm9 = vcmp.eq.s32.totalorder %v2939_v0, 0  ;;  %v3173_v30 = vpop.permute.xlu0 %3172 }
 0xda1   :  { %7352 = vcosq.f32 %v2933_v31 }
 0xda2   :  { %7354 = vsinq.f32 %v2933_v31 }
 0xda6   :  { %v7349_v8 = vpop.eup %7348 }
 0xda7   :  { %v7351_v19 = vpop.eup %7350  ;;  %v3049_v22 = vxor.u32 2147483648, %v7349_v8 }
 0xda8   :  { %v3046_v25 = vxor.u32 2147483648, %v7351_v19 }
 0xda9   :  { %v3050_v58 = vsel %vm3048_vm3, %v3049_v22, %v7351_v19  ;;  %vm2940_vm3 = vcmp.lt.s32.totalorder %v2939_v0, 2 }
 0xdaa   :  { %v3047_v48 = vsel %vm3045_vm10, %v7349_v8, %v3046_v25 }
 0xdab   :  { %v3051_v1 = vsel %vm3044_vm5, %v3047_v48, %v3050_v58 }
 0xdac   :  { %v3052_v29 = vsel %vm3041_vm6, nan, %v3051_v1  ;;  %vm2937_vm6 = vweird.f32 %v8934_v7 }
 0xdad   :  { %v3054_v2 = vmul.f32 %v3052_v29, %v3052_v29 }
 0xdae   :  { %v7353_v52 = vpop.eup %7352 }
 0xdaf   :  { %v3066_v63 = vmul.f32 %v3063_v15, %v3054_v2  ;;  %v7355_v60 = vpop.eup %7354  ;;  %v2945_v28 = vxor.u32 2147483648, %v7353_v52 }
 0xdb0   :  { %v2942_v6 = vxor.u32 2147483648, %v7355_v60 }
 0xdb1   :  { %v3068_v38 = vadd.f32 %v3066_v63, %v8924_v27  ;;  %v2946_v61 = vsel %vm2944_vm1, %v2945_v28, %v7355_v60 }
 0xdb2   :  { %v2943_v42 = vsel %vm2941_vm9, %v7353_v52, %v2942_v6 }
 0xdb3   :  { %6911 = vmatprep.subr.mxu1 %v3068_v38  ;;  %v2947_v51 = vsel %vm2940_vm3, %v2943_v42, %v2946_v61 }
 0xdb4   :  { %6912 = vmatpush3.msra.mxu1 %v3068_v38  ;;  %v2948_v17 = vsel %vm2937_vm6, nan, %v2947_v51 }
 0xdb5   :  { %v3053_v54 = vmul.f32 %v2948_v17, %v2948_v17 }
 0xdb7   :  { %v3065_v45 = vmul.f32 %v3058_v16, %v3053_v54 }
 0xdb9   :  { %v3067_v27 = vadd.f32 %v3065_v45, %v8929_v14 }
 0xdbb   :  { %6913 = vmatprep.subr.mxu1 %v3067_v27 }
 0xdbc   :  { %6914 = vmatpush3.msra.mxu1 %v3067_v27 }
 0xdbd   :  { %6916 = vmatmul.mubr.msk.f32.vlgmr.msra.gmra.mxu1 %vm288_vm0, %v3070_v5 }
 0xe7d   :  { %v6917_v49 = vpop.f32.mrf.mxu1 }
 0xe7e   :  { %v3161_v26 = vadd.f32 %v6917_v49, %v3081_v34 }
 0xe7f   :  { %v3155_v12 = vpop.f32.mrf.mxu1 }
 0xe80   :  { %v9022_v32 = vadd.f32 %v3161_v26, %v8721_v46  ;;  %v3156_v7 = vadd.f32 %v3155_v12, %v3076_v56 }
 0xe82   :  { %v9025_v59 = vmul.f32 %v3178_v33, %v9022_v32  ;;  %v9028_v14 = vadd.f32 %v3156_v7, %v8727_v21 }
 0xe84   :  { %v3286_v9 = vand.u32 2147483647, %v9025_v59  ;;  %v3289_v18 = vand.u32 2139095040, %v9025_v59  ;;  %v9033_v44 = vmul.f32 %v3173_v30, %v9028_v14 }
 0xe86   :  { %v3290_v31 = vshrl.u32 %v3289_v18, 23  ;;  %v3293_v46 = vand.u32 8388607, %v3286_v9  ;;  %v3185_v20 = vand.u32 2139095040, %v9033_v44  ;;  %v3182_v8 = vand.u32 2147483647, %v9033_v44 }
 0xe88   :  { %v6506_v24 = vadd.s32 4294967169, %v3290_v31  ;;  %v3186_v19 = vshrl.u32 %v3185_v20, 23  ;;  %v3294_v22 = vor.u32 8388608, %v3293_v46  ;;  %v3189_v62 = vand.u32 8388607, %v3182_v8 }
 0xe8a   :  { %v3296_v21 = vadd.s32 1, %v6506_v24  ;;  %v6502_v25 = vadd.s32 4294967169, %v3186_v19  ;;  %v9041_v29 = vshll.u32 %v3294_v22, 8  ;;  %v3190_v63 = vor.u32 8388608, %v3189_v62 }
 0xe8c   :  { %vm3297_vm10 = vcmp.gt.s32.totalorder %v3296_v21, 0  ;;  %v3192_v48 = vadd.s32 1, %v6502_v25  ;;  %v3230_v24 = vshll.u32 %v3190_v63, 8 }
 0xe8d   :  { %v3298_v58 = vsel %vm3297_vm10, %v3296_v21, 0 }
 0xe8e   :  { %v3299_v1 = vshrl.u32 %v3298_v58, 5  ;;  %v3300_v10 = vand.u32 31, %v3298_v58  ;;  %vm3193_vm5 = vcmp.gt.s32.totalorder %v3192_v48, 0 }
 0xe8f   :  { %v3194_v27 = vsel %vm3193_vm5, %v3192_v48, 0 }
 0xe90   :  { %v3301_v2 = vsub.s32 32, %v3300_v10  ;;  %v3303_v15 = vshll.u32 %v7507_v35, %v3300_v10  ;;  %v3306_v0 = vshll.u32 %v7508_v37, %v3300_v10  ;;  %v3309_v52 = vshll.u32 %v7509_v39, %v3300_v10 }
 0xe91   :  { %v3312_v38 = vshll.u32 %v7510_v41, %v3300_v10  ;;  %v3315_v60 = vshll.u32 %v7511_v43, %v3300_v10  ;;  %vm3318_vm1 = vcmp.lt.s32.totalorder %v3299_v1, 1  ;;  %vm3320_vm9 = vcmp.lt.s32.totalorder %v3299_v1, 3 }
 0xe92   :  { %v3304_v28 = vshrl.u32 %v7508_v37, %v3301_v2  ;;  %v3307_v6 = vshrl.u32 %v7509_v39, %v3301_v2  ;;  %v3310_v61 = vshrl.u32 %v7510_v41, %v3301_v2  ;;  %v3302_v42 = vshrl.u32 %v7507_v35, %v3301_v2 }
 0xe93   :  { %v3313_v51 = vshrl.u32 %v7511_v43, %v3301_v2  ;;  %v3316_v17 = vshrl.u32 %v7512_v50, %v3301_v2  ;;  %vm3321_vm3 = vcmp.lt.s32.totalorder %v3299_v1, 4  ;;  %v3196_v49 = vand.u32 31, %v3194_v27 }
 0xe94   :  { %v3305_v54 = vor.u32 %v3304_v28, %v3303_v15  ;;  %v3308_v16 = vor.u32 %v3307_v6, %v3306_v0  ;;  %v3311_v45 = vor.u32 %v3310_v61, %v3309_v52  ;;  %vm3319_vm6 = vcmp.lt.s32.totalorder %v3299_v1, 2 }
 0xe95   :  { %v3314_v5 = vor.u32 %v3313_v51, %v3312_v38  ;;  %v3317_v34 = vor.u32 %v3316_v17, %v3315_v60  ;;  %v3197_v31 = vsub.s32 32, %v3196_v49  ;;  %v3195_v25 = vshrl.u32 %v3194_v27, 5 }
 0xe96   :  { %v3322_v56 = vsel %vm3318_vm1, %v3302_v42, %v3305_v54  ;;  %v3323_v26 = vsel %vm3321_vm3, %v3311_v45, 2102212464  ;;  %v3326_v12 = vsel %vm3318_vm1, %v3305_v54, %v3308_v16  ;;  %v3330_v7 = vsel %vm3318_vm1, %v3308_v16, %v3311_v45 }
 0xe97   :  { %v3324_v33 = vsel %vm3320_vm9, %v3308_v16, %v3323_v26  ;;  %v3327_v30 = vsel %vm3321_vm3, %v3314_v5, 920167782  ;;  %v3331_v18 = vsel %vm3321_vm3, %v3317_v34, 1326507024  ;;  %v3199_v2 = vshll.u32 %v7507_v35, %v3196_v49 }
 0xe98   :  { %v3328_v46 = vsel %vm3320_vm9, %v3311_v45, %v3327_v30  ;;  %v3332_v20 = vsel %vm3320_vm9, %v3314_v5, %v3331_v18  ;;  %v3325_v19 = vsel %vm3319_vm6, %v3322_v56, %v3324_v33  ;;  %v3200_v15 = vshrl.u32 %v7508_v37, %v3197_v31 }
 0xe99   :  { %v3329_v21 = vsel %vm3319_vm6, %v3326_v12, %v3328_v46  ;;  %v3333_v22 = vsel %vm3319_vm6, %v3330_v7, %v3332_v20  ;;  %v3202_v1 = vshll.u32 %v7508_v37, %v3196_v49  ;;  %v3203_v63 = vshrl.u32 %v7509_v39, %v3197_v31 }
 0xe9a   :  { %v9062_v62 = vmul.u32.u64.low %v9041_v29, %v3333_v22  ;;  %v9063_v58 = vmul.u32.u64.high %v9041_v29, %v3333_v22, %v9062_v62  ;;  %v9066_v48 = vmul.u32.u64.low %v9041_v29, %v3329_v21  ;;  %v9067_v10 = vmul.u32.u64.high %v9041_v29, %v3329_v21, %v9066_v48 }
 0xe9b   :  { %v3205_v0 = vshll.u32 %v7509_v39, %v3196_v49  ;;  %v3206_v52 = vshrl.u32 %v7510_v41, %v3197_v31  ;;  %v3208_v38 = vshll.u32 %v7510_v41, %v3196_v49  ;;  %v3209_v60 = vshrl.u32 %v7511_v43, %v3197_v31 }
 0xe9c   :  { %v3201_v28 = vor.u32 %v3200_v15, %v3199_v2  ;;  %v3204_v6 = vor.u32 %v3203_v63, %v3202_v1  ;;  %v3211_v61 = vshll.u32 %v7511_v43, %v3196_v49  ;;  %v3212_v42 = vshrl.u32 %v7512_v50, %v3197_v31 }
 0xe9d   :  { %v3341_v51 = vmul.u32 %v9041_v29, %v3325_v19  ;;  %vm3343_vm10 = vc.u32 %v9063_v58, %v9066_v48  ;;  %v3344_v17 = vadd.s32 1, %v9067_v10  ;;  %v3207_v54 = vor.u32 %v3206_v52, %v3205_v0 }
 0xe9e   :  { %v3198_v16 = vshrl.u32 %v7507_v35, %v3197_v31  ;;  %v3210_v45 = vor.u32 %v3209_v60, %v3208_v38  ;;  %v3213_v27 = vor.u32 %v3212_v42, %v3211_v61  ;;  %vm3214_vm5 = vcmp.lt.s32.totalorder %v3195_v25, 1 }
 0xe9f   :  { %v3345_v5 = vsel %vm3343_vm10, %v3344_v17, %v9067_v10  ;;  %vm3216_vm1 = vcmp.lt.s32.totalorder %v3195_v25, 3  ;;  %vm3217_vm9 = vcmp.lt.s32.totalorder %v3195_v25, 4  ;;  %v3222_v34 = vsel %vm3214_vm5, %v3201_v28, %v3204_v6 }
 0xea0   :  { %v3346_v49 = vadd.s32 %v3345_v5, %v3341_v51  ;;  %v3219_v56 = vsel %vm3217_vm9, %v3207_v54, 2102212464  ;;  %v3223_v26 = vsel %vm3217_vm9, %v3210_v45, 920167782  ;;  %v3226_v29 = vsel %vm3214_vm5, %v3204_v6, %v3207_v54 }
 0xea1   :  { %vm3215_vm3 = vcmp.lt.s32.totalorder %v3195_v25, 2  ;;  %v3218_v12 = vsel %vm3214_vm5, %v3198_v16, %v3201_v28  ;;  %v3224_v7 = vsel %vm3216_vm1, %v3207_v54, %v3223_v26  ;;  %v3227_v33 = vsel %vm3217_vm9, %v3213_v27, 1326507024 }
 0xea2   :  { %v3347_v30 = vadd.s32 536870912, %v3346_v49  ;;  %v3220_v18 = vsel %vm3216_vm1, %v3204_v6, %v3219_v56  ;;  %v3225_v46 = vsel %vm3215_vm3, %v3222_v34, %v3224_v7  ;;  %v3228_v31 = vsel %vm3216_vm1, %v3210_v45, %v3227_v33 }
 0xea3   :  { %v3229_v20 = vsel %vm3215_vm3, %v3226_v29, %v3228_v31  ;;  %v9086_v19 = vmul.u32.u64.low %v3230_v24, %v3225_v46  ;;  %v9087_v21 = vmul.u32.u64.high %v3230_v24, %v3225_v46, %v9086_v19  ;;  %v3221_v2 = vsel %vm3215_vm3, %v3218_v12, %v3220_v18 }
 0xea4   :  { %v3348_v22 = vshrl.u32 %v3347_v30, 30  ;;  %v9089_v62 = vmul.u32.u64.low %v3230_v24, %v3229_v20  ;;  %v9090_v10 = vmul.u32.u64.high %v3230_v24, %v3229_v20, %v9089_v62  ;;  %v3237_v63 = vmul.u32 %v3230_v24, %v3221_v2 }
 0xea5   :  { %v3240_v1 = vadd.s32 1, %v9087_v21  ;;  %v3342_v16 = vadd.s32 %v9066_v48, %v9063_v58  ;;  %vm3288_vm1 = vcmp.lt.s32.totalorder %v9025_v59, 0  ;;  %vm3287_vm9 = vcmp.le.f32.partialorder %v3286_v9, 0.7853982  ;;  %v3646_v9 = vld [vmem:[%s10152_s28 + $0x8] sm:$0xff] }
 0xea6   :  { %v3349_v15 = vshll.u32 %v3348_v22, 30  ;;  %vm3239_vm6 = vc.u32 %v9090_v10, %v9086_v19  ;;  %v3238_v20 = vadd.s32 %v9086_v19, %v9090_v10  ;;  %v3372_v62 = vsub.s32 4, %v3348_v22 }
 0xea7   :  { %v3241_v0 = vsel %vm3239_vm6, %v3240_v1, %v9087_v21  ;;  %vm3184_vm3 = vcmp.lt.s32.totalorder %v9033_v44, 0  ;;  %vm9105_vm6 = vcmp.le.f32.partialorder %v3182_v8, 0.7853982 }
 0xea8   :  { %v3350_v25 = vsub.s32 %v3346_v49, %v3349_v15  ;;  %v3242_v38 = vadd.s32 %v3241_v0, %v3237_v63 }
 0xeaa   :  { %v3352_v52 = vsub.s32 0, %v3350_v25  ;;  %v3243_v28 = vadd.s32 536870912, %v3242_v38 }
 0xeac   :  { %v6507_v60 = vmin.u32 %v3352_v52, %v3350_v25  ;;  %v3244_v61 = vshrl.u32 %v3243_v28, 30 }
 0xeae   :  { %v3354_v6 = vclz %v6507_v60  ;;  %v3245_v51 = vshll.u32 %v3244_v61, 30 }
 0xeb0   :  { %v6508_v42 = vadd.s32 4294967294, %v3354_v6  ;;  %v3246_v54 = vsub.s32 %v3242_v38, %v3245_v51  ;;  %v3373_v38 = vsel %vm3288_vm1, %v3372_v62, %v3348_v22 }
 0xeb1   :  { %v3375_v28 = vsel %vm3287_vm9, 0, %v3373_v38 }
 0xeb2   :  { %vm6509_vm10 = vcmp.lt.s32.totalorder %v6508_v42, 0  ;;  %v3248_v27 = vsub.s32 0, %v3246_v54 }
 0xeb3   :  { %v3357_v17 = vsel %vm6509_vm10, 0, %v6508_v42  ;;  %v3379_v42 = vadd.s32 3, %v3375_v28 }
 0xeb4   :  { %v3358_v45 = vsub.s32 32, %v3357_v17  ;;  %v3362_v24 = vsub.s32 4294967266, %v3357_v17  ;;  %v3359_v5 = vshll.u32 %v3350_v25, %v3357_v17  ;;  %v6503_v56 = vmin.u32 %v3248_v27, %v3246_v54 }
 0xeb5   :  { %v3268_v17 = vsub.s32 4, %v3244_v61 }
 0xeb6   :  { %v3360_v34 = vshrl.u32 %v3342_v16, %v3358_v45  ;;  %v3363_v49 = vadd.s32 127, %v3362_v24  ;;  %v3250_v12 = vclz %v6503_v56  ;;  %v3380_v16 = vand.u32 3, %v3379_v42 }
 0xeb7   :  { %v3269_v45 = vsel %vm3184_vm3, %v3268_v17, %v3244_v61  ;;  %v3400_v61 = vpop.permute.xlu1 %3399  ;;  %v3409_v17 = vld [vmem:[%s10151_s8 + $0x8] sm:$0xff] }
 0xeb8   :  { %v3361_v26 = vor.u32 %v3360_v34, %v3359_v5  ;;  %v3364_v29 = vshll.u32 %v3363_v49, 23  ;;  %v6504_v33 = vadd.s32 4294967294, %v3250_v12  ;;  %vm3385_vm10 = vcmp.eq.s32.totalorder %v3380_v16, 2 }
 0xeb9   :  { %v3271_v8 = vsel %vm9105_vm6, 0, %v3269_v45  ;;  %v3985_v45 = vld [vmem:[%s10156_s21 + $0x8] sm:$0xff] }
 0xeba   :  { %v3365_v7 = vor.u32 4788187, %v3364_v29  ;;  %v3368_v18 = vcvt.s32.f32 %v3361_v26  ;;  %vm6505_vm5 = vcmp.lt.s32.totalorder %v6504_v33, 0  ;;  %v3275_v29 = vadd.s32 3, %v3271_v8 }
 0xebb   :  { %v3253_v31 = vsel %vm6505_vm5, 0, %v6504_v33  ;;  %vm3382_vm5 = vcmp.eq.s32.totalorder %v3380_v16, 0 }
 0xebc   :  { %v3366_v30 = vand.u32 2147483647, %v3365_v7  ;;  %v3254_v58 = vsub.s32 32, %v3253_v31  ;;  %v3258_v48 = vsub.s32 4294967266, %v3253_v31  ;;  %v3255_v2 = vshll.u32 %v3246_v54, %v3253_v31 }
 0xebe   :  { %v3369_v46 = vmul.f32 %v3368_v18, %v3366_v30  ;;  %v3256_v15 = vshrl.u32 %v3238_v20, %v3254_v58  ;;  %v3259_v1 = vadd.s32 127, %v3258_v48  ;;  %v3276_v30 = vand.u32 3, %v3275_v29 }
 0xec0   :  { %v3370_v21 = vxor.u32 2147483648, %v3369_v46  ;;  %v3257_v0 = vor.u32 %v3256_v15, %v3255_v2  ;;  %v3260_v52 = vshll.u32 %v3259_v1, 23  ;;  %v3395_v15 = vpop.permute.xlu0 %3394 }
 0xec2   :  { %v3371_v25 = vsel %vm3288_vm1, %v3370_v21, %v3369_v46  ;;  %v3261_v19 = vor.u32 4788187, %v3260_v52  ;;  %v3264_v60 = vcvt.s32.f32 %v3257_v0  ;;  %vm3381_vm1 = vcmp.lt.s32.totalorder %v3380_v16, 2  ;;  %v3983_v16 = vld [vmem:[%s10155_s0 + $0x8] sm:$0xff] }
 0xec3   :  { %v3374_v63 = vsel %vm3287_vm9, %v9025_v59, %v3371_v25  ;;  %vm3378_vm9 = vweird.f32 %v9025_v59 }
 0xec4   :  { %7356 = vcosq.f32 %v3374_v63  ;;  %v3262_v10 = vand.u32 2147483647, %v3261_v19 }
 0xec5   :  { %7358 = vsinq.f32 %v3374_v63 }
 0xec6   :  { %v3265_v6 = vmul.f32 %v3264_v60, %v3262_v10 }
 0xec8   :  { %v3266_v51 = vxor.u32 2147483648, %v3265_v6 }
 0xeca   :  { %v3267_v54 = vsel %vm3184_vm3, %v3266_v51, %v3265_v6  ;;  %vm3281_vm3 = vcmp.eq.s32.totalorder %v3276_v30, 2 }
 0xecb   :  { %v3270_v22 = vsel %vm9105_vm6, %v9033_v44, %v3267_v54  ;;  %vm3278_vm6 = vcmp.eq.s32.totalorder %v3276_v30, 0  ;;  %v3648_v54 = vld [vmem:[%s10153_s20 + $0x8] sm:$0xff] }
 0xecc   :  { %7360 = vcosq.f32 %v3270_v22 }
 0xecd   :  { %7362 = vsinq.f32 %v3270_v22  ;;  %v3888_v22 = vld [vmem:[%s10154_s2 + $0x8] sm:$0xff] }
 0xed1   :  { %v7357_v24 = vpop.eup %7356 }
 0xed2   :  { %v7359_v27 = vpop.eup %7358  ;;  %v3386_v5 = vxor.u32 2147483648, %v7357_v24 }
 0xed3   :  { %v3383_v34 = vxor.u32 2147483648, %v7359_v27 }
 0xed4   :  { %v3387_v49 = vsel %vm3385_vm10, %v3386_v5, %v7359_v27  ;;  %vm3277_vm10 = vcmp.lt.s32.totalorder %v3276_v30, 2  ;;  %v3408_v30 = vld [vmem:[%s10151_s8] sm:$0xff]  ;;  %s7533_s8 = smov 30  }
 0xed5   :  { %v3384_v56 = vsel %vm3382_vm5, %v7357_v24, %v3383_v34  ;;  %vm3274_vm5 = vweird.f32 %v9033_v44 }
 0xed6   :  { %v3388_v26 = vsel %vm3381_vm1, %v3384_v56, %v3387_v49  ;;  %vm3418_vm1 = vcmask 220160  }
 0xed7   :  { %v3389_v12 = vsel %vm3378_vm9, nan, %v3388_v26  ;;  %vm3421_vm9 = vcmask 482304  }
 0xed8   :  { %v3391_v7 = vmul.f32 %v3389_v12, %v3389_v12 }
 0xed9   :  { %v7361_v18 = vpop.eup %7360 }
 0xeda   :  { %v3403_v33 = vmul.f32 %v3400_v61, %v3391_v7  ;;  %v7363_v31 = vpop.eup %7362  ;;  %v3282_v20 = vxor.u32 2147483648, %v7361_v18  ;;  %v3406_v61 = vld [vmem:[%s10157_s6] sm:$0xff] }
 0xedb   :  { %v3279_v58 = vxor.u32 2147483648, %v7363_v31  ;;  %6946 = vmatprep.mubr.msk.f32.mxu0 %vm1931_vm2, %v3406_v61 }
 0xedc   :  { %v3405_v46 = vadd.f32 %v3403_v33, %v9022_v32  ;;  %v3283_v48 = vsel %vm3281_vm3, %v3282_v20, %v7363_v31  ;;  %v3887_v31 = vld [vmem:[%s10154_s2] sm:$0xff]  ;;  %s10166_s2 = sld [smem:[#allocation52_spill]] }
 0xedd   :  { %v3280_v59 = vsel %vm3278_vm6, %v7361_v18, %v3279_v58  ;;  %v3645_v18 = vld [vmem:[%s10152_s28] sm:$0xff]  ;;  %s10163_s28 = sld [smem:[#allocation29_spill]] }
 0xede   :  { %3464 = vrot.lane.b32.xlu1 %v3405_v46, %s7500_s25  ;;  %v3284_v21 = vsel %vm3277_vm10, %v3280_v59, %v3283_v48  ;;  %v3982_v20 = vld [vmem:[%s10155_s0] sm:$0xff]  ;;  %s7535_s0 = smov 67  }
 0xedf   :  { %v3285_v62 = vsel %vm3274_vm5, nan, %v3284_v21  ;;  %v3984_v58 = vld [vmem:[%s10156_s21] sm:$0xff]  ;;  %s10172_s21 = sld [smem:[#allocation31_spill]] }
 0xee0   :  { %v3390_v2 = vmul.f32 %v3285_v62, %v3285_v62 }
 0xee2   :  { %3414 = vrot.lane.b32.xlu1 %v3405_v46, %s7525_s3  ;;  %v3402_v1 = vmul.f32 %v3395_v15, %v3390_v2  ;;  %v3647_v46 = vld [vmem:[%s10153_s20] sm:$0xff]  ;;  %s10165_s20 = sld [smem:[#allocation30_spill]] }
 0xee4   :  { %v3404_v25 = vadd.f32 %v3402_v1, %v9028_v14 }
 0xee6   :  { %3462 = vrot.lane.b32.xlu0 %v3404_v25, %s7500_s25 }
 0xeea   :  { %3412 = vrot.lane.b32.xlu0 %v3404_v25, %s7525_s3 }
 0xf50   :  { %v3465_v63 = vpop.permute.xlu1 %3464 }
 0xf51   :  { %v3469_v0 = vsel %vm3418_vm1, 0.0, %v3465_v63 }
 0xf52   :  { %v3471_v44 = vsel %vm3421_vm9, %v3469_v0, 0.0 }
 0xf53   :  { %3496 = vrot.lane.b32.xlu1 %v3471_v44, %s7526_s30 }
 0xf54   :  { %v3415_v10 = vpop.permute.xlu1 %3414 }
 0xf55   :  { %v3420_v60 = vsel %vm3418_vm1, 0.0, %v3415_v10 }
 0xf56   :  { %v9142_v28 = vsel %vm3421_vm9, %v3420_v60, 0.0 }
 0xf57   :  { %3492 = vrot.lane.b32.xlu1 %v3471_v44, %s7527_s4 }
 0xf58   :  { %v3463_v52 = vpop.permute.xlu0 %3462 }
 0xf59   :  { %v3468_v38 = vsel %vm3418_vm1, 0.0, %v3463_v52 }
 0xf5a   :  { %v9129_v19 = vsel %vm3421_vm9, %v3468_v38, 0.0 }
 0xf5b   :  { %3488 = vrot.lane.b32.xlu1 %v3471_v44, %s7528_s15  ;;  %3494 = vrot.lane.b32.xlu0 %v9129_v19, %s7526_s30 }
 0xf5c   :  { %v3413_v6 = vpop.permute.xlu0 %3412 }
 0xf5d   :  { %v3419_v42 = vsel %vm3418_vm1, 0.0, %v3413_v6 }
 0xf5e   :  { %v9164_v51 = vsel %vm3421_vm9, %v3419_v42, 0.0 }
 0xf5f   :  { %3484 = vrot.lane.b32.xlu1 %v3471_v44, %s7529_s13  ;;  %3490 = vrot.lane.b32.xlu0 %v9129_v19, %s7527_s4 }
 0xf63   :  { %3480 = vrot.lane.b32.xlu1 %v3471_v44, %s7522_s23  ;;  %3486 = vrot.lane.b32.xlu0 %v9129_v19, %s7528_s15 }
 0xf67   :  { %3476 = vrot.lane.b32.xlu1 %v3471_v44, %s7524_s1  ;;  %3482 = vrot.lane.b32.xlu0 %v9129_v19, %s7529_s13 }
 0xf6b   :  { %3458 = vrot.lane.b32.xlu1 %v9142_v28, %s7526_s30  ;;  %3478 = vrot.lane.b32.xlu0 %v9129_v19, %s7522_s23 }
 0xf6f   :  { %3452 = vrot.lane.b32.xlu1 %v9142_v28, %s7527_s4  ;;  %3474 = vrot.lane.b32.xlu0 %v9129_v19, %s7524_s1 }
 0xf73   :  { %3446 = vrot.lane.b32.xlu1 %v9142_v28, %s7528_s15 }
 0xf77   :  { %3440 = vrot.lane.b32.xlu1 %v9142_v28, %s7529_s13 }
 0xf7b   :  { %3434 = vrot.lane.b32.xlu1 %v9142_v28, %s7522_s23 }
 0xf7f   :  { %3428 = vrot.lane.b32.xlu1 %v9142_v28, %s7524_s1 }
 0xf83   :  { %3456 = vrot.lane.b32.xlu1 %v9164_v51, %s7526_s30 }
 0xf87   :  { %3450 = vrot.lane.b32.xlu1 %v9164_v51, %s7527_s4 }
 0xf8b   :  { %3444 = vrot.lane.b32.xlu1 %v9164_v51, %s7528_s15 }
 0xf8f   :  { %3438 = vrot.lane.b32.xlu1 %v9164_v51, %s7529_s13 }
 0xf93   :  { %3432 = vrot.lane.b32.xlu1 %v9164_v51, %s7522_s23 }
 0xf97   :  { %3426 = vrot.lane.b32.xlu1 %v9164_v51, %s7524_s1 }
 0xf9b   :  { %3500 = vrot.lane.b32.xlu1 %v3471_v44, %s7519_s16 }
 0xf9f   :  { %3561 = vperm.xlu1 %7307, %v3409_v17  }
 0xfa3   :  { %3656 = vperm.xlu1 %7307, %v3646_v9  }
 0xfa7   :  { %3878 = vperm.xlu1 %7307, %v3648_v54  }
 0xfab   :  { %3896 = vperm.xlu1 %7307, %v3888_v22  }
 0xfaf   :  { %3993 = vperm.xlu1 %7307, %v3983_v16  }
 0xfb3   :  { %4215 = vperm.xlu1 %7307, %v3985_v45  }
 0xfc5   :  { %v3497_v24 = vpop.permute.xlu1 %3496 }
 0xfc6   :  { %3524 = vrot.lane.b32.xlu0 %v3497_v24, %s7519_s16 }
 0xfc9   :  { %v3493_v27 = vpop.permute.xlu1 %3492 }
 0xfca   :  { %3520 = vrot.lane.b32.xlu0 %v3493_v27, %s7519_s16 }
 0xfcd   :  { %v3489_v5 = vpop.permute.xlu1 %3488  ;;  %v3495_v8 = vpop.permute.xlu0 %3494 }
 0xfce   :  { %3516 = vrot.lane.b32.xlu0 %v3489_v5, %s7519_s16 }
 0xfd1   :  { %v3485_v34 = vpop.permute.xlu1 %3484  ;;  %v3491_v56 = vpop.permute.xlu0 %3490 }
 0xfd2   :  { %3512 = vrot.lane.b32.xlu0 %v3485_v34, %s7519_s16 }
 0xfd5   :  { %v3481_v49 = vpop.permute.xlu1 %3480  ;;  %v3487_v29 = vpop.permute.xlu0 %3486 }
 0xfd6   :  { %3508 = vrot.lane.b32.xlu0 %v3481_v49, %s7519_s16 }
 0xfd9   :  { %v3477_v26 = vpop.permute.xlu1 %3476  ;;  %v3483_v12 = vpop.permute.xlu0 %3482 }
 0xfda   :  { %3504 = vrot.lane.b32.xlu0 %v3477_v26, %s7519_s16 }
 0xfdd   :  { %v3479_v7 = vpop.permute.xlu0 %3478  ;;  %v3459_v48 = vpop.permute.xlu1 %3458 }
 0xfde   :  { %3522 = vrot.lane.b32.xlu0 %v3495_v8, %s7519_s16 }
 0xfe1   :  { %v3475_v33 = vpop.permute.xlu0 %3474  ;;  %v3453_v59 = vpop.permute.xlu1 %3452 }
 0xfe2   :  { %3518 = vrot.lane.b32.xlu0 %v3491_v56, %s7519_s16 }
 0xfe5   :  { %v3447_v21 = vpop.permute.xlu1 %3446 }
 0xfe6   :  { %3514 = vrot.lane.b32.xlu0 %v3487_v29, %s7519_s16 }
 0xfe9   :  { %v3441_v62 = vpop.permute.xlu1 %3440 }
 0xfea   :  { %3510 = vrot.lane.b32.xlu0 %v3483_v12, %s7519_s16 }
 0xfed   :  { %v3435_v2 = vpop.permute.xlu1 %3434 }
 0xfee   :  { %3506 = vrot.lane.b32.xlu0 %v3479_v7, %s7519_s16 }
 0xff1   :  { %v3429_v25 = vpop.permute.xlu1 %3428 }
 0xff2   :  { %3502 = vrot.lane.b32.xlu0 %v3475_v33, %s7519_s16 }
 0xff5   :  { %v3457_v0 = vpop.permute.xlu1 %3456 }
 0xff6   :  { %3498 = vrot.lane.b32.xlu0 %v9129_v19, %s7519_s16  ;;  %s10158_s16 = sld [smem:[#allocation20_spill]] }
 0xff9   :  { %v3451_v38 = vpop.permute.xlu1 %3450 }
 0xffa   :  { %3556 = vperm.xlu0 %7306, %v3408_v30  }
 0xffd   :  { %v3445_v10 = vpop.permute.xlu1 %3444 }
 0xffe   :  { %3651 = vperm.xlu0 %7306, %v3645_v18  }
0x1001   :  { %v3439_v17 = vpop.permute.xlu1 %3438 }
0x1002   :  { %3873 = vperm.xlu0 %7306, %v3647_v46  }
0x1005   :  { %v3433_v45 = vpop.permute.xlu1 %3432 }
0x1006   :  { %3891 = vperm.xlu0 %7306, %v3887_v31   ;;  %v3407_v31 = vld [vmem:[%s10157_s6 + $0x8] sm:$0xff]  ;;  %s10173_s6 = sld [smem:[#allocation27_spill]] }
0x1009   :  { %v3427_v49 = vpop.permute.xlu1 %3426 }
0x100a   :  { %3988 = vperm.xlu0 %7306, %v3982_v20   ;;  %v3885_v20 = vld [vmem:[%s10158_s16] sm:$0xff] }
0x100b   :  { %6953 = vmatprep.mubr.msk.f32.mxu1 %vm288_vm0, %v3885_v20 }
0x100d   :  { %v3501_v7 = vpop.permute.xlu1 %3500 }
0x100e   :  { %4210 = vperm.xlu0 %7306, %v3984_v58   ;;  %v3541_v30 = vsel %vm1359_vm12, %v9142_v28, %v3501_v7 }
0x101a   :  { %v3562_v58 = vpop.permute.xlu1 %3561 }
0x101e   :  { %v3657_v28 = vpop.permute.xlu1 %3656 }
0x1038   :  { %v3525_v15 = vpop.permute.xlu0 %3524 }
0x1039   :  { %v3553_v1 = vsel %vm1359_vm12, %v3459_v48, %v3525_v15 }
0x103a   :  { %6918 = vmatprep.subr.mxu0 %v3553_v1 }
0x103b   :  { %6919 = vmatpush3.msra.mxu0 %v3553_v1 }
0x103c   :  { %v3521_v63 = vpop.permute.xlu0 %3520 }
0x103d   :  { %v3551_v9 = vsel %vm1359_vm12, %v3453_v59, %v3521_v63 }
0x1040   :  { %v3517_v44 = vpop.permute.xlu0 %3516 }
0x1041   :  { %v3549_v16 = vsel %vm1359_vm12, %v3447_v21, %v3517_v44 }
0x1044   :  { %v3513_v52 = vpop.permute.xlu0 %3512 }
0x1045   :  { %v3547_v5 = vsel %vm1359_vm12, %v3441_v62, %v3513_v52 }
0x1048   :  { %v3509_v19 = vpop.permute.xlu0 %3508 }
0x1049   :  { %v3545_v56 = vsel %vm1359_vm12, %v3435_v2, %v3509_v19 }
0x104c   :  { %v3505_v60 = vpop.permute.xlu0 %3504 }
0x104d   :  { %v3543_v12 = vsel %vm1359_vm12, %v3429_v25, %v3505_v60 }
0x1050   :  { %v3523_v6 = vpop.permute.xlu0 %3522 }
0x1051   :  { %v3552_v42 = vsel %vm1359_vm12, %v3457_v0, %v3523_v6 }
0x1052   :  { %6920 = vmatprep.subr.mxu0 %v3552_v42 }
0x1053   :  { %6921 = vmatpush3.msra.mxu0 %v3552_v42 }
0x1054   :  { %v3519_v54 = vpop.permute.xlu0 %3518  ;;  %6922 = vmatprep.subr.mxu0 %v3551_v9 }
0x1055   :  { %6923 = vmatpush3.msra.mxu0 %v3551_v9  ;;  %v3550_v22 = vsel %vm1359_vm12, %v3451_v38, %v3519_v54 }
0x1056   :  { %6924 = vmatprep.subr.mxu0 %v3550_v22 }
0x1057   :  { %6925 = vmatpush3.msra.mxu0 %v3550_v22 }
0x1058   :  { %v3515_v24 = vpop.permute.xlu0 %3514  ;;  %6926 = vmatprep.subr.mxu0 %v3549_v16 }
0x1059   :  { %6927 = vmatpush3.msra.mxu0 %v3549_v16  ;;  %v3548_v27 = vsel %vm1359_vm12, %v3445_v10, %v3515_v24 }
0x105a   :  { %6928 = vmatprep.subr.mxu0 %v3548_v27 }
0x105b   :  { %6929 = vmatpush3.msra.mxu0 %v3548_v27 }
0x105c   :  { %v3511_v34 = vpop.permute.xlu0 %3510  ;;  %6930 = vmatprep.subr.mxu0 %v3547_v5 }
0x105d   :  { %6931 = vmatpush3.msra.mxu0 %v3547_v5  ;;  %v3546_v8 = vsel %vm1359_vm12, %v3439_v17, %v3511_v34 }
0x105e   :  { %6932 = vmatprep.subr.mxu0 %v3546_v8 }
0x105f   :  { %6933 = vmatpush3.msra.mxu0 %v3546_v8 }
0x1060   :  { %v3507_v26 = vpop.permute.xlu0 %3506  ;;  %6934 = vmatprep.subr.mxu0 %v3545_v56 }
0x1061   :  { %6935 = vmatpush3.msra.mxu0 %v3545_v56  ;;  %v3544_v29 = vsel %vm1359_vm12, %v3433_v45, %v3507_v26 }
0x1062   :  { %6936 = vmatprep.subr.mxu0 %v3544_v29 }
0x1063   :  { %6937 = vmatpush3.msra.mxu0 %v3544_v29 }
0x1064   :  { %v3503_v61 = vpop.permute.xlu0 %3502  ;;  %6938 = vmatprep.subr.mxu0 %v3543_v12 }
0x1065   :  { %6939 = vmatpush3.msra.mxu0 %v3543_v12  ;;  %v3542_v33 = vsel %vm1359_vm12, %v3427_v49, %v3503_v61 }
0x1066   :  { %6940 = vmatprep.subr.mxu0 %v3542_v33 }
0x1067   :  { %6941 = vmatpush3.msra.mxu0 %v3542_v33 }
0x1068   :  { %v3499_v18 = vpop.permute.xlu0 %3498  ;;  %6942 = vmatprep.subr.mxu0 %v3541_v30 }
0x1069   :  { %6943 = vmatpush3.msra.mxu0 %v3541_v30  ;;  %v3540_v46 = vsel %vm1359_vm12, %v9164_v51, %v3499_v18 }
0x106a   :  { %6944 = vmatprep.subr.mxu0 %v3540_v46 }
0x106b   :  { %6945 = vmatpush3.msra.mxu0 %v3540_v46 }
0x106c   :  { %6947 = vmatmul.mubr.msk.f32.vlgmr.msra.gmra.mxu0 %vm1931_vm2, %v3407_v31 }
0x1075   :  { %v3557_v48 = vpop.permute.xlu0 %3556 }
0x1079   :  { %v3652_v51 = vpop.permute.xlu0 %3651 }
0x112c   :  { %v6948_v59 = vpop.f32.mrf.mxu0 }
0x112d   :  { %v9227_v21 = vadd.f32 %v6948_v59, %v3562_v58 }
0x112e   :  { %v3636_v62 = vpop.f32.mrf.mxu0 }
0x112f   :  { %v9230_v2 = vmul.f32 %v3657_v28, %v9227_v21  ;;  %v9232_v15 = vadd.f32 %v3636_v62, %v3557_v48 }
0x1131   :  { %v3765_v1 = vand.u32 2147483647, %v9230_v2  ;;  %v3768_v25 = vand.u32 2139095040, %v9230_v2  ;;  %v9237_v63 = vmul.f32 %v3652_v51, %v9232_v15 }
0x1133   :  { %v3769_v0 = vshrl.u32 %v3768_v25, 23  ;;  %v3772_v44 = vand.u32 8388607, %v3765_v1  ;;  %v3664_v52 = vand.u32 2139095040, %v9237_v63  ;;  %v3661_v19 = vand.u32 2147483647, %v9237_v63 }
0x1135   :  { %v6516_v38 = vadd.s32 4294967169, %v3769_v0  ;;  %v3665_v10 = vshrl.u32 %v3664_v52, 23  ;;  %v3773_v6 = vor.u32 8388608, %v3772_v44  ;;  %v3668_v17 = vand.u32 8388607, %v3661_v19 }
0x1137   :  { %v3775_v60 = vadd.s32 1, %v6516_v38  ;;  %v6512_v42 = vadd.s32 4294967169, %v3665_v10  ;;  %v9245_v45 = vshll.u32 %v3773_v6, 8  ;;  %v3669_v5 = vor.u32 8388608, %v3668_v17 }
0x1139   :  { %vm3776_vm2 = vcmp.gt.s32.totalorder %v3775_v60, 0  ;;  %v3671_v54 = vadd.s32 1, %v6512_v42 }
0x113a   :  { %v3777_v9 = vsel %vm3776_vm2, %v3775_v60, 0  ;;  %v3709_v60 = vshll.u32 %v3669_v5, 8 }
0x113b   :  { %v3778_v22 = vshrl.u32 %v3777_v9, 5  ;;  %v3779_v16 = vand.u32 31, %v3777_v9  ;;  %vm3672_vm3 = vcmp.gt.s32.totalorder %v3671_v54, 0 }
0x113c   :  { %v3673_v31 = vsel %vm3672_vm3, %v3671_v54, 0 }
0x113d   :  { %v3780_v24 = vsub.s32 32, %v3779_v16  ;;  %v3782_v27 = vshll.u32 %v7507_v35, %v3779_v16  ;;  %v3785_v34 = vshll.u32 %v7508_v37, %v3779_v16  ;;  %v3788_v8 = vshll.u32 %v7509_v39, %v3779_v16 }
0x113e   :  { %v3791_v49 = vshll.u32 %v7510_v41, %v3779_v16  ;;  %v3794_v56 = vshll.u32 %v7511_v43, %v3779_v16  ;;  %vm3797_vm6 = vcmp.lt.s32.totalorder %v3778_v22, 1  ;;  %vm3799_vm10 = vcmp.lt.s32.totalorder %v3778_v22, 3 }
0x113f   :  { %v3783_v26 = vshrl.u32 %v7508_v37, %v3780_v24  ;;  %v3786_v29 = vshrl.u32 %v7509_v39, %v3780_v24  ;;  %v3789_v12 = vshrl.u32 %v7510_v41, %v3780_v24  ;;  %v3781_v7 = vshrl.u32 %v7507_v35, %v3780_v24 }
0x1140   :  { %v3792_v61 = vshrl.u32 %v7511_v43, %v3780_v24  ;;  %v3795_v33 = vshrl.u32 %v7512_v50, %v3780_v24  ;;  %vm3800_vm5 = vcmp.lt.s32.totalorder %v3778_v22, 4  ;;  %v3675_v48 = vand.u32 31, %v3673_v31 }
0x1141   :  { %v3784_v30 = vor.u32 %v3783_v26, %v3782_v27  ;;  %v3787_v18 = vor.u32 %v3786_v29, %v3785_v34  ;;  %v3790_v46 = vor.u32 %v3789_v12, %v3788_v8  ;;  %vm3798_vm9 = vcmp.lt.s32.totalorder %v3778_v22, 2 }
0x1142   :  { %v3793_v20 = vor.u32 %v3792_v61, %v3791_v49  ;;  %v3796_v58 = vor.u32 %v3795_v33, %v3794_v56  ;;  %v3676_v52 = vsub.s32 32, %v3675_v48  ;;  %v3674_v9 = vshrl.u32 %v3673_v31, 5 }
0x1143   :  { %v3801_v59 = vsel %vm3797_vm6, %v3781_v7, %v3784_v30  ;;  %v3802_v28 = vsel %vm3800_vm5, %v3790_v46, 2102212464  ;;  %v3805_v62 = vsel %vm3797_vm6, %v3784_v30, %v3787_v18  ;;  %v3809_v51 = vsel %vm3797_vm6, %v3787_v18, %v3790_v46 }
0x1144   :  { %v3803_v25 = vsel %vm3799_vm10, %v3787_v18, %v3802_v28  ;;  %v3806_v0 = vsel %vm3800_vm5, %v3793_v20, 920167782  ;;  %v3810_v44 = vsel %vm3800_vm5, %v3796_v58, 1326507024  ;;  %v3678_v34 = vshll.u32 %v7507_v35, %v3675_v48 }
0x1145   :  { %v3807_v38 = vsel %vm3799_vm10, %v3790_v46, %v3806_v0  ;;  %v3811_v10 = vsel %vm3799_vm10, %v3793_v20, %v3810_v44  ;;  %v3804_v6 = vsel %vm3798_vm9, %v3801_v59, %v3803_v25  ;;  %v3679_v8 = vshrl.u32 %v7508_v37, %v3676_v52 }
0x1146   :  { %v3808_v42 = vsel %vm3798_vm9, %v3805_v62, %v3807_v38  ;;  %v3812_v17 = vsel %vm3798_vm9, %v3809_v51, %v3811_v10  ;;  %v3681_v22 = vshll.u32 %v7508_v37, %v3675_v48  ;;  %v3682_v5 = vshrl.u32 %v7509_v39, %v3676_v52 }
0x1147   :  { %v9266_v54 = vmul.u32.u64.low %v9245_v45, %v3812_v17  ;;  %v9267_v16 = vmul.u32.u64.high %v9245_v45, %v3812_v17, %v9266_v54  ;;  %v9270_v24 = vmul.u32.u64.low %v9245_v45, %v3808_v42  ;;  %v9271_v27 = vmul.u32.u64.high %v9245_v45, %v3808_v42, %v9270_v24 }
0x1148   :  { %v3684_v49 = vshll.u32 %v7509_v39, %v3675_v48  ;;  %v3685_v56 = vshrl.u32 %v7510_v41, %v3676_v52  ;;  %v3687_v26 = vshll.u32 %v7510_v41, %v3675_v48  ;;  %v3688_v29 = vshrl.u32 %v7511_v43, %v3676_v52 }
0x1149   :  { %v3680_v12 = vor.u32 %v3679_v8, %v3678_v34  ;;  %v3683_v7 = vor.u32 %v3682_v5, %v3681_v22  ;;  %v3690_v61 = vshll.u32 %v7511_v43, %v3675_v48  ;;  %v3691_v33 = vshrl.u32 %v7512_v50, %v3676_v52 }
0x114a   :  { %v3820_v30 = vmul.u32 %v9245_v45, %v3804_v6  ;;  %vm3822_vm2 = vc.u32 %v9267_v16, %v9270_v24  ;;  %v3823_v18 = vadd.s32 1, %v9271_v27  ;;  %v3686_v46 = vor.u32 %v3685_v56, %v3684_v49 }
0x114b   :  { %v3677_v31 = vshrl.u32 %v7507_v35, %v3676_v52  ;;  %v3689_v20 = vor.u32 %v3688_v29, %v3687_v26  ;;  %v3692_v58 = vor.u32 %v3691_v33, %v3690_v61  ;;  %vm3693_vm3 = vcmp.lt.s32.totalorder %v3674_v9, 1 }
0x114c   :  { %v3824_v59 = vsel %vm3822_vm2, %v3823_v18, %v9271_v27  ;;  %vm3695_vm6 = vcmp.lt.s32.totalorder %v3674_v9, 3  ;;  %vm3696_vm10 = vcmp.lt.s32.totalorder %v3674_v9, 4  ;;  %v3701_v48 = vsel %vm3693_vm3, %v3680_v12, %v3683_v7 }
0x114d   :  { %v3825_v28 = vadd.s32 %v3824_v59, %v3820_v30  ;;  %v3698_v62 = vsel %vm3696_vm10, %v3686_v46, 2102212464  ;;  %v3702_v51 = vsel %vm3696_vm10, %v3689_v20, 920167782  ;;  %v3705_v45 = vsel %vm3693_vm3, %v3683_v7, %v3686_v46 }
0x114e   :  { %vm3694_vm5 = vcmp.lt.s32.totalorder %v3674_v9, 2  ;;  %v3697_v25 = vsel %vm3693_vm3, %v3677_v31, %v3680_v12  ;;  %v3703_v0 = vsel %vm3695_vm6, %v3686_v46, %v3702_v51  ;;  %v3706_v44 = vsel %vm3696_vm10, %v3692_v58, 1326507024 }
0x114f   :  { %v3826_v38 = vadd.s32 536870912, %v3825_v28  ;;  %v3699_v10 = vsel %vm3695_vm6, %v3683_v7, %v3698_v62  ;;  %v3704_v6 = vsel %vm3694_vm5, %v3701_v48, %v3703_v0  ;;  %v3707_v52 = vsel %vm3695_vm6, %v3689_v20, %v3706_v44 }
0x1150   :  { %v3708_v42 = vsel %vm3694_vm5, %v3705_v45, %v3707_v52  ;;  %v9290_v17 = vmul.u32.u64.low %v3709_v60, %v3704_v6  ;;  %v9291_v54 = vmul.u32.u64.high %v3709_v60, %v3704_v6, %v9290_v17  ;;  %v3700_v22 = vsel %vm3694_vm5, %v3697_v25, %v3699_v10 }
0x1151   :  { %v3827_v27 = vshrl.u32 %v3826_v38, 30  ;;  %v9293_v34 = vmul.u32.u64.low %v3709_v60, %v3708_v42  ;;  %v9294_v8 = vmul.u32.u64.high %v3709_v60, %v3708_v42, %v9293_v34  ;;  %v3716_v56 = vmul.u32 %v3709_v60, %v3700_v22 }
0x1152   :  { %v3719_v49 = vadd.s32 1, %v9291_v54  ;;  %v3821_v58 = vadd.s32 %v9270_v24, %v9267_v16  ;;  %vm3767_vm6 = vcmp.lt.s32.totalorder %v9230_v2, 0  ;;  %vm3766_vm10 = vcmp.le.f32.partialorder %v3765_v1, 0.7853982 }
0x1153   :  { %v3828_v5 = vshll.u32 %v3827_v27, 30  ;;  %vm3718_vm9 = vc.u32 %v9294_v8, %v9290_v17  ;;  %v3717_v34 = vadd.s32 %v9290_v17, %v9294_v8  ;;  %vm3663_vm5 = vcmp.lt.s32.totalorder %v9237_v63, 0 }
0x1154   :  { %v3720_v26 = vsel %vm3718_vm9, %v3719_v49, %v9291_v54  ;;  %vm9309_vm9 = vcmp.le.f32.partialorder %v3661_v19, 0.7853982 }
0x1155   :  { %v3829_v9 = vsub.s32 %v3825_v28, %v3828_v5  ;;  %v3721_v12 = vadd.s32 %v3720_v26, %v3716_v56  ;;  %v3851_v5 = vsub.s32 4, %v3827_v27 }
0x1157   :  { %v3831_v29 = vsub.s32 0, %v3829_v9  ;;  %v3722_v61 = vadd.s32 536870912, %v3721_v12 }
0x1159   :  { %v6517_v7 = vmin.u32 %v3831_v29, %v3829_v9  ;;  %v3723_v30 = vshrl.u32 %v3722_v61, 30  ;;  %v3852_v61 = vsel %vm3767_vm6, %v3851_v5, %v3827_v27 }
0x115b   :  { %v3833_v33 = vclz %v6517_v7  ;;  %v3724_v46 = vshll.u32 %v3723_v30, 30 }
0x115d   :  { %v6518_v18 = vadd.s32 4294967294, %v3833_v33  ;;  %v3725_v20 = vsub.s32 %v3721_v12, %v3724_v46 }
0x115f   :  { %vm6519_vm2 = vcmp.lt.s32.totalorder %v6518_v18, 0  ;;  %v3727_v48 = vsub.s32 0, %v3725_v20 }
0x1160   :  { %v3836_v31 = vsel %vm6519_vm2, 0, %v6518_v18  ;;  %v3854_v18 = vsel %vm3766_vm10, 0, %v3852_v61 }
0x1161   :  { %v3837_v59 = vsub.s32 32, %v3836_v31  ;;  %v3841_v60 = vsub.s32 4294967266, %v3836_v31  ;;  %v3838_v28 = vshll.u32 %v3829_v9, %v3836_v31  ;;  %v6513_v45 = vmin.u32 %v3727_v48, %v3725_v20 }
0x1162   :  { %v3858_v31 = vadd.s32 3, %v3854_v18 }
0x1163   :  { %v3839_v62 = vshrl.u32 %v3821_v58, %v3837_v59  ;;  %v3842_v51 = vadd.s32 127, %v3841_v60  ;;  %v3729_v44 = vclz %v6513_v45  ;;  %v3747_v58 = vsub.s32 4, %v3723_v30 }
0x1164   :  { %v3859_v60 = vand.u32 3, %v3858_v31 }
0x1165   :  { %v3840_v25 = vor.u32 %v3839_v62, %v3838_v28  ;;  %v3843_v0 = vshll.u32 %v3842_v51, 23  ;;  %v6514_v10 = vadd.s32 4294967294, %v3729_v44  ;;  %v3748_v48 = vsel %vm3663_vm5, %v3747_v58, %v3723_v30  ;;  %v3879_v30 = vpop.permute.xlu1 %3878 }
0x1166   :  { %vm3864_vm2 = vcmp.eq.s32.totalorder %v3859_v60, 2  ;;  %v3750_v19 = vsel %vm9309_vm9, 0, %v3748_v48 }
0x1167   :  { %v3844_v38 = vor.u32 4788187, %v3843_v0  ;;  %v3847_v52 = vcvt.s32.f32 %v3840_v25  ;;  %vm6515_vm3 = vcmp.lt.s32.totalorder %v6514_v10, 0 }
0x1168   :  { %v3732_v54 = vsel %vm6515_vm3, 0, %v6514_v10  ;;  %vm3861_vm3 = vcmp.eq.s32.totalorder %v3859_v60, 0 }
0x1169   :  { %v3845_v6 = vand.u32 2147483647, %v3844_v38  ;;  %v3733_v16 = vsub.s32 32, %v3732_v54  ;;  %v3737_v24 = vsub.s32 4294967266, %v3732_v54  ;;  %v3734_v49 = vshll.u32 %v3725_v20, %v3732_v54 }
0x116a   :  { %v3754_v38 = vadd.s32 3, %v3750_v19 }
0x116b   :  { %v3848_v42 = vmul.f32 %v3847_v52, %v3845_v6  ;;  %v3735_v9 = vshrl.u32 %v3717_v34, %v3733_v16  ;;  %v3738_v56 = vadd.s32 127, %v3737_v24 }
0x116d   :  { %v3849_v22 = vxor.u32 2147483648, %v3848_v42  ;;  %v3736_v12 = vor.u32 %v3735_v9, %v3734_v49  ;;  %v3739_v7 = vshll.u32 %v3738_v56, 23 }
0x116f   :  { %v3850_v26 = vsel %vm3767_vm6, %v3849_v22, %v3848_v42  ;;  %v3740_v17 = vor.u32 4788187, %v3739_v7  ;;  %v3743_v33 = vcvt.s32.f32 %v3736_v12  ;;  %vm3860_vm6 = vcmp.lt.s32.totalorder %v3859_v60, 2  ;;  %v3886_v12 = vld [vmem:[%s10158_s16 + $0x8] sm:$0xff]  ;;  %v3897_v7 = vpop.permute.xlu1 %3896  ;;  %s10175_s16 = sld [smem:[#allocation38_spill]] }
0x1170   :  { %v3853_v29 = vsel %vm3766_vm10, %v9230_v2, %v3850_v26  ;;  %vm3857_vm10 = vweird.f32 %v9230_v2  ;;  %v3755_v42 = vand.u32 3, %v3754_v38  ;;  %v3874_v26 = vpop.permute.xlu0 %3873 }
0x1171   :  { %7364 = vcosq.f32 %v3853_v29  ;;  %v3741_v8 = vand.u32 2147483647, %v3740_v17 }
0x1172   :  { %7366 = vsinq.f32 %v3853_v29 }
0x1173   :  { %v3744_v46 = vmul.f32 %v3743_v33, %v3741_v8 }
0x1174   :  { %v3892_v17 = vpop.permute.xlu0 %3891 }
0x1175   :  { %v3745_v20 = vxor.u32 2147483648, %v3744_v46 }
0x1177   :  { %v3746_v59 = vsel %vm3663_vm5, %v3745_v20, %v3744_v46  ;;  %vm3760_vm5 = vcmp.eq.s32.totalorder %v3755_v42, 2  ;;  %v3994_v46 = vpop.permute.xlu1 %3993 }
0x1178   :  { %v3749_v27 = vsel %vm9309_vm9, %v9237_v63, %v3746_v59  ;;  %vm3757_vm9 = vcmp.eq.s32.totalorder %v3755_v42, 0  ;;  %v3989_v20 = vpop.permute.xlu0 %3988 }
0x1179   :  { %7368 = vcosq.f32 %v3749_v27 }
0x117a   :  { %7370 = vsinq.f32 %v3749_v27 }
0x117e   :  { %v7365_v28 = vpop.eup %7364 }
0x117f   :  { %v7367_v62 = vpop.eup %7366  ;;  %v3865_v51 = vxor.u32 2147483648, %v7365_v28 }
0x1180   :  { %v3862_v45 = vxor.u32 2147483648, %v7367_v62 }
0x1181   :  { %v3866_v25 = vsel %vm3864_vm2, %v3865_v51, %v7367_v62  ;;  %vm3756_vm2 = vcmp.lt.s32.totalorder %v3755_v42, 2 }
0x1182   :  { %v3863_v0 = vsel %vm3861_vm3, %v7365_v28, %v3862_v45  ;;  %vm3753_vm3 = vweird.f32 %v9237_v63 }
0x1183   :  { %v3867_v44 = vsel %vm3860_vm6, %v3863_v0, %v3866_v25 }
0x1184   :  { %v3868_v10 = vsel %vm3857_vm10, nan, %v3867_v44 }
0x1185   :  { %v3870_v6 = vmul.f32 %v3868_v10, %v3868_v10 }
0x1186   :  { %v7369_v54 = vpop.eup %7368 }
0x1187   :  { %v3882_v52 = vmul.f32 %v3879_v30, %v3870_v6  ;;  %v7371_v16 = vpop.eup %7370  ;;  %v3761_v24 = vxor.u32 2147483648, %v7369_v54 }
0x1188   :  { %v3758_v22 = vxor.u32 2147483648, %v7371_v16 }
0x1189   :  { %v3884_v34 = vadd.f32 %v3882_v52, %v9227_v21  ;;  %v3762_v5 = vsel %vm3760_vm5, %v3761_v24, %v7371_v16 }
0x118a   :  { %v3759_v2 = vsel %vm3757_vm9, %v7369_v54, %v3758_v22 }
0x118b   :  { %6949 = vmatprep.subr.mxu1 %v3884_v34  ;;  %v3763_v49 = vsel %vm3756_vm2, %v3759_v2, %v3762_v5 }
0x118c   :  { %6950 = vmatpush3.msra.mxu1 %v3884_v34  ;;  %v3764_v9 = vsel %vm3753_vm3, nan, %v3763_v49 }
0x118d   :  { %v3869_v56 = vmul.f32 %v3764_v9, %v3764_v9 }
0x118f   :  { %v3881_v29 = vmul.f32 %v3874_v26, %v3869_v56 }
0x1191   :  { %v3883_v21 = vadd.f32 %v3881_v29, %v9232_v15 }
0x1193   :  { %6951 = vmatprep.subr.mxu1 %v3883_v21 }
0x1194   :  { %6952 = vmatpush3.msra.mxu1 %v3883_v21 }
0x1195   :  { %6954 = vmatmul.mubr.msk.f32.vlgmr.msra.gmra.mxu1 %vm288_vm0, %v3886_v12 }
0x1255   :  { %v6955_v61 = vpop.f32.mrf.mxu1 }
0x1256   :  { %v3977_v8 = vadd.f32 %v6955_v61, %v3897_v7 }
0x1257   :  { %v3971_v33 = vpop.f32.mrf.mxu1 }
0x1258   :  { %v9325_v18 = vadd.f32 %v3977_v8, %v9022_v32  ;;  %v3972_v63 = vadd.f32 %v3971_v33, %v3892_v17 }
0x125a   :  { %v9328_v31 = vmul.f32 %v3994_v46, %v9325_v18  ;;  %v9331_v15 = vadd.f32 %v3972_v63, %v9028_v14 }
0x125c   :  { %v4102_v58 = vand.u32 2147483647, %v9328_v31  ;;  %v4105_v1 = vand.u32 2139095040, %v9328_v31  ;;  %v9336_v59 = vmul.f32 %v3989_v20, %v9331_v15 }
0x125e   :  { %v4106_v27 = vshrl.u32 %v4105_v1, 23  ;;  %v4109_v32 = vand.u32 8388607, %v4102_v58  ;;  %v4001_v60 = vand.u32 2139095040, %v9336_v59  ;;  %v3998_v28 = vand.u32 2147483647, %v9336_v59 }
0x1260   :  { %v6526_v48 = vadd.s32 4294967169, %v4106_v27  ;;  %v4002_v62 = vshrl.u32 %v4001_v60, 23  ;;  %v4110_v51 = vor.u32 8388608, %v4109_v32  ;;  %v4005_v19 = vand.u32 8388607, %v3998_v28 }
0x1262   :  { %v4112_v14 = vadd.s32 1, %v6526_v48  ;;  %v6522_v45 = vadd.s32 4294967169, %v4002_v62  ;;  %v9344_v10 = vshll.u32 %v4110_v51, 8  ;;  %v4006_v52 = vor.u32 8388608, %v4005_v19 }
0x1264   :  { %vm4113_vm0 = vcmp.gt.s32.totalorder %v4112_v14, 0  ;;  %v4008_v0 = vadd.s32 1, %v6522_v45  ;;  %v4046_v48 = vshll.u32 %v4006_v52, 8 }
0x1265   :  { %v4114_v25 = vsel %vm4113_vm0, %v4112_v14, 0 }
0x1266   :  { %v4115_v44 = vshrl.u32 %v4114_v25, 5  ;;  %v4116_v38 = vand.u32 31, %v4114_v25  ;;  %vm4009_vm6 = vcmp.gt.s32.totalorder %v4008_v0, 0 }
0x1267   :  { %v4010_v21 = vsel %vm4009_vm6, %v4008_v0, 0 }
0x1268   :  { %v4117_v6 = vsub.s32 32, %v4116_v38  ;;  %v4119_v30 = vshll.u32 %v7507_v35, %v4116_v38  ;;  %v4122_v42 = vshll.u32 %v7508_v37, %v4116_v38  ;;  %v4125_v54 = vshll.u32 %v7509_v39, %v4116_v38 }
0x1269   :  { %v4128_v34 = vshll.u32 %v7510_v41, %v4116_v38  ;;  %v4131_v16 = vshll.u32 %v7511_v43, %v4116_v38  ;;  %vm4134_vm10 = vcmp.lt.s32.totalorder %v4115_v44, 1  ;;  %vm4136_vm5 = vcmp.lt.s32.totalorder %v4115_v44, 3 }
0x126a   :  { %v4120_v24 = vshrl.u32 %v7508_v37, %v4117_v6  ;;  %v4123_v22 = vshrl.u32 %v7509_v39, %v4117_v6  ;;  %v4126_v5 = vshrl.u32 %v7510_v41, %v4117_v6  ;;  %v4118_v2 = vshrl.u32 %v7507_v35, %v4117_v6 }
0x126b   :  { %v4129_v49 = vshrl.u32 %v7511_v43, %v4117_v6  ;;  %v4132_v9 = vshrl.u32 %v7512_v50, %v4117_v6  ;;  %vm4137_vm9 = vcmp.lt.s32.totalorder %v4115_v44, 4  ;;  %v4012_v61 = vand.u32 31, %v4010_v21 }
0x126c   :  { %v4121_v56 = vor.u32 %v4120_v24, %v4119_v30  ;;  %v4124_v26 = vor.u32 %v4123_v22, %v4122_v42  ;;  %v4127_v29 = vor.u32 %v4126_v5, %v4125_v54  ;;  %vm4135_vm2 = vcmp.lt.s32.totalorder %v4115_v44, 2 }
0x126d   :  { %v4130_v12 = vor.u32 %v4129_v49, %v4128_v34  ;;  %v4133_v7 = vor.u32 %v4132_v9, %v4131_v16  ;;  %v4013_v27 = vsub.s32 32, %v4012_v61  ;;  %v4011_v45 = vshrl.u32 %v4010_v21, 5 }
0x126e   :  { %v4138_v17 = vsel %vm4134_vm10, %v4118_v2, %v4121_v56  ;;  %v4139_v8 = vsel %vm4137_vm9, %v4127_v29, 2102212464  ;;  %v4142_v33 = vsel %vm4134_vm10, %v4121_v56, %v4124_v26  ;;  %v4146_v63 = vsel %vm4134_vm10, %v4124_v26, %v4127_v29 }
0x126f   :  { %v4140_v46 = vsel %vm4136_vm5, %v4124_v26, %v4139_v8  ;;  %v4143_v20 = vsel %vm4137_vm9, %v4130_v12, 920167782  ;;  %v4147_v1 = vsel %vm4137_vm9, %v4133_v7, 1326507024  ;;  %v4015_v6 = vshll.u32 %v7507_v35, %v4012_v61 }
0x1270   :  { %v4144_v32 = vsel %vm4136_vm5, %v4127_v29, %v4143_v20  ;;  %v4148_v60 = vsel %vm4136_vm5, %v4130_v12, %v4147_v1  ;;  %v4141_v62 = vsel %vm4135_vm2, %v4138_v17, %v4140_v46  ;;  %v4016_v30 = vshrl.u32 %v7508_v37, %v4013_v27 }
0x1271   :  { %v4145_v14 = vsel %vm4135_vm2, %v4142_v33, %v4144_v32  ;;  %v4149_v51 = vsel %vm4135_vm2, %v4146_v63, %v4148_v60  ;;  %v4018_v44 = vshll.u32 %v7508_v37, %v4012_v61  ;;  %v4019_v52 = vshrl.u32 %v7509_v39, %v4013_v27 }
0x1272   :  { %v9365_v19 = vmul.u32.u64.low %v9344_v10, %v4149_v51  ;;  %v9366_v25 = vmul.u32.u64.high %v9344_v10, %v4149_v51, %v9365_v19  ;;  %v9369_v0 = vmul.u32.u64.low %v9344_v10, %v4145_v14  ;;  %v9370_v38 = vmul.u32.u64.high %v9344_v10, %v4145_v14, %v9369_v0 }
0x1273   :  { %v4021_v42 = vshll.u32 %v7509_v39, %v4012_v61  ;;  %v4022_v54 = vshrl.u32 %v7510_v41, %v4013_v27  ;;  %v4024_v34 = vshll.u32 %v7510_v41, %v4012_v61  ;;  %v4025_v16 = vshrl.u32 %v7511_v43, %v4013_v27 }
0x1274   :  { %v4017_v24 = vor.u32 %v4016_v30, %v4015_v6  ;;  %v4020_v22 = vor.u32 %v4019_v52, %v4018_v44  ;;  %v4027_v5 = vshll.u32 %v7511_v43, %v4012_v61  ;;  %v4028_v2 = vshrl.u32 %v7512_v50, %v4013_v27 }
0x1275   :  { %v4157_v49 = vmul.u32 %v9344_v10, %v4141_v62  ;;  %vm4159_vm3 = vc.u32 %v9366_v25, %v9369_v0  ;;  %v4160_v9 = vadd.s32 1, %v9370_v38  ;;  %v4023_v56 = vor.u32 %v4022_v54, %v4021_v42 }
0x1276   :  { %v4014_v26 = vshrl.u32 %v7507_v35, %v4013_v27  ;;  %v4026_v29 = vor.u32 %v4025_v16, %v4024_v34  ;;  %v4029_v21 = vor.u32 %v4028_v2, %v4027_v5  ;;  %vm4030_vm0 = vcmp.lt.s32.totalorder %v4011_v45, 1 }
0x1277   :  { %v4161_v12 = vsel %vm4159_vm3, %v4160_v9, %v9370_v38  ;;  %vm4032_vm6 = vcmp.lt.s32.totalorder %v4011_v45, 3  ;;  %vm4033_vm10 = vcmp.lt.s32.totalorder %v4011_v45, 4  ;;  %v4038_v7 = vsel %vm4030_vm0, %v4017_v24, %v4020_v22 }
0x1278   :  { %v4162_v61 = vadd.s32 %v4161_v12, %v4157_v49  ;;  %v4035_v17 = vsel %vm4033_vm10, %v4023_v56, 2102212464  ;;  %v4039_v8 = vsel %vm4033_vm10, %v4026_v29, 920167782  ;;  %v4042_v10 = vsel %vm4030_vm0, %v4020_v22, %v4023_v56 }
0x1279   :  { %vm4031_vm5 = vcmp.lt.s32.totalorder %v4011_v45, 2  ;;  %v4034_v33 = vsel %vm4030_vm0, %v4014_v26, %v4017_v24  ;;  %v4040_v63 = vsel %vm4032_vm6, %v4023_v56, %v4039_v8  ;;  %v4043_v46 = vsel %vm4033_vm10, %v4029_v21, 1326507024 }
0x127a   :  { %v4163_v20 = vadd.s32 536870912, %v4162_v61  ;;  %v4036_v1 = vsel %vm4032_vm6, %v4020_v22, %v4035_v17  ;;  %v4041_v32 = vsel %vm4031_vm5, %v4038_v7, %v4040_v63  ;;  %v4044_v27 = vsel %vm4032_vm6, %v4026_v29, %v4043_v46 }
0x127b   :  { %v4045_v60 = vsel %vm4031_vm5, %v4042_v10, %v4044_v27  ;;  %v9389_v62 = vmul.u32.u64.low %v4046_v48, %v4041_v32  ;;  %v9390_v14 = vmul.u32.u64.high %v4046_v48, %v4041_v32, %v9389_v62  ;;  %v4037_v6 = vsel %vm4031_vm5, %v4034_v33, %v4036_v1 }
0x127c   :  { %v4164_v51 = vshrl.u32 %v4163_v20, 30  ;;  %v9392_v19 = vmul.u32.u64.low %v4046_v48, %v4045_v60  ;;  %v9393_v38 = vmul.u32.u64.high %v4046_v48, %v4045_v60, %v9392_v19  ;;  %v4053_v52 = vmul.u32 %v4046_v48, %v4037_v6 }
0x127d   :  { %v4056_v44 = vadd.s32 1, %v9390_v14  ;;  %v4158_v26 = vadd.s32 %v9369_v0, %v9366_v25  ;;  %vm4104_vm0 = vcmp.lt.s32.totalorder %v9328_v31, 0  ;;  %vm4103_vm6 = vcmp.le.f32.partialorder %v4102_v58, 0.7853982 }
0x127e   :  { %v4165_v30 = vshll.u32 %v4164_v51, 30  ;;  %vm4055_vm9 = vc.u32 %v9393_v38, %v9389_v62  ;;  %v4054_v60 = vadd.s32 %v9389_v62, %v9393_v38  ;;  %v4188_v19 = vsub.s32 4, %v4164_v51 }
0x127f   :  { %v4057_v42 = vsel %vm4055_vm9, %v4056_v44, %v9390_v14  ;;  %vm4000_vm10 = vcmp.lt.s32.totalorder %v9336_v59, 0  ;;  %vm9408_vm5 = vcmp.le.f32.partialorder %v3998_v28, 0.7853982 }
0x1280   :  { %v4166_v45 = vsub.s32 %v4162_v61, %v4165_v30  ;;  %v4058_v34 = vadd.s32 %v4057_v42, %v4053_v52 }
0x1282   :  { %v4168_v54 = vsub.s32 0, %v4166_v45  ;;  %v4059_v24 = vadd.s32 536870912, %v4058_v34 }
0x1284   :  { %v6527_v16 = vmin.u32 %v4168_v54, %v4166_v45  ;;  %v4060_v5 = vshrl.u32 %v4059_v24, 30 }
0x1286   :  { %v4170_v22 = vclz %v6527_v16  ;;  %v4061_v49 = vshll.u32 %v4060_v5, 30 }
0x1288   :  { %v6528_v2 = vadd.s32 4294967294, %v4170_v22  ;;  %v4062_v56 = vsub.s32 %v4058_v34, %v4061_v49  ;;  %v4189_v34 = vsel %vm4104_vm0, %v4188_v19, %v4164_v51 }
0x1289   :  { %v4191_v24 = vsel %vm4103_vm6, 0, %v4189_v34 }
0x128a   :  { %vm6529_vm2 = vcmp.lt.s32.totalorder %v6528_v2, 0  ;;  %v4064_v21 = vsub.s32 0, %v4062_v56 }
0x128b   :  { %v4173_v9 = vsel %vm6529_vm2, 0, %v6528_v2  ;;  %v4195_v2 = vadd.s32 3, %v4191_v24 }
0x128c   :  { %v4174_v29 = vsub.s32 32, %v4173_v9  ;;  %v4178_v48 = vsub.s32 4294967266, %v4173_v9  ;;  %v4175_v12 = vshll.u32 %v4166_v45, %v4173_v9  ;;  %v6523_v17 = vmin.u32 %v4064_v21, %v4062_v56 }
0x128d   :  { %v4084_v9 = vsub.s32 4, %v4060_v5 }
0x128e   :  { %v4176_v7 = vshrl.u32 %v4158_v26, %v4174_v29  ;;  %v4179_v61 = vadd.s32 127, %v4178_v48  ;;  %v4066_v33 = vclz %v6523_v17  ;;  %v4196_v26 = vand.u32 3, %v4195_v2 }
0x128f   :  { %v4085_v29 = vsel %vm4000_vm10, %v4084_v9, %v4060_v5  ;;  %v4216_v5 = vpop.permute.xlu1 %4215  ;;  %v7532_v2 = vmov 0.0  }
0x1290   :  { %v4177_v8 = vor.u32 %v4176_v7, %v4175_v12  ;;  %v4180_v10 = vshll.u32 %v4179_v61, 23  ;;  %v6524_v46 = vadd.s32 4294967294, %v4066_v33  ;;  %vm4201_vm9 = vcmp.eq.s32.totalorder %v4196_v26, 2  ;;  %6956 = vmatprep.subr.mxu1 %v7532_v2  ;;  %6997 = vmatprep.subr.mxu0 %v7532_v2 }
0x1291   :  { %v4087_v28 = vsel %vm9408_vm5, 0, %v4085_v29  ;;  %vm4198_vm2 = vcmp.eq.s32.totalorder %v4196_v26, 0  ;;  %v9448_v29 = vadd.s32 56, %v8296_v3 }
0x1292   :  { %v4181_v63 = vor.u32 4788187, %v4180_v10  ;;  %v4184_v1 = vcvt.s32.f32 %v4177_v8  ;;  %vm6525_vm3 = vcmp.lt.s32.totalorder %v6524_v46, 0  ;;  %v4091_v10 = vadd.s32 3, %v4087_v28 }
0x1293   :  { %v4069_v27 = vsel %vm6525_vm3, 0, %v6524_v46  ;;  %vm4197_vm3 = vcmp.lt.s32.totalorder %v4196_v26, 2  ;;  %v4368_v28 = vmul.u32 2, %v9448_v29 }
0x1294   :  { %v4182_v20 = vand.u32 2147483647, %v4181_v63  ;;  %v4070_v25 = vsub.s32 32, %v4069_v27  ;;  %v4074_v0 = vsub.s32 4294967266, %v4069_v27  ;;  %v4071_v6 = vshll.u32 %v4062_v56, %v4069_v27 }
0x1296   :  { %v4185_v32 = vmul.f32 %v4184_v1, %v4182_v20  ;;  %v4072_v30 = vshrl.u32 %v4054_v60, %v4070_v25  ;;  %v4075_v44 = vadd.s32 127, %v4074_v0  ;;  %v4092_v20 = vand.u32 3, %v4091_v10 }
0x1298   :  { %v4186_v14 = vxor.u32 2147483648, %v4185_v32  ;;  %v4073_v42 = vor.u32 %v4072_v30, %v4071_v6  ;;  %v4076_v54 = vshll.u32 %v4075_v44, 23  ;;  %v4211_v30 = vpop.permute.xlu0 %4210 }
0x129a   :  { %v4187_v45 = vsel %vm4104_vm0, %v4186_v14, %v4185_v32  ;;  %v4077_v62 = vor.u32 4788187, %v4076_v54  ;;  %v4080_v16 = vcvt.s32.f32 %v4073_v42  ;;  %vm4194_vm0 = vweird.f32 %v9328_v31 }
0x129b   :  { %v4190_v52 = vsel %vm4103_vm6, %v9328_v31, %v4187_v45  ;;  %vm4097_vm6 = vcmp.eq.s32.totalorder %v4092_v20, 2 }
0x129c   :  { %7372 = vcosq.f32 %v4190_v52  ;;  %v4078_v38 = vand.u32 2147483647, %v4077_v62 }
0x129d   :  { %7374 = vsinq.f32 %v4190_v52 }
0x129e   :  { %v4081_v22 = vmul.f32 %v4080_v16, %v4078_v38 }
0x12a0   :  { %v4082_v49 = vxor.u32 2147483648, %v4081_v22 }
0x12a2   :  { %v4083_v56 = vsel %vm4000_vm10, %v4082_v49, %v4081_v22  ;;  %vm4094_vm10 = vcmp.eq.s32.totalorder %v4092_v20, 0 }
0x12a3   :  { %v4086_v51 = vsel %vm9408_vm5, %v9336_v59, %v4083_v56  ;;  %vm4093_vm5 = vcmp.lt.s32.totalorder %v4092_v20, 2 }
0x12a4   :  { %7376 = vcosq.f32 %v4086_v51 }
0x12a5   :  { %7378 = vsinq.f32 %v4086_v51  ;;  %v4650_v51 = vld [vmem:[%s10163_s28] sm:$0xff]  ;;  %s10178_s28 = sld [smem:[#allocation37_spill]] }
0x12a9   :  { %v7373_v48 = vpop.eup %7372 }
0x12aa   :  { %v7375_v21 = vpop.eup %7374  ;;  %v4202_v12 = vxor.u32 2147483648, %v7373_v48 }
0x12ab   :  { %v4199_v7 = vxor.u32 2147483648, %v7375_v21 }
0x12ac   :  { %v4203_v61 = vsel %vm4201_vm9, %v4202_v12, %v7375_v21  ;;  %vm4090_vm9 = vweird.f32 %v9336_v59  ;;  %v9454_v21 = vadd.s32 40, %v8296_v3  ;;  %v9457_v12 = vadd.s32 32, %v8296_v3 }
0x12ad   :  { %v4200_v17 = vsel %vm4198_vm2, %v7373_v48, %v4199_v7  ;;  %vm4235_vm2 = vcmask 269312   ;;  %v9451_v48 = vadd.s32 48, %v8296_v3  ;;  %v4651_v7 = vld [vmem:[%s10165_s20] sm:$0xff]  ;;  %s10188_s20 = sld [smem:[#allocation28_spill]] }
0x12ae   :  { %v4204_v8 = vsel %vm4197_vm3, %v4200_v17, %v4203_v61  ;;  %v4366_v17 = vmul.u32 2, %v9454_v21  ;;  %vm4372_vm3 = vcmp.eq.s32.totalorder %v8317_v40, %v4368_v28 }
0x12af   :  { %v4205_v33 = vsel %vm4194_vm0, nan, %v4204_v8  ;;  %v4367_v61 = vmul.u32 2, %v9451_v48  ;;  %v4365_v8 = vmul.u32 2, %v9457_v12  ;;  %6998 = vmatpush3.msk.msra.mxu0 %vm4372_vm3, %v7517_v47 }
0x12b0   :  { %v4207_v63 = vmul.f32 %v4205_v33, %v4205_v33  ;;  %6999 = vmatprep.subr.mxu0 %v7532_v2 }
0x12b1   :  { %v7377_v1 = vpop.eup %7376  ;;  %vm4371_vm0 = vcmp.eq.s32.totalorder %v8317_v40, %v4367_v61 }
0x12b2   :  { %v4219_v46 = vmul.f32 %v4216_v5, %v4207_v63  ;;  %v7379_v27 = vpop.eup %7378  ;;  %v4098_v60 = vxor.u32 2147483648, %v7377_v1  ;;  %7000 = vmatpush3.msk.msra.mxu0 %vm4371_vm0, %v7517_v47 }
0x12b3   :  { %v4095_v25 = vxor.u32 2147483648, %v7379_v27  ;;  %7001 = vmatprep.subr.mxu0 %v7532_v2 }
0x12b4   :  { %v4221_v32 = vadd.f32 %v4219_v46, %v9325_v18  ;;  %v4099_v31 = vsel %vm4097_vm6, %v4098_v60, %v7379_v27  ;;  %vm4370_vm6 = vcmp.eq.s32.totalorder %v8317_v40, %v4366_v17 }
0x12b5   :  { %v4096_v0 = vsel %vm4094_vm10, %v7377_v1, %v4095_v25  ;;  %vm4369_vm10 = vcmp.eq.s32.totalorder %v8317_v40, %v4365_v8  ;;  %7002 = vmatpush3.msk.msra.mxu0 %vm4370_vm6, %v7517_v47 }
0x12b6   :  { %4240 = vrot.lane.b32.xlu0 %v4221_v32, %s7530_s27  ;;  %4229 = vrot.lane.b32.xlu1 %v4221_v32, %s7514_s24  ;;  %v4100_v14 = vsel %vm4093_vm5, %v4096_v0, %v4099_v31  ;;  %v4222_v31 = vld [vmem:[%s10166_s2] sm:$0xff]  ;;  %vm10169_vm5 = vcmask 523264  }
0x12b7   :  { %v4101_v19 = vsel %vm4090_vm9, nan, %v4100_v14  ;;  %7003 = vmatprep.subr.mxu0 %v7532_v2 }
0x12b8   :  { %v4206_v6 = vmul.f32 %v4101_v19, %v4101_v19  ;;  %7004 = vmatpush3.msk.msra.mxu0 %vm4369_vm10, %v7517_v47 }
0x12b9   :  { %7005 = vmatprep.subr.mxu0 %v7532_v2 }
0x12ba   :  { %v4218_v44 = vmul.f32 %v4211_v30, %v4206_v6  ;;  %7006 = vmatpush3.msk.msra.mxu0 %vm8370_vm11, %v7517_v47 }
0x12bb   :  { %7007 = vmatprep.subr.mxu0 %v7532_v2 }
0x12bc   :  { %v4220_v18 = vadd.f32 %v4218_v44, %v9331_v15  ;;  %7008 = vmatpush3.msk.msra.mxu0 %vm8383_vm13, %v7517_v47  ;;  %v4485_v44 = vadd.s32 1, %v4368_v28 }
0x12bd   :  { %7009 = vmatprep.subr.mxu0 %v7532_v2 }
0x12be   :  { %4238 = vrot.lane.b32.xlu0 %v4220_v18, %s7530_s27  ;;  %4227 = vrot.lane.b32.xlu1 %v4220_v18, %s7514_s24  ;;  %vm4489_vm11 = vcmp.eq.s32.totalorder %v8317_v40, %v4485_v44  ;;  %s7536_s27 = smov 64  }
0x12bf   :  { %7010 = vmatpush3.msk.msra.mxu0 %vm8392_vm14, %v7517_v47 }
0x12c0   :  { %7011 = vmatprep.subr.mxu0 %v7532_v2 }
0x12c1   :  { %7012 = vmatpush3.msk.msra.mxu0 %vm8403_vm15, %v7517_v47  ;;  %vm10167_vm15 = vcmp.eq.s32.totalorder %v8317_v40, %v8348_v53 }
0x12c2   :  { %7033 = vmatprep.subr.mxu0 %v7532_v2 }
0x1328   :  { %v4241_v45 = vpop.permute.xlu0 %4240  ;;  %v4230_v52 = vpop.permute.xlu1 %4229 }
0x1329   :  { %v4245_v42 = vsel %vm991_vm4, 0.0, %v4241_v45  ;;  %v4234_v54 = vsel %vm991_vm4, 0.0, %v4230_v52  ;;  %v4484_v45 = vadd.s32 1, %v4367_v61 }
0x132a   :  { %v4247_v34 = vsel %vm4235_vm2, %v4245_v42, 0.0  ;;  %v4237_v62 = vsel %vm4235_vm2, %v4234_v54, 0.0  ;;  %v4223_v54 = vld [vmem:[%s10166_s2 + $0x8] sm:$0xff]  ;;  %s7537_s2 = smov 73  }
0x132b   :  { %4262 = vrot.lane.b32.xlu0 %v4247_v34, %s7514_s24  ;;  %4256 = vrot.lane.b32.xlu1 %v4237_v62, %s7514_s24  ;;  %vm4488_vm13 = vcmp.eq.s32.totalorder %v8317_v40, %v4484_v45 }
0x1330   :  { %v4239_v59 = vpop.permute.xlu0 %4238  ;;  %v4228_v38 = vpop.permute.xlu1 %4227 }
0x1331   :  { %v4244_v15 = vsel %vm991_vm4, 0.0, %v4239_v59  ;;  %v4233_v16 = vsel %vm991_vm4, 0.0, %v4228_v38  ;;  %vm7534_vm4 = vmmov 0   ;;  %v4482_v59 = vadd.s32 1, %v4365_v8 }
0x1332   :  { %v4246_v24 = vsel %vm4235_vm2, %v4244_v15, 0.0  ;;  %v4236_v22 = vsel %vm4235_vm2, %v4233_v16, 0.0  ;;  %6964 = vmatprep.mubr.msk.f32.mxu1 %vm7534_vm4, %v7532_v2  ;;  %7013 = vmatprep.mubr.msk.f32.mxu0 %vm7534_vm4, %v7532_v2 }
0x1333   :  { %4260 = vrot.lane.b32.xlu0 %v4246_v24, %s7514_s24  ;;  %4254 = vrot.lane.b32.xlu1 %v4236_v22, %s7514_s24  ;;  %s10164_s24 = sld [smem:[#allocation51_spill]] }
0x1337   :  { %4278 = vrot.lane.b32.xlu0 %v4247_v34, %s7531_s29  ;;  %4266 = vrot.lane.b32.xlu1 %v4237_v62, %s7504_s10 }
0x1339   :  { %v4224_v26 = vld [vmem:[%s10164_s24] sm:$0xff]  ;;  %s10182_s24 = sld [smem:[#allocation26_spill]] }
0x133b   :  { %4276 = vrot.lane.b32.xlu0 %v4246_v24, %s7531_s29  ;;  %4264 = vrot.lane.b32.xlu1 %v4236_v22, %s7504_s10 }
0x139d   :  { %v4263_v49 = vpop.permute.xlu0 %4262  ;;  %v4257_v9 = vpop.permute.xlu1 %4256 }
0x139e   :  { %4282 = vrot.lane.b32.xlu0 %v4263_v49, %s7531_s29  ;;  %4270 = vrot.lane.b32.xlu1 %v4257_v9, %s7504_s10 }
0x13a2   :  { %4399 = vrot.lane.b32.xlu0 %v4263_v49, %s7533_s8  ;;  %4387 = vrot.lane.b32.xlu1 %v4257_v9, %s7505_s7 }
0x13a5   :  { %v4261_v58 = vpop.permute.xlu0 %4260  ;;  %v4255_v56 = vpop.permute.xlu1 %4254 }
0x13a6   :  { %4280 = vrot.lane.b32.xlu0 %v4261_v58, %s7531_s29  ;;  %4268 = vrot.lane.b32.xlu1 %v4255_v56, %s7504_s10  ;;  %s10176_s29 = sld [smem:[#allocation25_spill]] }
0x13a9   :  { %v4279_v36 = vpop.permute.xlu0 %4278  ;;  %v4267_v10 = vpop.permute.xlu1 %4266 }
0x13aa   :  { %4395 = vrot.lane.b32.xlu0 %v4247_v34, %s7533_s8  ;;  %4383 = vrot.lane.b32.xlu1 %v4237_v62, %s7505_s7  ;;  %v4289_v27 = vsel %vm1359_vm12, %v4267_v10, %v4279_v36  ;;  %v4483_v62 = vadd.s32 1, %v4366_v17 }
0x13ac   :  { %vm4487_vm14 = vcmp.eq.s32.totalorder %v8317_v40, %v4483_v62 }
0x13ad   :  { %v4277_v33 = vpop.permute.xlu0 %4276  ;;  %v4265_v63 = vpop.permute.xlu1 %4264 }
0x13ae   :  { %4397 = vrot.lane.b32.xlu0 %v4261_v58, %s7533_s8  ;;  %4385 = vrot.lane.b32.xlu1 %v4255_v56, %s7505_s7  ;;  %v4288_v0 = vsel %vm1359_vm12, %v4265_v63, %v4277_v33 }
0x13b2   :  { %4393 = vrot.lane.b32.xlu0 %v4246_v24, %s7533_s8  ;;  %4381 = vrot.lane.b32.xlu1 %v4236_v22, %s7505_s7  ;;  %s10177_s8 = sld [smem:[#allocation32_spill]] }
0x13b6   :  { %4654 = vperm.xlu0 %7306, %v4650_v51   ;;  %4646 = vperm.xlu1 %7307, %v4224_v26  }
0x13ba   :  { %4765 = vperm.xlu1 %7307, %v4651_v7  }
0x1410   :  { %v4283_v57 = vpop.permute.xlu0 %4282  ;;  %v4271_v5 = vpop.permute.xlu1 %4270 }
0x1411   :  { %v4291_v46 = vsel %vm1359_vm12, %v4271_v5, %v4283_v57 }
0x1412   :  { %6957 = vmatpush3.msra.mxu1 %v4291_v46 }
0x1413   :  { %6958 = vmatprep.subr.mxu1 %v7532_v2 }
0x1414   :  { %v4400_v23 = vpop.permute.xlu0 %4399  ;;  %v4388_v20 = vpop.permute.xlu1 %4387 }
0x1415   :  { %v4408_v14 = vsel %vm1359_vm12, %v4388_v20, %v4400_v23 }
0x1418   :  { %v4281_v1 = vpop.permute.xlu0 %4280  ;;  %v4269_v32 = vpop.permute.xlu1 %4268 }
0x1419   :  { %v4290_v4 = vsel %vm1359_vm12, %v4269_v32, %v4281_v1 }
0x141a   :  { %6959 = vmatpush3.msra.mxu1 %v4290_v4 }
0x141b   :  { %6960 = vmatprep.subr.mxu1 %v7532_v2 }
0x141c   :  { %v4396_v60 = vpop.permute.xlu0 %4395  ;;  %6961 = vmatpush3.msra.mxu1 %v4289_v27  ;;  %v4384_v25 = vpop.permute.xlu1 %4383 }
0x141d   :  { %6962 = vmatprep.subr.mxu1 %v7532_v2  ;;  %v4406_v18 = vsel %vm1359_vm12, %v4384_v25, %v4396_v60 }
0x141e   :  { %6963 = vmatpush3.msra.mxu1 %v4288_v0 }
0x141f   :  { %6965 = vmatmul.mubr.msk.f32.vlgmr.msra.gmra.mxu1 %vm1359_vm12, %v4222_v31  ;;  %6967 = vmatprep.subr.mxu1 %v7532_v2 }
0x1420   :  { %v4398_v19 = vpop.permute.xlu0 %4397  ;;  %6968 = vmatpush3.msra.mxu1 %v4408_v14  ;;  %v4386_v6 = vpop.permute.xlu1 %4385  ;;  %6975 = vmatprep.mubr.msk.f32.mxu1 %vm7534_vm4, %v7532_v2 }
0x1421   :  { %v4407_v30 = vsel %vm1359_vm12, %v4386_v6, %v4398_v19  ;;  %6969 = vmatprep.subr.mxu1 %v7532_v2 }
0x1422   :  { %6970 = vmatpush3.msra.mxu1 %v4407_v30 }
0x1423   :  { %6971 = vmatprep.subr.mxu1 %v7532_v2 }
0x1424   :  { %v4394_v52 = vpop.permute.xlu0 %4393  ;;  %6972 = vmatpush3.msra.mxu1 %v4406_v18  ;;  %v4382_v42 = vpop.permute.xlu1 %4381 }
0x1425   :  { %v4405_v34 = vsel %vm1359_vm12, %v4382_v42, %v4394_v52  ;;  %6973 = vmatprep.subr.mxu1 %v7532_v2 }
0x1426   :  { %6974 = vmatpush3.msra.mxu1 %v4405_v34 }
0x1427   :  { %6976 = vmatmul.mubr.msk.f32.vlgmr.msra.gmra.mxu1 %vm1359_vm12, %v4223_v54  ;;  %6978 = vmatprep.subr.mxu1 %v7532_v2  ;;  %vm4486_vm12 = vcmp.eq.s32.totalorder %v8317_v40, %v4482_v59 }
0x1428   :  { %6979 = vmatpush3.msk.msra.mxu1 %vm4489_vm11, %v7517_v47  ;;  %6994 = vmatprep.mubr.msk.f32.mxu1 %vm7534_vm4, %v7532_v2 }
0x1429   :  { %6980 = vmatprep.subr.mxu1 %v7532_v2 }
0x142a   :  { %6981 = vmatpush3.msk.msra.mxu1 %vm4488_vm13, %v7517_v47 }
0x142b   :  { %6982 = vmatprep.subr.mxu1 %v7532_v2 }
0x142c   :  { %6983 = vmatpush3.msk.msra.mxu1 %vm4487_vm14, %v7517_v47 }
0x142d   :  { %6984 = vmatprep.subr.mxu1 %v7532_v2 }
0x142e   :  { %6985 = vmatpush3.msk.msra.mxu1 %vm4486_vm12, %v7517_v47 }
0x142f   :  { %6986 = vmatprep.subr.mxu1 %v7532_v2 }
0x1430   :  { %6987 = vmatpush3.msk.msra.mxu1 %vm1350_vm7, %v7517_v47  ;;  %vm10168_vm7 = vcmp.eq.s32.totalorder %v8317_v40, %v8353_v13 }
0x1431   :  { %6988 = vmatprep.subr.mxu1 %v7532_v2  ;;  %v4647_v13 = vpop.permute.xlu1 %4646  ;;  %v4655_v49 = vpop.permute.xlu0 %4654 }
0x1432   :  { %6989 = vmatpush3.msk.msra.mxu1 %vm1349_vm8, %v7517_v47  ;;  %vm10170_vm8 = vmmov %vm10169_vm5 }
0x1433   :  { %6990 = vmatprep.subr.mxu1 %v7532_v2 }
0x1434   :  { %6991 = vmatpush3.msk.msra.mxu1 %vm10167_vm15, %v7517_v47 }
0x1435   :  { %6992 = vmatprep.subr.mxu1 %v7532_v2 }
0x1436   :  { %6993 = vmatpush3.msk.msra.mxu1 %vm10168_vm7, %v7517_v47 }
0x1437   :  { %7016 = vmatprep.subr.mxu1 %v7532_v2 }
0x14df   :  { %v4361_v11 = vpop.f32.mrf.mxu1 }
0x14e0   :  { %7014 = vmatmul.mubr.msk.f32.vlgmr.msra.gmra.mxu0 %vm10169_vm5, %v4361_v11 }
0x14e1   :  { %v6966_v55 = vpop.f32.mrf.mxu1  ;;  %7035 = vmatprep.mubr.msk.f32.mxu0 %vm7534_vm4, %v7532_v2 }
0x14e7   :  { %v4478_v38 = vpop.f32.mrf.mxu1 }
0x14e8   :  { %6995 = vmatmul.mubr.msk.f32.vlgmr.msra.gmra.mxu1 %vm10170_vm8, %v4478_v38  ;;  %vm4777_vm8 = vcmask 547840  }
0x14e9   :  { %v6977_v53 = vpop.f32.mrf.mxu1  ;;  %7030 = vmatprep.mubr.msk.f32.mxu1 %vm7534_vm4, %v7532_v2 }
0x15a0   :  { %v4640_v15 = vpop.f32.mrf.mxu0 }
0x15a2   :  { %v7015_v16 = vpop.f32.mrf.mxu0 }
0x15a8   :  { %v4567_v40 = vpop.f32.mrf.mxu1 }
0x15a9   :  { %v4641_v47 = vadd.f32 %v4640_v15, %v4567_v40 }
0x15aa   :  { %v6996_v24 = vpop.f32.mrf.mxu1 }
0x15ab   :  { %v9562_v22 = vadd.f32 %v4647_v13, %v4641_v47 }
0x15ad   :  { %v9565_v9 = vmul.f32 %v4655_v49, %v9562_v22 }
0x15af   :  { %v4661_v58 = vand.u32 2139095040, %v9565_v9  ;;  %v4658_v29 = vand.u32 2147483647, %v9565_v9  ;;  %vm4660_vm13 = vcmp.lt.s32.totalorder %v9565_v9, 0  ;;  %vm4750_vm5 = vweird.f32 %v9565_v9 }
0x15b1   :  { %v4662_v56 = vshrl.u32 %v4661_v58, 23  ;;  %v4665_v12 = vand.u32 8388607, %v4658_v29  ;;  %vm4659_vm14 = vcmp.le.f32.partialorder %v4658_v29, 0.7853982 }
0x15b3   :  { %v6558_v51 = vadd.s32 4294967169, %v4662_v56  ;;  %v4666_v23 = vor.u32 8388608, %v4665_v12 }
0x15b5   :  { %v4668_v26 = vadd.s32 1, %v6558_v51  ;;  %v4706_v44 = vshll.u32 %v4666_v23, 8 }
0x15b7   :  { %vm4669_vm9 = vcmp.gt.s32.totalorder %v4668_v26, 0 }
0x15b8   :  { %v4670_v48 = vsel %vm4669_vm9, %v4668_v26, 0  ;;  %vm10171_vm9 = vcmask 23552  }
0x15b9   :  { %v4672_v21 = vand.u32 31, %v4670_v48  ;;  %v4671_v28 = vshrl.u32 %v4670_v48, 5 }
0x15bb   :  { %v4673_v7 = vsub.s32 32, %v4672_v21  ;;  %v4675_v61 = vshll.u32 %v7507_v35, %v4672_v21  ;;  %v4678_v17 = vshll.u32 %v7508_v37, %v4672_v21  ;;  %v4681_v10 = vshll.u32 %v7509_v39, %v4672_v21 }
0x15bc   :  { %v4684_v63 = vshll.u32 %v7510_v41, %v4672_v21  ;;  %v4687_v5 = vshll.u32 %v7511_v43, %v4672_v21  ;;  %vm4690_vm2 = vcmp.lt.s32.totalorder %v4671_v28, 1  ;;  %vm4693_vm3 = vcmp.lt.s32.totalorder %v4671_v28, 4 }
0x15bd   :  { %v4676_v8 = vshrl.u32 %v7508_v37, %v4673_v7  ;;  %v4679_v36 = vshrl.u32 %v7509_v39, %v4673_v7  ;;  %v4682_v33 = vshrl.u32 %v7510_v41, %v4673_v7  ;;  %v4685_v57 = vshrl.u32 %v7511_v43, %v4673_v7 }
0x15be   :  { %v4688_v46 = vshrl.u32 %v7512_v50, %v4673_v7  ;;  %v4674_v0 = vshrl.u32 %v7507_v35, %v4673_v7  ;;  %vm4692_vm0 = vcmp.lt.s32.totalorder %v4671_v28, 3  ;;  %vm4691_vm6 = vcmp.lt.s32.totalorder %v4671_v28, 2 }
0x15bf   :  { %v4677_v20 = vor.u32 %v4676_v8, %v4675_v61  ;;  %v4680_v1 = vor.u32 %v4679_v36, %v4678_v17  ;;  %v4683_v32 = vor.u32 %v4682_v33, %v4681_v10  ;;  %v4686_v4 = vor.u32 %v4685_v57, %v4684_v63 }
0x15c0   :  { %v4689_v27 = vor.u32 %v4688_v46, %v4687_v5 }
0x15c1   :  { %v4695_v60 = vsel %vm4693_vm3, %v4683_v32, 2102212464  ;;  %v4698_v25 = vsel %vm4690_vm2, %v4677_v20, %v4680_v1  ;;  %v4702_v31 = vsel %vm4690_vm2, %v4680_v1, %v4683_v32  ;;  %v4699_v14 = vsel %vm4693_vm3, %v4686_v4, 920167782 }
0x15c2   :  { %v4703_v19 = vsel %vm4693_vm3, %v4689_v27, 1326507024  ;;  %v4700_v6 = vsel %vm4692_vm0, %v4683_v32, %v4699_v14  ;;  %v4694_v18 = vsel %vm4690_vm2, %v4674_v0, %v4677_v20  ;;  %v4696_v45 = vsel %vm4692_vm0, %v4680_v1, %v4695_v60  ;;  %vm10174_vm2 = vmmov %vm10171_vm9 }
0x15c3   :  { %v4704_v30 = vsel %vm4692_vm0, %v4686_v4, %v4703_v19  ;;  %v4701_v52 = vsel %vm4691_vm6, %v4698_v25, %v4700_v6  ;;  %v4697_v11 = vsel %vm4691_vm6, %v4694_v18, %v4696_v45  ;;  %v4766_v6 = vpop.permute.xlu1 %4765  ;;  %vm10179_vm3 = vcmask 523264  }
0x15c4   :  { %v4705_v42 = vsel %vm4691_vm6, %v4702_v31, %v4704_v30  ;;  %v9585_v62 = vmul.u32.u64.low %v4706_v44, %v4701_v52  ;;  %v9586_v59 = vmul.u32.u64.high %v4706_v44, %v4701_v52, %v9585_v62  ;;  %v4713_v38 = vmul.u32 %v4706_v44, %v4697_v11  ;;  %vm10180_vm0 = vmmov %vm10179_vm3 }
0x15c5   :  { %v9582_v54 = vmul.u32.u64.low %v4706_v44, %v4705_v42  ;;  %v9583_v34 = vmul.u32.u64.high %v4706_v44, %v4705_v42, %v9582_v54  ;;  %vm10181_vm6 = vmmov %vm10180_vm0 }
0x15c6   :  { %v4716_v55 = vadd.s32 1, %v9586_v59 }
0x15c7   :  { %vm4715_vm10 = vc.u32 %v9583_v34, %v9585_v62  ;;  %v4714_v26 = vadd.s32 %v9585_v62, %v9583_v34  ;;  %v4922_v34 = vld [vmem:[%s10172_s21] sm:$0xff]  ;;  %s10190_s21 = sld [smem:[#allocation39_spill]] }
0x15c8   :  { %v4717_v53 = vsel %vm4715_vm10, %v4716_v55, %v9586_v59  ;;  %v5043_v62 = vld [vmem:[%s10173_s6] sm:$0xff]  ;;  %vm10183_vm10 = vmmov %vm10180_vm0  ;;  %s10191_s6 = sld [smem:[#allocation35_spill]] }
0x15c9   :  { %v4718_v15 = vadd.s32 %v4717_v53, %v4713_v38  ;;  %v5125_v59 = vld [vmem:[%s10175_s16] sm:$0xff]  ;;  %s10194_s16 = sld [smem:[#allocation33_spill]] }
0x15cb   :  { %v4719_v16 = vadd.s32 536870912, %v4718_v15 }
0x15cd   :  { %v4720_v40 = vshrl.u32 %v4719_v16, 30 }
0x15cf   :  { %v4721_v47 = vshll.u32 %v4720_v40, 30  ;;  %v4744_v57 = vsub.s32 4, %v4720_v40 }
0x15d1   :  { %v4722_v13 = vsub.s32 %v4718_v15, %v4721_v47  ;;  %v4745_v23 = vsel %vm4660_vm13, %v4744_v57, %v4720_v40  ;;  %v4771_v40 = vld [vmem:[%s10176_s29] sm:$0xff]  ;;  %s10200_s29 = sld [smem:[#allocation34_spill]] }
0x15d2   :  { %v4747_v20 = vsel %vm4659_vm14, 0, %v4745_v23  ;;  %v4923_v47 = vld [vmem:[%s10177_s8] sm:$0xff]  ;;  %s10206_s8 = sld [smem:[#allocation36_spill]] }
0x15d3   :  { %v4724_v24 = vsub.s32 0, %v4722_v13  ;;  %v4751_v1 = vadd.s32 3, %v4747_v20 }
0x15d5   :  { %v6559_v49 = vmin.u32 %v4724_v24, %v4722_v13  ;;  %v4752_v32 = vand.u32 3, %v4751_v1 }
0x15d7   :  { %v4726_v58 = vclz %v6559_v49  ;;  %vm4757_vm12 = vcmp.eq.s32.totalorder %v4752_v32, 2  ;;  %vm4754_vm15 = vcmp.eq.s32.totalorder %v4752_v32, 0  ;;  %vm4753_vm7 = vcmp.lt.s32.totalorder %v4752_v32, 2 }
0x15d9   :  { %v6560_v56 = vadd.s32 4294967294, %v4726_v58 }
0x15db   :  { %vm6561_vm11 = vcmp.lt.s32.totalorder %v6560_v56, 0 }
0x15dc   :  { %v4729_v51 = vsel %vm6561_vm11, 0, %v6560_v56  ;;  %vm10184_vm11 = vmmov %vm10180_vm0 }
0x15dd   :  { %v4730_v48 = vsub.s32 32, %v4729_v51  ;;  %v4734_v21 = vsub.s32 4294967266, %v4729_v51  ;;  %v4731_v12 = vshll.u32 %v4722_v13, %v4729_v51  ;;  %v5124_v13 = vld [vmem:[%s10178_s28] sm:$0xff]  ;;  %s7538_s28 = smov 91  }
0x15df   :  { %v4732_v7 = vshrl.u32 %v4714_v26, %v4730_v48  ;;  %v4735_v28 = vadd.s32 127, %v4734_v21 }
0x15e1   :  { %v4733_v61 = vor.u32 %v4732_v7, %v4731_v12  ;;  %v4736_v17 = vshll.u32 %v4735_v28, 23 }
0x15e3   :  { %v4737_v8 = vor.u32 4788187, %v4736_v17  ;;  %v4740_v10 = vcvt.s32.f32 %v4733_v61 }
0x15e5   :  { %v4738_v36 = vand.u32 2147483647, %v4737_v8 }
0x15e7   :  { %v4741_v33 = vmul.f32 %v4740_v10, %v4738_v36 }
0x15e9   :  { %v4742_v63 = vxor.u32 2147483648, %v4741_v33 }
0x15eb   :  { %v4743_v5 = vsel %vm4660_vm13, %v4742_v63, %v4741_v33  ;;  %vm10185_vm13 = vmmov %vm10180_vm0 }
0x15ec   :  { %v4746_v46 = vsel %vm4659_vm14, %v9565_v9, %v4743_v5  ;;  %v4770_v5 = vld [vmem:[%s10182_s24] sm:$0xff]  ;;  %vm10186_vm14 = vmmov %vm10180_vm0  ;;  %s10207_s24 = sld [smem:[#allocation47_spill]] }
0x15ed   :  { %7380 = vcosq.f32 %v4746_v46 }
0x15ee   :  { %7382 = vsinq.f32 %v4746_v46 }
0x15fa   :  { %v7381_v4 = vpop.eup %7380 }
0x15fb   :  { %v7383_v27 = vpop.eup %7382  ;;  %v4758_v60 = vxor.u32 2147483648, %v7381_v4 }
0x15fc   :  { %v4755_v25 = vxor.u32 2147483648, %v7383_v27 }
0x15fd   :  { %v4759_v31 = vsel %vm4757_vm12, %v4758_v60, %v7383_v27  ;;  %vm10187_vm12 = vcmask 457728  }
0x15fe   :  { %v4756_v0 = vsel %vm4754_vm15, %v7381_v4, %v4755_v25 }
0x15ff   :  { %v4760_v29 = vsel %vm4753_vm7, %v4756_v0, %v4759_v31 }
0x1600   :  { %v4761_v14 = vsel %vm4750_vm5, nan, %v4760_v29 }
0x1601   :  { %v4762_v19 = vmul.f32 %v4761_v14, %v4761_v14 }
0x1603   :  { %v4768_v30 = vmul.f32 %v4766_v6, %v4762_v19 }
0x1605   :  { %v4769_v44 = vadd.f32 %v4768_v30, %v9562_v22 }
0x1607   :  { %4773 = vrot.lane.b32.xlu1 %v4769_v44, %s7498_s17  ;;  %4798 = vrot.lane.b32.xlu0 %v4769_v44, %s7535_s0 }
0x1679   :  { %v4799_v18 = vpop.permute.xlu0 %4798  ;;  %v4774_v9 = vpop.permute.xlu1 %4773 }
0x167a   :  { %v4801_v45 = vsel %vm10171_vm9, 0.0, %v4799_v18  ;;  %v4776_v42 = vsel %vm10174_vm2, 0.0, %v4774_v9 }
0x167b   :  { %v4802_v52 = vsel %vm4777_vm8, %v4801_v45, 0.0  ;;  %v9610_v54 = vsel %vm4777_vm8, %v4776_v42, 0.0 }
0x167c   :  { %4812 = vrot.lane.b32.xlu1 %v4802_v52, %s7500_s25  ;;  %4814 = vrot.lane.b32.xlu0 %v4802_v52, %s7501_s5 }
0x1680   :  { %4808 = vrot.lane.b32.xlu1 %v4802_v52, %s7502_s9  ;;  %4810 = vrot.lane.b32.xlu0 %v4802_v52, %s7503_s12 }
0x1684   :  { %4804 = vrot.lane.b32.xlu1 %v4802_v52, %s7504_s10  ;;  %4806 = vrot.lane.b32.xlu0 %v4802_v52, %s7505_s7 }
0x1688   :  { %4795 = vrot.lane.b32.xlu0 %v9610_v54, %s7501_s5 }
0x168c   :  { %4792 = vrot.lane.b32.xlu0 %v9610_v54, %s7500_s25 }
0x1690   :  { %4789 = vrot.lane.b32.xlu0 %v9610_v54, %s7503_s12 }
0x1694   :  { %4786 = vrot.lane.b32.xlu0 %v9610_v54, %s7502_s9 }
0x1698   :  { %4783 = vrot.lane.b32.xlu0 %v9610_v54, %s7505_s7 }
0x169c   :  { %4780 = vrot.lane.b32.xlu0 %v9610_v54, %s7504_s10 }
0x16a0   :  { %4816 = vrot.lane.b32.xlu0 %v4802_v52, %s7536_s27 }
0x16a4   :  { %4926 = vperm.xlu0 %7306, %v4922_v34  }
0x16a8   :  { %5046 = vperm.xlu0 %7306, %v5043_v62  }
0x16ac   :  { %5239 = vperm.xlu0 %7306, %v5125_v59  }
0x16ee   :  { %v4815_v11 = vpop.permute.xlu0 %4814  ;;  %v4813_v55 = vpop.permute.xlu1 %4812 }
0x16ef   :  { %4828 = vrot.lane.b32.xlu1 %v4815_v11, %s7536_s27 }
0x16f2   :  { %v4811_v38 = vpop.permute.xlu0 %4810  ;;  %v4809_v53 = vpop.permute.xlu1 %4808 }
0x16f3   :  { %4826 = vrot.lane.b32.xlu1 %v4813_v55, %s7536_s27 }
0x16f6   :  { %v4807_v15 = vpop.permute.xlu0 %4806  ;;  %v4805_v16 = vpop.permute.xlu1 %4804 }
0x16f7   :  { %4824 = vrot.lane.b32.xlu1 %v4811_v38, %s7536_s27 }
0x16fa   :  { %v4796_v24 = vpop.permute.xlu0 %4795 }
0x16fb   :  { %4822 = vrot.lane.b32.xlu1 %v4809_v53, %s7536_s27 }
0x16fe   :  { %v4793_v49 = vpop.permute.xlu0 %4792 }
0x16ff   :  { %4820 = vrot.lane.b32.xlu1 %v4807_v15, %s7536_s27 }
0x1702   :  { %v4790_v58 = vpop.permute.xlu0 %4789 }
0x1703   :  { %4818 = vrot.lane.b32.xlu1 %v4805_v16, %s7536_s27 }
0x1706   :  { %v4787_v26 = vpop.permute.xlu0 %4786 }
0x1707   :  { %4846 = vperm.xlu1 %7307, %v4771_v40  }
0x170a   :  { %v4784_v12 = vpop.permute.xlu0 %4783 }
0x170b   :  { %5037 = vperm.xlu1 %7307, %v4923_v47  }
0x170e   :  { %v4781_v8 = vpop.permute.xlu0 %4780 }
0x170f   :  { %5128 = vperm.xlu1 %7307, %v5124_v13  }
0x1712   :  { %v4817_v33 = vpop.permute.xlu0 %4816 }
0x1713   :  { %v4837_v46 = vsel %vm10186_vm14, %v9610_v54, %v4817_v33 }
0x171f   :  { %v4927_v32 = vpop.permute.xlu0 %4926 }
0x1761   :  { %v4829_v56 = vpop.permute.xlu1 %4828 }
0x1762   :  { %v4843_v51 = vsel %vm10179_vm3, %v4796_v24, %v4829_v56 }
0x1763   :  { %7017 = vmatpush3.msra.mxu1 %v4843_v51 }
0x1764   :  { %7018 = vmatprep.subr.mxu1 %v7532_v2 }
0x1765   :  { %v4827_v48 = vpop.permute.xlu1 %4826 }
0x1766   :  { %v4842_v21 = vsel %vm10180_vm0, %v4793_v49, %v4827_v48 }
0x1767   :  { %7019 = vmatpush3.msra.mxu1 %v4842_v21 }
0x1768   :  { %7020 = vmatprep.subr.mxu1 %v7532_v2 }
0x1769   :  { %v4825_v7 = vpop.permute.xlu1 %4824 }
0x176a   :  { %v4841_v28 = vsel %vm10181_vm6, %v4790_v58, %v4825_v7 }
0x176b   :  { %7021 = vmatpush3.msra.mxu1 %v4841_v28 }
0x176c   :  { %7022 = vmatprep.subr.mxu1 %v7532_v2 }
0x176d   :  { %v4823_v61 = vpop.permute.xlu1 %4822 }
0x176e   :  { %v4840_v17 = vsel %vm10183_vm10, %v4787_v26, %v4823_v61 }
0x176f   :  { %7023 = vmatpush3.msra.mxu1 %v4840_v17 }
0x1770   :  { %7024 = vmatprep.subr.mxu1 %v7532_v2 }
0x1771   :  { %v4821_v36 = vpop.permute.xlu1 %4820 }
0x1772   :  { %v4839_v10 = vsel %vm10184_vm11, %v4784_v12, %v4821_v36 }
0x1773   :  { %7025 = vmatpush3.msra.mxu1 %v4839_v10 }
0x1774   :  { %7026 = vmatprep.subr.mxu1 %v7532_v2 }
0x1775   :  { %v4819_v63 = vpop.permute.xlu1 %4818 }
0x1776   :  { %v4838_v57 = vsel %vm10185_vm13, %v4781_v8, %v4819_v63 }
0x1777   :  { %7027 = vmatpush3.msra.mxu1 %v4838_v57 }
0x1778   :  { %7028 = vmatprep.subr.mxu1 %v7532_v2 }
0x1779   :  { %7029 = vmatpush3.msra.mxu1 %v4837_v46 }
0x177a   :  { %7031 = vmatmul.mubr.msk.f32.vlgmr.msra.gmra.mxu1 %vm10187_vm12, %v4770_v5  ;;  %7055 = vmatprep.subr.mxu1 %v7532_v2 }
0x177b   :  { %7057 = vmatprep.mubr.msk.f32.mxu1 %vm7534_vm4, %v7532_v2 }
0x1782   :  { %v4847_v23 = vpop.permute.xlu1 %4846 }
0x183a   :  { %v4918_v20 = vpop.f32.mrf.mxu1 }
0x183b   :  { %v9656_v1 = vadd.f32 %v4918_v20, %v4847_v23 }
0x183c   :  { %v7032_v4 = vpop.f32.mrf.mxu1 }
0x183d   :  { %v9659_v27 = vmul.f32 %v4927_v32, %v9656_v1 }
0x183f   :  { %v4933_v60 = vand.u32 2139095040, %v9659_v27  ;;  %v4930_v29 = vand.u32 2147483647, %v9659_v27  ;;  %vm4932_vm6 = vcmp.lt.s32.totalorder %v9659_v27, 0  ;;  %vm5022_vm12 = vweird.f32 %v9659_v27 }
0x1841   :  { %v4934_v25 = vshrl.u32 %v4933_v60, 23  ;;  %v4937_v6 = vand.u32 8388607, %v4930_v29  ;;  %vm4931_vm10 = vcmp.le.f32.partialorder %v4930_v29, 0.7853982 }
0x1843   :  { %v6563_v31 = vadd.s32 4294967169, %v4934_v25  ;;  %v4938_v55 = vor.u32 8388608, %v4937_v6 }
0x1845   :  { %v4940_v0 = vadd.s32 1, %v6563_v31  ;;  %v4978_v48 = vshll.u32 %v4938_v55, 8 }
0x1847   :  { %vm4941_vm15 = vcmp.gt.s32.totalorder %v4940_v0, 0 }
0x1848   :  { %v4942_v14 = vsel %vm4941_vm15, %v4940_v0, 0  ;;  %vm5049_vm15 = vcmask 64512  }
0x1849   :  { %v4944_v19 = vand.u32 31, %v4942_v14  ;;  %v4943_v44 = vshrl.u32 %v4942_v14, 5 }
0x184b   :  { %v4945_v30 = vsub.s32 32, %v4944_v19  ;;  %v4947_v18 = vshll.u32 %v7507_v35, %v4944_v19  ;;  %v4950_v45 = vshll.u32 %v7508_v37, %v4944_v19  ;;  %v4953_v42 = vshll.u32 %v7509_v39, %v4944_v19 }
0x184c   :  { %v4956_v34 = vshll.u32 %v7510_v41, %v4944_v19  ;;  %v4959_v59 = vshll.u32 %v7511_v43, %v4944_v19  ;;  %vm4962_vm7 = vcmp.lt.s32.totalorder %v4943_v44, 1  ;;  %vm4965_vm5 = vcmp.lt.s32.totalorder %v4943_v44, 4 }
0x184d   :  { %v4948_v52 = vshrl.u32 %v7508_v37, %v4945_v30  ;;  %v4951_v9 = vshrl.u32 %v7509_v39, %v4945_v30  ;;  %v4954_v54 = vshrl.u32 %v7510_v41, %v4945_v30  ;;  %v4957_v62 = vshrl.u32 %v7511_v43, %v4945_v30 }
0x184e   :  { %v4960_v11 = vshrl.u32 %v7512_v50, %v4945_v30  ;;  %v4946_v49 = vshrl.u32 %v7507_v35, %v4945_v30  ;;  %vm4964_vm9 = vcmp.lt.s32.totalorder %v4943_v44, 3  ;;  %vm4963_vm2 = vcmp.lt.s32.totalorder %v4943_v44, 2 }
0x184f   :  { %v4949_v38 = vor.u32 %v4948_v52, %v4947_v18  ;;  %v4952_v53 = vor.u32 %v4951_v9, %v4950_v45  ;;  %v4955_v15 = vor.u32 %v4954_v54, %v4953_v42  ;;  %v4958_v16 = vor.u32 %v4957_v62, %v4956_v34 }
0x1850   :  { %v4961_v40 = vor.u32 %v4960_v11, %v4959_v59 }
0x1851   :  { %v4967_v47 = vsel %vm4965_vm5, %v4955_v15, 2102212464  ;;  %v4970_v13 = vsel %vm4962_vm7, %v4949_v38, %v4952_v53  ;;  %v4974_v24 = vsel %vm4962_vm7, %v4952_v53, %v4955_v15  ;;  %v4971_v58 = vsel %vm4965_vm5, %v4958_v16, 920167782 }
0x1852   :  { %v4975_v56 = vsel %vm4965_vm5, %v4961_v40, 1326507024  ;;  %v4972_v51 = vsel %vm4964_vm9, %v4955_v15, %v4971_v58  ;;  %v4966_v21 = vsel %vm4962_vm7, %v4946_v49, %v4949_v38  ;;  %v4968_v12 = vsel %vm4964_vm9, %v4952_v53, %v4967_v47 }
0x1853   :  { %v4976_v26 = vsel %vm4964_vm9, %v4958_v16, %v4975_v56  ;;  %v4973_v7 = vsel %vm4963_vm2, %v4970_v13, %v4972_v51  ;;  %v4969_v10 = vsel %vm4963_vm2, %v4966_v21, %v4968_v12  ;;  %v5042_v12 = vld [vmem:[%s10188_s20] sm:$0xff]  ;;  %s10208_s20 = sld [smem:[#allocation43_spill]] }
0x1854   :  { %v4977_v28 = vsel %vm4963_vm2, %v4974_v24, %v4976_v26  ;;  %v9679_v8 = vmul.u32.u64.low %v4978_v48, %v4973_v7  ;;  %v9680_v36 = vmul.u32.u64.high %v4978_v48, %v4973_v7, %v9679_v8  ;;  %v4985_v63 = vmul.u32 %v4978_v48, %v4969_v10  ;;  %v5038_v26 = vpop.permute.xlu1 %5037  ;;  %v5047_v7 = vpop.permute.xlu0 %5046 }
0x1855   :  { %v9676_v61 = vmul.u32.u64.low %v4978_v48, %v4977_v28  ;;  %v9677_v17 = vmul.u32.u64.high %v4978_v48, %v4977_v28, %v9676_v61 }
0x1856   :  { %v4988_v33 = vadd.s32 1, %v9680_v36 }
0x1857   :  { %vm4987_vm3 = vc.u32 %v9677_v17, %v9679_v8  ;;  %v4986_v14 = vadd.s32 %v9679_v8, %v9677_v17 }
0x1858   :  { %v4989_v57 = vsel %vm4987_vm3, %v4988_v33, %v9680_v36  ;;  %v5129_v8 = vpop.permute.xlu1 %5128 }
0x1859   :  { %v4990_v5 = vadd.s32 %v4989_v57, %v4985_v63 }
0x185b   :  { %v4991_v46 = vadd.s32 536870912, %v4990_v5 }
0x185d   :  { %v4992_v23 = vshrl.u32 %v4991_v46, 30 }
0x185f   :  { %v4993_v20 = vshll.u32 %v4992_v23, 30  ;;  %v5016_v59 = vsub.s32 4, %v4992_v23 }
0x1861   :  { %v4994_v32 = vsub.s32 %v4990_v5, %v4993_v20  ;;  %v5017_v38 = vsel %vm4932_vm6, %v5016_v59, %v4992_v23 }
0x1862   :  { %v5019_v53 = vsel %vm4931_vm10, 0, %v5017_v38 }
0x1863   :  { %v4996_v4 = vsub.s32 0, %v4994_v32  ;;  %v5023_v15 = vadd.s32 3, %v5019_v53 }
0x1865   :  { %v6564_v60 = vmin.u32 %v4996_v4, %v4994_v32  ;;  %v5024_v16 = vand.u32 3, %v5023_v15 }
0x1867   :  { %v4998_v25 = vclz %v6564_v60  ;;  %vm5029_vm11 = vcmp.eq.s32.totalorder %v5024_v16, 2  ;;  %vm5026_vm13 = vcmp.eq.s32.totalorder %v5024_v16, 0  ;;  %vm5025_vm14 = vcmp.lt.s32.totalorder %v5024_v16, 2 }
0x1869   :  { %v6565_v31 = vadd.s32 4294967294, %v4998_v25 }
0x186b   :  { %vm6566_vm0 = vcmp.lt.s32.totalorder %v6565_v31, 0 }
0x186c   :  { %v5001_v0 = vsel %vm6566_vm0, 0, %v6565_v31 }
0x186d   :  { %v5002_v19 = vsub.s32 32, %v5001_v0  ;;  %v5006_v6 = vsub.s32 4294967266, %v5001_v0  ;;  %v5003_v30 = vshll.u32 %v4994_v32, %v5001_v0 }
0x186f   :  { %v5004_v44 = vshrl.u32 %v4986_v14, %v5002_v19  ;;  %v5007_v18 = vadd.s32 127, %v5006_v6 }
0x1871   :  { %v5005_v45 = vor.u32 %v5004_v44, %v5003_v30  ;;  %v5008_v52 = vshll.u32 %v5007_v18, 23 }
0x1873   :  { %v5009_v9 = vor.u32 4788187, %v5008_v52  ;;  %v5012_v54 = vcvt.s32.f32 %v5005_v45 }
0x1875   :  { %v5010_v42 = vand.u32 2147483647, %v5009_v9 }
0x1877   :  { %v5013_v34 = vmul.f32 %v5012_v54, %v5010_v42 }
0x1879   :  { %v5014_v62 = vxor.u32 2147483648, %v5013_v34 }
0x187b   :  { %v5015_v11 = vsel %vm4932_vm6, %v5014_v62, %v5013_v34 }
0x187c   :  { %v5018_v55 = vsel %vm4931_vm10, %v9659_v27, %v5015_v11 }
0x187d   :  { %7384 = vcosq.f32 %v5018_v55 }
0x187e   :  { %7386 = vsinq.f32 %v5018_v55 }
0x188a   :  { %v7385_v40 = vpop.eup %7384 }
0x188b   :  { %v7387_v47 = vpop.eup %7386  ;;  %v5030_v13 = vxor.u32 2147483648, %v7385_v40 }
0x188c   :  { %v5027_v24 = vxor.u32 2147483648, %v7387_v47 }
0x188d   :  { %v5031_v49 = vsel %vm5029_vm11, %v5030_v13, %v7387_v47 }
0x188e   :  { %v5028_v58 = vsel %vm5026_vm13, %v7385_v40, %v5027_v24 }
0x188f   :  { %v5032_v29 = vsel %vm5025_vm14, %v5028_v58, %v5031_v49 }
0x1890   :  { %v5033_v56 = vsel %vm5022_vm12, nan, %v5032_v29 }
0x1891   :  { %v5034_v51 = vmul.f32 %v5033_v56, %v5033_v56 }
0x1893   :  { %v5040_v48 = vmul.f32 %v5038_v26, %v5034_v51 }
0x1895   :  { %v5041_v21 = vadd.f32 %v5040_v48, %v9656_v1 }
0x1897   :  { %7034 = vmatpush3.msra.mxu0 %v5041_v21 }
0x1898   :  { %7036 = vmatmul.mubr.msk.f32.vlgmr.msra.gmra.mxu0 %vm5049_vm15, %v5042_v12  ;;  %7038 = vmatprep.subr.mxu0 %v7532_v2 }
0x1899   :  { %7052 = vmatprep.mubr.msk.f32.mxu0 %vm7534_vm4, %v7532_v2 }
0x1958   :  { %v5119_v28 = vpop.f32.mrf.mxu0 }
0x1959   :  { %v5120_v27 = vadd.f32 %v5119_v28, %v5047_v7 }
0x195a   :  { %v7037_v61 = vpop.f32.mrf.mxu0 }
0x195b   :  { %v9698_v17 = vadd.f32 %v5120_v27, %v9562_v22 }
0x195d   :  { %v9701_v1 = vmul.f32 %v5129_v8, %v9698_v17 }
0x195f   :  { %v5135_v36 = vand.u32 2139095040, %v9701_v1  ;;  %v5132_v57 = vand.u32 2147483647, %v9701_v1  ;;  %vm5134_vm10 = vcmp.lt.s32.totalorder %v9701_v1, 0 }
0x1961   :  { %v5136_v10 = vshrl.u32 %v5135_v36, 23  ;;  %v5139_v23 = vand.u32 8388607, %v5132_v57  ;;  %vm5133_vm11 = vcmp.le.f32.partialorder %v5132_v57, 0.7853982 }
0x1963   :  { %v6568_v33 = vadd.s32 4294967169, %v5136_v10  ;;  %v5140_v44 = vor.u32 8388608, %v5139_v23 }
0x1965   :  { %v5142_v63 = vadd.s32 1, %v6568_v33  ;;  %v5180_v15 = vshll.u32 %v5140_v44, 8 }
0x1967   :  { %vm5143_vm7 = vcmp.gt.s32.totalorder %v5142_v63, 0 }
0x1968   :  { %v5144_v5 = vsel %vm5143_vm7, %v5142_v63, 0  ;;  %vm5224_vm7 = vweird.f32 %v9701_v1 }
0x1969   :  { %v5146_v46 = vand.u32 31, %v5144_v5  ;;  %v5145_v22 = vshrl.u32 %v5144_v5, 5 }
0x196b   :  { %v5147_v20 = vsub.s32 32, %v5146_v46  ;;  %v5149_v32 = vshll.u32 %v7507_v35, %v5146_v46  ;;  %v5152_v4 = vshll.u32 %v7508_v37, %v5146_v46  ;;  %v5155_v31 = vshll.u32 %v7509_v39, %v5146_v46 }
0x196c   :  { %v5158_v14 = vshll.u32 %v7510_v41, %v5146_v46  ;;  %v5161_v6 = vshll.u32 %v7511_v43, %v5146_v46  ;;  %vm5164_vm5 = vcmp.lt.s32.totalorder %v5145_v22, 1  ;;  %vm5167_vm9 = vcmp.lt.s32.totalorder %v5145_v22, 4 }
0x196d   :  { %v5150_v60 = vshrl.u32 %v7508_v37, %v5147_v20  ;;  %v5153_v25 = vshrl.u32 %v7509_v39, %v5147_v20  ;;  %v5156_v0 = vshrl.u32 %v7510_v41, %v5147_v20  ;;  %v5159_v19 = vshrl.u32 %v7511_v43, %v5147_v20 }
0x196e   :  { %v5162_v30 = vshrl.u32 %v7512_v50, %v5147_v20  ;;  %v5148_v59 = vshrl.u32 %v7507_v35, %v5147_v20  ;;  %vm5166_vm2 = vcmp.lt.s32.totalorder %v5145_v22, 3  ;;  %vm5165_vm3 = vcmp.lt.s32.totalorder %v5145_v22, 2 }
0x196f   :  { %v5151_v18 = vor.u32 %v5150_v60, %v5149_v32  ;;  %v5154_v45 = vor.u32 %v5153_v25, %v5152_v4  ;;  %v5157_v52 = vor.u32 %v5156_v0, %v5155_v31  ;;  %v5160_v9 = vor.u32 %v5159_v19, %v5158_v14 }
0x1970   :  { %v5163_v42 = vor.u32 %v5162_v30, %v5161_v6 }
0x1971   :  { %v5169_v54 = vsel %vm5167_vm9, %v5157_v52, 2102212464  ;;  %v5172_v34 = vsel %vm5164_vm5, %v5151_v18, %v5154_v45  ;;  %v5176_v62 = vsel %vm5164_vm5, %v5154_v45, %v5157_v52  ;;  %v5173_v11 = vsel %vm5167_vm9, %v5160_v9, 920167782 }
0x1972   :  { %v5177_v55 = vsel %vm5167_vm9, %v5163_v42, 1326507024  ;;  %v5174_v38 = vsel %vm5166_vm2, %v5157_v52, %v5173_v11  ;;  %v5168_v16 = vsel %vm5164_vm5, %v5148_v59, %v5151_v18  ;;  %v5170_v40 = vsel %vm5166_vm2, %v5154_v45, %v5169_v54 }
0x1973   :  { %v5178_v53 = vsel %vm5166_vm2, %v5160_v9, %v5177_v55  ;;  %v5175_v47 = vsel %vm5165_vm3, %v5172_v34, %v5174_v38  ;;  %v5171_v56 = vsel %vm5165_vm3, %v5168_v16, %v5170_v40  ;;  %v5240_v38 = vpop.permute.xlu0 %5239  ;;  %vm5251_vm5 = vcmask 596992  }
0x1974   :  { %v5179_v13 = vsel %vm5165_vm3, %v5176_v62, %v5178_v53  ;;  %v9721_v58 = vmul.u32.u64.low %v5180_v15, %v5175_v47  ;;  %v9722_v29 = vmul.u32.u64.high %v5180_v15, %v5175_v47, %v9721_v58  ;;  %v5187_v26 = vmul.u32 %v5180_v15, %v5171_v56 }
0x1975   :  { %v9718_v24 = vmul.u32.u64.low %v5180_v15, %v5179_v13  ;;  %v9719_v49 = vmul.u32.u64.high %v5180_v15, %v5179_v13, %v9718_v24  ;;  %vm10189_vm9 = vcmask 72704   ;;  %vm10197_vm3 = vcmask 523264  }
0x1976   :  { %v5190_v51 = vadd.s32 1, %v9722_v29  ;;  %vm10192_vm2 = vmmov %vm10189_vm9 }
0x1977   :  { %vm5189_vm0 = vc.u32 %v9719_v49, %v9721_v58  ;;  %v5188_v63 = vadd.s32 %v9721_v58, %v9719_v49  ;;  %v5396_v49 = vld [vmem:[%s10190_s21] sm:$0xff] }
0x1978   :  { %v5191_v48 = vsel %vm5189_vm0, %v5190_v51, %v9722_v29  ;;  %v5517_v58 = vld [vmem:[%s10191_s6] sm:$0xff]  ;;  %vm10198_vm0 = vmmov %vm10197_vm3 }
0x1979   :  { %v5192_v21 = vadd.s32 %v5191_v48, %v5187_v26 }
0x197b   :  { %v5193_v12 = vadd.s32 536870912, %v5192_v21 }
0x197d   :  { %v5194_v7 = vshrl.u32 %v5193_v12, 30 }
0x197f   :  { %v5195_v28 = vshll.u32 %v5194_v7, 30  ;;  %v5218_v19 = vsub.s32 4, %v5194_v7 }
0x1981   :  { %v5196_v27 = vsub.s32 %v5192_v21, %v5195_v28  ;;  %v5219_v44 = vsel %vm5134_vm10, %v5218_v19, %v5194_v7  ;;  %v5245_v7 = vld [vmem:[%s10194_s16] sm:$0xff] }
0x1982   :  { %v5221_v18 = vsel %vm5133_vm11, 0, %v5219_v44 }
0x1983   :  { %v5198_v61 = vsub.s32 0, %v5196_v27  ;;  %v5225_v45 = vadd.s32 3, %v5221_v18 }
0x1985   :  { %v6569_v8 = vmin.u32 %v5198_v61, %v5196_v27  ;;  %v5226_v52 = vand.u32 3, %v5225_v45 }
0x1987   :  { %v5200_v36 = vclz %v6569_v8  ;;  %vm5231_vm13 = vcmp.eq.s32.totalorder %v5226_v52, 2  ;;  %vm5228_vm14 = vcmp.eq.s32.totalorder %v5226_v52, 0  ;;  %vm5227_vm12 = vcmp.lt.s32.totalorder %v5226_v52, 2 }
0x1989   :  { %v6570_v10 = vadd.s32 4294967294, %v5200_v36 }
0x198b   :  { %vm6571_vm6 = vcmp.lt.s32.totalorder %v6570_v10, 0 }
0x198c   :  { %v5203_v33 = vsel %vm6571_vm6, 0, %v6570_v10  ;;  %vm10199_vm6 = vmmov %vm10198_vm0 }
0x198d   :  { %v5204_v5 = vsub.s32 32, %v5203_v33  ;;  %v5208_v46 = vsub.s32 4294967266, %v5203_v33  ;;  %v5205_v23 = vshll.u32 %v5196_v27, %v5203_v33 }
0x198f   :  { %v5206_v20 = vshrl.u32 %v5188_v63, %v5204_v5  ;;  %v5209_v22 = vadd.s32 127, %v5208_v46 }
0x1991   :  { %v5207_v32 = vor.u32 %v5206_v20, %v5205_v23  ;;  %v5210_v4 = vshll.u32 %v5209_v22, 23 }
0x1993   :  { %v5211_v60 = vor.u32 4788187, %v5210_v4  ;;  %v5214_v31 = vcvt.s32.f32 %v5207_v32 }
0x1995   :  { %v5212_v25 = vand.u32 2147483647, %v5211_v60 }
0x1997   :  { %v5215_v0 = vmul.f32 %v5214_v31, %v5212_v25 }
0x1999   :  { %v5216_v14 = vxor.u32 2147483648, %v5215_v0 }
0x199b   :  { %v5217_v6 = vsel %vm5134_vm10, %v5216_v14, %v5215_v0  ;;  %vm10201_vm10 = vmmov %vm10198_vm0 }
0x199c   :  { %v5220_v30 = vsel %vm5133_vm11, %v9701_v1, %v5217_v6  ;;  %vm10202_vm11 = vmmov %vm10198_vm0  ;;  %v5244_v6 = vld [vmem:[%s10200_s29] sm:$0xff] }
0x199d   :  { %7388 = vcosq.f32 %v5220_v30 }
0x199e   :  { %7390 = vsinq.f32 %v5220_v30 }
0x19aa   :  { %v7389_v9 = vpop.eup %7388 }
0x19ab   :  { %v7391_v42 = vpop.eup %7390  ;;  %v5232_v54 = vxor.u32 2147483648, %v7389_v9 }
0x19ac   :  { %v5229_v34 = vxor.u32 2147483648, %v7391_v42 }
0x19ad   :  { %v5233_v62 = vsel %vm5231_vm13, %v5232_v54, %v7391_v42  ;;  %vm10203_vm13 = vmmov %vm10198_vm0 }
0x19ae   :  { %v5230_v59 = vsel %vm5228_vm14, %v7389_v9, %v5229_v34  ;;  %vm10204_vm14 = vmmov %vm10198_vm0 }
0x19af   :  { %v5234_v57 = vsel %vm5227_vm12, %v5230_v59, %v5233_v62  ;;  %vm10205_vm12 = vcmask 457728  }
0x19b0   :  { %v5235_v11 = vsel %vm5224_vm7, nan, %v5234_v57 }
0x19b1   :  { %v5236_v55 = vmul.f32 %v5235_v11, %v5235_v11 }
0x19b3   :  { %v5242_v53 = vmul.f32 %v5240_v38, %v5236_v55 }
0x19b5   :  { %v5243_v15 = vadd.f32 %v5242_v53, %v9698_v17 }
0x19b7   :  { %5247 = vrot.lane.b32.xlu0 %v5243_v15, %s7521_s14  ;;  %5272 = vrot.lane.b32.xlu1 %v5243_v15, %s7537_s2  ;;  %s10193_s14 = sld [smem:[#allocation46_spill]] }
0x19bd   :  { %v5598_v29 = vld [vmem:[%s10193_s14] sm:$0xff] }
0x1a29   :  { %v5273_v16 = vpop.permute.xlu1 %5272  ;;  %v5248_v1 = vpop.permute.xlu0 %5247 }
0x1a2a   :  { %v5275_v40 = vsel %vm10189_vm9, 0.0, %v5273_v16  ;;  %v5250_v13 = vsel %vm10192_vm2, 0.0, %v5248_v1 }
0x1a2b   :  { %v5276_v47 = vsel %vm5251_vm5, %v5275_v40, 0.0  ;;  %v9743_v24 = vsel %vm5251_vm5, %v5250_v13, 0.0 }
0x1a2c   :  { %5286 = vrot.lane.b32.xlu0 %v5276_v47, %s7513_s19  ;;  %5288 = vrot.lane.b32.xlu1 %v5276_v47, %s7522_s23 }
0x1a30   :  { %5282 = vrot.lane.b32.xlu0 %v5276_v47, %s7524_s1  ;;  %5284 = vrot.lane.b32.xlu1 %v5276_v47, %s7523_s22 }
0x1a34   :  { %5278 = vrot.lane.b32.xlu0 %v5276_v47, %s7502_s9  ;;  %5280 = vrot.lane.b32.xlu1 %v5276_v47, %s7501_s5 }
0x1a38   :  { %5269 = vrot.lane.b32.xlu1 %v9743_v24, %s7522_s23 }
0x1a3c   :  { %5266 = vrot.lane.b32.xlu1 %v9743_v24, %s7513_s19  ;;  %s10195_s19 = sld [smem:[#allocation40_spill]] }
0x1a40   :  { %5263 = vrot.lane.b32.xlu1 %v9743_v24, %s7523_s22  ;;  %s10196_s22 = sld [smem:[#allocation45_spill]] }
0x1a42   :  { %v5397_v28 = vld [vmem:[%s10195_s19] sm:$0xff] }
0x1a44   :  { %5260 = vrot.lane.b32.xlu1 %v9743_v24, %s7524_s1 }
0x1a46   :  { %v5597_v27 = vld [vmem:[%s10196_s22] sm:$0xff] }
0x1a48   :  { %5257 = vrot.lane.b32.xlu1 %v9743_v24, %s7501_s5 }
0x1a4c   :  { %5254 = vrot.lane.b32.xlu1 %v9743_v24, %s7502_s9 }
0x1a50   :  { %5290 = vrot.lane.b32.xlu1 %v5276_v47, %s7536_s27 }
0x1a54   :  { %5400 = vperm.xlu1 %7307, %v5396_v49  }
0x1a58   :  { %5520 = vperm.xlu1 %7307, %v5517_v58  }
0x1a5c   :  { %5712 = vperm.xlu1 %7307, %v5598_v29  }
0x1a9e   :  { %v5289_v56 = vpop.permute.xlu1 %5288  ;;  %v5287_v51 = vpop.permute.xlu0 %5286 }
0x1a9f   :  { %5302 = vrot.lane.b32.xlu0 %v5289_v56, %s7536_s27 }
0x1aa2   :  { %v5285_v26 = vpop.permute.xlu1 %5284  ;;  %v5283_v48 = vpop.permute.xlu0 %5282 }
0x1aa3   :  { %5300 = vrot.lane.b32.xlu0 %v5287_v51, %s7536_s27 }
0x1aa6   :  { %v5281_v21 = vpop.permute.xlu1 %5280  ;;  %v5279_v12 = vpop.permute.xlu0 %5278 }
0x1aa7   :  { %5298 = vrot.lane.b32.xlu0 %v5285_v26, %s7536_s27 }
0x1aaa   :  { %v5270_v61 = vpop.permute.xlu1 %5269 }
0x1aab   :  { %5296 = vrot.lane.b32.xlu0 %v5283_v48, %s7536_s27 }
0x1aae   :  { %v5267_v8 = vpop.permute.xlu1 %5266 }
0x1aaf   :  { %5294 = vrot.lane.b32.xlu0 %v5281_v21, %s7536_s27 }
0x1ab2   :  { %v5264_v36 = vpop.permute.xlu1 %5263 }
0x1ab3   :  { %5292 = vrot.lane.b32.xlu0 %v5279_v12, %s7536_s27 }
0x1ab6   :  { %v5261_v63 = vpop.permute.xlu1 %5260 }
0x1ab7   :  { %5320 = vperm.xlu0 %7306, %v5245_v7  }
0x1aba   :  { %v5258_v23 = vpop.permute.xlu1 %5257 }
0x1abb   :  { %5511 = vperm.xlu0 %7306, %v5397_v28  }
0x1abe   :  { %v5255_v60 = vpop.permute.xlu1 %5254 }
0x1abf   :  { %5601 = vperm.xlu0 %7306, %v5597_v27  }
0x1ac2   :  { %v5291_v0 = vpop.permute.xlu1 %5290 }
0x1ac3   :  { %v5311_v30 = vsel %vm10204_vm14, %v9743_v24, %v5291_v0 }
0x1acf   :  { %v5401_v52 = vpop.permute.xlu1 %5400 }
0x1b11   :  { %v5303_v10 = vpop.permute.xlu0 %5302 }
0x1b12   :  { %v5317_v33 = vsel %vm10197_vm3, %v5270_v61, %v5303_v10 }
0x1b13   :  { %7039 = vmatpush3.msra.mxu0 %v5317_v33 }
0x1b14   :  { %7040 = vmatprep.subr.mxu0 %v7532_v2 }
0x1b15   :  { %v5301_v5 = vpop.permute.xlu0 %5300 }
0x1b16   :  { %v5316_v46 = vsel %vm10198_vm0, %v5267_v8, %v5301_v5 }
0x1b17   :  { %7041 = vmatpush3.msra.mxu0 %v5316_v46 }
0x1b18   :  { %7042 = vmatprep.subr.mxu0 %v7532_v2 }
0x1b19   :  { %v5299_v20 = vpop.permute.xlu0 %5298 }
0x1b1a   :  { %v5315_v22 = vsel %vm10199_vm6, %v5264_v36, %v5299_v20 }
0x1b1b   :  { %7043 = vmatpush3.msra.mxu0 %v5315_v22 }
0x1b1c   :  { %7044 = vmatprep.subr.mxu0 %v7532_v2 }
0x1b1d   :  { %v5297_v32 = vpop.permute.xlu0 %5296 }
0x1b1e   :  { %v5314_v4 = vsel %vm10201_vm10, %v5261_v63, %v5297_v32 }
0x1b1f   :  { %7045 = vmatpush3.msra.mxu0 %v5314_v4 }
0x1b20   :  { %7046 = vmatprep.subr.mxu0 %v7532_v2 }
0x1b21   :  { %v5295_v25 = vpop.permute.xlu0 %5294 }
0x1b22   :  { %v5313_v31 = vsel %vm10202_vm11, %v5258_v23, %v5295_v25 }
0x1b23   :  { %7047 = vmatpush3.msra.mxu0 %v5313_v31 }
0x1b24   :  { %7048 = vmatprep.subr.mxu0 %v7532_v2 }
0x1b25   :  { %v5293_v14 = vpop.permute.xlu0 %5292 }
0x1b26   :  { %v5312_v19 = vsel %vm10203_vm13, %v5255_v60, %v5293_v14 }
0x1b27   :  { %7049 = vmatpush3.msra.mxu0 %v5312_v19 }
0x1b28   :  { %7050 = vmatprep.subr.mxu0 %v7532_v2 }
0x1b29   :  { %7051 = vmatpush3.msra.mxu0 %v5311_v30 }
0x1b2a   :  { %7053 = vmatmul.mubr.msk.f32.vlgmr.msra.gmra.mxu0 %vm10205_vm12, %v5244_v6  ;;  %7077 = vmatprep.subr.mxu0 %v7532_v2 }
0x1b2b   :  { %7079 = vmatprep.mubr.msk.f32.mxu0 %vm7534_vm4, %v7532_v2 }
0x1b32   :  { %v5321_v44 = vpop.permute.xlu0 %5320 }
0x1bea   :  { %v5392_v18 = vpop.f32.mrf.mxu0 }
0x1beb   :  { %v9789_v45 = vadd.f32 %v5392_v18, %v5321_v44 }
0x1bec   :  { %v7054_v9 = vpop.f32.mrf.mxu0 }
0x1bed   :  { %v9792_v42 = vmul.f32 %v5401_v52, %v9789_v45 }
0x1bef   :  { %v5407_v54 = vand.u32 2139095040, %v9792_v42  ;;  %v5404_v57 = vand.u32 2147483647, %v9792_v42  ;;  %vm5406_vm10 = vcmp.lt.s32.totalorder %v9792_v42, 0 }
0x1bf1   :  { %v5408_v34 = vshrl.u32 %v5407_v54, 23  ;;  %v5411_v38 = vand.u32 8388607, %v5404_v57  ;;  %vm5405_vm11 = vcmp.le.f32.partialorder %v5404_v57, 0.7853982 }
0x1bf3   :  { %v6573_v62 = vadd.s32 4294967169, %v5408_v34  ;;  %v5412_v51 = vor.u32 8388608, %v5411_v38 }
0x1bf5   :  { %v5414_v59 = vadd.s32 1, %v6573_v62  ;;  %v5452_v5 = vshll.u32 %v5412_v51, 8 }
0x1bf7   :  { %vm5415_vm7 = vcmp.gt.s32.totalorder %v5414_v59, 0 }
0x1bf8   :  { %v5416_v11 = vsel %vm5415_vm7, %v5414_v59, 0  ;;  %vm5496_vm7 = vweird.f32 %v9792_v42 }
0x1bf9   :  { %v5418_v55 = vand.u32 31, %v5416_v11  ;;  %v5417_v15 = vshrl.u32 %v5416_v11, 5 }
0x1bfb   :  { %v5419_v53 = vsub.s32 32, %v5418_v55  ;;  %v5421_v16 = vshll.u32 %v7507_v35, %v5418_v55  ;;  %v5424_v40 = vshll.u32 %v7508_v37, %v5418_v55  ;;  %v5427_v13 = vshll.u32 %v7509_v39, %v5418_v55 }
0x1bfc   :  { %v5430_v49 = vshll.u32 %v7510_v41, %v5418_v55  ;;  %v5433_v29 = vshll.u32 %v7511_v43, %v5418_v55  ;;  %vm5436_vm5 = vcmp.lt.s32.totalorder %v5417_v15, 1  ;;  %vm5439_vm9 = vcmp.lt.s32.totalorder %v5417_v15, 4 }
0x1bfd   :  { %v5422_v47 = vshrl.u32 %v7508_v37, %v5419_v53  ;;  %v5425_v1 = vshrl.u32 %v7509_v39, %v5419_v53  ;;  %v5428_v24 = vshrl.u32 %v7510_v41, %v5419_v53  ;;  %v5431_v58 = vshrl.u32 %v7511_v43, %v5419_v53 }
0x1bfe   :  { %v5434_v56 = vshrl.u32 %v7512_v50, %v5419_v53  ;;  %v5420_v8 = vshrl.u32 %v7507_v35, %v5419_v53  ;;  %vm5438_vm2 = vcmp.lt.s32.totalorder %v5417_v15, 3  ;;  %vm5437_vm3 = vcmp.lt.s32.totalorder %v5417_v15, 2 }
0x1bff   :  { %v5423_v26 = vor.u32 %v5422_v47, %v5421_v16  ;;  %v5426_v48 = vor.u32 %v5425_v1, %v5424_v40  ;;  %v5429_v21 = vor.u32 %v5428_v24, %v5427_v13  ;;  %v5432_v12 = vor.u32 %v5431_v58, %v5430_v49 }
0x1c00   :  { %v5435_v7 = vor.u32 %v5434_v56, %v5433_v29 }
0x1c01   :  { %v5441_v28 = vsel %vm5439_vm9, %v5429_v21, 2102212464  ;;  %v5444_v27 = vsel %vm5436_vm5, %v5423_v26, %v5426_v48  ;;  %v5448_v61 = vsel %vm5436_vm5, %v5426_v48, %v5429_v21  ;;  %v5445_v36 = vsel %vm5439_vm9, %v5432_v12, 920167782 }
0x1c02   :  { %v5449_v10 = vsel %vm5439_vm9, %v5435_v7, 1326507024  ;;  %v5446_v33 = vsel %vm5438_vm2, %v5429_v21, %v5445_v36  ;;  %v5440_v46 = vsel %vm5436_vm5, %v5420_v8, %v5423_v26  ;;  %v5442_v23 = vsel %vm5438_vm2, %v5426_v48, %v5441_v28 }
0x1c03   :  { %v5450_v63 = vsel %vm5438_vm2, %v5432_v12, %v5449_v10  ;;  %v5447_v20 = vsel %vm5437_vm3, %v5444_v27, %v5446_v33  ;;  %v5443_v31 = vsel %vm5437_vm3, %v5440_v46, %v5442_v23  ;;  %v5516_v23 = vld [vmem:[%s10206_s8] sm:$0xff] }
0x1c04   :  { %v5451_v22 = vsel %vm5437_vm3, %v5448_v61, %v5450_v63  ;;  %v9812_v60 = vmul.u32.u64.low %v5452_v5, %v5447_v20  ;;  %v9813_v25 = vmul.u32.u64.high %v5452_v5, %v5447_v20, %v9812_v60  ;;  %v5459_v14 = vmul.u32 %v5452_v5, %v5443_v31  ;;  %v5512_v63 = vpop.permute.xlu0 %5511  ;;  %v5521_v20 = vpop.permute.xlu1 %5520 }
0x1c05   :  { %v9809_v32 = vmul.u32.u64.low %v5452_v5, %v5451_v22  ;;  %v9810_v4 = vmul.u32.u64.high %v5452_v5, %v5451_v22, %v9809_v32 }
0x1c06   :  { %v5462_v0 = vadd.s32 1, %v9813_v25 }
0x1c07   :  { %vm5461_vm0 = vc.u32 %v9810_v4, %v9812_v60  ;;  %v5460_v11 = vadd.s32 %v9812_v60, %v9810_v4 }
0x1c08   :  { %v5463_v19 = vsel %vm5461_vm0, %v5462_v0, %v9813_v25  ;;  %v5602_v60 = vpop.permute.xlu0 %5601 }
0x1c09   :  { %v5464_v6 = vadd.s32 %v5463_v19, %v5459_v14 }
0x1c0b   :  { %v5465_v30 = vadd.s32 536870912, %v5464_v6 }
0x1c0d   :  { %v5466_v44 = vshrl.u32 %v5465_v30, 30 }
0x1c0f   :  { %v5467_v18 = vshll.u32 %v5466_v44, 30  ;;  %v5490_v29 = vsub.s32 4, %v5466_v44 }
0x1c11   :  { %v5468_v52 = vsub.s32 %v5464_v6, %v5467_v18  ;;  %v5491_v26 = vsel %vm5406_vm10, %v5490_v29, %v5466_v44 }
0x1c12   :  { %v5493_v48 = vsel %vm5405_vm11, 0, %v5491_v26 }
0x1c13   :  { %v5470_v9 = vsub.s32 0, %v5468_v52  ;;  %v5497_v21 = vadd.s32 3, %v5493_v48 }
0x1c15   :  { %v6574_v54 = vmin.u32 %v5470_v9, %v5468_v52  ;;  %v5498_v12 = vand.u32 3, %v5497_v21 }
0x1c17   :  { %v5472_v34 = vclz %v6574_v54  ;;  %vm5503_vm13 = vcmp.eq.s32.totalorder %v5498_v12, 2  ;;  %vm5500_vm14 = vcmp.eq.s32.totalorder %v5498_v12, 0  ;;  %vm5499_vm12 = vcmp.lt.s32.totalorder %v5498_v12, 2 }
0x1c19   :  { %v6575_v62 = vadd.s32 4294967294, %v5472_v34 }
0x1c1b   :  { %vm6576_vm6 = vcmp.lt.s32.totalorder %v6575_v62, 0 }
0x1c1c   :  { %v5475_v59 = vsel %vm6576_vm6, 0, %v6575_v62 }
0x1c1d   :  { %v5476_v55 = vsub.s32 32, %v5475_v59  ;;  %v5480_v38 = vsub.s32 4294967266, %v5475_v59  ;;  %v5477_v53 = vshll.u32 %v5468_v52, %v5475_v59 }
0x1c1f   :  { %v5478_v15 = vshrl.u32 %v5460_v11, %v5476_v55  ;;  %v5481_v16 = vadd.s32 127, %v5480_v38 }
0x1c21   :  { %v5479_v40 = vor.u32 %v5478_v15, %v5477_v53  ;;  %v5482_v47 = vshll.u32 %v5481_v16, 23 }
0x1c23   :  { %v5483_v1 = vor.u32 4788187, %v5482_v47  ;;  %v5486_v24 = vcvt.s32.f32 %v5479_v40 }
0x1c25   :  { %v5484_v13 = vand.u32 2147483647, %v5483_v1 }
0x1c27   :  { %v5487_v49 = vmul.f32 %v5486_v24, %v5484_v13 }
0x1c29   :  { %v5488_v58 = vxor.u32 2147483648, %v5487_v49 }
0x1c2b   :  { %v5489_v56 = vsel %vm5406_vm10, %v5488_v58, %v5487_v49 }
0x1c2c   :  { %v5492_v51 = vsel %vm5405_vm11, %v9792_v42, %v5489_v56 }
0x1c2d   :  { %7392 = vcosq.f32 %v5492_v51 }
0x1c2e   :  { %7394 = vsinq.f32 %v5492_v51 }
0x1c3a   :  { %v7393_v7 = vpop.eup %7392 }
0x1c3b   :  { %v7395_v28 = vpop.eup %7394  ;;  %v5504_v27 = vxor.u32 2147483648, %v7393_v7 }
0x1c3c   :  { %v5501_v61 = vxor.u32 2147483648, %v7395_v28 }
0x1c3d   :  { %v5505_v8 = vsel %vm5503_vm13, %v5504_v27, %v7395_v28 }
0x1c3e   :  { %v5502_v36 = vsel %vm5500_vm14, %v7393_v7, %v5501_v61 }
0x1c3f   :  { %v5506_v57 = vsel %vm5499_vm12, %v5502_v36, %v5505_v8 }
0x1c40   :  { %v5507_v10 = vsel %vm5496_vm7, nan, %v5506_v57 }
0x1c41   :  { %v5508_v33 = vmul.f32 %v5507_v10, %v5507_v10 }
0x1c43   :  { %v5514_v5 = vmul.f32 %v5512_v63, %v5508_v33 }
0x1c45   :  { %v5515_v46 = vadd.f32 %v5514_v5, %v9789_v45 }
0x1c47   :  { %7056 = vmatpush3.msra.mxu1 %v5515_v46 }
0x1c48   :  { %7058 = vmatmul.mubr.msk.f32.vlgmr.msra.gmra.mxu1 %vm5049_vm15, %v5516_v23  ;;  %7060 = vmatprep.subr.mxu1 %v7532_v2 }
0x1c49   :  { %7074 = vmatprep.mubr.msk.f32.mxu1 %vm7534_vm4, %v7532_v2 }
0x1d08   :  { %v5592_v22 = vpop.f32.mrf.mxu1 }
0x1d09   :  { %v5593_v32 = vadd.f32 %v5592_v22, %v5521_v20 }
0x1d0a   :  { %v7059_v42 = vpop.f32.mrf.mxu1 }
0x1d0b   :  { %v9831_v4 = vadd.f32 %v5593_v32, %v9698_v17 }
0x1d0d   :  { %v9834_v25 = vmul.f32 %v5602_v60, %v9831_v4 }
0x1d0f   :  { %v5608_v45 = vand.u32 2139095040, %v9834_v25  ;;  %v5605_v19 = vand.u32 2147483647, %v9834_v25  ;;  %vm5607_vm11 = vcmp.lt.s32.totalorder %v9834_v25, 0 }
0x1d11   :  { %v5609_v31 = vshrl.u32 %v5608_v45, 23  ;;  %v5612_v44 = vand.u32 8388607, %v5605_v19  ;;  %vm5606_vm13 = vcmp.le.f32.partialorder %v5605_v19, 0.7853982 }
0x1d13   :  { %v6578_v0 = vadd.s32 4294967169, %v5609_v31  ;;  %v5613_v15 = vor.u32 8388608, %v5612_v44 }
0x1d15   :  { %v5615_v14 = vadd.s32 1, %v6578_v0  ;;  %v5653_v21 = vshll.u32 %v5613_v15, 8 }
0x1d17   :  { %vm5616_vm5 = vcmp.gt.s32.totalorder %v5615_v14, 0 }
0x1d18   :  { %v5617_v6 = vsel %vm5616_vm5, %v5615_v14, 0  ;;  %vm5697_vm5 = vweird.f32 %v9834_v25 }
0x1d19   :  { %v5619_v30 = vand.u32 31, %v5617_v6  ;;  %v5618_v17 = vshrl.u32 %v5617_v6, 5 }
0x1d1b   :  { %v5620_v18 = vsub.s32 32, %v5619_v30  ;;  %v5622_v52 = vshll.u32 %v7507_v35, %v5619_v30  ;;  %v5625_v9 = vshll.u32 %v7508_v37, %v5619_v30  ;;  %v5628_v62 = vshll.u32 %v7509_v39, %v5619_v30 }
0x1d1c   :  { %v5631_v11 = vshll.u32 %v7510_v41, %v5619_v30  ;;  %v5634_v38 = vshll.u32 %v7511_v43, %v5619_v30  ;;  %vm5637_vm9 = vcmp.lt.s32.totalorder %v5618_v17, 1  ;;  %vm5640_vm2 = vcmp.lt.s32.totalorder %v5618_v17, 4 }
0x1d1d   :  { %v5623_v54 = vshrl.u32 %v7508_v37, %v5620_v18  ;;  %v5626_v34 = vshrl.u32 %v7509_v39, %v5620_v18  ;;  %v5629_v59 = vshrl.u32 %v7510_v41, %v5620_v18  ;;  %v5632_v55 = vshrl.u32 %v7511_v43, %v5620_v18 }
0x1d1e   :  { %v5635_v53 = vshrl.u32 %v7512_v50, %v5620_v18  ;;  %v5621_v29 = vshrl.u32 %v7507_v35, %v5620_v18  ;;  %vm5639_vm3 = vcmp.lt.s32.totalorder %v5618_v17, 3  ;;  %vm5638_vm0 = vcmp.lt.s32.totalorder %v5618_v17, 2 }
0x1d1f   :  { %v5624_v16 = vor.u32 %v5623_v54, %v5622_v52  ;;  %v5627_v40 = vor.u32 %v5626_v34, %v5625_v9  ;;  %v5630_v47 = vor.u32 %v5629_v59, %v5628_v62  ;;  %v5633_v1 = vor.u32 %v5632_v55, %v5631_v11 }
0x1d20   :  { %v5636_v13 = vor.u32 %v5635_v53, %v5634_v38 }
0x1d21   :  { %v5642_v24 = vsel %vm5640_vm2, %v5630_v47, 2102212464  ;;  %v5645_v49 = vsel %vm5637_vm9, %v5624_v16, %v5627_v40  ;;  %v5649_v58 = vsel %vm5637_vm9, %v5627_v40, %v5630_v47  ;;  %v5646_v56 = vsel %vm5640_vm2, %v5633_v1, 920167782 }
0x1d22   :  { %v5650_v51 = vsel %vm5640_vm2, %v5636_v13, 1326507024  ;;  %v5647_v26 = vsel %vm5639_vm3, %v5630_v47, %v5646_v56  ;;  %v5641_v12 = vsel %vm5637_vm9, %v5621_v29, %v5624_v16  ;;  %v5643_v7 = vsel %vm5639_vm3, %v5627_v40, %v5642_v24 }
0x1d23   :  { %v5651_v48 = vsel %vm5639_vm3, %v5633_v1, %v5650_v51  ;;  %v5648_v28 = vsel %vm5638_vm0, %v5645_v49, %v5647_v26  ;;  %v5644_v10 = vsel %vm5638_vm0, %v5641_v12, %v5643_v7  ;;  %v5713_v26 = vpop.permute.xlu1 %5712  ;;  %vm5724_vm9 = vcmask 744448  }
0x1d24   :  { %v5652_v27 = vsel %vm5638_vm0, %v5649_v58, %v5651_v48  ;;  %v9854_v36 = vmul.u32.u64.low %v5653_v21, %v5648_v28  ;;  %v9855_v57 = vmul.u32.u64.high %v5653_v21, %v5648_v28, %v9854_v36  ;;  %v5660_v63 = vmul.u32 %v5653_v21, %v5644_v10 }
0x1d25   :  { %v9851_v61 = vmul.u32.u64.low %v5653_v21, %v5652_v27  ;;  %v9852_v8 = vmul.u32.u64.high %v5653_v21, %v5652_v27, %v9851_v61 }
0x1d26   :  { %v5663_v33 = vadd.s32 1, %v9855_v57 }
0x1d27   :  { %vm5662_vm6 = vc.u32 %v9852_v8, %v9854_v36  ;;  %v5661_v14 = vadd.s32 %v9854_v36, %v9852_v8  ;;  %v5869_v8 = vld [vmem:[%s10207_s24] sm:$0xff] }
0x1d28   :  { %v5664_v5 = vsel %vm5662_vm6, %v5663_v33, %v9855_v57  ;;  %v5990_v36 = vld [vmem:[%s10208_s20] sm:$0xff] }
0x1d29   :  { %v5665_v46 = vadd.s32 %v5664_v5, %v5660_v63  ;;  %v6071_v57 = vld [vmem:[%s7858_s18] sm:$0xff]  ;;  %s10220_s18 = sld [smem:[#allocation44_spill]] }
0x1d2b   :  { %v5666_v23 = vadd.s32 536870912, %v5665_v46 }
0x1d2d   :  { %v5667_v20 = vshrl.u32 %v5666_v23, 30 }
0x1d2f   :  { %v5668_v22 = vshll.u32 %v5667_v20, 30  ;;  %v5691_v55 = vsub.s32 4, %v5667_v20 }
0x1d31   :  { %v5669_v32 = vsub.s32 %v5665_v46, %v5668_v22  ;;  %v5692_v15 = vsel %vm5607_vm11, %v5691_v55, %v5667_v20 }
0x1d32   :  { %v5694_v16 = vsel %vm5606_vm13, 0, %v5692_v15 }
0x1d33   :  { %v5671_v42 = vsub.s32 0, %v5669_v32  ;;  %v5698_v40 = vadd.s32 3, %v5694_v16 }
0x1d35   :  { %v6579_v60 = vmin.u32 %v5671_v42, %v5669_v32  ;;  %v5699_v47 = vand.u32 3, %v5698_v40 }
0x1d37   :  { %v5673_v45 = vclz %v6579_v60  ;;  %vm5704_vm14 = vcmp.eq.s32.totalorder %v5699_v47, 2  ;;  %vm5701_vm12 = vcmp.eq.s32.totalorder %v5699_v47, 0  ;;  %vm5700_vm7 = vcmp.lt.s32.totalorder %v5699_v47, 2 }
0x1d39   :  { %v6580_v31 = vadd.s32 4294967294, %v5673_v45 }
0x1d3b   :  { %vm6581_vm10 = vcmp.lt.s32.totalorder %v6580_v31, 0 }
0x1d3c   :  { %v5676_v0 = vsel %vm6581_vm10, 0, %v6580_v31 }
0x1d3d   :  { %v5677_v6 = vsub.s32 32, %v5676_v0  ;;  %v5681_v30 = vsub.s32 4294967266, %v5676_v0  ;;  %v5678_v44 = vshll.u32 %v5669_v32, %v5676_v0  ;;  %v6070_v32 = vld [vmem:[%s7853_s11] sm:$0xff]  ;;  %s10214_s11 = sld [smem:[#allocation42_spill]] }
0x1d3f   :  { %v5679_v18 = vshrl.u32 %v5661_v14, %v5677_v6  ;;  %v5682_v17 = vadd.s32 127, %v5681_v30 }
0x1d41   :  { %v5680_v52 = vor.u32 %v5679_v18, %v5678_v44  ;;  %v5683_v9 = vshll.u32 %v5682_v17, 23 }
0x1d43   :  { %v5684_v54 = vor.u32 4788187, %v5683_v9  ;;  %v5687_v62 = vcvt.s32.f32 %v5680_v52 }
0x1d45   :  { %v5685_v34 = vand.u32 2147483647, %v5684_v54 }
0x1d47   :  { %v5688_v59 = vmul.f32 %v5687_v62, %v5685_v34 }
0x1d49   :  { %v5689_v11 = vxor.u32 2147483648, %v5688_v59 }
0x1d4b   :  { %v5690_v38 = vsel %vm5607_vm11, %v5689_v11, %v5688_v59 }
0x1d4c   :  { %v5693_v53 = vsel %vm5606_vm13, %v9834_v25, %v5690_v38  ;;  %v5717_v38 = vld [vmem:[%s10214_s11] sm:$0xff]  ;;  %vm10219_vm13 = vcmask 457728  }
0x1d4d   :  { %7396 = vcosq.f32 %v5693_v53 }
0x1d4e   :  { %7398 = vsinq.f32 %v5693_v53 }
0x1d5a   :  { %v7397_v1 = vpop.eup %7396 }
0x1d5b   :  { %v7399_v13 = vpop.eup %7398  ;;  %v5705_v24 = vxor.u32 2147483648, %v7397_v1 }
0x1d5c   :  { %v5702_v49 = vxor.u32 2147483648, %v7399_v13 }
0x1d5d   :  { %v5706_v58 = vsel %vm5704_vm14, %v5705_v24, %v7399_v13 }
0x1d5e   :  { %v5703_v29 = vsel %vm5701_vm12, %v7397_v1, %v5702_v49 }
0x1d5f   :  { %v5707_v19 = vsel %vm5700_vm7, %v5703_v29, %v5706_v58 }
0x1d60   :  { %v5708_v56 = vsel %vm5697_vm5, nan, %v5707_v19 }
0x1d61   :  { %v5709_v51 = vmul.f32 %v5708_v56, %v5708_v56 }
0x1d63   :  { %v5715_v48 = vmul.f32 %v5713_v26, %v5709_v51 }
0x1d65   :  { %v5716_v21 = vadd.f32 %v5715_v48, %v9831_v4 }
0x1d67   :  { %5720 = vrot.lane.b32.xlu1 %v5716_v21, %s7525_s3  ;;  %5745 = vrot.lane.b32.xlu0 %v5716_v21, %s7538_s28  ;;  %s10209_s3 = sld [smem:[#allocation41_spill]] }
0x1d6d   :  { %v5718_v20 = vld [vmem:[%s10209_s3] sm:$0xff] }
0x1dd9   :  { %v5746_v12 = vpop.permute.xlu0 %5745  ;;  %v5721_v25 = vpop.permute.xlu1 %5720 }
0x1dda   :  { %v5748_v7 = vsel %vm3418_vm1, 0.0, %v5746_v12  ;;  %v5723_v27 = vsel %vm3418_vm1, 0.0, %v5721_v25  ;;  %vm10211_vm1 = vcmask 523264  }
0x1ddb   :  { %v5749_v28 = vsel %vm5724_vm9, %v5748_v7, 0.0  ;;  %v9876_v61 = vsel %vm5724_vm9, %v5723_v27, 0.0  ;;  %vm10212_vm2 = vmmov %vm10211_vm1 }
0x1ddc   :  { %5759 = vrot.lane.b32.xlu1 %v5749_v28, %s7527_s4  ;;  %5761 = vrot.lane.b32.xlu0 %v5749_v28, %s7526_s30  ;;  %vm10213_vm3 = vmmov %vm10211_vm1 }
0x1ddd   :  { %vm10215_vm0 = vmmov %vm10211_vm1 }
0x1dde   :  { %vm10216_vm6 = vmmov %vm10215_vm0 }
0x1ddf   :  { %vm10217_vm10 = vmmov %vm10215_vm0 }
0x1de0   :  { %5755 = vrot.lane.b32.xlu1 %v5749_v28, %s7529_s13  ;;  %5757 = vrot.lane.b32.xlu0 %v5749_v28, %s7528_s15  ;;  %vm10218_vm11 = vmmov %vm10215_vm0 }
0x1de4   :  { %5751 = vrot.lane.b32.xlu1 %v5749_v28, %s7524_s1  ;;  %5753 = vrot.lane.b32.xlu0 %v5749_v28, %s7522_s23 }
0x1de8   :  { %5742 = vrot.lane.b32.xlu0 %v9876_v61, %s7526_s30  ;;  %s10210_s30 = sld [smem:[#allocation48_spill]] }
0x1dec   :  { %5739 = vrot.lane.b32.xlu0 %v9876_v61, %s7527_s4 }
0x1dee   :  { %v5870_v22 = vld [vmem:[%s10210_s30] sm:$0xff] }
0x1df0   :  { %5736 = vrot.lane.b32.xlu0 %v9876_v61, %s7528_s15 }
0x1df4   :  { %5733 = vrot.lane.b32.xlu0 %v9876_v61, %s7529_s13 }
0x1df8   :  { %5730 = vrot.lane.b32.xlu0 %v9876_v61, %s7522_s23 }
0x1dfc   :  { %5727 = vrot.lane.b32.xlu0 %v9876_v61, %s7524_s1 }
0x1e00   :  { %5763 = vrot.lane.b32.xlu0 %v5749_v28, %s7536_s27 }
0x1e04   :  { %5873 = vperm.xlu0 %7306, %v5869_v8  }
0x1e08   :  { %5993 = vperm.xlu0 %7306, %v5990_v36  }
0x1e0c   :  { %6185 = vperm.xlu0 %7306, %v6071_v57  }
0x1e4e   :  { %v5762_v10 = vpop.permute.xlu0 %5761  ;;  %v5760_v33 = vpop.permute.xlu1 %5759 }
0x1e4f   :  { %5775 = vrot.lane.b32.xlu1 %v5762_v10, %s7536_s27 }
0x1e52   :  { %v5758_v63 = vpop.permute.xlu0 %5757  ;;  %v5756_v5 = vpop.permute.xlu1 %5755 }
0x1e53   :  { %5773 = vrot.lane.b32.xlu1 %v5760_v33, %s7536_s27 }
0x1e56   :  { %v5754_v46 = vpop.permute.xlu0 %5753  ;;  %v5752_v23 = vpop.permute.xlu1 %5751 }
0x1e57   :  { %5771 = vrot.lane.b32.xlu1 %v5758_v63, %s7536_s27 }
0x1e5a   :  { %v5743_v42 = vpop.permute.xlu0 %5742 }
0x1e5b   :  { %5769 = vrot.lane.b32.xlu1 %v5756_v5, %s7536_s27 }
0x1e5e   :  { %v5740_v60 = vpop.permute.xlu0 %5739 }
0x1e5f   :  { %5767 = vrot.lane.b32.xlu1 %v5754_v46, %s7536_s27 }
0x1e62   :  { %v5737_v45 = vpop.permute.xlu0 %5736 }
0x1e63   :  { %5765 = vrot.lane.b32.xlu1 %v5752_v23, %s7536_s27 }
0x1e66   :  { %v5734_v14 = vpop.permute.xlu0 %5733 }
0x1e67   :  { %5793 = vperm.xlu1 %7307, %v5718_v20  }
0x1e6a   :  { %v5731_v44 = vpop.permute.xlu0 %5730 }
0x1e6b   :  { %5984 = vperm.xlu1 %7307, %v5870_v22  }
0x1e6e   :  { %v5728_v54 = vpop.permute.xlu0 %5727 }
0x1e6f   :  { %6074 = vperm.xlu1 %7307, %v6070_v32  }
0x1e72   :  { %v5764_v59 = vpop.permute.xlu0 %5763 }
0x1e73   :  { %v5784_v53 = vsel %vm10218_vm11, %v9876_v61, %v5764_v59 }
0x1e7f   :  { %v5874_v47 = vpop.permute.xlu0 %5873 }
0x1ec1   :  { %v5776_v31 = vpop.permute.xlu1 %5775 }
0x1ec2   :  { %v5790_v0 = vsel %vm10211_vm1, %v5743_v42, %v5776_v31 }
0x1ec3   :  { %7061 = vmatpush3.msra.mxu1 %v5790_v0 }
0x1ec4   :  { %7062 = vmatprep.subr.mxu1 %v7532_v2 }
0x1ec5   :  { %v5774_v6 = vpop.permute.xlu1 %5773 }
0x1ec6   :  { %v5789_v30 = vsel %vm10212_vm2, %v5740_v60, %v5774_v6 }
0x1ec7   :  { %7063 = vmatpush3.msra.mxu1 %v5789_v30 }
0x1ec8   :  { %7064 = vmatprep.subr.mxu1 %v7532_v2 }
0x1ec9   :  { %v5772_v18 = vpop.permute.xlu1 %5771 }
0x1eca   :  { %v5788_v17 = vsel %vm10213_vm3, %v5737_v45, %v5772_v18 }
0x1ecb   :  { %7065 = vmatpush3.msra.mxu1 %v5788_v17 }
0x1ecc   :  { %7066 = vmatprep.subr.mxu1 %v7532_v2 }
0x1ecd   :  { %v5770_v52 = vpop.permute.xlu1 %5769 }
0x1ece   :  { %v5787_v9 = vsel %vm10215_vm0, %v5734_v14, %v5770_v52 }
0x1ecf   :  { %7067 = vmatpush3.msra.mxu1 %v5787_v9 }
0x1ed0   :  { %7068 = vmatprep.subr.mxu1 %v7532_v2 }
0x1ed1   :  { %v5768_v34 = vpop.permute.xlu1 %5767 }
0x1ed2   :  { %v5786_v62 = vsel %vm10216_vm6, %v5731_v44, %v5768_v34 }
0x1ed3   :  { %7069 = vmatpush3.msra.mxu1 %v5786_v62 }
0x1ed4   :  { %7070 = vmatprep.subr.mxu1 %v7532_v2 }
0x1ed5   :  { %v5766_v11 = vpop.permute.xlu1 %5765 }
0x1ed6   :  { %v5785_v55 = vsel %vm10217_vm10, %v5728_v54, %v5766_v11 }
0x1ed7   :  { %7071 = vmatpush3.msra.mxu1 %v5785_v55 }
0x1ed8   :  { %7072 = vmatprep.subr.mxu1 %v7532_v2 }
0x1ed9   :  { %7073 = vmatpush3.msra.mxu1 %v5784_v53 }
0x1eda   :  { %7075 = vmatmul.mubr.msk.f32.vlgmr.msra.gmra.mxu1 %vm10219_vm13, %v5717_v38 }
0x1ee2   :  { %v5794_v15 = vpop.permute.xlu1 %5793 }
0x1f9a   :  { %v5865_v16 = vpop.f32.mrf.mxu1 }
0x1f9b   :  { %v9919_v40 = vadd.f32 %v5865_v16, %v5794_v15 }
0x1f9c   :  { %v7076_v1 = vpop.f32.mrf.mxu1 }
0x1f9d   :  { %v9922_v13 = vmul.f32 %v5874_v47, %v9919_v40 }
0x1f9f   :  { %v5880_v24 = vand.u32 2139095040, %v9922_v13  ;;  %v5877_v19 = vand.u32 2147483647, %v9922_v13  ;;  %vm5879_vm3 = vcmp.lt.s32.totalorder %v9922_v13, 0  ;;  %vm5969_vm13 = vweird.f32 %v9922_v13 }
0x1fa1   :  { %v5881_v49 = vshrl.u32 %v5880_v24, 23  ;;  %v5884_v26 = vand.u32 8388607, %v5877_v19  ;;  %vm5878_vm0 = vcmp.le.f32.partialorder %v5877_v19, 0.7853982 }
0x1fa3   :  { %v6583_v58 = vadd.s32 4294967169, %v5881_v49  ;;  %v5885_v33 = vor.u32 8388608, %v5884_v26 }
0x1fa5   :  { %v5887_v29 = vadd.s32 1, %v6583_v58  ;;  %v5925_v6 = vshll.u32 %v5885_v33, 8 }
0x1fa7   :  { %vm5888_vm14 = vcmp.gt.s32.totalorder %v5887_v29, 0 }
0x1fa8   :  { %v5889_v56 = vsel %vm5888_vm14, %v5887_v29, 0 }
0x1fa9   :  { %v5891_v51 = vand.u32 31, %v5889_v56  ;;  %v5890_v21 = vshrl.u32 %v5889_v56, 5 }
0x1fab   :  { %v5892_v48 = vsub.s32 32, %v5891_v51  ;;  %v5894_v12 = vshll.u32 %v7507_v35, %v5891_v51  ;;  %v5897_v7 = vshll.u32 %v7508_v37, %v5891_v51  ;;  %v5900_v27 = vshll.u32 %v7509_v39, %v5891_v51 }
0x1fac   :  { %v5903_v8 = vshll.u32 %v7510_v41, %v5891_v51  ;;  %v5906_v57 = vshll.u32 %v7511_v43, %v5891_v51  ;;  %vm5909_vm12 = vcmp.lt.s32.totalorder %v5890_v21, 1  ;;  %vm5912_vm7 = vcmp.lt.s32.totalorder %v5890_v21, 4 }
0x1fad   :  { %v5895_v28 = vshrl.u32 %v7508_v37, %v5892_v48  ;;  %v5898_v25 = vshrl.u32 %v7509_v39, %v5892_v48  ;;  %v5901_v61 = vshrl.u32 %v7510_v41, %v5892_v48  ;;  %v5904_v36 = vshrl.u32 %v7511_v43, %v5892_v48 }
0x1fae   :  { %v5907_v10 = vshrl.u32 %v7512_v50, %v5892_v48  ;;  %v5893_v60 = vshrl.u32 %v7507_v35, %v5892_v48  ;;  %vm5911_vm5 = vcmp.lt.s32.totalorder %v5890_v21, 3  ;;  %vm5910_vm9 = vcmp.lt.s32.totalorder %v5890_v21, 2 }
0x1faf   :  { %v5896_v63 = vor.u32 %v5895_v28, %v5894_v12  ;;  %v5899_v5 = vor.u32 %v5898_v25, %v5897_v7  ;;  %v5902_v46 = vor.u32 %v5901_v61, %v5900_v27  ;;  %v5905_v23 = vor.u32 %v5904_v36, %v5903_v8 }
0x1fb0   :  { %v5908_v20 = vor.u32 %v5907_v10, %v5906_v57 }
0x1fb1   :  { %v5914_v22 = vsel %vm5912_vm7, %v5902_v46, 2102212464  ;;  %v5917_v32 = vsel %vm5909_vm12, %v5896_v63, %v5899_v5  ;;  %v5921_v42 = vsel %vm5909_vm12, %v5899_v5, %v5902_v46  ;;  %v5918_v45 = vsel %vm5912_vm7, %v5905_v23, 920167782 }
0x1fb2   :  { %v5922_v31 = vsel %vm5912_vm7, %v5908_v20, 1326507024  ;;  %v5919_v0 = vsel %vm5911_vm5, %v5902_v46, %v5918_v45  ;;  %v5913_v30 = vsel %vm5909_vm12, %v5893_v60, %v5896_v63  ;;  %v5915_v44 = vsel %vm5911_vm5, %v5899_v5, %v5914_v22 }
0x1fb3   :  { %v5923_v14 = vsel %vm5911_vm5, %v5905_v23, %v5922_v31  ;;  %v5920_v18 = vsel %vm5910_vm9, %v5917_v32, %v5919_v0  ;;  %v5916_v62 = vsel %vm5910_vm9, %v5913_v30, %v5915_v44  ;;  %v5989_v44 = vld [vmem:[%s10220_s18] sm:$0xff] }
0x1fb4   :  { %v5924_v17 = vsel %vm5910_vm9, %v5921_v42, %v5923_v14  ;;  %v9942_v54 = vmul.u32.u64.low %v5925_v6, %v5920_v18  ;;  %v9943_v34 = vmul.u32.u64.high %v5925_v6, %v5920_v18, %v9942_v54  ;;  %v5932_v11 = vmul.u32 %v5925_v6, %v5916_v62  ;;  %v5985_v14 = vpop.permute.xlu1 %5984  ;;  %v5994_v18 = vpop.permute.xlu0 %5993 }
0x1fb5   :  { %v9939_v52 = vmul.u32.u64.low %v5925_v6, %v5924_v17  ;;  %v9940_v9 = vmul.u32.u64.high %v5925_v6, %v5924_v17, %v9939_v52 }
0x1fb6   :  { %v5935_v59 = vadd.s32 1, %v9943_v34 }
0x1fb7   :  { %vm5934_vm1 = vc.u32 %v9940_v9, %v9942_v54  ;;  %v5933_v56 = vadd.s32 %v9942_v54, %v9940_v9 }
0x1fb8   :  { %v5936_v55 = vsel %vm5934_vm1, %v5935_v59, %v9943_v34  ;;  %v6075_v54 = vpop.permute.xlu1 %6074 }
0x1fb9   :  { %v5937_v38 = vadd.s32 %v5936_v55, %v5932_v11 }
0x1fbb   :  { %v5938_v53 = vadd.s32 536870912, %v5937_v38 }
0x1fbd   :  { %v5939_v15 = vshrl.u32 %v5938_v53, 30 }
0x1fbf   :  { %v5940_v16 = vshll.u32 %v5939_v15, 30  ;;  %v5963_v57 = vsub.s32 4, %v5939_v15 }
0x1fc1   :  { %v5941_v47 = vsub.s32 %v5937_v38, %v5940_v16  ;;  %v5964_v63 = vsel %vm5879_vm3, %v5963_v57, %v5939_v15 }
0x1fc2   :  { %v5966_v5 = vsel %vm5878_vm0, 0, %v5964_v63 }
0x1fc3   :  { %v5943_v1 = vsub.s32 0, %v5941_v47  ;;  %v5970_v46 = vadd.s32 3, %v5966_v5 }
0x1fc5   :  { %v6584_v24 = vmin.u32 %v5943_v1, %v5941_v47  ;;  %v5971_v23 = vand.u32 3, %v5970_v46 }
0x1fc7   :  { %v5945_v49 = vclz %v6584_v24  ;;  %vm5976_vm6 = vcmp.eq.s32.totalorder %v5971_v23, 2  ;;  %vm5973_vm10 = vcmp.eq.s32.totalorder %v5971_v23, 0  ;;  %vm5972_vm11 = vcmp.lt.s32.totalorder %v5971_v23, 2 }
0x1fc9   :  { %v6585_v58 = vadd.s32 4294967294, %v5945_v49 }
0x1fcb   :  { %vm6586_vm2 = vcmp.lt.s32.totalorder %v6585_v58, 0 }
0x1fcc   :  { %v5948_v29 = vsel %vm6586_vm2, 0, %v6585_v58 }
0x1fcd   :  { %v5949_v51 = vsub.s32 32, %v5948_v29  ;;  %v5953_v26 = vsub.s32 4294967266, %v5948_v29  ;;  %v5950_v48 = vshll.u32 %v5941_v47, %v5948_v29 }
0x1fcf   :  { %v5951_v21 = vshrl.u32 %v5933_v56, %v5949_v51  ;;  %v5954_v12 = vadd.s32 127, %v5953_v26 }
0x1fd1   :  { %v5952_v7 = vor.u32 %v5951_v21, %v5950_v48  ;;  %v5955_v28 = vshll.u32 %v5954_v12, 23 }
0x1fd3   :  { %v5956_v25 = vor.u32 4788187, %v5955_v28  ;;  %v5959_v61 = vcvt.s32.f32 %v5952_v7 }
0x1fd5   :  { %v5957_v27 = vand.u32 2147483647, %v5956_v25 }
0x1fd7   :  { %v5960_v8 = vmul.f32 %v5959_v61, %v5957_v27 }
0x1fd9   :  { %v5961_v36 = vxor.u32 2147483648, %v5960_v8 }
0x1fdb   :  { %v5962_v10 = vsel %vm5879_vm3, %v5961_v36, %v5960_v8 }
0x1fdc   :  { %v5965_v33 = vsel %vm5878_vm0, %v9922_v13, %v5962_v10 }
0x1fdd   :  { %7400 = vcosq.f32 %v5965_v33 }
0x1fde   :  { %7402 = vsinq.f32 %v5965_v33 }
0x1fea   :  { %v7401_v20 = vpop.eup %7400 }
0x1feb   :  { %v7403_v22 = vpop.eup %7402  ;;  %v5977_v32 = vxor.u32 2147483648, %v7401_v20 }
0x1fec   :  { %v5974_v42 = vxor.u32 2147483648, %v7403_v22 }
0x1fed   :  { %v5978_v60 = vsel %vm5976_vm6, %v5977_v32, %v7403_v22 }
0x1fee   :  { %v5975_v45 = vsel %vm5973_vm10, %v7401_v20, %v5974_v42 }
0x1fef   :  { %v5979_v19 = vsel %vm5972_vm11, %v5975_v45, %v5978_v60  ;;  %vm10221_vm11 = vcmask 23552  }
0x1ff0   :  { %v5980_v31 = vsel %vm5969_vm13, nan, %v5979_v19  ;;  %vm10222_vm13 = vmmov %vm10221_vm11 }
0x1ff1   :  { %v5981_v0 = vmul.f32 %v5980_v31, %v5980_v31 }
0x1ff3   :  { %v5987_v6 = vmul.f32 %v5985_v14, %v5981_v0 }
0x1ff5   :  { %v5988_v30 = vadd.f32 %v5987_v6, %v9919_v40 }
0x1ff7   :  { %7078 = vmatpush3.msra.mxu0 %v5988_v30 }
0x1ff8   :  { %7080 = vmatmul.mubr.msk.f32.vlgmr.msra.gmra.mxu0 %vm5049_vm15, %v5989_v44  ;;  %7082 = vmatprep.subr.mxu0 %v7532_v2 }
0x1ff9   :  { %7096 = vmatprep.mubr.msk.f32.mxu0 %vm7534_vm4, %v7532_v2 }
0x20b8   :  { %v6065_v17 = vpop.f32.mrf.mxu0 }
0x20b9   :  { %v6066_v52 = vadd.f32 %v6065_v17, %v5994_v18 }
0x20ba   :  { %v7081_v13 = vpop.f32.mrf.mxu0 }
0x20bb   :  { %v9961_v9 = vadd.f32 %v6066_v52, %v9831_v4 }
0x20bd   :  { %v9964_v34 = vmul.f32 %v6075_v54, %v9961_v9 }
0x20bf   :  { %v6081_v40 = vand.u32 2139095040, %v9964_v34  ;;  %v6078_v55 = vand.u32 2147483647, %v9964_v34  ;;  %vm6080_vm1 = vcmp.lt.s32.totalorder %v9964_v34, 0  ;;  %vm6170_vm10 = vweird.f32 %v9964_v34 }
0x20c1   :  { %v6082_v62 = vshrl.u32 %v6081_v40, 23  ;;  %v6085_v15 = vand.u32 8388607, %v6078_v55  ;;  %vm6079_vm2 = vcmp.le.f32.partialorder %v6078_v55, 0.7853982 }
0x20c3   :  { %v6588_v59 = vadd.s32 4294967169, %v6082_v62  ;;  %v6086_v21 = vor.u32 8388608, %v6085_v15 }
0x20c5   :  { %v6088_v11 = vadd.s32 1, %v6588_v59 }
0x20c7   :  { %vm6089_vm15 = vcmp.gt.s32.totalorder %v6088_v11, 0 }
0x20c8   :  { %v6090_v38 = vsel %vm6089_vm15, %v6088_v11, 0 }
0x20c9   :  { %v6092_v53 = vand.u32 31, %v6090_v38  ;;  %v6091_v4 = vshrl.u32 %v6090_v38, 5 }
0x20cb   :  { %v6093_v16 = vsub.s32 32, %v6092_v53  ;;  %v6095_v47 = vshll.u32 %v7507_v35, %v6092_v53  ;;  %v6098_v1 = vshll.u32 %v7508_v37, %v6092_v53  ;;  %v6101_v58 = vshll.u32 %v7509_v39, %v6092_v53 }
0x20cc   :  { %v6104_v56 = vshll.u32 %v7510_v41, %v6092_v53  ;;  %v6107_v26 = vshll.u32 %v7511_v43, %v6092_v53  ;;  %vm6110_vm4 = vcmp.lt.s32.totalorder %v6091_v4, 1  ;;  %vm6113_vm14 = vcmp.lt.s32.totalorder %v6091_v4, 4 }
0x20cd   :  { %v6096_v24 = vshrl.u32 %v7508_v37, %v6093_v16  ;;  %v6099_v49 = vshrl.u32 %v7509_v39, %v6093_v16  ;;  %v6102_v29 = vshrl.u32 %v7510_v41, %v6093_v16  ;;  %v6105_v51 = vshrl.u32 %v7511_v43, %v6093_v16 }
0x20ce   :  { %v6108_v48 = vshrl.u32 %v7512_v50, %v6093_v16  ;;  %v6094_v8 = vshrl.u32 %v7507_v35, %v6093_v16  ;;  %vm6112_vm12 = vcmp.lt.s32.totalorder %v6091_v4, 3  ;;  %vm6111_vm7 = vcmp.lt.s32.totalorder %v6091_v4, 2 }
0x20cf   :  { %v6097_v12 = vor.u32 %v6096_v24, %v6095_v47  ;;  %v6100_v7 = vor.u32 %v6099_v49, %v6098_v1  ;;  %v6103_v28 = vor.u32 %v6102_v29, %v6101_v58  ;;  %v6106_v25 = vor.u32 %v6105_v51, %v6104_v56 }
0x20d0   :  { %v6109_v37 = vor.u32 %v6108_v48, %v6107_v26  ;;  %v6126_v50 = vshll.u32 %v6086_v21, 8 }
0x20d1   :  { %v6115_v27 = vsel %vm6113_vm14, %v6103_v28, 2102212464  ;;  %v6118_v39 = vsel %vm6110_vm4, %v6097_v12, %v6100_v7  ;;  %v6122_v61 = vsel %vm6110_vm4, %v6100_v7, %v6103_v28  ;;  %v6119_v41 = vsel %vm6113_vm14, %v6106_v25, 920167782 }
0x20d2   :  { %v6123_v36 = vsel %vm6113_vm14, %v6109_v37, 1326507024  ;;  %v6120_v43 = vsel %vm6112_vm12, %v6103_v28, %v6119_v41  ;;  %v6114_v10 = vsel %vm6110_vm4, %v6094_v8, %v6097_v12  ;;  %v6116_v33 = vsel %vm6112_vm12, %v6100_v7, %v6115_v27  ;;  %v6186_v27 = vpop.permute.xlu0 %6185 }
0x20d3   :  { %v6124_v57 = vsel %vm6112_vm12, %v6106_v25, %v6123_v36  ;;  %v6121_v63 = vsel %vm6111_vm7, %v6118_v39, %v6120_v43  ;;  %v6117_v32 = vsel %vm6111_vm7, %v6114_v10, %v6116_v33 }
0x20d4   :  { %v6125_v5 = vsel %vm6111_vm7, %v6122_v61, %v6124_v57  ;;  %v9984_v20 = vmul.u32.u64.low %v6126_v50, %v6121_v63  ;;  %v9985_v22 = vmul.u32.u64.high %v6126_v50, %v6121_v63, %v9984_v20  ;;  %v6133_v42 = vmul.u32 %v6126_v50, %v6117_v32 }
0x20d5   :  { %v9981_v46 = vmul.u32.u64.low %v6126_v50, %v6125_v5  ;;  %v9982_v23 = vmul.u32.u64.high %v6126_v50, %v6125_v5, %v9981_v46 }
0x20d6   :  { %v6136_v35 = vadd.s32 1, %v9985_v22  ;;  %v6191_v46 = vld [vmem:[#allocation2] sm:$0x1] }
0x20d7   :  { %vm6135_vm5 = vc.u32 %v9982_v23, %v9984_v20  ;;  %v6134_v52 = vadd.s32 %v9984_v20, %v9982_v23 }
0x20d8   :  { %v6137_v60 = vsel %vm6135_vm5, %v6136_v35, %v9985_v22 }
0x20d9   :  { %v6138_v45 = vadd.s32 %v6137_v60, %v6133_v42 }
0x20db   :  { %v6139_v19 = vadd.s32 536870912, %v6138_v45 }
0x20dd   :  { %v6140_v31 = vshrl.u32 %v6139_v19, 30 }
0x20df   :  { %v6141_v0 = vshll.u32 %v6140_v31, 30  ;;  %v6164_v1 = vsub.s32 4, %v6140_v31 }
0x20e1   :  { %v6142_v14 = vsub.s32 %v6138_v45, %v6141_v0  ;;  %v6165_v58 = vsel %vm6080_vm1, %v6164_v1, %v6140_v31 }
0x20e2   :  { %v6167_v29 = vsel %vm6079_vm2, 0, %v6165_v58 }
0x20e3   :  { %v6144_v6 = vsub.s32 0, %v6142_v14  ;;  %v6171_v56 = vadd.s32 3, %v6167_v29 }
0x20e5   :  { %v6589_v30 = vmin.u32 %v6144_v6, %v6142_v14  ;;  %v6172_v51 = vand.u32 3, %v6171_v56 }
0x20e7   :  { %v6146_v44 = vclz %v6589_v30  ;;  %vm6177_vm3 = vcmp.eq.s32.totalorder %v6172_v51, 2  ;;  %vm6174_vm0 = vcmp.eq.s32.totalorder %v6172_v51, 0  ;;  %vm6173_vm6 = vcmp.lt.s32.totalorder %v6172_v51, 2 }
0x20e9   :  { %v6590_v18 = vadd.s32 4294967294, %v6146_v44 }
0x20eb   :  { %vm6591_vm9 = vcmp.lt.s32.totalorder %v6590_v18, 0 }
0x20ec   :  { %v6149_v17 = vsel %vm6591_vm9, 0, %v6590_v18  ;;  %vm10230_vm9 = vcmask 457728  }
0x20ed   :  { %v6150_v13 = vsub.s32 32, %v6149_v17  ;;  %v6154_v54 = vsub.s32 4294967266, %v6149_v17  ;;  %v6151_v40 = vshll.u32 %v6142_v14, %v6149_v17 }
0x20ef   :  { %v6152_v62 = vshrl.u32 %v6134_v52, %v6150_v13  ;;  %v6155_v59 = vadd.s32 127, %v6154_v54  ;;  %v6190_v54 = vld [vmem:[#allocation3] sm:$0x1] }
0x20f1   :  { %v6153_v11 = vor.u32 %v6152_v62, %v6151_v40  ;;  %v6156_v38 = vshll.u32 %v6155_v59, 23  ;;  %v6270_v62 = vsub.s32 0, %v8296_v3 }
0x20f3   :  { %v6157_v53 = vor.u32 4788187, %v6156_v38  ;;  %v6160_v16 = vcvt.s32.f32 %v6153_v11 }
0x20f5   :  { %v6158_v15 = vand.u32 2147483647, %v6157_v53 }
0x20f7   :  { %v6161_v4 = vmul.f32 %v6160_v16, %v6158_v15 }
0x20f9   :  { %v6162_v47 = vxor.u32 2147483648, %v6161_v4 }
0x20fb   :  { %v6163_v24 = vsel %vm6080_vm1, %v6162_v47, %v6161_v4 }
0x20fc   :  { %v6166_v49 = vsel %vm6079_vm2, %v9964_v34, %v6163_v24 }
0x20fd   :  { %7404 = vcosq.f32 %v6166_v49 }
0x20fe   :  { %7406 = vsinq.f32 %v6166_v49 }
0x210a   :  { %v7405_v26 = vpop.eup %7404 }
0x210b   :  { %v7407_v48 = vpop.eup %7406  ;;  %v6178_v21 = vxor.u32 2147483648, %v7405_v26 }
0x210c   :  { %v6175_v12 = vxor.u32 2147483648, %v7407_v48 }
0x210d   :  { %v6179_v7 = vsel %vm6177_vm3, %v6178_v21, %v7407_v48 }
0x210e   :  { %v6176_v28 = vsel %vm6174_vm0, %v7405_v26, %v6175_v12 }
0x210f   :  { %v6180_v55 = vsel %vm6173_vm6, %v6176_v28, %v6179_v7 }
0x2110   :  { %v6181_v25 = vsel %vm6170_vm10, nan, %v6180_v55 }
0x2111   :  { %v6182_v37 = vmul.f32 %v6181_v25, %v6181_v25 }
0x2113   :  { %v6188_v39 = vmul.f32 %v6186_v27, %v6182_v37 }
0x2115   :  { %v6189_v61 = vadd.f32 %v6188_v39, %v9961_v9 }
0x2117   :  { %6193 = vrot.lane.b32.xlu0 %v6189_v61, %s7498_s17  ;;  %6217 = vrot.lane.b32.xlu1 %v6189_v61, %s7535_s0 }
0x2189   :  { %v6218_v8 = vpop.permute.xlu1 %6217  ;;  %v6194_v34 = vpop.permute.xlu0 %6193 }
0x218a   :  { %v6220_v41 = vsel %vm10221_vm11, 0.0, %v6218_v8  ;;  %v6196_v9 = vsel %vm10222_vm13, 0.0, %v6194_v34 }
0x218b   :  { %v6221_v36 = vsel %vm4777_vm8, %v6220_v41, 0.0  ;;  %v6197_v43 = vsel %vm4777_vm8, %v6196_v9, 0.0  ;;  %vm10223_vm8 = vcmask 523264  }
0x218c   :  { %6231 = vrot.lane.b32.xlu0 %v6221_v36, %s7500_s25  ;;  %6233 = vrot.lane.b32.xlu1 %v6221_v36, %s7501_s5  ;;  %vm10224_vm15 = vmmov %vm10223_vm8 }
0x218d   :  { %vm10225_vm4 = vmmov %vm10223_vm8 }
0x218e   :  { %vm10226_vm14 = vmmov %vm10225_vm4 }
0x218f   :  { %vm10227_vm12 = vmmov %vm10225_vm4 }
0x2190   :  { %6227 = vrot.lane.b32.xlu0 %v6221_v36, %s7502_s9  ;;  %6229 = vrot.lane.b32.xlu1 %v6221_v36, %s7503_s12  ;;  %vm10228_vm7 = vmmov %vm10225_vm4 }
0x2191   :  { %vm10229_vm5 = vmmov %vm10225_vm4 }
0x2194   :  { %6223 = vrot.lane.b32.xlu0 %v6221_v36, %s7504_s10  ;;  %6225 = vrot.lane.b32.xlu1 %v6221_v36, %s7505_s7 }
0x2198   :  { %6214 = vrot.lane.b32.xlu1 %v6197_v43, %s7501_s5 }
0x219c   :  { %6211 = vrot.lane.b32.xlu1 %v6197_v43, %s7500_s25 }
0x21a0   :  { %6208 = vrot.lane.b32.xlu1 %v6197_v43, %s7503_s12 }
0x21a4   :  { %6205 = vrot.lane.b32.xlu1 %v6197_v43, %s7502_s9 }
0x21a8   :  { %6202 = vrot.lane.b32.xlu1 %v6197_v43, %s7505_s7 }
0x21ac   :  { %6199 = vrot.lane.b32.xlu1 %v6197_v43, %s7504_s10 }
0x21b0   :  { %6235 = vrot.lane.b32.xlu1 %v6221_v36, %s7536_s27 }
0x21fe   :  { %v6234_v57 = vpop.permute.xlu1 %6233  ;;  %v6232_v50 = vpop.permute.xlu0 %6231 }
0x21ff   :  { %6247 = vrot.lane.b32.xlu0 %v6234_v57, %s7536_s27 }
0x2202   :  { %v6230_v10 = vpop.permute.xlu1 %6229  ;;  %v6228_v33 = vpop.permute.xlu0 %6227 }
0x2203   :  { %6245 = vrot.lane.b32.xlu0 %v6232_v50, %s7536_s27 }
0x2206   :  { %v6226_v63 = vpop.permute.xlu1 %6225  ;;  %v6224_v5 = vpop.permute.xlu0 %6223 }
0x2207   :  { %6243 = vrot.lane.b32.xlu0 %v6230_v10, %s7536_s27 }
0x220a   :  { %v6215_v23 = vpop.permute.xlu1 %6214 }
0x220b   :  { %6241 = vrot.lane.b32.xlu0 %v6228_v33, %s7536_s27 }
0x220e   :  { %v6212_v20 = vpop.permute.xlu1 %6211 }
0x220f   :  { %6239 = vrot.lane.b32.xlu0 %v6226_v63, %s7536_s27 }
0x2212   :  { %v6209_v22 = vpop.permute.xlu1 %6208 }
0x2213   :  { %6237 = vrot.lane.b32.xlu0 %v6224_v5, %s7536_s27 }
0x2216   :  { %v6206_v42 = vpop.permute.xlu1 %6205 }
0x2217   :  { %6265 = vperm.xlu0 %7306, %v6191_v46  }
0x221a   :  { %v6203_v19 = vpop.permute.xlu1 %6202 }
0x221e   :  { %v6200_v30 = vpop.permute.xlu1 %6199 }
0x2222   :  { %v6236_v17 = vpop.permute.xlu1 %6235 }
0x2223   :  { %v6256_v40 = vsel %vm10229_vm5, %v6197_v43, %v6236_v17 }
0x2271   :  { %v6248_v32 = vpop.permute.xlu0 %6247 }
0x2272   :  { %v6262_v35 = vsel %vm10223_vm8, %v6215_v23, %v6248_v32 }
0x2273   :  { %7083 = vmatpush3.msra.mxu0 %v6262_v35 }
0x2274   :  { %7084 = vmatprep.subr.mxu0 %v7532_v2 }
0x2275   :  { %v6246_v60 = vpop.permute.xlu0 %6245 }
0x2276   :  { %v6261_v45 = vsel %vm10224_vm15, %v6212_v20, %v6246_v60 }
0x2277   :  { %7085 = vmatpush3.msra.mxu0 %v6261_v45 }
0x2278   :  { %7086 = vmatprep.subr.mxu0 %v7532_v2 }
0x2279   :  { %v6244_v31 = vpop.permute.xlu0 %6243 }
0x227a   :  { %v6260_v0 = vsel %vm10225_vm4, %v6209_v22, %v6244_v31 }
0x227b   :  { %7087 = vmatpush3.msra.mxu0 %v6260_v0 }
0x227c   :  { %7088 = vmatprep.subr.mxu0 %v7532_v2 }
0x227d   :  { %v6242_v14 = vpop.permute.xlu0 %6241 }
0x227e   :  { %v6259_v6 = vsel %vm10226_vm14, %v6206_v42, %v6242_v14 }
0x227f   :  { %7089 = vmatpush3.msra.mxu0 %v6259_v6 }
0x2280   :  { %7090 = vmatprep.subr.mxu0 %v7532_v2 }
0x2281   :  { %v6240_v44 = vpop.permute.xlu0 %6239 }
0x2282   :  { %v6258_v18 = vsel %vm10227_vm12, %v6203_v19, %v6240_v44 }
0x2283   :  { %7091 = vmatpush3.msra.mxu0 %v6258_v18 }
0x2284   :  { %7092 = vmatprep.subr.mxu0 %v7532_v2 }
0x2285   :  { %v6238_v52 = vpop.permute.xlu0 %6237 }
0x2286   :  { %v6257_v13 = vsel %vm10228_vm7, %v6200_v30, %v6238_v52 }
0x2287   :  { %7093 = vmatpush3.msra.mxu0 %v6257_v13 }
0x2288   :  { %7094 = vmatprep.subr.mxu0 %v7532_v2 }
0x2289   :  { %7095 = vmatpush3.msra.mxu0 %v6256_v40 }
0x228a   :  { %7097 = vmatmul.mubr.msk.f32.vlgmr.msra.gmra.mxu0 %vm10230_vm9, %v6190_v54 }
0x2292   :  { %v6266_v59 = vpop.permute.xlu0 %6265 }
0x2293   :  { %v6271_v11 = vrot.slane %v6266_v59, %v6270_v62 }
0x234a   :  { %v6341_v38 = vpop.f32.mrf.mxu0 }
0x234b   :  { %v6342_v53 = vadd.f32 %v6341_v38, %v6271_v11 }
0x234c   :  { %v7098_v15 = vpop.f32.mrf.mxu0 }
0x234d   :  { %7408 = vtanh.f32 %v6342_v53 }
0x235a   :  { %v7409_v16 = vpop.eup %7408 }
0x235b   :  { %6346 = vst [vmem:[%s7863_s26] sm:$0x1] %v7409_v16 }
0x235c   :  { %6351 = vsyncpa [#allocation4], 1 }

</bundles_post_ra>
